<compile_context>
chip_gen: v7x
topology: tpu7x:2x2x1
jax: 0.10.0
libtpu: 0.0.40
codegen_flags: <defaults>
</compile_context>

<pallas_src>
import jax
import jax.numpy as jnp
from jax.experimental import pallas as pl
from jax.experimental.pallas import tpu as pltpu

HIDDEN_DIM = 384     # encoder output channels
NDIM = 1024          # projection head output dim
POOL = 7             # AvgPool2d(7) -> spatial map must be 7x7
HW = POOL * POOL     # 49
EPS = 1e-12          # torch F.normalize default eps


def _round_up(v, m):
    return ((v + m - 1) // m) * m


def _vmem_capacity_bytes():
    """Physical VMEM per core; conservative 64 MiB (v7x-sized) fallback."""
    try:
        cap = getattr(pltpu.get_tpu_info(), "vmem_capacity_bytes", None)
        if cap:
            return int(cap)
    except Exception:
        pass
    return 64 << 20


def _choose_tile_and_vmem(batch, batch_tile, x_itemsize, w_itemsize):
    """Pick a batch tile that fits 5/8 of physical VMEM and >=2 grid steps."""
    budget = (_vmem_capacity_bytes() * 5) // 8
    # Per batch-row VMEM: double-buffered x row (384 sublanes x 49->128 padded
    # lanes) + double-buffered f32 output row.
    per_row = 2 * HIDDEN_DIM * 128 * x_itemsize + 2 * NDIM * 4
    # Resident W and bias (counted double-buffered) + slack for internal scratch.
    fixed = 2 * (HIDDEN_DIM * NDIM * w_itemsize + NDIM * 4) + (4 << 20)
    max_tb = max(8, ((budget - fixed) // per_row) // 8 * 8)

    tb = min(batch_tile, max_tb, batch)
    if batch > 8:
        # Guarantee >= 2 grid steps so ("parallel",) can use both TCs on v7x.
        tb = min(tb, max(8, _round_up(-(-batch // 2), 8)))
    if tb < batch:
        tb = max(8, (tb // 8) * 8)   # output block sublane dim must be 8-aligned
    return tb, budget


def _make_kernel(batch, tb, mask_rows):
    def kernel(x_ref, w_ref, b_ref, o_ref):
        # x_ref: (tb, 384, 49)   w_ref: (384, 1024) [pre-scaled by 1/49]
        # b_ref: (1, 1024) f32   o_ref: (tb, 1024) f32
        # Global average pool: plain sum over the spatial (lane) axis — the
        # 1/49 is folded into W.  Accumulate in f32 even for bf16 inputs.
        pooled = jnp.sum(x_ref[...].astype(jnp.float32), axis=-1)          # (tb, C)
        # Projection head on the MXU, f32 accumulation.
        feat = jnp.dot(pooled.astype(w_ref.dtype), w_ref[...],
                       preferred_element_type=jnp.float32) + b_ref[...]    # (tb, N)
        if mask_rows:
            # Ragged last block: zero the padded rows so rsqrt never sees
            # stale-VMEM garbage (those rows are dropped on writeback anyway).
            row = jax.lax.broadcasted_iota(jnp.int32, (tb, 1), 0)
            feat = jnp.where(pl.program_id(0) * tb + row < batch, feat, 0.0)
        # F.normalize(dim=1): z / max(||z||, eps) == z * rsqrt(max(||z||^2, eps^2)).
        ssq = jnp.sum(feat * feat, axis=1, keepdims=True)                   # (tb, 1)
        inv = jax.lax.rsqrt(jnp.maximum(ssq, EPS * EPS))                    # exact, EUP
        o_ref[...] = feat * inv
    return kernel


def custom_encoder_forward(x_nchw, w, b, *, batch_tile=128, use_bf16_inputs=False):
    """SupCon head forward.

    x_nchw: (B, 384, 7, 7) backbone feature map (NCHW)
    w:      (384, 1024)    Linear weight, input-major (torch weight.T)
    b:      (1024,)        Linear bias
    Returns L2-row-normalized projections, (B, 1024) float32.
    """
    B, C, H, W_ = x_nchw.shape
    assert C == HIDDEN_DIM and H == POOL and W_ == POOL, "expects (B, 384, 7, 7)"
    assert w.shape == (HIDDEN_DIM, NDIM) and b.shape == (NDIM,)

    # Free layout glue: collapse the contiguous 7x7 minor dims -> (B, C, 49).
    x_flat = x_nchw.reshape(B, C, HW)
    # Fold the 1/49 average into the weight (one-time, exact in f32).
    w_scaled = (w / HW).astype(jnp.float32)
    b2d = b.reshape(1, NDIM).astype(jnp.float32)
    if use_bf16_inputs:
        # Halves x/W HBM traffic (largest relative win on v5e).  Accumulation
        # and the normalize stay in f32; expect ~1e-3-level output deltas.
        x_flat = x_flat.astype(jnp.bfloat16)
        w_scaled = w_scaled.astype(jnp.bfloat16)

    tb, vmem_limit = _choose_tile_and_vmem(
        B, batch_tile, x_flat.dtype.itemsize, w_scaled.dtype.itemsize)
    grid = (pl.cdiv(B, tb),)
    kernel = _make_kernel(B, tb, mask_rows=(B % tb != 0))

    cost = pl.CostEstimate(
        flops=B * (C * HW + 2 * C * NDIM + 3 * NDIM),
        transcendentals=B,                                   # one rsqrt per row
        bytes_accessed=(x_flat.size * x_flat.dtype.itemsize
                        + w_scaled.size * w_scaled.dtype.itemsize
                        + b2d.size * 4 + B * NDIM * 4),
    )

    return pl.pallas_call(
        kernel,
        out_shape=jax.ShapeDtypeStruct((B, NDIM), jnp.float32),
        grid_spec=pltpu.PrefetchScalarGridSpec(
            num_scalar_prefetch=0,
            grid=grid,
            in_specs=[
                # x: one batch tile per grid step (default 2-deep pipelining;
                # compute << DMA so deeper buffering would only waste VMEM).
                pl.BlockSpec((tb, C, HW), lambda i: (i, 0, 0)),
                # W, b: constant index map -> VMEM resident across steps.
                pl.BlockSpec((HIDDEN_DIM, NDIM), lambda i: (0, 0)),
                pl.BlockSpec((1, NDIM), lambda i: (0, 0)),
            ],
            out_specs=pl.BlockSpec((tb, NDIM), lambda i: (i, 0)),
        ),
        compiler_params=pltpu.CompilerParams(
            # Independent batch tiles: shard across TensorCores on v7x megacore.
            dimension_semantics=("parallel",),
            vmem_limit_bytes=vmem_limit,
        ),
        cost_estimate=cost,
    )(x_flat, w_scaled, b2d)


def _reference(x_nchw, w, b):
    pooled = jnp.mean(x_nchw.astype(jnp.float32), axis=(2, 3))   # (B, C)
    feat = pooled @ w + b                                        # (B, N)
    norm = jnp.linalg.norm(feat, axis=1, keepdims=True)
    return feat / jnp.maximum(norm, EPS)


if __name__ == "__main__":
    key = jax.random.PRNGKey(0)
    kx, kw, kb = jax.random.split(key, 3)

    # Small shapes consistent with the module: hidden_dim=384, 7x7 map, ndim=1024.
    # B=20 is deliberately not a multiple of the tile -> exercises the ragged mask.
    B = 20
    x = jax.random.normal(kx, (B, HIDDEN_DIM, POOL, POOL), dtype=jnp.float32)

    # Deterministic Linear(384, 1024) params (PyTorch-style uniform bound).
    bound = 1.0 / (HIDDEN_DIM ** 0.5)
    w = jax.random.uniform(kw, (HIDDEN_DIM, NDIM), jnp.float32, -bound, bound)
    b = jax.random.uniform(kb, (NDIM,), jnp.float32, -bound, bound)

    ref = _reference(x, w, b)

    # 1) f32, auto tile: >=2 grid steps, ragged last block -> masked rows.
    out = jax.block_until_ready(custom_encoder_forward(x, w, b))
    assert out.shape == (B, NDIM)
    assert jnp.allclose(out, ref, atol=1e-5, rtol=1e-5), "f32 ragged mismatch"
    assert jnp.allclose(jnp.linalg.norm(out, axis=1), 1.0, atol=1e-5)

    # 2) f32, explicit small tile with exact division (no mask path).
    out16 = jax.block_until_ready(custom_encoder_forward(x[:16], w, b, batch_tile=8))
    assert jnp.allclose(out16, ref[:16], atol=1e-5, rtol=1e-5), "f32 tiled mismatch"

    # 3) bf16 inputs (halved HBM traffic, f32 accumulation) -> looser tolerance.
    out_bf16 = jax.block_until_ready(
        custom_encoder_forward(x, w, b, use_bf16_inputs=True))
    assert jnp.allclose(out_bf16, ref, atol=1e-2, rtol=1e-2), "bf16 mismatch"

    print("KERNEL_OK")
</pallas_src>

<mosaic_0001>
module attributes {stable_mosaic.version = 11 : i64} {
  func.func @kernel(%arg0: i32, %arg1: memref<16x384x49xf32, #tpu.memory_space<vmem>>, %arg2: memref<384x1024xf32, #tpu.memory_space<vmem>>, %arg3: memref<1x1024xf32, #tpu.memory_space<vmem>>, %arg4: memref<16x1024xf32, #tpu.memory_space<vmem>>) attributes {dimension_semantics = [#tpu.dimension_semantics<parallel>], iteration_bounds = array<i64: 2>, scalar_prefetch = 0 : i64, scratch_operands = 0 : i64, tpu.core_type = #tpu.core_type<tc>, window_params = [{transform_indices = @transform_0, window_bounds = array<i64: 16, 384, 49>}, {pipeline_mode = #tpu.pipeline_mode<synchronous>, transform_indices = @transform_1, window_bounds = array<i64: 384, 1024>}, {pipeline_mode = #tpu.pipeline_mode<synchronous>, transform_indices = @transform_2, window_bounds = array<i64: 1, 1024>}, {transform_indices = @transform_3, window_bounds = array<i64: 16, 1024>}]} {
    %c0 = arith.constant 0 : index
    %c0_0 = arith.constant 0 : index
    %c0_1 = arith.constant 0 : index
    %0 = vector.load %arg1[%c0, %c0_0, %c0_1] : memref<16x384x49xf32, #tpu.memory_space<vmem>>, vector<16x384x49xf32>
    %cst = arith.constant dense<0.000000e+00> : vector<16x384xf32>
    %1 = vector.multi_reduction <add>, %0, %cst [2] : vector<16x384x49xf32> to vector<16x384xf32>
    %c0_2 = arith.constant 0 : index
    %c0_3 = arith.constant 0 : index
    %2 = vector.load %arg2[%c0_2, %c0_3] : memref<384x1024xf32, #tpu.memory_space<vmem>>, vector<384x1024xf32>
    %cst_4 = arith.constant dense<0.000000e+00> : vector<16x1024xf32>
    %3 = tpu.matmul %1, %2, %cst_4 {dimension_numbers = #tpu.dot_dimension_numbers<[1], [0], [0], [1], [0, 0, 1, 1], [], []>} : vector<16x384xf32>, vector<384x1024xf32>, vector<16x1024xf32> -> vector<16x1024xf32>
    %c0_5 = arith.constant 0 : index
    %c0_6 = arith.constant 0 : index
    %4 = vector.load %arg3[%c0_5, %c0_6] : memref<1x1024xf32, #tpu.memory_space<vmem>>, vector<1x1024xf32>
    %5 = vector.broadcast %4 : vector<1x1024xf32> to vector<16x1024xf32>
    %6 = arith.addf %3, %5 : vector<16x1024xf32>
    %7 = tpu.iota {dimensions = array<i32: 0>} : vector<16x1xi32>
    %c16_i32 = arith.constant 16 : i32
    %8 = arith.muli %arg0, %c16_i32 : i32
    %9 = vector.broadcast %8 : i32 to vector<16x1xi32>
    %10 = arith.addi %9, %7 : vector<16x1xi32>
    %c20_i32 = arith.constant 20 : i32
    %11 = vector.broadcast %c20_i32 : i32 to vector<16x1xi32>
    %12 = arith.cmpi slt, %10, %11 : vector<16x1xi32>
    %cst_7 = arith.constant 0.000000e+00 : f32
    %13 = vector.shape_cast %12 : vector<16x1xi1> to vector<16x1xi1>
    %14 = vector.broadcast %13 : vector<16x1xi1> to vector<16x1024xi1>
    %15 = vector.broadcast %cst_7 : f32 to vector<16x1024xf32>
    %16 = arith.select %14, %6, %15 : vector<16x1024xi1>, vector<16x1024xf32>
    %17 = arith.mulf %16, %16 : vector<16x1024xf32>
    %cst_8 = arith.constant dense<0.000000e+00> : vector<16xf32>
    %18 = vector.multi_reduction <add>, %17, %cst_8 [1] : vector<16x1024xf32> to vector<16xf32>
    %19 = vector.shape_cast %18 : vector<16xf32> to vector<16x1xf32>
    %cst_9 = arith.constant 1.000000e-24 : f32
    %20 = vector.broadcast %cst_9 : f32 to vector<16x1xf32>
    %21 = arith.maximumf %19, %20 : vector<16x1xf32>
    %22 = math.rsqrt %21 : vector<16x1xf32>
    %23 = vector.broadcast %22 : vector<16x1xf32> to vector<16x1024xf32>
    %24 = arith.mulf %16, %23 : vector<16x1024xf32>
    %c0_10 = arith.constant 0 : index
    %c0_11 = arith.constant 0 : index
    %25 = vector.load %arg4[%c0_10, %c0_11] : memref<16x1024xf32, #tpu.memory_space<vmem>>, vector<16x1024xf32>
    tpu.vector_store %arg4[%c0_10, %c0_11], %24 {strides = array<i32>} : memref<16x1024xf32, #tpu.memory_space<vmem>>, vector<16x1024xf32>,
    return
  }
  func.func @transform_0(%arg0: i32) -> (i32, i32, i32) {
    %c0_i32 = arith.constant 0 : i32
    %c0_i32_0 = arith.constant 0 : i32
    %c0_i32_1 = arith.constant 0 : i32
    return %arg0, %c0_i32, %c0_i32_0 : i32, i32, i32
  }
  func.func @transform_1(%arg0: i32) -> (i32, i32) {
    %c0_i32 = arith.constant 0 : i32
    %c0_i32_0 = arith.constant 0 : i32
    %c0_i32_1 = arith.constant 0 : i32
    return %c0_i32, %c0_i32_0 : i32, i32
  }
  func.func @transform_2(%arg0: i32) -> (i32, i32) {
    %c0_i32 = arith.constant 0 : i32
    %c0_i32_0 = arith.constant 0 : i32
    %c0_i32_1 = arith.constant 0 : i32
    return %c0_i32, %c0_i32_0 : i32, i32
  }
  func.func @transform_3(%arg0: i32) -> (i32, i32) {
    %c0_i32 = arith.constant 0 : i32
    %c0_i32_0 = arith.constant 0 : i32
    return %arg0, %c0_i32 : i32, i32
  }
}

</mosaic_0001>

<bundles_post_ra>
// kernel: tpu_custom_call.1
= control target key start
LH: loop header
LB: loop body
LE: loop exit
PB: predicated region body
PF: predicated region fallthrough
CT: control target
= control target key end

     0   :  { %8 = vsyncpa [#allocation3], 0  ;;  %s14685_s0 = inlined_call_operand.vmem [shape: f32[20,384,49], index: 0, kind: input, shape index: {}]   ;;  %s14686_s1 = inlined_call_operand.vmem [shape: f32[384,1024], index: 1, kind: input, shape index: {}]   ;;  %s14687_s2 = inlined_call_operand.vmem [shape: f32[1,1024], index: 2, kind: input, shape index: {}]   ;;  %s14688_s3 = inlined_call_operand.hbm [shape: f32[20,1024], index: 3, kind: output, shape index: {}]  }
   0x1   :  { %10 = vsyncpa [#allocation3 + $0x1], 0  ;;  %s9722_s12 = smov 0   ;;  %s9724_s13 = smov 0  }
   0x2   :  { %s9726_s14 = smov 0   ;;  %s9728_s15 = smov 0  }
   0x3 LB: > { %s9743_s16 = sadd.s32 4294967295, %s9696_s15   ;;  %s9150_s17 = sadd.s32 4294967294, %s9696_s15   ;;  %s9696_s15 = sphi %s9728_s15, %s14805_s15   ;;  %s9692_s14 = sphi %s9726_s14, %s14804_s14   ;;  %s9688_s13 = sphi %s9724_s13, %s14803_s13   ;;  %s9684_s12 = sphi %s9722_s12, %s14802_s12  }
   0x4   : > { %s9747_s18 = sadd.s32 1, %s9696_s15   ;;  %s91_s19 = sadd.s32 1, %s9692_s14 }
   0x5   : > { %s88_s20 = ssub.s32 %s9696_s15, %s9747_s18  ;;  %p101_p0 = scmp.ne.s32.totalorder %s9692_s14, %s9688_s13 }
   0x6   : > { %p89_p1 = scmp.eq.s32.totalorder %s88_s20, 0  ;;  %p102_p2 = scmp.eq.s32.totalorder %s9743_s16, 1 }
   0x7   : > { %p107_p3 = scmp.ne.s32.totalorder %s9688_s13, %s9684_s12  ;;  %p108_p4 = scmp.eq.s32.totalorder %s9150_s17, 1 }
   0x8   : > { %s9758_s21 = scalar_select %p89_p1, %s9692_s14, %s91_s19  }
   0x9   : > { %p9760_p5 = por %p102_p2, %p101_p0  ;;  %p9764_p6 = por %p108_p4, %p107_p3 }
   0xa   : > { %p9153_p7 = scmp.ge.s32.totalorder %s9696_s15, 1  ;;  %p152_p8 = scmp.lt.s32.totalorder %s9696_s15, 3 }
   0xc   : > { %p153_p9 = pnand %p9153_p7, %p152_p8 }
   0xd   : > { %s9771_s24 = sshll.u32 (!%p153_p9), %s9743_s16, 4  ;;  %vm973_vm0 = vcmask (!%p153_p9), 400384   ;;  %vm4483_vm1 = vcmask (!%p153_p9), 130112   ;;  %vm14697_vm2 = vcmask (!%p153_p9), 195712   ;;  %vm4497_vm3 = vcmask (!%p153_p9), 261312  }
   0xe   : > { %156 = sbr.rel (%p153_p9) target bundleno = 2161 (0x871), region = 32  ;;  %p188_p10 = scmp.lt.s32.totalorder (!%p153_p9), %s9771_s24, 19  ;;  %vm4504_vm4 = vcmask (!%p153_p9), 326912   ;;  %vm4511_vm5 = vcmask (!%p153_p9), 392512   ;;  %vm4518_vm6 = vcmask (!%p153_p9), 458112   ;;  %vm4525_vm7 = vcmask (!%p153_p9), 523712  }
   0xf   : > { %vm14690_vm8 = vcmask (!%p153_p9), 589312   ;;  %vm4539_vm9 = vcmask (!%p153_p9), 654912   ;;  %vm4546_vm10 = vcmask (!%p153_p9), 720512   ;;  %vm14689_vm11 = vcmask (!%p153_p9), 786112  }
  0x10   : > { %vm4560_vm12 = vcmask (!%p153_p9), 851712   ;;  %vm4567_vm13 = vcmask (!%p153_p9), 917312   ;;  %vm4574_vm14 = vcmask (!%p153_p9), 982912   ;;  %vm4581_vm15 = vcmask (!%p153_p9), 1048512  }
  0x15   : > { %s189_s25 = scalar_select %p188_p10, %s9771_s24, 19 }
  0x16   : > { %s9159_s9 = sshll.u32 (%p9760_p5), %s9743_s16, 1 }
  0x17   : > { %s9588_s26 = smul.u32 384, %s189_s25  ;;  %s9075_s10 = ssub.s32 (%p9760_p5), 3, %s9159_s9 }
  0x18   : > { %p9076_p11 = scmp.lt.s32.totalorder (%p9760_p5), %s9075_s10, 2 }
  0x19   : > { %s9778_s29 = scalar_lea.vmem %s14685_s0, %s9588_s26 }
  0x1a   : > { %v207_v0 = vld [vmem:[%s9778_s29 + $0x10] sm:$0xff]  ;;  %v205_v1 = vld [vmem:[%s9778_s29] sm:$0xff]  ;;  %v208_v2 = vld [vmem:[%s9778_s29 + $0x18] sm:$0xff] }
  0x1b   : > { %v980_v3 = vsel %vm973_vm0, %v207_v0, 0.0  ;;  %v974_v4 = vsel %vm973_vm0, %v205_v1, 0.0  ;;  %v206_v5 = vld [vmem:[%s9778_s29 + $0x8] sm:$0xff]  ;;  %v983_v6 = vsel %vm973_vm0, %v208_v2, 0.0  ;;  %v209_v9 = vld [vmem:[%s9778_s29 + $0x20] sm:$0xff]  ;;  %v212_v12 = vld [vmem:[%s9778_s29 + $0x38] sm:$0xff] }
  0x1c   : > { %981 = vadd.xlane.f32.xlu1 %v980_v3  ;;  %975 = vadd.xlane.f32.xlu0 %v974_v4  ;;  %v977_v7 = vsel %vm973_vm0, %v206_v5, 0.0  ;;  %v210_v8 = vld [vmem:[%s9778_s29 + $0x28] sm:$0xff]  ;;  %v986_v11 = vsel %vm973_vm0, %v209_v9, 0.0  ;;  %v211_v13 = vld [vmem:[%s9778_s29 + $0x30] sm:$0xff]  ;;  %v995_v14 = vsel %vm973_vm0, %v212_v12, 0.0  ;;  %v213_v17 = vld [vmem:[%s9778_s29 + $0x40] sm:$0xff] }
  0x1d   : > { %v989_v10 = vsel %vm973_vm0, %v210_v8, 0.0  ;;  %v992_v15 = vsel %vm973_vm0, %v211_v13, 0.0  ;;  %v214_v16 = vld [vmem:[%s9778_s29 + $0x48] sm:$0xff]  ;;  %v998_v19 = vsel %vm973_vm0, %v213_v17, 0.0  ;;  %v216_v20 = vld [vmem:[%s9778_s29 + $0x58] sm:$0xff]  ;;  %v215_v21 = vld [vmem:[%s9778_s29 + $0x50] sm:$0xff] }
  0x1e   : > { %v1001_v18 = vsel %vm973_vm0, %v214_v16, 0.0  ;;  %v1007_v22 = vsel %vm973_vm0, %v216_v20, 0.0  ;;  %v1004_v23 = vsel %vm973_vm0, %v215_v21, 0.0  ;;  %v218_v24 = vld [vmem:[%s9778_s29 + $0x68] sm:$0xff]  ;;  %v217_v25 = vld [vmem:[%s9778_s29 + $0x60] sm:$0xff]  ;;  %v220_v28 = vld [vmem:[%s9778_s29 + $0x78] sm:$0xff] }
  0x1f   : > { %v1013_v26 = vsel %vm973_vm0, %v218_v24, 0.0  ;;  %v1010_v27 = vsel %vm973_vm0, %v217_v25, 0.0  ;;  %v219_v29 = vld [vmem:[%s9778_s29 + $0x70] sm:$0xff]  ;;  %v1019_v30 = vsel %vm973_vm0, %v220_v28, 0.0  ;;  %v222_v32 = vld [vmem:[%s9778_s29 + $0x88] sm:$0xff]  ;;  %v221_v33 = vld [vmem:[%s9778_s29 + $0x80] sm:$0xff] }
  0x20   : > { %984 = vadd.xlane.f32.xlu1 %v983_v6  ;;  %978 = vadd.xlane.f32.xlu0 %v977_v7  ;;  %v1016_v31 = vsel %vm973_vm0, %v219_v29, 0.0  ;;  %v1025_v34 = vsel %vm973_vm0, %v222_v32, 0.0  ;;  %v1022_v35 = vsel %vm973_vm0, %v221_v33, 0.0  ;;  %v224_v36 = vld [vmem:[%s9778_s29 + $0x98] sm:$0xff]  ;;  %v223_v37 = vld [vmem:[%s9778_s29 + $0x90] sm:$0xff]  ;;  %v226_v40 = vld [vmem:[%s9778_s29 + $0xa8] sm:$0xff] }
  0x21   : > { %v1031_v38 = vsel %vm973_vm0, %v224_v36, 0.0  ;;  %v1028_v39 = vsel %vm973_vm0, %v223_v37, 0.0  ;;  %v225_v41 = vld [vmem:[%s9778_s29 + $0xa0] sm:$0xff]  ;;  %v1037_v42 = vsel %vm973_vm0, %v226_v40, 0.0  ;;  %v228_v44 = vld [vmem:[%s9778_s29 + $0xb8] sm:$0xff]  ;;  %v227_v45 = vld [vmem:[%s9778_s29 + $0xb0] sm:$0xff] }
  0x22   : > { %v1034_v43 = vsel %vm973_vm0, %v225_v41, 0.0  ;;  %v1043_v46 = vsel %vm973_vm0, %v228_v44, 0.0  ;;  %v1040_v47 = vsel %vm973_vm0, %v227_v45, 0.0  ;;  %v230_v48 = vld [vmem:[%s9778_s29 + $0xc8] sm:$0xff]  ;;  %v229_v49 = vld [vmem:[%s9778_s29 + $0xc0] sm:$0xff]  ;;  %v232_v52 = vld [vmem:[%s9778_s29 + $0xd8] sm:$0xff] }
  0x23   : > { %v1049_v50 = vsel %vm973_vm0, %v230_v48, 0.0  ;;  %v1046_v51 = vsel %vm973_vm0, %v229_v49, 0.0  ;;  %v231_v53 = vld [vmem:[%s9778_s29 + $0xd0] sm:$0xff]  ;;  %v1055_v54 = vsel %vm973_vm0, %v232_v52, 0.0  ;;  %v234_v56 = vld [vmem:[%s9778_s29 + $0xe8] sm:$0xff]  ;;  %v233_v57 = vld [vmem:[%s9778_s29 + $0xe0] sm:$0xff] }
  0x24   : > { %990 = vadd.xlane.f32.xlu1 %v989_v10  ;;  %987 = vadd.xlane.f32.xlu0 %v986_v11  ;;  %v1052_v55 = vsel %vm973_vm0, %v231_v53, 0.0  ;;  %v1061_v58 = vsel %vm973_vm0, %v234_v56, 0.0  ;;  %v1058_v59 = vsel %vm973_vm0, %v233_v57, 0.0  ;;  %v236_v60 = vld [vmem:[%s9778_s29 + $0xf8] sm:$0xff]  ;;  %v235_v61 = vld [vmem:[%s9778_s29 + $0xf0] sm:$0xff]  ;;  %v238_v0 = vld [vmem:[%s9778_s29 + $0x108] sm:$0xff] }
  0x25   : > { %v1067_v62 = vsel %vm973_vm0, %v236_v60, 0.0  ;;  %v1064_v63 = vsel %vm973_vm0, %v235_v61, 0.0  ;;  %v237_v1 = vld [vmem:[%s9778_s29 + $0x100] sm:$0xff]  ;;  %v1073_v2 = vsel %vm973_vm0, %v238_v0, 0.0  ;;  %v240_v4 = vld [vmem:[%s9778_s29 + $0x118] sm:$0xff]  ;;  %v239_v5 = vld [vmem:[%s9778_s29 + $0x110] sm:$0xff] }
  0x26   : > { %v1070_v3 = vsel %vm973_vm0, %v237_v1, 0.0  ;;  %v1079_v6 = vsel %vm973_vm0, %v240_v4, 0.0  ;;  %v1076_v7 = vsel %vm973_vm0, %v239_v5, 0.0  ;;  %v242_v8 = vld [vmem:[%s9778_s29 + $0x128] sm:$0xff]  ;;  %v241_v9 = vld [vmem:[%s9778_s29 + $0x120] sm:$0xff]  ;;  %v244_v12 = vld [vmem:[%s9778_s29 + $0x138] sm:$0xff] }
  0x27   : > { %v1085_v10 = vsel %vm973_vm0, %v242_v8, 0.0  ;;  %v1082_v11 = vsel %vm973_vm0, %v241_v9, 0.0  ;;  %v243_v13 = vld [vmem:[%s9778_s29 + $0x130] sm:$0xff]  ;;  %v246_v16 = vld [vmem:[%s9778_s29 + $0x148] sm:$0xff]  ;;  %v245_v17 = vld [vmem:[%s9778_s29 + $0x140] sm:$0xff] }
  0x28   : > { %996 = vadd.xlane.f32.xlu1 %v995_v14  ;;  %993 = vadd.xlane.f32.xlu0 %v992_v15  ;;  %v1091_v14 = vsel %vm973_vm0, %v244_v12, 0.0  ;;  %v1088_v15 = vsel %vm973_vm0, %v243_v13, 0.0  ;;  %v248_v20 = vld [vmem:[%s9778_s29 + $0x158] sm:$0xff]  ;;  %v247_v21 = vld [vmem:[%s9778_s29 + $0x150] sm:$0xff]  ;;  %v250_v24 = vld [vmem:[%s9778_s29 + $0x168] sm:$0xff] }
  0x29   : > { %v249_v25 = vld [vmem:[%s9778_s29 + $0x160] sm:$0xff]  ;;  %v252_v28 = vld [vmem:[%s9778_s29 + $0x178] sm:$0xff]  ;;  %v251_v29 = vld [vmem:[%s9778_s29 + $0x170] sm:$0xff] }
  0x2a   : > { %v254_v32 = vld [vmem:[%s9778_s29 + $0x188] sm:$0xff]  ;;  %v253_v33 = vld [vmem:[%s9778_s29 + $0x180] sm:$0xff]  ;;  %v256_v36 = vld [vmem:[%s9778_s29 + $0x198] sm:$0xff] }
  0x2b   : > { %v255_v37 = vld [vmem:[%s9778_s29 + $0x190] sm:$0xff]  ;;  %v258_v40 = vld [vmem:[%s9778_s29 + $0x1a8] sm:$0xff]  ;;  %v257_v41 = vld [vmem:[%s9778_s29 + $0x1a0] sm:$0xff] }
  0x2c   : > { %1002 = vadd.xlane.f32.xlu1 %v1001_v18  ;;  %999 = vadd.xlane.f32.xlu0 %v998_v19  ;;  %v1097_v18 = vsel %vm973_vm0, %v246_v16, 0.0  ;;  %v1094_v19 = vsel %vm973_vm0, %v245_v17, 0.0  ;;  %v260_v44 = vld [vmem:[%s9778_s29 + $0x1b8] sm:$0xff]  ;;  %v259_v45 = vld [vmem:[%s9778_s29 + $0x1b0] sm:$0xff]  ;;  %v262_v48 = vld [vmem:[%s9778_s29 + $0x1c8] sm:$0xff] }
  0x2d   : > { %v261_v49 = vld [vmem:[%s9778_s29 + $0x1c0] sm:$0xff]  ;;  %v264_v52 = vld [vmem:[%s9778_s29 + $0x1d8] sm:$0xff]  ;;  %v263_v53 = vld [vmem:[%s9778_s29 + $0x1d0] sm:$0xff] }
  0x2e   : > { %v266_v56 = vld [vmem:[%s9778_s29 + $0x1e8] sm:$0xff]  ;;  %v265_v57 = vld [vmem:[%s9778_s29 + $0x1e0] sm:$0xff]  ;;  %v268_v60 = vld [vmem:[%s9778_s29 + $0x1f8] sm:$0xff] }
  0x2f   : > { %v267_v61 = vld [vmem:[%s9778_s29 + $0x1f0] sm:$0xff]  ;;  %v270_v0 = vld [vmem:[%s9778_s29 + $0x208] sm:$0xff]  ;;  %v269_v1 = vld [vmem:[%s9778_s29 + $0x200] sm:$0xff] }
  0x30   : > { %1008 = vadd.xlane.f32.xlu1 %v1007_v22  ;;  %1005 = vadd.xlane.f32.xlu0 %v1004_v23  ;;  %v1103_v22 = vsel %vm973_vm0, %v248_v20, 0.0  ;;  %v1100_v23 = vsel %vm973_vm0, %v247_v21, 0.0  ;;  %v272_v4 = vld [vmem:[%s9778_s29 + $0x218] sm:$0xff]  ;;  %v271_v5 = vld [vmem:[%s9778_s29 + $0x210] sm:$0xff]  ;;  %v274_v8 = vld [vmem:[%s9778_s29 + $0x228] sm:$0xff] }
  0x31   : > { %v273_v9 = vld [vmem:[%s9778_s29 + $0x220] sm:$0xff]  ;;  %v276_v13 = vld [vmem:[%s9778_s29 + $0x238] sm:$0xff] }
  0x32   : > { %v1178_v12 = vsel %vm973_vm0, %v273_v9, 0.0  ;;  %v1187_v16 = vsel %vm973_vm0, %v276_v13, 0.0  ;;  %v277_v20 = vld [vmem:[%s9778_s29 + $0x240] sm:$0xff]  ;;  %v286_v9 = vld [vmem:[%s9778_s29 + $0x288] sm:$0xff] }
  0x34   : > { %1014 = vadd.xlane.f32.xlu1 %v1013_v26  ;;  %1011 = vadd.xlane.f32.xlu0 %v1010_v27  ;;  %v1109_v26 = vsel %vm973_vm0, %v250_v24, 0.0  ;;  %v1106_v27 = vsel %vm973_vm0, %v249_v25, 0.0 }
  0x38   : > { %1020 = vadd.xlane.f32.xlu1 %v1019_v30  ;;  %1017 = vadd.xlane.f32.xlu0 %v1016_v31  ;;  %v1115_v30 = vsel %vm973_vm0, %v252_v28, 0.0  ;;  %v1112_v31 = vsel %vm973_vm0, %v251_v29, 0.0  ;;  %v280_v28 = vld [vmem:[%s9778_s29 + $0x258] sm:$0xff] }
  0x3c   : > { %1026 = vadd.xlane.f32.xlu1 %v1025_v34  ;;  %1023 = vadd.xlane.f32.xlu0 %v1022_v35  ;;  %v1121_v34 = vsel %vm973_vm0, %v254_v32, 0.0  ;;  %v1118_v35 = vsel %vm973_vm0, %v253_v33, 0.0 }
  0x40   : > { %1032 = vadd.xlane.f32.xlu1 %v1031_v38  ;;  %1029 = vadd.xlane.f32.xlu0 %v1028_v39  ;;  %v1127_v38 = vsel %vm973_vm0, %v256_v36, 0.0  ;;  %v1124_v39 = vsel %vm973_vm0, %v255_v37, 0.0  ;;  %v1199_v36 = vsel %vm973_vm0, %v280_v28, 0.0 }
  0x44   : > { %1038 = vadd.xlane.f32.xlu1 %v1037_v42  ;;  %1035 = vadd.xlane.f32.xlu0 %v1034_v43  ;;  %v1133_v42 = vsel %vm973_vm0, %v258_v40, 0.0  ;;  %v1130_v43 = vsel %vm973_vm0, %v257_v41, 0.0 }
  0x48   : > { %1044 = vadd.xlane.f32.xlu1 %v1043_v46  ;;  %1041 = vadd.xlane.f32.xlu0 %v1040_v47  ;;  %v1139_v46 = vsel %vm973_vm0, %v260_v44, 0.0  ;;  %v1136_v47 = vsel %vm973_vm0, %v259_v45, 0.0 }
  0x4c   : > { %1050 = vadd.xlane.f32.xlu1 %v1049_v50  ;;  %1047 = vadd.xlane.f32.xlu0 %v1046_v51  ;;  %v1145_v50 = vsel %vm973_vm0, %v262_v48, 0.0  ;;  %v1142_v51 = vsel %vm973_vm0, %v261_v49, 0.0 }
  0x50   : > { %1056 = vadd.xlane.f32.xlu1 %v1055_v54  ;;  %1053 = vadd.xlane.f32.xlu0 %v1052_v55  ;;  %v1151_v54 = vsel %vm973_vm0, %v264_v52, 0.0  ;;  %v1148_v55 = vsel %vm973_vm0, %v263_v53, 0.0 }
  0x54   : > { %1062 = vadd.xlane.f32.xlu1 %v1061_v58  ;;  %1059 = vadd.xlane.f32.xlu0 %v1058_v59  ;;  %v1157_v58 = vsel %vm973_vm0, %v266_v56, 0.0  ;;  %v1154_v59 = vsel %vm973_vm0, %v265_v57, 0.0  ;;  %v284_v57 = vld [vmem:[%s9778_s29 + $0x278] sm:$0xff] }
  0x58   : > { %1068 = vadd.xlane.f32.xlu1 %v1067_v62  ;;  %1065 = vadd.xlane.f32.xlu0 %v1064_v63  ;;  %v1163_v62 = vsel %vm973_vm0, %v268_v60, 0.0  ;;  %v1160_v63 = vsel %vm973_vm0, %v267_v61, 0.0 }
  0x5c   : > { %1074 = vadd.xlane.f32.xlu1 %v1073_v2  ;;  %1071 = vadd.xlane.f32.xlu0 %v1070_v3  ;;  %v1169_v2 = vsel %vm973_vm0, %v270_v0, 0.0  ;;  %v1166_v3 = vsel %vm973_vm0, %v269_v1, 0.0 }
  0x60   : > { %1080 = vadd.xlane.f32.xlu1 %v1079_v6  ;;  %1077 = vadd.xlane.f32.xlu0 %v1076_v7  ;;  %v1175_v6 = vsel %vm973_vm0, %v272_v4, 0.0  ;;  %v1172_v7 = vsel %vm973_vm0, %v271_v5, 0.0 }
  0x64   : > { %1086 = vadd.xlane.f32.xlu1 %v1085_v10  ;;  %1083 = vadd.xlane.f32.xlu0 %v1082_v11  ;;  %v3664_v10 = vlaneseq  ;;  %v1181_v11 = vsel %vm973_vm0, %v274_v8, 0.0 }
  0x68   : > { %1092 = vadd.xlane.f32.xlu1 %v1091_v14  ;;  %1089 = vadd.xlane.f32.xlu0 %v1088_v15  ;;  %v275_v14 = vld [vmem:[%s9778_s29 + $0x230] sm:$0xff]  ;;  %v9922_v15 = vand.u32 127, %v3664_v10 }
  0x69   : > { %v1184_v17 = vsel %vm973_vm0, %v275_v14, 0.0 }
  0x6a   : > { %v4492_v21 = vadd.s32 4294967272, %v9922_v15  ;;  %v4506_v29 = vadd.s32 4294967256, %v9922_v15  ;;  %v4520_v44 = vadd.s32 4294967240, %v9922_v15  ;;  %v4513_v48 = vadd.s32 4294967248, %v9922_v15 }
  0x6b   : > { %v4527_v60 = vadd.s32 4294967232, %v9922_v15  ;;  %v4548_v13 = vadd.s32 4294967208, %v9922_v15  ;;  %v4541_v14 = vadd.s32 4294967216, %v9922_v15 }
  0x6c   : > { %1098 = vadd.xlane.f32.xlu1 %v1097_v18  ;;  %1095 = vadd.xlane.f32.xlu0 %v1094_v19  ;;  %v9926_v18 = vshrl.u32 %v3664_v10, 7  ;;  %v278_v19 = vld [vmem:[%s9778_s29 + $0x248] sm:$0xff]  ;;  %v285_v10 = vld [vmem:[%s9778_s29 + $0x280] sm:$0xff] }
  0x6e   : > { %v9943_v32 = vsub.s32 %v4492_v21, %v9926_v18  ;;  %v9955_v40 = vsub.s32 %v4506_v29, %v9926_v18  ;;  %v9973_v56 = vsub.s32 %v4520_v44, %v9926_v18  ;;  %v9983_v0 = vsub.s32 %v4513_v48, %v9926_v18  ;;  %v289_v48 = vld [vmem:[%s9778_s29 + $0x2a0] sm:$0xff] }
  0x6f   : > { %v9993_v8 = vsub.s32 %v4527_v60, %v9926_v18  ;;  %v10012_v29 = vsub.s32 %v4548_v13, %v9926_v18 }
  0x70   : > { %1104 = vadd.xlane.f32.xlu1 %v1103_v22  ;;  %1101 = vadd.xlane.f32.xlu0 %v1100_v23  ;;  %v4478_v22 = vadd.s32 4294967288, %v9922_v15  ;;  %v4485_v23 = vadd.s32 4294967280, %v9922_v15 }
  0x72   : > { %v9946_v33 = vsub.s32 %v4478_v22, %v9926_v18 }
  0x74   : > { %1110 = vadd.xlane.f32.xlu1 %v1109_v26  ;;  %1107 = vadd.xlane.f32.xlu0 %v1106_v27  ;;  %v1193_v26 = vsel %vm973_vm0, %v278_v19, 0.0  ;;  %v1190_v27 = vsel %vm973_vm0, %v277_v20, 0.0  ;;  %v1214_v19 = vsel %vm973_vm0, %v285_v10, 0.0  ;;  %v294_v10 = vld [vmem:[%s9778_s29 + $0x2c8] sm:$0xff] }
  0x78   : > { %1116 = vadd.xlane.f32.xlu1 %v1115_v30  ;;  %1113 = vadd.xlane.f32.xlu0 %v1112_v31  ;;  %v4499_v30 = vadd.s32 4294967264, %v9922_v15  ;;  %v9940_v31 = vsub.s32 %v9922_v15, %v9926_v18 }
  0x7a   : > { %v9958_v41 = vsub.s32 %v4499_v30, %v9926_v18  ;;  %v10015_v30 = vsub.s32 %v4541_v14, %v9926_v18 }
  0x7c   : > { %1122 = vadd.xlane.f32.xlu1 %v1121_v34  ;;  %1119 = vadd.xlane.f32.xlu0 %v1118_v35  ;;  %v279_v34 = vld [vmem:[%s9778_s29 + $0x250] sm:$0xff]  ;;  %v9950_v35 = vsub.s32 %v4485_v23, %v9926_v18  ;;  %v288_v23 = vld [vmem:[%s9778_s29 + $0x298] sm:$0xff] }
  0x80   : > { %1128 = vadd.xlane.f32.xlu1 %v1127_v38  ;;  %1125 = vadd.xlane.f32.xlu0 %v1124_v39  ;;  %v1196_v39 = vsel %vm973_vm0, %v279_v34, 0.0 }
  0x84   : > { %1134 = vadd.xlane.f32.xlu1 %v1133_v42  ;;  %1131 = vadd.xlane.f32.xlu0 %v1130_v43  ;;  %v282_v42 = vld [vmem:[%s9778_s29 + $0x268] sm:$0xff]  ;;  %v281_v43 = vld [vmem:[%s9778_s29 + $0x260] sm:$0xff] }
  0x85   : > { %v1202_v52 = vsel %vm973_vm0, %v281_v43, 0.0 }
  0x88   : > { %1140 = vadd.xlane.f32.xlu1 %v1139_v46  ;;  %1137 = vadd.xlane.f32.xlu0 %v1136_v47 }
  0x8c   : > { %1146 = vadd.xlane.f32.xlu1 %v1145_v50  ;;  %1143 = vadd.xlane.f32.xlu0 %v1142_v51  ;;  %v1205_v51 = vsel %vm973_vm0, %v282_v42, 0.0 }
  0x90   : > { %1152 = vadd.xlane.f32.xlu1 %v1151_v54  ;;  %1149 = vadd.xlane.f32.xlu0 %v1148_v55 }
  0x94   : > { %1158 = vadd.xlane.f32.xlu1 %v1157_v58  ;;  %1155 = vadd.xlane.f32.xlu0 %v1154_v59  ;;  %v283_v58 = vld [vmem:[%s9778_s29 + $0x270] sm:$0xff]  ;;  %v4534_v59 = vadd.s32 4294967224, %v9922_v15 }
  0x98   : > { %1164 = vadd.xlane.f32.xlu1 %v1163_v62  ;;  %1161 = vadd.xlane.f32.xlu0 %v1160_v63 }
  0x9c   : > { %1170 = vadd.xlane.f32.xlu1 %v1169_v2  ;;  %1167 = vadd.xlane.f32.xlu0 %v1166_v3  ;;  %v1211_v2 = vsel %vm973_vm0, %v284_v57, 0.0  ;;  %v1208_v3 = vsel %vm973_vm0, %v283_v58, 0.0  ;;  %v1226_v57 = vsel %vm973_vm0, %v289_v48, 0.0 }
  0xa0   : > { %1176 = vadd.xlane.f32.xlu1 %v1175_v6  ;;  %1173 = vadd.xlane.f32.xlu0 %v1172_v7  ;;  %v9990_v7 = vsub.s32 %v4534_v59, %v9926_v18 }
  0xa4   : > { %1182 = vadd.xlane.f32.xlu1 %v1181_v11  ;;  %1179 = vadd.xlane.f32.xlu0 %v1178_v12 }
  0xa8   : > { %1188 = vadd.xlane.f32.xlu1 %v1187_v16  ;;  %1185 = vadd.xlane.f32.xlu0 %v1184_v17  ;;  %v1217_v17 = vsel %vm973_vm0, %v286_v9, 0.0 }
  0xa9   : > { %v982_v24 = vpop.xlane.xlu1 %981  ;;  %v976_v25 = vpop.xlane.xlu0 %975 }
  0xaa   : > { %v4477_v45 = vrot.slane %v976_v25, %v9940_v31  ;;  %v4489_v49 = vrot.slane %v982_v24, %v9950_v35  ;;  %v287_v24 = vld [vmem:[%s9778_s29 + $0x290] sm:$0xff]  ;;  %v4562_v25 = vadd.s32 4294967192, %v9922_v15 }
  0xac   : > { %1194 = vadd.xlane.f32.xlu1 %v1193_v26  ;;  %1191 = vadd.xlane.f32.xlu0 %v1190_v27  ;;  %v4555_v26 = vadd.s32 4294967200, %v9922_v15  ;;  %v10022_v43 = vsub.s32 %v4562_v25, %v9926_v18 }
  0xad   : > { %v985_v37 = vpop.xlane.xlu1 %984  ;;  %v979_v38 = vpop.xlane.xlu0 %978 }
  0xae   : > { %v4496_v46 = vrot.slane %v985_v37, %v9943_v32  ;;  %v4482_v47 = vrot.slane %v979_v38, %v9946_v33  ;;  %v1220_v37 = vsel %vm973_vm0, %v287_v24, 0.0  ;;  %v10025_v44 = vsub.s32 %v4555_v26, %v9926_v18 }
  0xb0   : > { %v4484_v50 = vsel %vm4483_vm1, %v4482_v47, %v4477_v45  ;;  %1200 = vadd.xlane.f32.xlu1 %v1199_v36  ;;  %1197 = vadd.xlane.f32.xlu0 %v1196_v39  ;;  %v1223_v36 = vsel %vm973_vm0, %v288_v23, 0.0  ;;  %v290_v47 = vld [vmem:[%s9778_s29 + $0x2a8] sm:$0xff]  ;;  %v295_v23 = vld [vmem:[%s9778_s29 + $0x2d0] sm:$0xff] }
  0xb1   : > { %v4491_v53 = vsel %vm14697_vm2, %v4489_v49, %v4484_v50  ;;  %v991_v54 = vpop.xlane.xlu1 %990  ;;  %v988_v55 = vpop.xlane.xlu0 %987  ;;  %v4576_v49 = vadd.s32 4294967176, %v9922_v15  ;;  %v4569_v50 = vadd.s32 4294967184, %v9922_v15 }
  0xb2   : > { %v4510_v61 = vrot.slane %v991_v54, %v9955_v40  ;;  %v4498_v62 = vsel %vm4497_vm3, %v4496_v46, %v4491_v53  ;;  %v4503_v63 = vrot.slane %v988_v55, %v9958_v41  ;;  %v1229_v55 = vsel %vm973_vm0, %v290_v47, 0.0 }
  0xb3   : > { %v10040_v15 = vsub.s32 %v4576_v49, %v9926_v18  ;;  %v10043_v60 = vsub.s32 %v4569_v50, %v9926_v18 }
  0xb4   : > { %v4505_v1 = vsel %vm4504_vm4, %v4503_v63, %v4498_v62  ;;  %1206 = vadd.xlane.f32.xlu1 %v1205_v51  ;;  %1203 = vadd.xlane.f32.xlu0 %v1202_v52  ;;  %v291_v62 = vld [vmem:[%s9778_s29 + $0x2b0] sm:$0xff] }
  0xb5   : > { %v997_v4 = vpop.xlane.xlu1 %996  ;;  %v4512_v5 = vsel %vm4511_vm5, %v4510_v61, %v4505_v1  ;;  %v994_v6 = vpop.xlane.xlu0 %993  ;;  %v292_v61 = vld [vmem:[%s9778_s29 + $0x2b8] sm:$0xff] }
  0xb6   : > { %v4524_v11 = vrot.slane %v997_v4, %v9973_v56  ;;  %v4517_v12 = vrot.slane %v994_v6, %v9983_v0  ;;  %v1235_v4 = vsel %vm973_vm0, %v292_v61, 0.0 }
  0xb8   : > { %v4519_v16 = vsel %vm4518_vm6, %v4517_v12, %v4512_v5  ;;  %1212 = vadd.xlane.f32.xlu1 %v1211_v2  ;;  %1209 = vadd.xlane.f32.xlu0 %v1208_v3  ;;  %v1232_v5 = vsel %vm973_vm0, %v291_v62, 0.0 }
  0xb9   : > { %v1003_v20 = vpop.xlane.xlu1 %1002  ;;  %v4526_v21 = vsel %vm4525_vm7, %v4524_v11, %v4519_v16  ;;  %v1000_v22 = vpop.xlane.xlu0 %999  ;;  %v293_v11 = vld [vmem:[%s9778_s29 + $0x2c0] sm:$0xff] }
  0xba   : > { %v4538_v27 = vrot.slane %v1003_v20, %v9990_v7  ;;  %v4531_v28 = vrot.slane %v1000_v22, %v9993_v8  ;;  %v296_v22 = vld [vmem:[%s9778_s29 + $0x2d8] sm:$0xff] }
  0xbc   : > { %v4533_v34 = vsel %vm14690_vm8, %v4531_v28, %v4526_v21  ;;  %1218 = vadd.xlane.f32.xlu1 %v1217_v17  ;;  %1215 = vadd.xlane.f32.xlu0 %v1214_v19  ;;  %v1241_v17 = vsel %vm973_vm0, %v294_v10, 0.0  ;;  %v1238_v19 = vsel %vm973_vm0, %v293_v11, 0.0  ;;  %v1244_v28 = vsel %vm973_vm0, %v295_v23, 0.0 }
  0xbd   : > { %v1009_v38 = vpop.xlane.xlu1 %1008  ;;  %v4540_v39 = vsel %vm4539_vm9, %v4538_v27, %v4533_v34  ;;  %v1006_v42 = vpop.xlane.xlu0 %1005  ;;  %v1247_v27 = vsel %vm973_vm0, %v296_v22, 0.0 }
  0xbe   : > { %v4552_v45 = vrot.slane %v1009_v38, %v10012_v29  ;;  %v4545_v46 = vrot.slane %v1006_v42, %v10015_v30  ;;  %v297_v38 = vld [vmem:[%s9778_s29 + $0x2e0] sm:$0xff] }
  0xbf   : > { %v1250_v48 = vsel %vm973_vm0, %v297_v38, 0.0 }
  0xc0   : > { %v4547_v51 = vsel %vm4546_vm10, %v4545_v46, %v4540_v39  ;;  %1224 = vadd.xlane.f32.xlu1 %v1223_v36  ;;  %1221 = vadd.xlane.f32.xlu0 %v1220_v37  ;;  %v298_v37 = vld [vmem:[%s9778_s29 + $0x2e8] sm:$0xff] }
  0xc1   : > { %v1015_v52 = vpop.xlane.xlu1 %1014  ;;  %v4554_v53 = vsel %vm14689_vm11, %v4552_v45, %v4547_v51  ;;  %v1012_v54 = vpop.xlane.xlu0 %1011  ;;  %v1253_v47 = vsel %vm973_vm0, %v298_v37, 0.0  ;;  %v300_v51 = vld [vmem:[%s9778_s29 + $0x2f8] sm:$0xff] }
  0xc2   : > { %v4566_v58 = vrot.slane %v1015_v52, %v10022_v43  ;;  %v4559_v59 = vrot.slane %v1012_v54, %v10025_v44  ;;  %v299_v52 = vld [vmem:[%s9778_s29 + $0x2f0] sm:$0xff] }
  0xc4   : > { %v4561_v63 = vsel %vm4560_vm12, %v4559_v59, %v4554_v53  ;;  %1230 = vadd.xlane.f32.xlu1 %v1229_v55  ;;  %1227 = vadd.xlane.f32.xlu0 %v1226_v57  ;;  %v1256_v59 = vsel %vm973_vm0, %v299_v52, 0.0 }
  0xc5   : > { %v1021_v1 = vpop.xlane.xlu1 %1020  ;;  %v4568_v2 = vsel %vm4567_vm13, %v4566_v58, %v4561_v63  ;;  %v1018_v3 = vpop.xlane.xlu0 %1017  ;;  %v1259_v58 = vsel %vm973_vm0, %v300_v51, 0.0  ;;  %v302_v63 = vld [vmem:[%s9778_s29 + $0x308] sm:$0xff] }
  0xc6   : > { %v4580_v6 = vrot.slane %v1021_v1, %v10040_v15  ;;  %v4573_v9 = vrot.slane %v1018_v3, %v10043_v60  ;;  %v301_v1 = vld [vmem:[%s9778_s29 + $0x300] sm:$0xff] }
  0xc8   : > { %v4575_v12 = vsel %vm4574_vm14, %v4573_v9, %v4568_v2  ;;  %1236 = vadd.xlane.f32.xlu1 %v1235_v4  ;;  %1233 = vadd.xlane.f32.xlu0 %v1232_v5  ;;  %v1262_v9 = vsel %vm973_vm0, %v301_v1, 0.0 }
  0xc9   : > { %v10057_v13 = vsel %vm4581_vm15, %v4580_v6, %v4575_v12  ;;  %v1027_v14 = vpop.xlane.xlu1 %1026  ;;  %v1024_v16 = vpop.xlane.xlu0 %1023  ;;  %v1265_v6 = vsel %vm973_vm0, %v302_v63, 0.0  ;;  %v304_v12 = vld [vmem:[%s9778_s29 + $0x318] sm:$0xff] }
  0xca   : > { %v4590_v20 = vrot.slane %v1027_v14, %v9946_v33  ;;  %v4586_v21 = vrot.slane %v1024_v16, %v9940_v31  ;;  %v303_v14 = vld [vmem:[%s9778_s29 + $0x310] sm:$0xff] }
  0xcb   : > { %v1268_v22 = vsel %vm973_vm0, %v303_v14, 0.0 }
  0xcc   : > { %v4591_v24 = vsel %vm4483_vm1, %v4590_v20, %v4586_v21  ;;  %1242 = vadd.xlane.f32.xlu1 %v1241_v17  ;;  %1239 = vadd.xlane.f32.xlu0 %v1238_v19  ;;  %v1271_v21 = vsel %vm973_vm0, %v304_v12, 0.0 }
  0xcd   : > { %v1033_v25 = vpop.xlane.xlu1 %1032  ;;  %v1030_v26 = vpop.xlane.xlu0 %1029 }
  0xce   : > { %v4600_v34 = vrot.slane %v1033_v25, %v9943_v32  ;;  %v4595_v36 = vrot.slane %v1030_v26, %v9950_v35  ;;  %v306_v25 = vld [vmem:[%s9778_s29 + $0x328] sm:$0xff]  ;;  %v305_v26 = vld [vmem:[%s9778_s29 + $0x320] sm:$0xff] }
  0xcf   : > { %v1277_v37 = vsel %vm973_vm0, %v306_v25, 0.0  ;;  %v1274_v38 = vsel %vm973_vm0, %v305_v26, 0.0 }
  0xd0   : > { %v4596_v39 = vsel %vm14697_vm2, %v4595_v36, %v4591_v24  ;;  %1248 = vadd.xlane.f32.xlu1 %v1247_v27  ;;  %1245 = vadd.xlane.f32.xlu0 %v1244_v28 }
  0xd1   : > { %v1039_v42 = vpop.xlane.xlu1 %1038  ;;  %v4601_v45 = vsel %vm4497_vm3, %v4600_v34, %v4596_v39  ;;  %v1036_v46 = vpop.xlane.xlu0 %1035 }
  0xd2   : > { %v4610_v49 = vrot.slane %v1039_v42, %v9955_v40  ;;  %v4605_v50 = vrot.slane %v1036_v46, %v9958_v41  ;;  %v307_v46 = vld [vmem:[%s9778_s29 + $0x330] sm:$0xff] }
  0xd3   : > { %v1280_v52 = vsel %vm973_vm0, %v307_v46, 0.0 }
  0xd4   : > { %v4606_v53 = vsel %vm4504_vm4, %v4605_v50, %v4601_v45  ;;  %1254 = vadd.xlane.f32.xlu1 %v1253_v47  ;;  %1251 = vadd.xlane.f32.xlu0 %v1250_v48  ;;  %v308_v45 = vld [vmem:[%s9778_s29 + $0x338] sm:$0xff] }
  0xd5   : > { %v1045_v54 = vpop.xlane.xlu1 %1044  ;;  %v4611_v55 = vsel %vm4511_vm5, %v4610_v49, %v4606_v53  ;;  %v1042_v57 = vpop.xlane.xlu0 %1041  ;;  %v1283_v51 = vsel %vm973_vm0, %v308_v45, 0.0 }
  0xd6   : > { %v4620_v61 = vrot.slane %v1045_v54, %v9973_v56  ;;  %v4615_v62 = vrot.slane %v1042_v57, %v9983_v0  ;;  %v309_v57 = vld [vmem:[%s9778_s29 + $0x340] sm:$0xff] }
  0xd7   : > { %v1286_v1 = vsel %vm973_vm0, %v309_v57, 0.0 }
  0xd8   : > { %v4616_v2 = vsel %vm4518_vm6, %v4615_v62, %v4611_v55  ;;  %1260 = vadd.xlane.f32.xlu1 %v1259_v58  ;;  %1257 = vadd.xlane.f32.xlu0 %v1256_v59  ;;  %v310_v55 = vld [vmem:[%s9778_s29 + $0x348] sm:$0xff] }
  0xd9   : > { %v1051_v3 = vpop.xlane.xlu1 %1050  ;;  %v4621_v4 = vsel %vm4525_vm7, %v4620_v61, %v4616_v2  ;;  %v1048_v5 = vpop.xlane.xlu0 %1047  ;;  %v1289_v63 = vsel %vm973_vm0, %v310_v55, 0.0 }
  0xda   : > { %v4630_v10 = vrot.slane %v1051_v3, %v9990_v7  ;;  %v4625_v11 = vrot.slane %v1048_v5, %v9993_v8  ;;  %v311_v5 = vld [vmem:[%s9778_s29 + $0x350] sm:$0xff] }
  0xdb   : > { %v1292_v12 = vsel %vm973_vm0, %v311_v5, 0.0 }
  0xdc   : > { %v4626_v16 = vsel %vm14690_vm8, %v4625_v11, %v4621_v4  ;;  %1266 = vadd.xlane.f32.xlu1 %v1265_v6  ;;  %1263 = vadd.xlane.f32.xlu0 %v1262_v9  ;;  %v312_v4 = vld [vmem:[%s9778_s29 + $0x358] sm:$0xff] }
  0xdd   : > { %v1057_v17 = vpop.xlane.xlu1 %1056  ;;  %v4631_v19 = vsel %vm4539_vm9, %v4630_v10, %v4626_v16  ;;  %v1054_v20 = vpop.xlane.xlu0 %1053  ;;  %v1295_v11 = vsel %vm973_vm0, %v312_v4, 0.0 }
  0xde   : > { %v4640_v23 = vrot.slane %v1057_v17, %v10012_v29  ;;  %v4635_v24 = vrot.slane %v1054_v20, %v10015_v30  ;;  %v314_v17 = vld [vmem:[%s9778_s29 + $0x368] sm:$0xff] }
  0xe0   : > { %v4636_v27 = vsel %vm4546_vm10, %v4635_v24, %v4631_v19  ;;  %1272 = vadd.xlane.f32.xlu1 %v1271_v21  ;;  %1269 = vadd.xlane.f32.xlu0 %v1268_v22  ;;  %v313_v19 = vld [vmem:[%s9778_s29 + $0x360] sm:$0xff]  ;;  %v1301_v24 = vsel %vm973_vm0, %v314_v17, 0.0 }
  0xe1   : > { %v1063_v28 = vpop.xlane.xlu1 %1062  ;;  %v4641_v34 = vsel %vm14689_vm11, %v4640_v23, %v4636_v27  ;;  %v1060_v36 = vpop.xlane.xlu0 %1059  ;;  %v1298_v25 = vsel %vm973_vm0, %v313_v19, 0.0 }
  0xe2   : > { %v4650_v39 = vrot.slane %v1063_v28, %v10022_v43  ;;  %v4645_v42 = vrot.slane %v1060_v36, %v10025_v44  ;;  %v316_v28 = vld [vmem:[%s9778_s29 + $0x378] sm:$0xff] }
  0xe4   : > { %v4646_v47 = vsel %vm4560_vm12, %v4645_v42, %v4641_v34  ;;  %1278 = vadd.xlane.f32.xlu1 %v1277_v37  ;;  %1275 = vadd.xlane.f32.xlu0 %v1274_v38  ;;  %v315_v34 = vld [vmem:[%s9778_s29 + $0x370] sm:$0xff]  ;;  %v1307_v42 = vsel %vm973_vm0, %v316_v28, 0.0 }
  0xe5   : > { %v1069_v48 = vpop.xlane.xlu1 %1068  ;;  %v4651_v49 = vsel %vm4567_vm13, %v4650_v39, %v4646_v47  ;;  %v1066_v50 = vpop.xlane.xlu0 %1065  ;;  %v1304_v45 = vsel %vm973_vm0, %v315_v34, 0.0 }
  0xe6   : > { %v4660_v53 = vrot.slane %v1069_v48, %v10040_v15  ;;  %v4655_v54 = vrot.slane %v1066_v50, %v10043_v60  ;;  %v318_v48 = vld [vmem:[%s9778_s29 + $0x388] sm:$0xff] }
  0xe8   : > { %v4656_v58 = vsel %vm4574_vm14, %v4655_v54, %v4651_v49  ;;  %1284 = vadd.xlane.f32.xlu1 %v1283_v51  ;;  %1281 = vadd.xlane.f32.xlu0 %v1280_v52  ;;  %v317_v49 = vld [vmem:[%s9778_s29 + $0x380] sm:$0xff]  ;;  %v1313_v54 = vsel %vm973_vm0, %v318_v48, 0.0 }
  0xe9   : > { %v10122_v59 = vsel %vm4581_vm15, %v4660_v53, %v4656_v58  ;;  %v1075_v61 = vpop.xlane.xlu1 %1074  ;;  %v1072_v62 = vpop.xlane.xlu0 %1071  ;;  %v1310_v55 = vsel %vm973_vm0, %v317_v49, 0.0 }
  0xea   : > { %v4669_v2 = vrot.slane %v1075_v61, %v9946_v33  ;;  %v4665_v3 = vrot.slane %v1072_v62, %v9940_v31  ;;  %v320_v61 = vld [vmem:[%s9778_s29 + $0x398] sm:$0xff]  ;;  %v319_v62 = vld [vmem:[%s9778_s29 + $0x390] sm:$0xff] }
  0xeb   : > { %v1319_v4 = vsel %vm973_vm0, %v320_v61, 0.0  ;;  %v1316_v5 = vsel %vm973_vm0, %v319_v62, 0.0 }
  0xec   : > { %v4670_v6 = vsel %vm4483_vm1, %v4669_v2, %v4665_v3  ;;  %1290 = vadd.xlane.f32.xlu1 %v1289_v63  ;;  %1287 = vadd.xlane.f32.xlu0 %v1286_v1 }
  0xed   : > { %v1081_v9 = vpop.xlane.xlu1 %1080  ;;  %v1078_v10 = vpop.xlane.xlu0 %1077 }
  0xee   : > { %v4679_v14 = vrot.slane %v1081_v9, %v9943_v32  ;;  %v4674_v16 = vrot.slane %v1078_v10, %v9950_v35  ;;  %v322_v10 = vld [vmem:[%s9778_s29 + $0x3a8] sm:$0xff] }
  0xef   : > { %v1325_v19 = vsel %vm973_vm0, %v322_v10, 0.0 }
  0xf0   : > { %v4675_v20 = vsel %vm14697_vm2, %v4674_v16, %v4670_v6  ;;  %1296 = vadd.xlane.f32.xlu1 %v1295_v11  ;;  %1293 = vadd.xlane.f32.xlu0 %v1292_v12  ;;  %v321_v11 = vld [vmem:[%s9778_s29 + $0x3a0] sm:$0xff] }
  0xf1   : > { %v1087_v21 = vpop.xlane.xlu1 %1086  ;;  %v4680_v22 = vsel %vm4497_vm3, %v4679_v14, %v4675_v20  ;;  %v1084_v23 = vpop.xlane.xlu0 %1083  ;;  %v1322_v20 = vsel %vm973_vm0, %v321_v11, 0.0 }
  0xf2   : > { %v4689_v26 = vrot.slane %v1087_v21, %v9955_v40  ;;  %v4684_v27 = vrot.slane %v1084_v23, %v9958_v41  ;;  %v324_v23 = vld [vmem:[%s9778_s29 + $0x3b8] sm:$0xff] }
  0xf3   : > { %v1331_v34 = vsel %vm973_vm0, %v324_v23, 0.0 }
  0xf4   : > { %v4685_v36 = vsel %vm4504_vm4, %v4684_v27, %v4680_v22  ;;  %1302 = vadd.xlane.f32.xlu1 %v1301_v24  ;;  %1299 = vadd.xlane.f32.xlu0 %v1298_v25  ;;  %v323_v24 = vld [vmem:[%s9778_s29 + $0x3b0] sm:$0xff] }
  0xf5   : > { %v1093_v37 = vpop.xlane.xlu1 %1092  ;;  %v4690_v38 = vsel %vm4511_vm5, %v4689_v26, %v4685_v36  ;;  %v1090_v39 = vpop.xlane.xlu0 %1089  ;;  %v1328_v36 = vsel %vm973_vm0, %v323_v24, 0.0 }
  0xf6   : > { %v4699_v46 = vrot.slane %v1093_v37, %v9973_v56  ;;  %v4694_v47 = vrot.slane %v1090_v39, %v9983_v0  ;;  %v326_v39 = vld [vmem:[%s9778_s29 + $0x3c8] sm:$0xff] }
  0xf7   : > { %v1337_v49 = vsel %vm973_vm0, %v326_v39, 0.0 }
  0xf8   : > { %v4695_v50 = vsel %vm4518_vm6, %v4694_v47, %v4690_v38  ;;  %1308 = vadd.xlane.f32.xlu1 %v1307_v42  ;;  %1305 = vadd.xlane.f32.xlu0 %v1304_v45  ;;  %v325_v42 = vld [vmem:[%s9778_s29 + $0x3c0] sm:$0xff] }
  0xf9   : > { %v1099_v51 = vpop.xlane.xlu1 %1098  ;;  %v4700_v52 = vsel %vm4525_vm7, %v4699_v46, %v4695_v50  ;;  %v1096_v53 = vpop.xlane.xlu0 %1095  ;;  %v1334_v50 = vsel %vm973_vm0, %v325_v42, 0.0 }
  0xfa   : > { %v4709_v57 = vrot.slane %v1099_v51, %v9990_v7  ;;  %v4704_v58 = vrot.slane %v1096_v53, %v9993_v8  ;;  %v328_v53 = vld [vmem:[%s9778_s29 + $0x3d8] sm:$0xff] }
  0xfb   : > { %v1343_v61 = vsel %vm973_vm0, %v328_v53, 0.0 }
  0xfc   : > { %v4705_v63 = vsel %vm14690_vm8, %v4704_v58, %v4700_v52  ;;  %1314 = vadd.xlane.f32.xlu1 %v1313_v54  ;;  %1311 = vadd.xlane.f32.xlu0 %v1310_v55  ;;  %v327_v54 = vld [vmem:[%s9778_s29 + $0x3d0] sm:$0xff] }
  0xfd   : > { %v1105_v1 = vpop.xlane.xlu1 %1104  ;;  %v4710_v2 = vsel %vm4539_vm9, %v4709_v57, %v4705_v63  ;;  %v1102_v3 = vpop.xlane.xlu0 %1101  ;;  %v1340_v62 = vsel %vm973_vm0, %v327_v54, 0.0 }
  0xfe   : > { %v4719_v6 = vrot.slane %v1105_v1, %v10012_v29  ;;  %v4714_v9 = vrot.slane %v1102_v3, %v10015_v30  ;;  %v329_v3 = vld [vmem:[%s9778_s29 + $0x3e0] sm:$0xff] }
  0xff   : > { %v1346_v11 = vsel %vm973_vm0, %v329_v3, 0.0 }
 0x100   : > { %v4715_v12 = vsel %vm4546_vm10, %v4714_v9, %v4710_v2  ;;  %1320 = vadd.xlane.f32.xlu1 %v1319_v4  ;;  %1317 = vadd.xlane.f32.xlu0 %v1316_v5  ;;  %v330_v2 = vld [vmem:[%s9778_s29 + $0x3e8] sm:$0xff] }
 0x101   : > { %v1111_v14 = vpop.xlane.xlu1 %1110  ;;  %v4720_v16 = vsel %vm14689_vm11, %v4719_v6, %v4715_v12  ;;  %v1108_v17 = vpop.xlane.xlu0 %1107  ;;  %v1349_v10 = vsel %vm973_vm0, %v330_v2, 0.0 }
 0x102   : > { %v4729_v21 = vrot.slane %v1111_v14, %v10022_v43  ;;  %v4724_v22 = vrot.slane %v1108_v17, %v10025_v44  ;;  %v331_v17 = vld [vmem:[%s9778_s29 + $0x3f0] sm:$0xff] }
 0x103   : > { %v1352_v24 = vsel %vm973_vm0, %v331_v17, 0.0 }
 0x104   : > { %v4725_v25 = vsel %vm4560_vm12, %v4724_v22, %v4720_v16  ;;  %1326 = vadd.xlane.f32.xlu1 %v1325_v19  ;;  %1323 = vadd.xlane.f32.xlu0 %v1322_v20  ;;  %v332_v16 = vld [vmem:[%s9778_s29 + $0x3f8] sm:$0xff] }
 0x105   : > { %v1117_v26 = vpop.xlane.xlu1 %1116  ;;  %v4730_v27 = vsel %vm4567_vm13, %v4729_v21, %v4725_v25  ;;  %v1114_v28 = vpop.xlane.xlu0 %1113  ;;  %v1355_v23 = vsel %vm973_vm0, %v332_v16, 0.0 }
 0x106   : > { %v4739_v37 = vrot.slane %v1117_v26, %v10040_v15  ;;  %v4734_v38 = vrot.slane %v1114_v28, %v10043_v60  ;;  %v333_v28 = vld [vmem:[%s9778_s29 + $0x400] sm:$0xff] }
 0x107   : > { %v1358_v42 = vsel %vm973_vm0, %v333_v28, 0.0 }
 0x108   : > { %v4735_v45 = vsel %vm4574_vm14, %v4734_v38, %v4730_v27  ;;  %1332 = vadd.xlane.f32.xlu1 %v1331_v34  ;;  %1329 = vadd.xlane.f32.xlu0 %v1328_v36  ;;  %v334_v27 = vld [vmem:[%s9778_s29 + $0x408] sm:$0xff] }
 0x109   : > { %v10187_v46 = vsel %vm4581_vm15, %v4739_v37, %v4735_v45  ;;  %v1123_v47 = vpop.xlane.xlu1 %1122  ;;  %v1120_v48 = vpop.xlane.xlu0 %1119  ;;  %v1361_v39 = vsel %vm973_vm0, %v334_v27, 0.0 }
 0x10a   : > { %v4748_v51 = vrot.slane %v1123_v47, %v9946_v33  ;;  %v4744_v52 = vrot.slane %v1120_v48, %v9940_v31  ;;  %v336_v48 = vld [vmem:[%s9778_s29 + $0x418] sm:$0xff] }
 0x10b   : > { %v1367_v54 = vsel %vm973_vm0, %v336_v48, 0.0 }
 0x10c   : > { %v4749_v55 = vsel %vm4483_vm1, %v4748_v51, %v4744_v52  ;;  %1338 = vadd.xlane.f32.xlu1 %v1337_v49  ;;  %1335 = vadd.xlane.f32.xlu0 %v1334_v50  ;;  %v335_v49 = vld [vmem:[%s9778_s29 + $0x410] sm:$0xff] }
 0x10d   : > { %v1129_v57 = vpop.xlane.xlu1 %1128  ;;  %v1126_v58 = vpop.xlane.xlu0 %1125 }
 0x10e   : > { %v4758_v63 = vrot.slane %v1129_v57, %v9943_v32  ;;  %v4753_v1 = vrot.slane %v1126_v58, %v9950_v35 }
 0x110   : > { %v4754_v4 = vsel %vm14697_vm2, %v4753_v1, %v4749_v55  ;;  %1344 = vadd.xlane.f32.xlu1 %v1343_v61  ;;  %1341 = vadd.xlane.f32.xlu0 %v1340_v62  ;;  %v1364_v55 = vsel %vm973_vm0, %v335_v49, 0.0  ;;  %v338_v61 = vld [vmem:[%s9778_s29 + $0x428] sm:$0xff]  ;;  %v337_v62 = vld [vmem:[%s9778_s29 + $0x420] sm:$0xff] }
 0x111   : > { %v1135_v5 = vpop.xlane.xlu1 %1134  ;;  %v4759_v6 = vsel %vm4497_vm3, %v4758_v63, %v4754_v4  ;;  %v1132_v9 = vpop.xlane.xlu0 %1131  ;;  %v1373_v4 = vsel %vm973_vm0, %v338_v61, 0.0 }
 0x112   : > { %v4768_v12 = vrot.slane %v1135_v5, %v9955_v40  ;;  %v4763_v14 = vrot.slane %v1132_v9, %v9958_v41  ;;  %v1370_v5 = vsel %vm973_vm0, %v337_v62, 0.0 }
 0x114   : > { %v4764_v19 = vsel %vm4504_vm4, %v4763_v14, %v4759_v6  ;;  %1350 = vadd.xlane.f32.xlu1 %v1349_v10  ;;  %1347 = vadd.xlane.f32.xlu0 %v1346_v11  ;;  %v340_v10 = vld [vmem:[%s9778_s29 + $0x438] sm:$0xff]  ;;  %v339_v11 = vld [vmem:[%s9778_s29 + $0x430] sm:$0xff] }
 0x115   : > { %v1141_v20 = vpop.xlane.xlu1 %1140  ;;  %v4769_v21 = vsel %vm4511_vm5, %v4768_v12, %v4764_v19  ;;  %v1138_v22 = vpop.xlane.xlu0 %1137  ;;  %v1379_v19 = vsel %vm973_vm0, %v340_v10, 0.0 }
 0x116   : > { %v4778_v25 = vrot.slane %v1141_v20, %v9973_v56  ;;  %v4773_v26 = vrot.slane %v1138_v22, %v9983_v0  ;;  %v1376_v20 = vsel %vm973_vm0, %v339_v11, 0.0 }
 0x118   : > { %v4774_v34 = vsel %vm4518_vm6, %v4773_v26, %v4769_v21  ;;  %1356 = vadd.xlane.f32.xlu1 %v1355_v23  ;;  %1353 = vadd.xlane.f32.xlu0 %v1352_v24  ;;  %v342_v23 = vld [vmem:[%s9778_s29 + $0x448] sm:$0xff]  ;;  %v341_v24 = vld [vmem:[%s9778_s29 + $0x440] sm:$0xff] }
 0x119   : > { %v1147_v36 = vpop.xlane.xlu1 %1146  ;;  %v4779_v37 = vsel %vm4525_vm7, %v4778_v25, %v4774_v34  ;;  %v1144_v38 = vpop.xlane.xlu0 %1143  ;;  %v1385_v34 = vsel %vm973_vm0, %v342_v23, 0.0 }
 0x11a   : > { %v4788_v45 = vrot.slane %v1147_v36, %v9990_v7  ;;  %v4783_v47 = vrot.slane %v1144_v38, %v9993_v8  ;;  %v1382_v36 = vsel %vm973_vm0, %v341_v24, 0.0 }
 0x11c   : > { %v4784_v50 = vsel %vm14690_vm8, %v4783_v47, %v4779_v37  ;;  %1362 = vadd.xlane.f32.xlu1 %v1361_v39  ;;  %1359 = vadd.xlane.f32.xlu0 %v1358_v42  ;;  %v344_v42 = vld [vmem:[%s9778_s29 + $0x458] sm:$0xff] }
 0x11d   : > { %v1153_v51 = vpop.xlane.xlu1 %1152  ;;  %v4789_v52 = vsel %vm4539_vm9, %v4788_v45, %v4784_v50  ;;  %v1150_v53 = vpop.xlane.xlu0 %1149  ;;  %v343_v45 = vld [vmem:[%s9778_s29 + $0x450] sm:$0xff]  ;;  %v1391_v50 = vsel %vm973_vm0, %v344_v42, 0.0 }
 0x11e   : > { %v4798_v57 = vrot.slane %v1153_v51, %v10012_v29  ;;  %v4793_v58 = vrot.slane %v1150_v53, %v10015_v30  ;;  %v1388_v51 = vsel %vm973_vm0, %v343_v45, 0.0  ;;  %v346_v53 = vld [vmem:[%s9778_s29 + $0x468] sm:$0xff] }
 0x11f   : > { %v1397_v62 = vsel %vm973_vm0, %v346_v53, 0.0 }
 0x120   : > { %v4794_v63 = vsel %vm4546_vm10, %v4793_v58, %v4789_v52  ;;  %1368 = vadd.xlane.f32.xlu1 %v1367_v54  ;;  %1365 = vadd.xlane.f32.xlu0 %v1364_v55  ;;  %v345_v54 = vld [vmem:[%s9778_s29 + $0x460] sm:$0xff] }
 0x121   : > { %v1159_v1 = vpop.xlane.xlu1 %1158  ;;  %v4799_v2 = vsel %vm14689_vm11, %v4798_v57, %v4794_v63  ;;  %v1156_v3 = vpop.xlane.xlu0 %1155  ;;  %vm14691_vm11 = vcmask 1041409   ;;  %v1394_v63 = vsel %vm973_vm0, %v345_v54, 0.0 }
 0x122   : > { %v4808_v6 = vrot.slane %v1159_v1, %v10022_v43  ;;  %v4803_v9 = vrot.slane %v1156_v3, %v10025_v44  ;;  %v348_v3 = vld [vmem:[%s9778_s29 + $0x478] sm:$0xff] }
 0x123   : > { %v1403_v11 = vsel %vm973_vm0, %v348_v3, 0.0 }
 0x124   : > { %v4804_v12 = vsel %vm4560_vm12, %v4803_v9, %v4799_v2  ;;  %1374 = vadd.xlane.f32.xlu1 %v1373_v4  ;;  %1371 = vadd.xlane.f32.xlu0 %v1370_v5  ;;  %v347_v4 = vld [vmem:[%s9778_s29 + $0x470] sm:$0xff] }
 0x125   : > { %v1165_v14 = vpop.xlane.xlu1 %1164  ;;  %v4809_v16 = vsel %vm4567_vm13, %v4808_v6, %v4804_v12  ;;  %v1162_v17 = vpop.xlane.xlu0 %1161  ;;  %v1400_v12 = vsel %vm973_vm0, %v347_v4, 0.0 }
 0x126   : > { %v4818_v21 = vrot.slane %v1165_v14, %v10040_v15  ;;  %v4813_v22 = vrot.slane %v1162_v17, %v10043_v60  ;;  %v350_v17 = vld [vmem:[%s9778_s29 + $0x488] sm:$0xff] }
 0x127   : > { %v1409_v24 = vsel %vm973_vm0, %v350_v17, 0.0 }
 0x128   : > { %v4814_v25 = vsel %vm4574_vm14, %v4813_v22, %v4809_v16  ;;  %1380 = vadd.xlane.f32.xlu1 %v1379_v19  ;;  %1377 = vadd.xlane.f32.xlu0 %v1376_v20  ;;  %v349_v19 = vld [vmem:[%s9778_s29 + $0x480] sm:$0xff] }
 0x129   : > { %v4819_v26 = vsel %vm4581_vm15, %v4818_v21, %v4814_v25  ;;  %v1171_v27 = vpop.xlane.xlu1 %1170  ;;  %v1168_v28 = vpop.xlane.xlu0 %1167  ;;  %v1406_v25 = vsel %vm973_vm0, %v349_v19, 0.0 }
 0x12a   : > { %v10256_v37 = vsel %vm14691_vm11, %v4819_v26, %v10057_v13  ;;  %v4827_v38 = vrot.slane %v1171_v27, %v9946_v33  ;;  %v4823_v39 = vrot.slane %v1168_v28, %v9940_v31  ;;  %v352_v28 = vld [vmem:[%s9778_s29 + $0x498] sm:$0xff] }
 0x12b   : > { %v1415_v45 = vsel %vm973_vm0, %v352_v28, 0.0 }
 0x12c   : > { %v4828_v47 = vsel %vm4483_vm1, %v4827_v38, %v4823_v39  ;;  %1386 = vadd.xlane.f32.xlu1 %v1385_v34  ;;  %1383 = vadd.xlane.f32.xlu0 %v1382_v36  ;;  %v351_v34 = vld [vmem:[%s9778_s29 + $0x490] sm:$0xff] }
 0x12d   : > { %v1177_v48 = vpop.xlane.xlu1 %1176  ;;  %v1174_v49 = vpop.xlane.xlu0 %1173 }
 0x12e   : > { %v4837_v13 = vrot.slane %v1177_v48, %v9943_v32  ;;  %v4832_v52 = vrot.slane %v1174_v49, %v9950_v35 }
 0x130   : > { %v4833_v55 = vsel %vm14697_vm2, %v4832_v52, %v4828_v47  ;;  %1392 = vadd.xlane.f32.xlu1 %v1391_v50  ;;  %1389 = vadd.xlane.f32.xlu0 %v1388_v51  ;;  %v1412_v47 = vsel %vm973_vm0, %v351_v34, 0.0  ;;  %v354_v50 = vld [vmem:[%s9778_s29 + $0x4a8] sm:$0xff]  ;;  %v353_v51 = vld [vmem:[%s9778_s29 + $0x4a0] sm:$0xff] }
 0x131   : > { %v1183_v57 = vpop.xlane.xlu1 %1182  ;;  %v4838_v58 = vsel %vm4497_vm3, %v4837_v13, %v4833_v55  ;;  %v1180_v61 = vpop.xlane.xlu0 %1179  ;;  %v1421_v55 = vsel %vm973_vm0, %v354_v50, 0.0 }
 0x132   : > { %v4847_v1 = vrot.slane %v1183_v57, %v9955_v40  ;;  %v4842_v2 = vrot.slane %v1180_v61, %v9958_v41  ;;  %v1418_v57 = vsel %vm973_vm0, %v353_v51, 0.0 }
 0x134   : > { %v4843_v5 = vsel %vm4504_vm4, %v4842_v2, %v4838_v58  ;;  %1398 = vadd.xlane.f32.xlu1 %v1397_v62  ;;  %1395 = vadd.xlane.f32.xlu0 %v1394_v63  ;;  %v356_v62 = vld [vmem:[%s9778_s29 + $0x4b8] sm:$0xff]  ;;  %v355_v63 = vld [vmem:[%s9778_s29 + $0x4b0] sm:$0xff] }
 0x135   : > { %v1189_v6 = vpop.xlane.xlu1 %1188  ;;  %v4848_v9 = vsel %vm4511_vm5, %v4847_v1, %v4843_v5  ;;  %v1186_v10 = vpop.xlane.xlu0 %1185  ;;  %v1427_v5 = vsel %vm973_vm0, %v356_v62, 0.0 }
 0x136   : > { %v4857_v14 = vrot.slane %v1189_v6, %v9973_v56  ;;  %v4852_v16 = vrot.slane %v1186_v10, %v9983_v0  ;;  %v1424_v6 = vsel %vm973_vm0, %v355_v63, 0.0 }
 0x138   : > { %v4853_v20 = vsel %vm4518_vm6, %v4852_v16, %v4848_v9  ;;  %1404 = vadd.xlane.f32.xlu1 %v1403_v11  ;;  %1401 = vadd.xlane.f32.xlu0 %v1400_v12  ;;  %v358_v11 = vld [vmem:[%s9778_s29 + $0x4c8] sm:$0xff]  ;;  %v357_v12 = vld [vmem:[%s9778_s29 + $0x4c0] sm:$0xff] }
 0x139   : > { %v1195_v21 = vpop.xlane.xlu1 %1194  ;;  %v4858_v22 = vsel %vm4525_vm7, %v4857_v14, %v4853_v20  ;;  %v1192_v23 = vpop.xlane.xlu0 %1191  ;;  %v1433_v20 = vsel %vm973_vm0, %v358_v11, 0.0 }
 0x13a   : > { %v4867_v26 = vrot.slane %v1195_v21, %v9990_v7  ;;  %v4862_v27 = vrot.slane %v1192_v23, %v9993_v8  ;;  %v1430_v21 = vsel %vm973_vm0, %v357_v12, 0.0 }
 0x13c   : > { %v4863_v36 = vsel %vm14690_vm8, %v4862_v27, %v4858_v22  ;;  %1410 = vadd.xlane.f32.xlu1 %v1409_v24  ;;  %1407 = vadd.xlane.f32.xlu0 %v1406_v25  ;;  %vm14700_vm8 = vcmask 786112   ;;  %v360_v25 = vld [vmem:[%s9778_s29 + $0x4d8] sm:$0xff] }
 0x13d   : > { %v1201_v38 = vpop.xlane.xlu1 %1200  ;;  %v4868_v39 = vsel %vm4539_vm9, %v4867_v26, %v4863_v36  ;;  %v1198_v42 = vpop.xlane.xlu0 %1197  ;;  %v359_v26 = vld [vmem:[%s9778_s29 + $0x4d0] sm:$0xff]  ;;  %v1439_v36 = vsel %vm973_vm0, %v360_v25, 0.0 }
 0x13e   : > { %v4877_v48 = vrot.slane %v1201_v38, %v10012_v29  ;;  %v4872_v49 = vrot.slane %v1198_v42, %v10015_v30  ;;  %v1436_v38 = vsel %vm973_vm0, %v359_v26, 0.0  ;;  %v362_v42 = vld [vmem:[%s9778_s29 + $0x4e8] sm:$0xff] }
 0x13f   : > { %v1445_v51 = vsel %vm973_vm0, %v362_v42, 0.0 }
 0x140   : > { %v4873_v13 = vsel %vm4546_vm10, %v4872_v49, %v4868_v39  ;;  %1416 = vadd.xlane.f32.xlu1 %v1415_v45  ;;  %1413 = vadd.xlane.f32.xlu0 %v1412_v47  ;;  %v361_v45 = vld [vmem:[%s9778_s29 + $0x4e0] sm:$0xff] }
 0x141   : > { %v1207_v52 = vpop.xlane.xlu1 %1206  ;;  %v4878_v53 = vsel %vm14700_vm8, %v4877_v48, %v4873_v13  ;;  %v1204_v54 = vpop.xlane.xlu0 %1203  ;;  %v1442_v13 = vsel %vm973_vm0, %v361_v45, 0.0  ;;  %vm14701_vm8 = vcmask 589312  }
 0x142   : > { %v4887_v58 = vrot.slane %v1207_v52, %v10022_v43  ;;  %v4882_v61 = vrot.slane %v1204_v54, %v10025_v44  ;;  %v364_v54 = vld [vmem:[%s9778_s29 + $0x4f8] sm:$0xff] }
 0x143   : > { %v1451_v63 = vsel %vm973_vm0, %v364_v54, 0.0 }
 0x144   : > { %v4883_v1 = vsel %vm4560_vm12, %v4882_v61, %v4878_v53  ;;  %1422 = vadd.xlane.f32.xlu1 %v1421_v55  ;;  %1419 = vadd.xlane.f32.xlu0 %v1418_v57  ;;  %v363_v55 = vld [vmem:[%s9778_s29 + $0x4f0] sm:$0xff] }
 0x145   : > { %v1213_v2 = vpop.xlane.xlu1 %1212  ;;  %v4888_v3 = vsel %vm4567_vm13, %v4887_v58, %v4883_v1  ;;  %v1210_v4 = vpop.xlane.xlu0 %1209  ;;  %v1448_v1 = vsel %vm973_vm0, %v363_v55, 0.0 }
 0x146   : > { %v4897_v9 = vrot.slane %v1213_v2, %v10040_v15  ;;  %v4892_v10 = vrot.slane %v1210_v4, %v10043_v60  ;;  %v366_v4 = vld [vmem:[%s9778_s29 + $0x508] sm:$0xff] }
 0x147   : > { %v1457_v12 = vsel %vm973_vm0, %v366_v4, 0.0 }
 0x148   : > { %v4893_v14 = vsel %vm4574_vm14, %v4892_v10, %v4888_v3  ;;  %1428 = vadd.xlane.f32.xlu1 %v1427_v5  ;;  %1425 = vadd.xlane.f32.xlu0 %v1424_v6  ;;  %v365_v5 = vld [vmem:[%s9778_s29 + $0x500] sm:$0xff] }
 0x149   : > { %v4898_v16 = vsel %vm4581_vm15, %v4897_v9, %v4893_v14  ;;  %v1219_v17 = vpop.xlane.xlu1 %1218  ;;  %v1216_v19 = vpop.xlane.xlu0 %1215  ;;  %v1454_v14 = vsel %vm973_vm0, %v365_v5, 0.0 }
 0x14a   : > { %v10323_v22 = vsel %vm14691_vm11, %v4898_v16, %v10122_v59  ;;  %v4906_v23 = vrot.slane %v1219_v17, %v9946_v33  ;;  %v4902_v24 = vrot.slane %v1216_v19, %v9940_v31  ;;  %v368_v19 = vld [vmem:[%s9778_s29 + $0x518] sm:$0xff] }
 0x14b   : > { %v1463_v26 = vsel %vm973_vm0, %v368_v19, 0.0 }
 0x14c   : > { %v4907_v27 = vsel %vm4483_vm1, %v4906_v23, %v4902_v24  ;;  %1434 = vadd.xlane.f32.xlu1 %v1433_v20  ;;  %1431 = vadd.xlane.f32.xlu0 %v1430_v21  ;;  %v367_v20 = vld [vmem:[%s9778_s29 + $0x510] sm:$0xff] }
 0x14d   : > { %v1225_v28 = vpop.xlane.xlu1 %1224  ;;  %v1222_v34 = vpop.xlane.xlu0 %1221 }
 0x14e   : > { %v4916_v59 = vrot.slane %v1225_v28, %v9943_v32  ;;  %v4911_v39 = vrot.slane %v1222_v34, %v9950_v35 }
 0x150   : > { %v4912_v47 = vsel %vm14697_vm2, %v4911_v39, %v4907_v27  ;;  %1440 = vadd.xlane.f32.xlu1 %v1439_v36  ;;  %1437 = vadd.xlane.f32.xlu0 %v1436_v38  ;;  %v1460_v27 = vsel %vm973_vm0, %v367_v20, 0.0  ;;  %v370_v36 = vld [vmem:[%s9778_s29 + $0x528] sm:$0xff]  ;;  %v369_v38 = vld [vmem:[%s9778_s29 + $0x520] sm:$0xff] }
 0x151   : > { %v1231_v48 = vpop.xlane.xlu1 %1230  ;;  %v4917_v49 = vsel %vm4497_vm3, %v4916_v59, %v4912_v47  ;;  %v1228_v50 = vpop.xlane.xlu0 %1227  ;;  %v1469_v47 = vsel %vm973_vm0, %v370_v36, 0.0 }
 0x152   : > { %v4926_v52 = vrot.slane %v1231_v48, %v9955_v40  ;;  %v4921_v53 = vrot.slane %v1228_v50, %v9958_v41  ;;  %v1466_v48 = vsel %vm973_vm0, %v369_v38, 0.0 }
 0x154   : > { %v4922_v57 = vsel %vm4504_vm4, %v4921_v53, %v4917_v49  ;;  %1446 = vadd.xlane.f32.xlu1 %v1445_v51  ;;  %1443 = vadd.xlane.f32.xlu0 %v1442_v13  ;;  %v372_v51 = vld [vmem:[%s9778_s29 + $0x538] sm:$0xff]  ;;  %v371_v13 = vld [vmem:[%s9778_s29 + $0x530] sm:$0xff] }
 0x155   : > { %v1237_v58 = vpop.xlane.xlu1 %1236  ;;  %v4927_v61 = vsel %vm4511_vm5, %v4926_v52, %v4922_v57  ;;  %v1234_v62 = vpop.xlane.xlu0 %1233  ;;  %v1475_v57 = vsel %vm973_vm0, %v372_v51, 0.0 }
 0x156   : > { %v4936_v2 = vrot.slane %v1237_v58, %v9973_v56  ;;  %v4931_v3 = vrot.slane %v1234_v62, %v9983_v0  ;;  %v1472_v58 = vsel %vm973_vm0, %v371_v13, 0.0 }
 0x158   : > { %v4932_v6 = vsel %vm4518_vm6, %v4931_v3, %v4927_v61  ;;  %1452 = vadd.xlane.f32.xlu1 %v1451_v63  ;;  %1449 = vadd.xlane.f32.xlu0 %v1448_v1  ;;  %v374_v63 = vld [vmem:[%s9778_s29 + $0x548] sm:$0xff]  ;;  %v373_v1 = vld [vmem:[%s9778_s29 + $0x540] sm:$0xff] }
 0x159   : > { %v1243_v9 = vpop.xlane.xlu1 %1242  ;;  %v4937_v10 = vsel %vm4525_vm7, %v4936_v2, %v4932_v6  ;;  %v1240_v11 = vpop.xlane.xlu0 %1239  ;;  %v1481_v6 = vsel %vm973_vm0, %v374_v63, 0.0 }
 0x15a   : > { %v4946_v16 = vrot.slane %v1243_v9, %v9990_v7  ;;  %v4941_v17 = vrot.slane %v1240_v11, %v9993_v8  ;;  %v1478_v9 = vsel %vm973_vm0, %v373_v1, 0.0 }
 0x15c   : > { %v4942_v21 = vsel %vm14701_vm8, %v4941_v17, %v4937_v10  ;;  %1458 = vadd.xlane.f32.xlu1 %v1457_v12  ;;  %1455 = vadd.xlane.f32.xlu0 %v1454_v14  ;;  %vm14702_vm8 = vcmask 786112   ;;  %v376_v14 = vld [vmem:[%s9778_s29 + $0x558] sm:$0xff] }
 0x15d   : > { %v1249_v23 = vpop.xlane.xlu1 %1248  ;;  %v4947_v24 = vsel %vm4539_vm9, %v4946_v16, %v4942_v21  ;;  %v1246_v25 = vpop.xlane.xlu0 %1245  ;;  %v375_v16 = vld [vmem:[%s9778_s29 + $0x550] sm:$0xff]  ;;  %v1487_v21 = vsel %vm973_vm0, %v376_v14, 0.0 }
 0x15e   : > { %v4956_v28 = vrot.slane %v1249_v23, %v10012_v29  ;;  %v4951_v34 = vrot.slane %v1246_v25, %v10015_v30  ;;  %v1484_v23 = vsel %vm973_vm0, %v375_v16, 0.0  ;;  %v378_v25 = vld [vmem:[%s9778_s29 + $0x568] sm:$0xff] }
 0x15f   : > { %v1493_v38 = vsel %vm973_vm0, %v378_v25, 0.0 }
 0x160   : > { %v4952_v59 = vsel %vm4546_vm10, %v4951_v34, %v4947_v24  ;;  %1464 = vadd.xlane.f32.xlu1 %v1463_v26  ;;  %1461 = vadd.xlane.f32.xlu0 %v1460_v27  ;;  %v377_v26 = vld [vmem:[%s9778_s29 + $0x560] sm:$0xff] }
 0x161   : > { %v1255_v39 = vpop.xlane.xlu1 %1254  ;;  %v4957_v42 = vsel %vm14702_vm8, %v4956_v28, %v4952_v59  ;;  %v1252_v45 = vpop.xlane.xlu0 %1251  ;;  %v1490_v59 = vsel %vm973_vm0, %v377_v26, 0.0  ;;  %vm14703_vm8 = vcmask 589312  }
 0x162   : > { %v4966_v49 = vrot.slane %v1255_v39, %v10022_v43  ;;  %v4961_v50 = vrot.slane %v1252_v45, %v10025_v44  ;;  %v380_v45 = vld [vmem:[%s9778_s29 + $0x578] sm:$0xff] }
 0x163   : > { %v1499_v13 = vsel %vm973_vm0, %v380_v45, 0.0 }
 0x164   : > { %v4962_v52 = vsel %vm4560_vm12, %v4961_v50, %v4957_v42  ;;  %1470 = vadd.xlane.f32.xlu1 %v1469_v47  ;;  %1467 = vadd.xlane.f32.xlu0 %v1466_v48  ;;  %v379_v47 = vld [vmem:[%s9778_s29 + $0x570] sm:$0xff] }
 0x165   : > { %v1261_v53 = vpop.xlane.xlu1 %1260  ;;  %v4967_v54 = vsel %vm4567_vm13, %v4966_v49, %v4962_v52  ;;  %v1258_v55 = vpop.xlane.xlu0 %1257  ;;  %v1496_v52 = vsel %vm973_vm0, %v379_v47, 0.0 }
 0x166   : > { %v4976_v61 = vrot.slane %v1261_v53, %v10040_v15  ;;  %v4971_v62 = vrot.slane %v1258_v55, %v10043_v60  ;;  %v382_v55 = vld [vmem:[%s9778_s29 + $0x588] sm:$0xff] }
 0x167   : > { %v1505_v1 = vsel %vm973_vm0, %v382_v55, 0.0 }
 0x168   : > { %v4972_v2 = vsel %vm4574_vm14, %v4971_v62, %v4967_v54  ;;  %1476 = vadd.xlane.f32.xlu1 %v1475_v57  ;;  %1473 = vadd.xlane.f32.xlu0 %v1472_v58  ;;  %v381_v57 = vld [vmem:[%s9778_s29 + $0x580] sm:$0xff] }
 0x169   : > { %v4977_v3 = vsel %vm4581_vm15, %v4976_v61, %v4972_v2  ;;  %v1267_v4 = vpop.xlane.xlu1 %1266  ;;  %v1264_v5 = vpop.xlane.xlu0 %1263  ;;  %v1502_v2 = vsel %vm973_vm0, %v381_v57, 0.0 }
 0x16a   : > { %v10390_v10 = vsel %vm14691_vm11, %v4977_v3, %v10187_v46  ;;  %v4985_v11 = vrot.slane %v1267_v4, %v9946_v33  ;;  %v4981_v12 = vrot.slane %v1264_v5, %v9940_v31  ;;  %v384_v5 = vld [vmem:[%s9778_s29 + $0x598] sm:$0xff]  ;;  %vm14705_vm11 = vcmask 589312  }
 0x16b   : > { %v1511_v16 = vsel %vm973_vm0, %v384_v5, 0.0 }
 0x16c   : > { %v4986_v17 = vsel %vm4483_vm1, %v4985_v11, %v4981_v12  ;;  %1482 = vadd.xlane.f32.xlu1 %v1481_v6  ;;  %1479 = vadd.xlane.f32.xlu0 %v1478_v9  ;;  %v383_v6 = vld [vmem:[%s9778_s29 + $0x590] sm:$0xff] }
 0x16d   : > { %v1273_v19 = vpop.xlane.xlu1 %1272  ;;  %v1270_v20 = vpop.xlane.xlu0 %1269 }
 0x16e   : > { %v4995_v46 = vrot.slane %v1273_v19, %v9943_v32  ;;  %v4990_v24 = vrot.slane %v1270_v20, %v9950_v35 }
 0x170   : > { %v4991_v27 = vsel %vm14697_vm2, %v4990_v24, %v4986_v17  ;;  %1488 = vadd.xlane.f32.xlu1 %v1487_v21  ;;  %1485 = vadd.xlane.f32.xlu0 %v1484_v23  ;;  %v1508_v17 = vsel %vm973_vm0, %v383_v6, 0.0  ;;  %v386_v21 = vld [vmem:[%s9778_s29 + $0x5a8] sm:$0xff]  ;;  %v385_v23 = vld [vmem:[%s9778_s29 + $0x5a0] sm:$0xff] }
 0x171   : > { %v1279_v28 = vpop.xlane.xlu1 %1278  ;;  %v4996_v34 = vsel %vm4497_vm3, %v4995_v46, %v4991_v27  ;;  %v1276_v36 = vpop.xlane.xlu0 %1275  ;;  %v1517_v27 = vsel %vm973_vm0, %v386_v21, 0.0 }
 0x172   : > { %v5005_v39 = vrot.slane %v1279_v28, %v9955_v40  ;;  %v5000_v42 = vrot.slane %v1276_v36, %v9958_v41  ;;  %v1514_v28 = vsel %vm973_vm0, %v385_v23, 0.0 }
 0x174   : > { %v5001_v48 = vsel %vm4504_vm4, %v5000_v42, %v4996_v34  ;;  %1494 = vadd.xlane.f32.xlu1 %v1493_v38  ;;  %1491 = vadd.xlane.f32.xlu0 %v1490_v59  ;;  %v388_v38 = vld [vmem:[%s9778_s29 + $0x5b8] sm:$0xff]  ;;  %v387_v59 = vld [vmem:[%s9778_s29 + $0x5b0] sm:$0xff] }
 0x175   : > { %v1285_v49 = vpop.xlane.xlu1 %1284  ;;  %v5006_v50 = vsel %vm4511_vm5, %v5005_v39, %v5001_v48  ;;  %v1282_v51 = vpop.xlane.xlu0 %1281  ;;  %v1523_v48 = vsel %vm973_vm0, %v388_v38, 0.0 }
 0x176   : > { %v5015_v53 = vrot.slane %v1285_v49, %v9973_v56  ;;  %v5010_v54 = vrot.slane %v1282_v51, %v9983_v0  ;;  %v1520_v49 = vsel %vm973_vm0, %v387_v59, 0.0 }
 0x178   : > { %v5011_v58 = vsel %vm4518_vm6, %v5010_v54, %v5006_v50  ;;  %1500 = vadd.xlane.f32.xlu1 %v1499_v13  ;;  %1497 = vadd.xlane.f32.xlu0 %v1496_v52  ;;  %v390_v13 = vld [vmem:[%s9778_s29 + $0x5c8] sm:$0xff]  ;;  %v389_v52 = vld [vmem:[%s9778_s29 + $0x5c0] sm:$0xff] }
 0x179   : > { %v1291_v61 = vpop.xlane.xlu1 %1290  ;;  %v5016_v62 = vsel %vm4525_vm7, %v5015_v53, %v5011_v58  ;;  %v1288_v63 = vpop.xlane.xlu0 %1287  ;;  %v1529_v58 = vsel %vm973_vm0, %v390_v13, 0.0 }
 0x17a   : > { %v5025_v3 = vrot.slane %v1291_v61, %v9990_v7  ;;  %v5020_v4 = vrot.slane %v1288_v63, %v9993_v8  ;;  %v1526_v61 = vsel %vm973_vm0, %v389_v52, 0.0 }
 0x17c   : > { %v5021_v9 = vsel %vm14703_vm8, %v5020_v4, %v5016_v62  ;;  %1506 = vadd.xlane.f32.xlu1 %v1505_v1  ;;  %1503 = vadd.xlane.f32.xlu0 %v1502_v2  ;;  %vm14704_vm8 = vcmask 786112   ;;  %v392_v2 = vld [vmem:[%s9778_s29 + $0x5d8] sm:$0xff] }
 0x17d   : > { %v1297_v11 = vpop.xlane.xlu1 %1296  ;;  %v5026_v12 = vsel %vm4539_vm9, %v5025_v3, %v5021_v9  ;;  %v1294_v14 = vpop.xlane.xlu0 %1293  ;;  %v391_v3 = vld [vmem:[%s9778_s29 + $0x5d0] sm:$0xff]  ;;  %v1535_v9 = vsel %vm973_vm0, %v392_v2, 0.0 }
 0x17e   : > { %v5035_v19 = vrot.slane %v1297_v11, %v10012_v29  ;;  %v5030_v20 = vrot.slane %v1294_v14, %v10015_v30  ;;  %v1532_v11 = vsel %vm973_vm0, %v391_v3, 0.0  ;;  %v394_v14 = vld [vmem:[%s9778_s29 + $0x5e8] sm:$0xff] }
 0x17f   : > { %v1541_v23 = vsel %vm973_vm0, %v394_v14, 0.0 }
 0x180   : > { %v5031_v46 = vsel %vm4546_vm10, %v5030_v20, %v5026_v12  ;;  %1512 = vadd.xlane.f32.xlu1 %v1511_v16  ;;  %1509 = vadd.xlane.f32.xlu0 %v1508_v17  ;;  %v393_v16 = vld [vmem:[%s9778_s29 + $0x5e0] sm:$0xff] }
 0x181   : > { %v1303_v24 = vpop.xlane.xlu1 %1302  ;;  %v5036_v25 = vsel %vm14704_vm8, %v5035_v19, %v5031_v46  ;;  %v1300_v26 = vpop.xlane.xlu0 %1299  ;;  %vm14692_vm8 = vcmask 1042434   ;;  %v1538_v46 = vsel %vm973_vm0, %v393_v16, 0.0 }
 0x182   : > { %v5045_v34 = vrot.slane %v1303_v24, %v10022_v43  ;;  %v5040_v36 = vrot.slane %v1300_v26, %v10025_v44  ;;  %v396_v26 = vld [vmem:[%s9778_s29 + $0x5f8] sm:$0xff] }
 0x183   : > { %v1547_v59 = vsel %vm973_vm0, %v396_v26, 0.0 }
 0x184   : > { %v5041_v39 = vsel %vm4560_vm12, %v5040_v36, %v5036_v25  ;;  %1518 = vadd.xlane.f32.xlu1 %v1517_v27  ;;  %1515 = vadd.xlane.f32.xlu0 %v1514_v28  ;;  %v395_v27 = vld [vmem:[%s9778_s29 + $0x5f0] sm:$0xff] }
 0x185   : > { %v1309_v42 = vpop.xlane.xlu1 %1308  ;;  %v5046_v45 = vsel %vm4567_vm13, %v5045_v34, %v5041_v39  ;;  %v1306_v47 = vpop.xlane.xlu0 %1305  ;;  %v1544_v39 = vsel %vm973_vm0, %v395_v27, 0.0 }
 0x186   : > { %v5055_v50 = vrot.slane %v1309_v42, %v10040_v15  ;;  %v5050_v51 = vrot.slane %v1306_v47, %v10043_v60  ;;  %v398_v47 = vld [vmem:[%s9778_s29 + $0x608] sm:$0xff] }
 0x187   : > { %v1553_v52 = vsel %vm973_vm0, %v398_v47, 0.0 }
 0x188   : > { %v5051_v53 = vsel %vm4574_vm14, %v5050_v51, %v5046_v45  ;;  %1524 = vadd.xlane.f32.xlu1 %v1523_v48  ;;  %1521 = vadd.xlane.f32.xlu0 %v1520_v49  ;;  %v397_v48 = vld [vmem:[%s9778_s29 + $0x600] sm:$0xff] }
 0x189   : > { %v5056_v54 = vsel %vm4581_vm15, %v5055_v50, %v5051_v53  ;;  %v1315_v55 = vpop.xlane.xlu1 %1314  ;;  %v1312_v57 = vpop.xlane.xlu0 %1311  ;;  %v1550_v53 = vsel %vm973_vm0, %v397_v48, 0.0 }
 0x18a   : > { %v10457_v62 = vsel %vm14692_vm8, %v5056_v54, %v10256_v37  ;;  %v5064_v63 = vrot.slane %v1315_v55, %v9946_v33  ;;  %v5060_v1 = vrot.slane %v1312_v57, %v9940_v31  ;;  %v400_v57 = vld [vmem:[%s9778_s29 + $0x618] sm:$0xff] }
 0x18b   : > { %v1559_v3 = vsel %vm973_vm0, %v400_v57, 0.0 }
 0x18c   : > { %v5065_v4 = vsel %vm4483_vm1, %v5064_v63, %v5060_v1  ;;  %1530 = vadd.xlane.f32.xlu1 %v1529_v58  ;;  %1527 = vadd.xlane.f32.xlu0 %v1526_v61  ;;  %v399_v58 = vld [vmem:[%s9778_s29 + $0x610] sm:$0xff] }
 0x18d   : > { %v1321_v5 = vpop.xlane.xlu1 %1320  ;;  %v1318_v6 = vpop.xlane.xlu0 %1317 }
 0x18e   : > { %v5074_v37 = vrot.slane %v1321_v5, %v9943_v32  ;;  %v5069_v12 = vrot.slane %v1318_v6, %v9950_v35 }
 0x190   : > { %v5070_v17 = vsel %vm14697_vm2, %v5069_v12, %v5065_v4  ;;  %1536 = vadd.xlane.f32.xlu1 %v1535_v9  ;;  %1533 = vadd.xlane.f32.xlu0 %v1532_v11  ;;  %v1556_v4 = vsel %vm973_vm0, %v399_v58, 0.0  ;;  %v402_v9 = vld [vmem:[%s9778_s29 + $0x628] sm:$0xff]  ;;  %v401_v11 = vld [vmem:[%s9778_s29 + $0x620] sm:$0xff] }
 0x191   : > { %v1327_v19 = vpop.xlane.xlu1 %1326  ;;  %v5075_v20 = vsel %vm4497_vm3, %v5074_v37, %v5070_v17  ;;  %v1324_v21 = vpop.xlane.xlu0 %1323  ;;  %v1565_v17 = vsel %vm973_vm0, %v402_v9, 0.0 }
 0x192   : > { %v5084_v24 = vrot.slane %v1327_v19, %v9955_v40  ;;  %v5079_v25 = vrot.slane %v1324_v21, %v9958_v41  ;;  %v1562_v19 = vsel %vm973_vm0, %v401_v11, 0.0 }
 0x194   : > { %v5080_v28 = vsel %vm4504_vm4, %v5079_v25, %v5075_v20  ;;  %1542 = vadd.xlane.f32.xlu1 %v1541_v23  ;;  %1539 = vadd.xlane.f32.xlu0 %v1538_v46  ;;  %v404_v23 = vld [vmem:[%s9778_s29 + $0x638] sm:$0xff]  ;;  %v403_v46 = vld [vmem:[%s9778_s29 + $0x630] sm:$0xff] }
 0x195   : > { %v1333_v34 = vpop.xlane.xlu1 %1332  ;;  %v5085_v36 = vsel %vm4511_vm5, %v5084_v24, %v5080_v28  ;;  %v1330_v38 = vpop.xlane.xlu0 %1329  ;;  %v1571_v28 = vsel %vm973_vm0, %v404_v23, 0.0 }
 0x196   : > { %v5094_v42 = vrot.slane %v1333_v34, %v9973_v56  ;;  %v5089_v45 = vrot.slane %v1330_v38, %v9983_v0  ;;  %v1568_v34 = vsel %vm973_vm0, %v403_v46, 0.0 }
 0x198   : > { %v5090_v49 = vsel %vm4518_vm6, %v5089_v45, %v5085_v36  ;;  %1548 = vadd.xlane.f32.xlu1 %v1547_v59  ;;  %1545 = vadd.xlane.f32.xlu0 %v1544_v39  ;;  %v406_v59 = vld [vmem:[%s9778_s29 + $0x648] sm:$0xff]  ;;  %v405_v39 = vld [vmem:[%s9778_s29 + $0x640] sm:$0xff] }
 0x199   : > { %v1339_v50 = vpop.xlane.xlu1 %1338  ;;  %v5095_v51 = vsel %vm4525_vm7, %v5094_v42, %v5090_v49  ;;  %v1336_v13 = vpop.xlane.xlu0 %1335  ;;  %v1577_v49 = vsel %vm973_vm0, %v406_v59, 0.0 }
 0x19a   : > { %v5104_v54 = vrot.slane %v1339_v50, %v9990_v7  ;;  %v5099_v55 = vrot.slane %v1336_v13, %v9993_v8  ;;  %v1574_v50 = vsel %vm973_vm0, %v405_v39, 0.0 }
 0x19c   : > { %v5100_v61 = vsel %vm14705_vm11, %v5099_v55, %v5095_v51  ;;  %1554 = vadd.xlane.f32.xlu1 %v1553_v52  ;;  %1551 = vadd.xlane.f32.xlu0 %v1550_v53  ;;  %vm14706_vm11 = vcmask 786112   ;;  %v408_v53 = vld [vmem:[%s9778_s29 + $0x658] sm:$0xff] }
 0x19d   : > { %v1345_v63 = vpop.xlane.xlu1 %1344  ;;  %v5105_v1 = vsel %vm4539_vm9, %v5104_v54, %v5100_v61  ;;  %v1342_v2 = vpop.xlane.xlu0 %1341  ;;  %v407_v54 = vld [vmem:[%s9778_s29 + $0x650] sm:$0xff]  ;;  %v1583_v61 = vsel %vm973_vm0, %v408_v53, 0.0 }
 0x19e   : > { %v5114_v5 = vrot.slane %v1345_v63, %v10012_v29  ;;  %v5109_v6 = vrot.slane %v1342_v2, %v10015_v30  ;;  %v1580_v63 = vsel %vm973_vm0, %v407_v54, 0.0  ;;  %v410_v2 = vld [vmem:[%s9778_s29 + $0x668] sm:$0xff] }
 0x19f   : > { %v1589_v11 = vsel %vm973_vm0, %v410_v2, 0.0 }
 0x1a0   : > { %v5110_v37 = vsel %vm4546_vm10, %v5109_v6, %v5105_v1  ;;  %1560 = vadd.xlane.f32.xlu1 %v1559_v3  ;;  %1557 = vadd.xlane.f32.xlu0 %v1556_v4  ;;  %v409_v3 = vld [vmem:[%s9778_s29 + $0x660] sm:$0xff] }
 0x1a1   : > { %v1351_v12 = vpop.xlane.xlu1 %1350  ;;  %v5115_v14 = vsel %vm14706_vm11, %v5114_v5, %v5110_v37  ;;  %v1348_v16 = vpop.xlane.xlu0 %1347  ;;  %v1586_v37 = vsel %vm973_vm0, %v409_v3, 0.0  ;;  %vm14707_vm11 = vcmask 589312  }
 0x1a2   : > { %v5124_v20 = vrot.slane %v1351_v12, %v10022_v43  ;;  %v5119_v21 = vrot.slane %v1348_v16, %v10025_v44  ;;  %v412_v16 = vld [vmem:[%s9778_s29 + $0x678] sm:$0xff] }
 0x1a3   : > { %v1595_v46 = vsel %vm973_vm0, %v412_v16, 0.0 }
 0x1a4   : > { %v5120_v24 = vsel %vm4560_vm12, %v5119_v21, %v5115_v14  ;;  %1566 = vadd.xlane.f32.xlu1 %v1565_v17  ;;  %1563 = vadd.xlane.f32.xlu0 %v1562_v19  ;;  %v411_v17 = vld [vmem:[%s9778_s29 + $0x670] sm:$0xff] }
 0x1a5   : > { %v1357_v25 = vpop.xlane.xlu1 %1356  ;;  %v5125_v26 = vsel %vm4567_vm13, %v5124_v20, %v5120_v24  ;;  %v1354_v27 = vpop.xlane.xlu0 %1353  ;;  %v1592_v24 = vsel %vm973_vm0, %v411_v17, 0.0 }
 0x1a6   : > { %v5134_v36 = vrot.slane %v1357_v25, %v10040_v15  ;;  %v5129_v38 = vrot.slane %v1354_v27, %v10043_v60  ;;  %v414_v27 = vld [vmem:[%s9778_s29 + $0x688] sm:$0xff] }
 0x1a7   : > { %v1601_v39 = vsel %vm973_vm0, %v414_v27, 0.0 }
 0x1a8   : > { %v5130_v42 = vsel %vm4574_vm14, %v5129_v38, %v5125_v26  ;;  %1572 = vadd.xlane.f32.xlu1 %v1571_v28  ;;  %1569 = vadd.xlane.f32.xlu0 %v1568_v34  ;;  %v413_v28 = vld [vmem:[%s9778_s29 + $0x680] sm:$0xff] }
 0x1a9   : > { %v5135_v45 = vsel %vm4581_vm15, %v5134_v36, %v5130_v42  ;;  %v1363_v47 = vpop.xlane.xlu1 %1362  ;;  %v1360_v48 = vpop.xlane.xlu0 %1359  ;;  %v1598_v42 = vsel %vm973_vm0, %v413_v28, 0.0 }
 0x1aa   : > { %v10524_v51 = vsel %vm14692_vm8, %v5135_v45, %v10323_v22  ;;  %v5143_v13 = vrot.slane %v1363_v47, %v9946_v33  ;;  %v5139_v52 = vrot.slane %v1360_v48, %v9940_v31  ;;  %v416_v48 = vld [vmem:[%s9778_s29 + $0x698] sm:$0xff] }
 0x1ab   : > { %v1607_v54 = vsel %vm973_vm0, %v416_v48, 0.0 }
 0x1ac   : > { %v5144_v55 = vsel %vm4483_vm1, %v5143_v13, %v5139_v52  ;;  %1578 = vadd.xlane.f32.xlu1 %v1577_v49  ;;  %1575 = vadd.xlane.f32.xlu0 %v1574_v50  ;;  %v415_v49 = vld [vmem:[%s9778_s29 + $0x690] sm:$0xff] }
 0x1ad   : > { %v1369_v57 = vpop.xlane.xlu1 %1368  ;;  %v1366_v58 = vpop.xlane.xlu0 %1365 }
 0x1ae   : > { %v5153_v22 = vrot.slane %v1369_v57, %v9943_v32  ;;  %v5148_v1 = vrot.slane %v1366_v58, %v9950_v35 }
 0x1b0   : > { %v5149_v4 = vsel %vm14697_vm2, %v5148_v1, %v5144_v55  ;;  %1584 = vadd.xlane.f32.xlu1 %v1583_v61  ;;  %1581 = vadd.xlane.f32.xlu0 %v1580_v63  ;;  %v1604_v55 = vsel %vm973_vm0, %v415_v49, 0.0  ;;  %v418_v61 = vld [vmem:[%s9778_s29 + $0x6a8] sm:$0xff]  ;;  %v417_v63 = vld [vmem:[%s9778_s29 + $0x6a0] sm:$0xff] }
 0x1b1   : > { %v1375_v5 = vpop.xlane.xlu1 %1374  ;;  %v5154_v6 = vsel %vm4497_vm3, %v5153_v22, %v5149_v4  ;;  %v1372_v9 = vpop.xlane.xlu0 %1371  ;;  %v1613_v4 = vsel %vm973_vm0, %v418_v61, 0.0 }
 0x1b2   : > { %v5163_v12 = vrot.slane %v1375_v5, %v9955_v40  ;;  %v5158_v14 = vrot.slane %v1372_v9, %v9958_v41  ;;  %v1610_v5 = vsel %vm973_vm0, %v417_v63, 0.0 }
 0x1b4   : > { %v5159_v19 = vsel %vm4504_vm4, %v5158_v14, %v5154_v6  ;;  %1590 = vadd.xlane.f32.xlu1 %v1589_v11  ;;  %1587 = vadd.xlane.f32.xlu0 %v1586_v37  ;;  %v420_v11 = vld [vmem:[%s9778_s29 + $0x6b8] sm:$0xff]  ;;  %v419_v37 = vld [vmem:[%s9778_s29 + $0x6b0] sm:$0xff] }
 0x1b5   : > { %v1381_v20 = vpop.xlane.xlu1 %1380  ;;  %v5164_v21 = vsel %vm4511_vm5, %v5163_v12, %v5159_v19  ;;  %v1378_v23 = vpop.xlane.xlu0 %1377  ;;  %v1619_v19 = vsel %vm973_vm0, %v420_v11, 0.0 }
 0x1b6   : > { %v5173_v25 = vrot.slane %v1381_v20, %v9973_v56  ;;  %v5168_v26 = vrot.slane %v1378_v23, %v9983_v0  ;;  %v1616_v20 = vsel %vm973_vm0, %v419_v37, 0.0 }
 0x1b8   : > { %v5169_v34 = vsel %vm4518_vm6, %v5168_v26, %v5164_v21  ;;  %1596 = vadd.xlane.f32.xlu1 %v1595_v46  ;;  %1593 = vadd.xlane.f32.xlu0 %v1592_v24  ;;  %v422_v46 = vld [vmem:[%s9778_s29 + $0x6c8] sm:$0xff]  ;;  %v421_v24 = vld [vmem:[%s9778_s29 + $0x6c0] sm:$0xff] }
 0x1b9   : > { %v1387_v36 = vpop.xlane.xlu1 %1386  ;;  %v5174_v38 = vsel %vm4525_vm7, %v5173_v25, %v5169_v34  ;;  %v1384_v59 = vpop.xlane.xlu0 %1383  ;;  %v1625_v34 = vsel %vm973_vm0, %v422_v46, 0.0 }
 0x1ba   : > { %v5183_v45 = vrot.slane %v1387_v36, %v9990_v7  ;;  %v5178_v47 = vrot.slane %v1384_v59, %v9993_v8  ;;  %v1622_v36 = vsel %vm973_vm0, %v421_v24, 0.0 }
 0x1bc   : > { %v5179_v50 = vsel %vm14707_vm11, %v5178_v47, %v5174_v38  ;;  %1602 = vadd.xlane.f32.xlu1 %v1601_v39  ;;  %1599 = vadd.xlane.f32.xlu0 %v1598_v42  ;;  %vm14708_vm11 = vcmask 786112   ;;  %v424_v42 = vld [vmem:[%s9778_s29 + $0x6d8] sm:$0xff] }
 0x1bd   : > { %v1393_v13 = vpop.xlane.xlu1 %1392  ;;  %v5184_v52 = vsel %vm4539_vm9, %v5183_v45, %v5179_v50  ;;  %v1390_v53 = vpop.xlane.xlu0 %1389  ;;  %v423_v45 = vld [vmem:[%s9778_s29 + $0x6d0] sm:$0xff]  ;;  %v1631_v50 = vsel %vm973_vm0, %v424_v42, 0.0 }
 0x1be   : > { %v5193_v57 = vrot.slane %v1393_v13, %v10012_v29  ;;  %v5188_v58 = vrot.slane %v1390_v53, %v10015_v30  ;;  %v1628_v13 = vsel %vm973_vm0, %v423_v45, 0.0  ;;  %v426_v53 = vld [vmem:[%s9778_s29 + $0x6e8] sm:$0xff] }
 0x1bf   : > { %v1637_v63 = vsel %vm973_vm0, %v426_v53, 0.0 }
 0x1c0   : > { %v5189_v22 = vsel %vm4546_vm10, %v5188_v58, %v5184_v52  ;;  %1608 = vadd.xlane.f32.xlu1 %v1607_v54  ;;  %1605 = vadd.xlane.f32.xlu0 %v1604_v55  ;;  %v425_v54 = vld [vmem:[%s9778_s29 + $0x6e0] sm:$0xff] }
 0x1c1   : > { %v1399_v1 = vpop.xlane.xlu1 %1398  ;;  %v5194_v2 = vsel %vm14708_vm11, %v5193_v57, %v5189_v22  ;;  %v1396_v3 = vpop.xlane.xlu0 %1395  ;;  %v1634_v22 = vsel %vm973_vm0, %v425_v54, 0.0  ;;  %vm14709_vm11 = vcmask 589312  }
 0x1c2   : > { %v5203_v6 = vrot.slane %v1399_v1, %v10022_v43  ;;  %v5198_v9 = vrot.slane %v1396_v3, %v10025_v44  ;;  %v428_v3 = vld [vmem:[%s9778_s29 + $0x6f8] sm:$0xff] }
 0x1c3   : > { %v1643_v37 = vsel %vm973_vm0, %v428_v3, 0.0 }
 0x1c4   : > { %v5199_v12 = vsel %vm4560_vm12, %v5198_v9, %v5194_v2  ;;  %1614 = vadd.xlane.f32.xlu1 %v1613_v4  ;;  %1611 = vadd.xlane.f32.xlu0 %v1610_v5  ;;  %v427_v4 = vld [vmem:[%s9778_s29 + $0x6f0] sm:$0xff] }
 0x1c5   : > { %v1405_v14 = vpop.xlane.xlu1 %1404  ;;  %v5204_v16 = vsel %vm4567_vm13, %v5203_v6, %v5199_v12  ;;  %v1402_v17 = vpop.xlane.xlu0 %1401  ;;  %v1640_v12 = vsel %vm973_vm0, %v427_v4, 0.0 }
 0x1c6   : > { %v5213_v21 = vrot.slane %v1405_v14, %v10040_v15  ;;  %v5208_v23 = vrot.slane %v1402_v17, %v10043_v60  ;;  %v430_v17 = vld [vmem:[%s9778_s29 + $0x708] sm:$0xff] }
 0x1c7   : > { %v1649_v24 = vsel %vm973_vm0, %v430_v17, 0.0 }
 0x1c8   : > { %v5209_v25 = vsel %vm4574_vm14, %v5208_v23, %v5204_v16  ;;  %1620 = vadd.xlane.f32.xlu1 %v1619_v19  ;;  %1617 = vadd.xlane.f32.xlu0 %v1616_v20  ;;  %v429_v19 = vld [vmem:[%s9778_s29 + $0x700] sm:$0xff] }
 0x1c9   : > { %v5214_v26 = vsel %vm4581_vm15, %v5213_v21, %v5209_v25  ;;  %v1411_v27 = vpop.xlane.xlu1 %1410  ;;  %v1408_v28 = vpop.xlane.xlu0 %1407  ;;  %v1646_v25 = vsel %vm973_vm0, %v429_v19, 0.0 }
 0x1ca   : > { %v10591_v38 = vsel %vm14692_vm8, %v5214_v26, %v10390_v10  ;;  %v5222_v59 = vrot.slane %v1411_v27, %v9946_v33  ;;  %v5218_v39 = vrot.slane %v1408_v28, %v9940_v31  ;;  %v432_v28 = vld [vmem:[%s9778_s29 + $0x718] sm:$0xff]  ;;  %vm14711_vm8 = vcmask 589312  }
 0x1cb   : > { %v1655_v45 = vsel %vm973_vm0, %v432_v28, 0.0 }
 0x1cc   : > { %v5223_v47 = vsel %vm4483_vm1, %v5222_v59, %v5218_v39  ;;  %1626 = vadd.xlane.f32.xlu1 %v1625_v34  ;;  %1623 = vadd.xlane.f32.xlu0 %v1622_v36  ;;  %v431_v34 = vld [vmem:[%s9778_s29 + $0x710] sm:$0xff] }
 0x1cd   : > { %v1417_v48 = vpop.xlane.xlu1 %1416  ;;  %v1414_v49 = vpop.xlane.xlu0 %1413 }
 0x1ce   : > { %v5232_v10 = vrot.slane %v1417_v48, %v9943_v32  ;;  %v5227_v52 = vrot.slane %v1414_v49, %v9950_v35 }
 0x1d0   : > { %v5228_v55 = vsel %vm14697_vm2, %v5227_v52, %v5223_v47  ;;  %1632 = vadd.xlane.f32.xlu1 %v1631_v50  ;;  %1629 = vadd.xlane.f32.xlu0 %v1628_v13  ;;  %v1652_v47 = vsel %vm973_vm0, %v431_v34, 0.0  ;;  %v434_v50 = vld [vmem:[%s9778_s29 + $0x728] sm:$0xff]  ;;  %v433_v13 = vld [vmem:[%s9778_s29 + $0x720] sm:$0xff] }
 0x1d1   : > { %v1423_v57 = vpop.xlane.xlu1 %1422  ;;  %v5233_v58 = vsel %vm4497_vm3, %v5232_v10, %v5228_v55  ;;  %v1420_v61 = vpop.xlane.xlu0 %1419  ;;  %v1661_v55 = vsel %vm973_vm0, %v434_v50, 0.0 }
 0x1d2   : > { %v5242_v1 = vrot.slane %v1423_v57, %v9955_v40  ;;  %v5237_v2 = vrot.slane %v1420_v61, %v9958_v41  ;;  %v1658_v57 = vsel %vm973_vm0, %v433_v13, 0.0 }
 0x1d4   : > { %v5238_v5 = vsel %vm4504_vm4, %v5237_v2, %v5233_v58  ;;  %1638 = vadd.xlane.f32.xlu1 %v1637_v63  ;;  %1635 = vadd.xlane.f32.xlu0 %v1634_v22  ;;  %v436_v63 = vld [vmem:[%s9778_s29 + $0x738] sm:$0xff]  ;;  %v435_v22 = vld [vmem:[%s9778_s29 + $0x730] sm:$0xff] }
 0x1d5   : > { %v1429_v6 = vpop.xlane.xlu1 %1428  ;;  %v5243_v9 = vsel %vm4511_vm5, %v5242_v1, %v5238_v5  ;;  %v1426_v11 = vpop.xlane.xlu0 %1425  ;;  %v1667_v5 = vsel %vm973_vm0, %v436_v63, 0.0 }
 0x1d6   : > { %v5252_v14 = vrot.slane %v1429_v6, %v9973_v56  ;;  %v5247_v16 = vrot.slane %v1426_v11, %v9983_v0  ;;  %v1664_v6 = vsel %vm973_vm0, %v435_v22, 0.0 }
 0x1d8   : > { %v5248_v20 = vsel %vm4518_vm6, %v5247_v16, %v5243_v9  ;;  %1644 = vadd.xlane.f32.xlu1 %v1643_v37  ;;  %1641 = vadd.xlane.f32.xlu0 %v1640_v12  ;;  %v438_v37 = vld [vmem:[%s9778_s29 + $0x748] sm:$0xff]  ;;  %v437_v12 = vld [vmem:[%s9778_s29 + $0x740] sm:$0xff] }
 0x1d9   : > { %v1435_v21 = vpop.xlane.xlu1 %1434  ;;  %v5253_v23 = vsel %vm4525_vm7, %v5252_v14, %v5248_v20  ;;  %v1432_v46 = vpop.xlane.xlu0 %1431  ;;  %v1673_v20 = vsel %vm973_vm0, %v438_v37, 0.0 }
 0x1da   : > { %v5262_v26 = vrot.slane %v1435_v21, %v9990_v7  ;;  %v5257_v27 = vrot.slane %v1432_v46, %v9993_v8  ;;  %v1670_v21 = vsel %vm973_vm0, %v437_v12, 0.0 }
 0x1dc   : > { %v5258_v36 = vsel %vm14709_vm11, %v5257_v27, %v5253_v23  ;;  %1650 = vadd.xlane.f32.xlu1 %v1649_v24  ;;  %1647 = vadd.xlane.f32.xlu0 %v1646_v25  ;;  %vm14710_vm11 = vcmask 786112   ;;  %v440_v25 = vld [vmem:[%s9778_s29 + $0x758] sm:$0xff] }
 0x1dd   : > { %v1441_v59 = vpop.xlane.xlu1 %1440  ;;  %v5263_v39 = vsel %vm4539_vm9, %v5262_v26, %v5258_v36  ;;  %v1438_v42 = vpop.xlane.xlu0 %1437  ;;  %v439_v26 = vld [vmem:[%s9778_s29 + $0x750] sm:$0xff]  ;;  %v1679_v36 = vsel %vm973_vm0, %v440_v25, 0.0 }
 0x1de   : > { %v5272_v48 = vrot.slane %v1441_v59, %v10012_v29  ;;  %v5267_v49 = vrot.slane %v1438_v42, %v10015_v30  ;;  %v1676_v59 = vsel %vm973_vm0, %v439_v26, 0.0  ;;  %v442_v42 = vld [vmem:[%s9778_s29 + $0x768] sm:$0xff] }
 0x1df   : > { %v1685_v13 = vsel %vm973_vm0, %v442_v42, 0.0 }
 0x1e0   : > { %v5268_v10 = vsel %vm4546_vm10, %v5267_v49, %v5263_v39  ;;  %1656 = vadd.xlane.f32.xlu1 %v1655_v45  ;;  %1653 = vadd.xlane.f32.xlu0 %v1652_v47  ;;  %v441_v45 = vld [vmem:[%s9778_s29 + $0x760] sm:$0xff] }
 0x1e1   : > { %v1447_v52 = vpop.xlane.xlu1 %1446  ;;  %v5273_v53 = vsel %vm14710_vm11, %v5272_v48, %v5268_v10  ;;  %v1444_v54 = vpop.xlane.xlu0 %1443  ;;  %vm14693_vm11 = vcmask 1043459   ;;  %v1682_v10 = vsel %vm973_vm0, %v441_v45, 0.0 }
 0x1e2   : > { %v5282_v58 = vrot.slane %v1447_v52, %v10022_v43  ;;  %v5277_v61 = vrot.slane %v1444_v54, %v10025_v44  ;;  %v444_v54 = vld [vmem:[%s9778_s29 + $0x778] sm:$0xff] }
 0x1e3   : > { %v1691_v22 = vsel %vm973_vm0, %v444_v54, 0.0 }
 0x1e4   : > { %v5278_v1 = vsel %vm4560_vm12, %v5277_v61, %v5273_v53  ;;  %1662 = vadd.xlane.f32.xlu1 %v1661_v55  ;;  %1659 = vadd.xlane.f32.xlu0 %v1658_v57  ;;  %v443_v55 = vld [vmem:[%s9778_s29 + $0x770] sm:$0xff] }
 0x1e5   : > { %v1453_v2 = vpop.xlane.xlu1 %1452  ;;  %v5283_v3 = vsel %vm4567_vm13, %v5282_v58, %v5278_v1  ;;  %v1450_v4 = vpop.xlane.xlu0 %1449  ;;  %v1688_v1 = vsel %vm973_vm0, %v443_v55, 0.0 }
 0x1e6   : > { %v5292_v9 = vrot.slane %v1453_v2, %v10040_v15  ;;  %v5287_v11 = vrot.slane %v1450_v4, %v10043_v60  ;;  %v446_v4 = vld [vmem:[%s9778_s29 + $0x788] sm:$0xff] }
 0x1e7   : > { %v1697_v12 = vsel %vm973_vm0, %v446_v4, 0.0 }
 0x1e8   : > { %v5288_v14 = vsel %vm4574_vm14, %v5287_v11, %v5283_v3  ;;  %1668 = vadd.xlane.f32.xlu1 %v1667_v5  ;;  %1665 = vadd.xlane.f32.xlu0 %v1664_v6  ;;  %v445_v5 = vld [vmem:[%s9778_s29 + $0x780] sm:$0xff] }
 0x1e9   : > { %v5293_v16 = vsel %vm4581_vm15, %v5292_v9, %v5288_v14  ;;  %v1459_v17 = vpop.xlane.xlu1 %1458  ;;  %v1456_v19 = vpop.xlane.xlu0 %1455  ;;  %v1694_v14 = vsel %vm973_vm0, %v445_v5, 0.0 }
 0x1ea   : > { %v10658_v23 = vsel %vm14693_vm11, %v5293_v16, %v10457_v62  ;;  %v5301_v46 = vrot.slane %v1459_v17, %v9946_v33  ;;  %v5297_v24 = vrot.slane %v1456_v19, %v9940_v31  ;;  %v448_v19 = vld [vmem:[%s9778_s29 + $0x798] sm:$0xff] }
 0x1eb   : > { %v1703_v26 = vsel %vm973_vm0, %v448_v19, 0.0 }
 0x1ec   : > { %v5302_v27 = vsel %vm4483_vm1, %v5301_v46, %v5297_v24  ;;  %1674 = vadd.xlane.f32.xlu1 %v1673_v20  ;;  %1671 = vadd.xlane.f32.xlu0 %v1670_v21  ;;  %v447_v20 = vld [vmem:[%s9778_s29 + $0x790] sm:$0xff] }
 0x1ed   : > { %v1465_v28 = vpop.xlane.xlu1 %1464  ;;  %v1462_v34 = vpop.xlane.xlu0 %1461 }
 0x1ee   : > { %v5311_v62 = vrot.slane %v1465_v28, %v9943_v32  ;;  %v5306_v39 = vrot.slane %v1462_v34, %v9950_v35 }
 0x1f0   : > { %v5307_v47 = vsel %vm14697_vm2, %v5306_v39, %v5302_v27  ;;  %1680 = vadd.xlane.f32.xlu1 %v1679_v36  ;;  %1677 = vadd.xlane.f32.xlu0 %v1676_v59  ;;  %v1700_v27 = vsel %vm973_vm0, %v447_v20, 0.0  ;;  %v450_v36 = vld [vmem:[%s9778_s29 + $0x7a8] sm:$0xff]  ;;  %v449_v59 = vld [vmem:[%s9778_s29 + $0x7a0] sm:$0xff] }
 0x1f1   : > { %v1471_v48 = vpop.xlane.xlu1 %1470  ;;  %v5312_v49 = vsel %vm4497_vm3, %v5311_v62, %v5307_v47  ;;  %v1468_v50 = vpop.xlane.xlu0 %1467  ;;  %v1709_v47 = vsel %vm973_vm0, %v450_v36, 0.0 }
 0x1f2   : > { %v5321_v52 = vrot.slane %v1471_v48, %v9955_v40  ;;  %v5316_v53 = vrot.slane %v1468_v50, %v9958_v41  ;;  %v1706_v48 = vsel %vm973_vm0, %v449_v59, 0.0 }
 0x1f4   : > { %v5317_v57 = vsel %vm4504_vm4, %v5316_v53, %v5312_v49  ;;  %1686 = vadd.xlane.f32.xlu1 %v1685_v13  ;;  %1683 = vadd.xlane.f32.xlu0 %v1682_v10  ;;  %v452_v13 = vld [vmem:[%s9778_s29 + $0x7b8] sm:$0xff]  ;;  %v451_v10 = vld [vmem:[%s9778_s29 + $0x7b0] sm:$0xff] }
 0x1f5   : > { %v1477_v58 = vpop.xlane.xlu1 %1476  ;;  %v5322_v61 = vsel %vm4511_vm5, %v5321_v52, %v5317_v57  ;;  %v1474_v63 = vpop.xlane.xlu0 %1473  ;;  %v1715_v57 = vsel %vm973_vm0, %v452_v13, 0.0 }
 0x1f6   : > { %v5331_v2 = vrot.slane %v1477_v58, %v9973_v56  ;;  %v5326_v3 = vrot.slane %v1474_v63, %v9983_v0  ;;  %v1712_v58 = vsel %vm973_vm0, %v451_v10, 0.0 }
 0x1f8   : > { %v5327_v6 = vsel %vm4518_vm6, %v5326_v3, %v5322_v61  ;;  %1692 = vadd.xlane.f32.xlu1 %v1691_v22  ;;  %1689 = vadd.xlane.f32.xlu0 %v1688_v1  ;;  %v454_v22 = vld [vmem:[%s9778_s29 + $0x7c8] sm:$0xff]  ;;  %v453_v1 = vld [vmem:[%s9778_s29 + $0x7c0] sm:$0xff] }
 0x1f9   : > { %v1483_v9 = vpop.xlane.xlu1 %1482  ;;  %v5332_v11 = vsel %vm4525_vm7, %v5331_v2, %v5327_v6  ;;  %v1480_v37 = vpop.xlane.xlu0 %1479  ;;  %v1721_v6 = vsel %vm973_vm0, %v454_v22, 0.0 }
 0x1fa   : > { %v5341_v16 = vrot.slane %v1483_v9, %v9990_v7  ;;  %v5336_v17 = vrot.slane %v1480_v37, %v9993_v8  ;;  %v1718_v9 = vsel %vm973_vm0, %v453_v1, 0.0 }
 0x1fc   : > { %v5337_v21 = vsel %vm14711_vm8, %v5336_v17, %v5332_v11  ;;  %1698 = vadd.xlane.f32.xlu1 %v1697_v12  ;;  %1695 = vadd.xlane.f32.xlu0 %v1694_v14  ;;  %vm14712_vm8 = vcmask 786112   ;;  %v456_v14 = vld [vmem:[%s9778_s29 + $0x7d8] sm:$0xff] }
 0x1fd   : > { %v1489_v46 = vpop.xlane.xlu1 %1488  ;;  %v5342_v24 = vsel %vm4539_vm9, %v5341_v16, %v5337_v21  ;;  %v1486_v25 = vpop.xlane.xlu0 %1485  ;;  %v455_v16 = vld [vmem:[%s9778_s29 + $0x7d0] sm:$0xff]  ;;  %v1727_v21 = vsel %vm973_vm0, %v456_v14, 0.0 }
 0x1fe   : > { %v5351_v28 = vrot.slane %v1489_v46, %v10012_v29  ;;  %v5346_v34 = vrot.slane %v1486_v25, %v10015_v30  ;;  %v1724_v46 = vsel %vm973_vm0, %v455_v16, 0.0  ;;  %v458_v25 = vld [vmem:[%s9778_s29 + $0x7e8] sm:$0xff] }
 0x1ff   : > { %v1733_v59 = vsel %vm973_vm0, %v458_v25, 0.0 }
 0x200   : > { %v5347_v62 = vsel %vm4546_vm10, %v5346_v34, %v5342_v24  ;;  %1704 = vadd.xlane.f32.xlu1 %v1703_v26  ;;  %1701 = vadd.xlane.f32.xlu0 %v1700_v27  ;;  %v457_v26 = vld [vmem:[%s9778_s29 + $0x7e0] sm:$0xff] }
 0x201   : > { %v1495_v39 = vpop.xlane.xlu1 %1494  ;;  %v5352_v42 = vsel %vm14712_vm8, %v5351_v28, %v5347_v62  ;;  %v1492_v45 = vpop.xlane.xlu0 %1491  ;;  %v1730_v62 = vsel %vm973_vm0, %v457_v26, 0.0  ;;  %vm14713_vm8 = vcmask 589312  }
 0x202   : > { %v5361_v49 = vrot.slane %v1495_v39, %v10022_v43  ;;  %v5356_v50 = vrot.slane %v1492_v45, %v10025_v44  ;;  %v460_v45 = vld [vmem:[%s9778_s29 + $0x7f8] sm:$0xff] }
 0x203   : > { %v1739_v10 = vsel %vm973_vm0, %v460_v45, 0.0 }
 0x204   : > { %v5357_v52 = vsel %vm4560_vm12, %v5356_v50, %v5352_v42  ;;  %1710 = vadd.xlane.f32.xlu1 %v1709_v47  ;;  %1707 = vadd.xlane.f32.xlu0 %v1706_v48  ;;  %v459_v47 = vld [vmem:[%s9778_s29 + $0x7f0] sm:$0xff] }
 0x205   : > { %v1501_v53 = vpop.xlane.xlu1 %1500  ;;  %v5362_v54 = vsel %vm4567_vm13, %v5361_v49, %v5357_v52  ;;  %v1498_v55 = vpop.xlane.xlu0 %1497  ;;  %v1736_v52 = vsel %vm973_vm0, %v459_v47, 0.0 }
 0x206   : > { %v5371_v61 = vrot.slane %v1501_v53, %v10040_v15  ;;  %v5366_v63 = vrot.slane %v1498_v55, %v10043_v60  ;;  %v462_v55 = vld [vmem:[%s9778_s29 + $0x808] sm:$0xff] }
 0x207   : > { %v1745_v1 = vsel %vm973_vm0, %v462_v55, 0.0 }
 0x208   : > { %v5367_v2 = vsel %vm4574_vm14, %v5366_v63, %v5362_v54  ;;  %1716 = vadd.xlane.f32.xlu1 %v1715_v57  ;;  %1713 = vadd.xlane.f32.xlu0 %v1712_v58  ;;  %v461_v57 = vld [vmem:[%s9778_s29 + $0x800] sm:$0xff] }
 0x209   : > { %v5372_v3 = vsel %vm4581_vm15, %v5371_v61, %v5367_v2  ;;  %v1507_v4 = vpop.xlane.xlu1 %1506  ;;  %v1504_v5 = vpop.xlane.xlu0 %1503  ;;  %v1742_v2 = vsel %vm973_vm0, %v461_v57, 0.0 }
 0x20a   : > { %v10725_v11 = vsel %vm14693_vm11, %v5372_v3, %v10524_v51  ;;  %v5380_v37 = vrot.slane %v1507_v4, %v9946_v33  ;;  %v5376_v12 = vrot.slane %v1504_v5, %v9940_v31  ;;  %v464_v5 = vld [vmem:[%s9778_s29 + $0x818] sm:$0xff] }
 0x20b   : > { %v1751_v16 = vsel %vm973_vm0, %v464_v5, 0.0 }
 0x20c   : > { %v5381_v17 = vsel %vm4483_vm1, %v5380_v37, %v5376_v12  ;;  %1722 = vadd.xlane.f32.xlu1 %v1721_v6  ;;  %1719 = vadd.xlane.f32.xlu0 %v1718_v9  ;;  %v463_v6 = vld [vmem:[%s9778_s29 + $0x810] sm:$0xff] }
 0x20d   : > { %v1513_v19 = vpop.xlane.xlu1 %1512  ;;  %v1510_v20 = vpop.xlane.xlu0 %1509 }
 0x20e   : > { %v5390_v51 = vrot.slane %v1513_v19, %v9943_v32  ;;  %v5385_v24 = vrot.slane %v1510_v20, %v9950_v35 }
 0x210   : > { %v5386_v27 = vsel %vm14697_vm2, %v5385_v24, %v5381_v17  ;;  %1728 = vadd.xlane.f32.xlu1 %v1727_v21  ;;  %1725 = vadd.xlane.f32.xlu0 %v1724_v46  ;;  %v1748_v17 = vsel %vm973_vm0, %v463_v6, 0.0  ;;  %v466_v21 = vld [vmem:[%s9778_s29 + $0x828] sm:$0xff]  ;;  %v465_v46 = vld [vmem:[%s9778_s29 + $0x820] sm:$0xff] }
 0x211   : > { %v1519_v28 = vpop.xlane.xlu1 %1518  ;;  %v5391_v34 = vsel %vm4497_vm3, %v5390_v51, %v5386_v27  ;;  %v1516_v36 = vpop.xlane.xlu0 %1515  ;;  %v1757_v27 = vsel %vm973_vm0, %v466_v21, 0.0 }
 0x212   : > { %v5400_v39 = vrot.slane %v1519_v28, %v9955_v40  ;;  %v5395_v42 = vrot.slane %v1516_v36, %v9958_v41  ;;  %v1754_v28 = vsel %vm973_vm0, %v465_v46, 0.0 }
 0x214   : > { %v5396_v48 = vsel %vm4504_vm4, %v5395_v42, %v5391_v34  ;;  %1734 = vadd.xlane.f32.xlu1 %v1733_v59  ;;  %1731 = vadd.xlane.f32.xlu0 %v1730_v62  ;;  %v468_v59 = vld [vmem:[%s9778_s29 + $0x838] sm:$0xff]  ;;  %v467_v62 = vld [vmem:[%s9778_s29 + $0x830] sm:$0xff] }
 0x215   : > { %v1525_v49 = vpop.xlane.xlu1 %1524  ;;  %v5401_v50 = vsel %vm4511_vm5, %v5400_v39, %v5396_v48  ;;  %v1522_v13 = vpop.xlane.xlu0 %1521  ;;  %v1763_v48 = vsel %vm973_vm0, %v468_v59, 0.0 }
 0x216   : > { %v5410_v53 = vrot.slane %v1525_v49, %v9973_v56  ;;  %v5405_v54 = vrot.slane %v1522_v13, %v9983_v0  ;;  %v1760_v49 = vsel %vm973_vm0, %v467_v62, 0.0 }
 0x218   : > { %v5406_v58 = vsel %vm4518_vm6, %v5405_v54, %v5401_v50  ;;  %1740 = vadd.xlane.f32.xlu1 %v1739_v10  ;;  %1737 = vadd.xlane.f32.xlu0 %v1736_v52  ;;  %v470_v10 = vld [vmem:[%s9778_s29 + $0x848] sm:$0xff]  ;;  %v469_v52 = vld [vmem:[%s9778_s29 + $0x840] sm:$0xff] }
 0x219   : > { %v1531_v61 = vpop.xlane.xlu1 %1530  ;;  %v5411_v63 = vsel %vm4525_vm7, %v5410_v53, %v5406_v58  ;;  %v1528_v22 = vpop.xlane.xlu0 %1527  ;;  %v1769_v58 = vsel %vm973_vm0, %v470_v10, 0.0 }
 0x21a   : > { %v5420_v3 = vrot.slane %v1531_v61, %v9990_v7  ;;  %v5415_v4 = vrot.slane %v1528_v22, %v9993_v8  ;;  %v1766_v61 = vsel %vm973_vm0, %v469_v52, 0.0 }
 0x21c   : > { %v5416_v9 = vsel %vm14713_vm8, %v5415_v4, %v5411_v63  ;;  %1746 = vadd.xlane.f32.xlu1 %v1745_v1  ;;  %1743 = vadd.xlane.f32.xlu0 %v1742_v2  ;;  %vm14714_vm8 = vcmask 786112   ;;  %v472_v2 = vld [vmem:[%s9778_s29 + $0x858] sm:$0xff] }
 0x21d   : > { %v1537_v37 = vpop.xlane.xlu1 %1536  ;;  %v5421_v12 = vsel %vm4539_vm9, %v5420_v3, %v5416_v9  ;;  %v1534_v14 = vpop.xlane.xlu0 %1533  ;;  %v471_v3 = vld [vmem:[%s9778_s29 + $0x850] sm:$0xff]  ;;  %v1775_v9 = vsel %vm973_vm0, %v472_v2, 0.0 }
 0x21e   : > { %v5430_v19 = vrot.slane %v1537_v37, %v10012_v29  ;;  %v5425_v20 = vrot.slane %v1534_v14, %v10015_v30  ;;  %v1772_v37 = vsel %vm973_vm0, %v471_v3, 0.0  ;;  %v474_v14 = vld [vmem:[%s9778_s29 + $0x868] sm:$0xff] }
 0x21f   : > { %v1781_v46 = vsel %vm973_vm0, %v474_v14, 0.0 }
 0x220   : > { %v5426_v51 = vsel %vm4546_vm10, %v5425_v20, %v5421_v12  ;;  %1752 = vadd.xlane.f32.xlu1 %v1751_v16  ;;  %1749 = vadd.xlane.f32.xlu0 %v1748_v17  ;;  %v473_v16 = vld [vmem:[%s9778_s29 + $0x860] sm:$0xff] }
 0x221   : > { %v1543_v24 = vpop.xlane.xlu1 %1542  ;;  %v5431_v25 = vsel %vm14714_vm8, %v5430_v19, %v5426_v51  ;;  %v1540_v26 = vpop.xlane.xlu0 %1539  ;;  %v1778_v51 = vsel %vm973_vm0, %v473_v16, 0.0  ;;  %vm14715_vm8 = vcmask 589312  }
 0x222   : > { %v5440_v34 = vrot.slane %v1543_v24, %v10022_v43  ;;  %v5435_v36 = vrot.slane %v1540_v26, %v10025_v44  ;;  %v476_v26 = vld [vmem:[%s9778_s29 + $0x878] sm:$0xff] }
 0x223   : > { %v1787_v62 = vsel %vm973_vm0, %v476_v26, 0.0 }
 0x224   : > { %v5436_v39 = vsel %vm4560_vm12, %v5435_v36, %v5431_v25  ;;  %1758 = vadd.xlane.f32.xlu1 %v1757_v27  ;;  %1755 = vadd.xlane.f32.xlu0 %v1754_v28  ;;  %v475_v27 = vld [vmem:[%s9778_s29 + $0x870] sm:$0xff] }
 0x225   : > { %v1549_v42 = vpop.xlane.xlu1 %1548  ;;  %v5441_v45 = vsel %vm4567_vm13, %v5440_v34, %v5436_v39  ;;  %v1546_v47 = vpop.xlane.xlu0 %1545  ;;  %v1784_v39 = vsel %vm973_vm0, %v475_v27, 0.0 }
 0x226   : > { %v5450_v50 = vrot.slane %v1549_v42, %v10040_v15  ;;  %v5445_v13 = vrot.slane %v1546_v47, %v10043_v60  ;;  %v478_v47 = vld [vmem:[%s9778_s29 + $0x888] sm:$0xff] }
 0x227   : > { %v1793_v52 = vsel %vm973_vm0, %v478_v47, 0.0 }
 0x228   : > { %v5446_v53 = vsel %vm4574_vm14, %v5445_v13, %v5441_v45  ;;  %1764 = vadd.xlane.f32.xlu1 %v1763_v48  ;;  %1761 = vadd.xlane.f32.xlu0 %v1760_v49  ;;  %v477_v48 = vld [vmem:[%s9778_s29 + $0x880] sm:$0xff] }
 0x229   : > { %v5451_v54 = vsel %vm4581_vm15, %v5450_v50, %v5446_v53  ;;  %v1555_v55 = vpop.xlane.xlu1 %1554  ;;  %v1552_v57 = vpop.xlane.xlu0 %1551  ;;  %v1790_v53 = vsel %vm973_vm0, %v477_v48, 0.0 }
 0x22a   : > { %v10792_v63 = vsel %vm14693_vm11, %v5451_v54, %v10591_v38  ;;  %v5459_v22 = vrot.slane %v1555_v55, %v9946_v33  ;;  %v5455_v1 = vrot.slane %v1552_v57, %v9940_v31  ;;  %v480_v57 = vld [vmem:[%s9778_s29 + $0x898] sm:$0xff]  ;;  %vm14717_vm11 = vcmask 589312  }
 0x22b   : > { %v1799_v3 = vsel %vm973_vm0, %v480_v57, 0.0 }
 0x22c   : > { %v5460_v4 = vsel %vm4483_vm1, %v5459_v22, %v5455_v1  ;;  %1770 = vadd.xlane.f32.xlu1 %v1769_v58  ;;  %1767 = vadd.xlane.f32.xlu0 %v1766_v61  ;;  %v479_v58 = vld [vmem:[%s9778_s29 + $0x890] sm:$0xff] }
 0x22d   : > { %v1561_v5 = vpop.xlane.xlu1 %1560  ;;  %v1558_v6 = vpop.xlane.xlu0 %1557 }
 0x22e   : > { %v5469_v38 = vrot.slane %v1561_v5, %v9943_v32  ;;  %v5464_v12 = vrot.slane %v1558_v6, %v9950_v35 }
 0x230   : > { %v5465_v17 = vsel %vm14697_vm2, %v5464_v12, %v5460_v4  ;;  %1776 = vadd.xlane.f32.xlu1 %v1775_v9  ;;  %1773 = vadd.xlane.f32.xlu0 %v1772_v37  ;;  %v1796_v4 = vsel %vm973_vm0, %v479_v58, 0.0  ;;  %v482_v9 = vld [vmem:[%s9778_s29 + $0x8a8] sm:$0xff]  ;;  %v481_v37 = vld [vmem:[%s9778_s29 + $0x8a0] sm:$0xff] }
 0x231   : > { %v1567_v19 = vpop.xlane.xlu1 %1566  ;;  %v5470_v20 = vsel %vm4497_vm3, %v5469_v38, %v5465_v17  ;;  %v1564_v21 = vpop.xlane.xlu0 %1563  ;;  %v1805_v17 = vsel %vm973_vm0, %v482_v9, 0.0 }
 0x232   : > { %v5479_v24 = vrot.slane %v1567_v19, %v9955_v40  ;;  %v5474_v25 = vrot.slane %v1564_v21, %v9958_v41  ;;  %v1802_v19 = vsel %vm973_vm0, %v481_v37, 0.0 }
 0x234   : > { %v5475_v28 = vsel %vm4504_vm4, %v5474_v25, %v5470_v20  ;;  %1782 = vadd.xlane.f32.xlu1 %v1781_v46  ;;  %1779 = vadd.xlane.f32.xlu0 %v1778_v51  ;;  %v484_v46 = vld [vmem:[%s9778_s29 + $0x8b8] sm:$0xff]  ;;  %v483_v51 = vld [vmem:[%s9778_s29 + $0x8b0] sm:$0xff] }
 0x235   : > { %v1573_v34 = vpop.xlane.xlu1 %1572  ;;  %v5480_v36 = vsel %vm4511_vm5, %v5479_v24, %v5475_v28  ;;  %v1570_v59 = vpop.xlane.xlu0 %1569  ;;  %v1811_v28 = vsel %vm973_vm0, %v484_v46, 0.0 }
 0x236   : > { %v5489_v42 = vrot.slane %v1573_v34, %v9973_v56  ;;  %v5484_v45 = vrot.slane %v1570_v59, %v9983_v0  ;;  %v1808_v34 = vsel %vm973_vm0, %v483_v51, 0.0 }
 0x238   : > { %v5485_v49 = vsel %vm4518_vm6, %v5484_v45, %v5480_v36  ;;  %1788 = vadd.xlane.f32.xlu1 %v1787_v62  ;;  %1785 = vadd.xlane.f32.xlu0 %v1784_v39  ;;  %v486_v62 = vld [vmem:[%s9778_s29 + $0x8c8] sm:$0xff]  ;;  %v485_v39 = vld [vmem:[%s9778_s29 + $0x8c0] sm:$0xff] }
 0x239   : > { %v1579_v50 = vpop.xlane.xlu1 %1578  ;;  %v5490_v13 = vsel %vm4525_vm7, %v5489_v42, %v5485_v49  ;;  %v1576_v10 = vpop.xlane.xlu0 %1575  ;;  %v1817_v49 = vsel %vm973_vm0, %v486_v62, 0.0 }
 0x23a   : > { %v5499_v54 = vrot.slane %v1579_v50, %v9990_v7  ;;  %v5494_v55 = vrot.slane %v1576_v10, %v9993_v8  ;;  %v1814_v50 = vsel %vm973_vm0, %v485_v39, 0.0 }
 0x23c   : > { %v5495_v61 = vsel %vm14715_vm8, %v5494_v55, %v5490_v13  ;;  %1794 = vadd.xlane.f32.xlu1 %v1793_v52  ;;  %1791 = vadd.xlane.f32.xlu0 %v1790_v53  ;;  %vm14716_vm8 = vcmask 786112   ;;  %v488_v52 = vld [vmem:[%s9778_s29 + $0x8d8] sm:$0xff]  ;;  %v487_v53 = vld [vmem:[%s9778_s29 + $0x8d0] sm:$0xff] }
 0x23d   : > { %v1585_v22 = vpop.xlane.xlu1 %1584  ;;  %v5500_v1 = vsel %vm4539_vm9, %v5499_v54, %v5495_v61  ;;  %v1582_v2 = vpop.xlane.xlu0 %1581  ;;  %v1823_v61 = vsel %vm973_vm0, %v488_v52, 0.0 }
 0x23e   : > { %v5509_v5 = vrot.slane %v1585_v22, %v10012_v29  ;;  %v5504_v6 = vrot.slane %v1582_v2, %v10015_v30  ;;  %v1820_v22 = vsel %vm973_vm0, %v487_v53, 0.0 }
 0x240   : > { %v5505_v38 = vsel %vm4546_vm10, %v5504_v6, %v5500_v1  ;;  %1800 = vadd.xlane.f32.xlu1 %v1799_v3  ;;  %1797 = vadd.xlane.f32.xlu0 %v1796_v4  ;;  %v490_v3 = vld [vmem:[%s9778_s29 + $0x8e8] sm:$0xff]  ;;  %v489_v4 = vld [vmem:[%s9778_s29 + $0x8e0] sm:$0xff] }
 0x241   : > { %v1591_v12 = vpop.xlane.xlu1 %1590  ;;  %v5510_v14 = vsel %vm14716_vm8, %v5509_v5, %v5505_v38  ;;  %v1588_v16 = vpop.xlane.xlu0 %1587  ;;  %vm14694_vm8 = vcmask 1044484   ;;  %v1829_v37 = vsel %vm973_vm0, %v490_v3, 0.0  ;;  %v1826_v38 = vsel %vm973_vm0, %v489_v4, 0.0 }
 0x242   : > { %v5519_v20 = vrot.slane %v1591_v12, %v10022_v43  ;;  %v5514_v21 = vrot.slane %v1588_v16, %v10025_v44  ;;  %v492_v16 = vld [vmem:[%s9778_s29 + $0x8f8] sm:$0xff] }
 0x243   : > { %v1835_v51 = vsel %vm973_vm0, %v492_v16, 0.0 }
 0x244   : > { %v5515_v24 = vsel %vm4560_vm12, %v5514_v21, %v5510_v14  ;;  %1806 = vadd.xlane.f32.xlu1 %v1805_v17  ;;  %1803 = vadd.xlane.f32.xlu0 %v1802_v19  ;;  %v491_v17 = vld [vmem:[%s9778_s29 + $0x8f0] sm:$0xff] }
 0x245   : > { %v1597_v25 = vpop.xlane.xlu1 %1596  ;;  %v5520_v26 = vsel %vm4567_vm13, %v5519_v20, %v5515_v24  ;;  %v1594_v27 = vpop.xlane.xlu0 %1593  ;;  %v1832_v24 = vsel %vm973_vm0, %v491_v17, 0.0 }
 0x246   : > { %v5529_v36 = vrot.slane %v1597_v25, %v10040_v15  ;;  %v5524_v59 = vrot.slane %v1594_v27, %v10043_v60  ;;  %v494_v27 = vld [vmem:[%s9778_s29 + $0x908] sm:$0xff] }
 0x247   : > { %v1841_v39 = vsel %vm973_vm0, %v494_v27, 0.0 }
 0x248   : > { %v5525_v42 = vsel %vm4574_vm14, %v5524_v59, %v5520_v26  ;;  %1812 = vadd.xlane.f32.xlu1 %v1811_v28  ;;  %1809 = vadd.xlane.f32.xlu0 %v1808_v34  ;;  %v493_v28 = vld [vmem:[%s9778_s29 + $0x900] sm:$0xff] }
 0x249   : > { %v5530_v45 = vsel %vm4581_vm15, %v5529_v36, %v5525_v42  ;;  %v1603_v47 = vpop.xlane.xlu1 %1602  ;;  %v1600_v48 = vpop.xlane.xlu0 %1599  ;;  %v1838_v42 = vsel %vm973_vm0, %v493_v28, 0.0 }
 0x24a   : > { %v5538_v13 = vrot.slane %v1603_v47, %v9946_v33  ;;  %v5534_v10 = vrot.slane %v1600_v48, %v9940_v31  ;;  %v10863_v54 = vsel %vm14694_vm8, %v5530_v45, %v10658_v23  ;;  %v496_v48 = vld [vmem:[%s9778_s29 + $0x918] sm:$0xff] }
 0x24b   : > { %v1847_v53 = vsel %vm973_vm0, %v496_v48, 0.0 }
 0x24c   : > { %v5539_v55 = vsel %vm4483_vm1, %v5538_v13, %v5534_v10  ;;  %1818 = vadd.xlane.f32.xlu1 %v1817_v49  ;;  %1815 = vadd.xlane.f32.xlu0 %v1814_v50  ;;  %v495_v49 = vld [vmem:[%s9778_s29 + $0x910] sm:$0xff] }
 0x24d   : > { %v1609_v57 = vpop.xlane.xlu1 %1608  ;;  %v1606_v58 = vpop.xlane.xlu0 %1605 }
 0x24e   : > { %v5548_v1 = vrot.slane %v1609_v57, %v9943_v32  ;;  %v5543_v2 = vrot.slane %v1606_v58, %v9950_v35 }
 0x250   : > { %v5544_v23 = vsel %vm14697_vm2, %v5543_v2, %v5539_v55  ;;  %1824 = vadd.xlane.f32.xlu1 %v1823_v61  ;;  %1821 = vadd.xlane.f32.xlu0 %v1820_v22  ;;  %v1844_v55 = vsel %vm973_vm0, %v495_v49, 0.0  ;;  %v498_v61 = vld [vmem:[%s9778_s29 + $0x928] sm:$0xff]  ;;  %v497_v22 = vld [vmem:[%s9778_s29 + $0x920] sm:$0xff] }
 0x251   : > { %v1615_v5 = vpop.xlane.xlu1 %1614  ;;  %v5549_v6 = vsel %vm4497_vm3, %v5548_v1, %v5544_v23  ;;  %v1612_v9 = vpop.xlane.xlu0 %1611  ;;  %v1853_v23 = vsel %vm973_vm0, %v498_v61, 0.0 }
 0x252   : > { %v5558_v12 = vrot.slane %v1615_v5, %v9955_v40  ;;  %v5553_v14 = vrot.slane %v1612_v9, %v9958_v41  ;;  %v1850_v5 = vsel %vm973_vm0, %v497_v22, 0.0 }
 0x254   : > { %v5554_v19 = vsel %vm4504_vm4, %v5553_v14, %v5549_v6  ;;  %1830 = vadd.xlane.f32.xlu1 %v1829_v37  ;;  %1827 = vadd.xlane.f32.xlu0 %v1826_v38  ;;  %v500_v37 = vld [vmem:[%s9778_s29 + $0x938] sm:$0xff]  ;;  %v499_v38 = vld [vmem:[%s9778_s29 + $0x930] sm:$0xff] }
 0x255   : > { %v1621_v20 = vpop.xlane.xlu1 %1620  ;;  %v5559_v21 = vsel %vm4511_vm5, %v5558_v12, %v5554_v19  ;;  %v1618_v46 = vpop.xlane.xlu0 %1617  ;;  %v1859_v19 = vsel %vm973_vm0, %v500_v37, 0.0 }
 0x256   : > { %v5568_v25 = vrot.slane %v1621_v20, %v9973_v56  ;;  %v5563_v26 = vrot.slane %v1618_v46, %v9983_v0  ;;  %v1856_v20 = vsel %vm973_vm0, %v499_v38, 0.0 }
 0x258   : > { %v5564_v34 = vsel %vm4518_vm6, %v5563_v26, %v5559_v21  ;;  %1836 = vadd.xlane.f32.xlu1 %v1835_v51  ;;  %1833 = vadd.xlane.f32.xlu0 %v1832_v24  ;;  %v502_v51 = vld [vmem:[%s9778_s29 + $0x948] sm:$0xff]  ;;  %v501_v24 = vld [vmem:[%s9778_s29 + $0x940] sm:$0xff] }
 0x259   : > { %v1627_v36 = vpop.xlane.xlu1 %1626  ;;  %v5569_v59 = vsel %vm4525_vm7, %v5568_v25, %v5564_v34  ;;  %v1624_v62 = vpop.xlane.xlu0 %1623  ;;  %v1865_v34 = vsel %vm973_vm0, %v502_v51, 0.0 }
 0x25a   : > { %v5578_v45 = vrot.slane %v1627_v36, %v9990_v7  ;;  %v5573_v47 = vrot.slane %v1624_v62, %v9993_v8  ;;  %v1862_v36 = vsel %vm973_vm0, %v501_v24, 0.0 }
 0x25c   : > { %v5574_v50 = vsel %vm14717_vm11, %v5573_v47, %v5569_v59  ;;  %1842 = vadd.xlane.f32.xlu1 %v1841_v39  ;;  %1839 = vadd.xlane.f32.xlu0 %v1838_v42  ;;  %vm14718_vm11 = vcmask 786112   ;;  %v504_v39 = vld [vmem:[%s9778_s29 + $0x958] sm:$0xff]  ;;  %v503_v42 = vld [vmem:[%s9778_s29 + $0x950] sm:$0xff] }
 0x25d   : > { %v1633_v13 = vpop.xlane.xlu1 %1632  ;;  %v5579_v10 = vsel %vm4539_vm9, %v5578_v45, %v5574_v50  ;;  %v1630_v52 = vpop.xlane.xlu0 %1629  ;;  %v1871_v50 = vsel %vm973_vm0, %v504_v39, 0.0 }
 0x25e   : > { %v5588_v57 = vrot.slane %v1633_v13, %v10012_v29  ;;  %v5583_v58 = vrot.slane %v1630_v52, %v10015_v30  ;;  %v1868_v13 = vsel %vm973_vm0, %v503_v42, 0.0 }
 0x260   : > { %v5584_v1 = vsel %vm4546_vm10, %v5583_v58, %v5579_v10  ;;  %1848 = vadd.xlane.f32.xlu1 %v1847_v53  ;;  %1845 = vadd.xlane.f32.xlu0 %v1844_v55  ;;  %v506_v53 = vld [vmem:[%s9778_s29 + $0x968] sm:$0xff]  ;;  %v505_v55 = vld [vmem:[%s9778_s29 + $0x960] sm:$0xff] }
 0x261   : > { %v1639_v2 = vpop.xlane.xlu1 %1638  ;;  %v5589_v3 = vsel %vm14718_vm11, %v5588_v57, %v5584_v1  ;;  %v1636_v4 = vpop.xlane.xlu0 %1635  ;;  %v1877_v22 = vsel %vm973_vm0, %v506_v53, 0.0  ;;  %v1874_v1 = vsel %vm973_vm0, %v505_v55, 0.0  ;;  %vm14719_vm11 = vcmask 589312  }
 0x262   : > { %v5598_v6 = vrot.slane %v1639_v2, %v10022_v43  ;;  %v5593_v9 = vrot.slane %v1636_v4, %v10025_v44  ;;  %v508_v4 = vld [vmem:[%s9778_s29 + $0x978] sm:$0xff] }
 0x263   : > { %v1883_v38 = vsel %vm973_vm0, %v508_v4, 0.0 }
 0x264   : > { %v5594_v12 = vsel %vm4560_vm12, %v5593_v9, %v5589_v3  ;;  %1854 = vadd.xlane.f32.xlu1 %v1853_v23  ;;  %1851 = vadd.xlane.f32.xlu0 %v1850_v5  ;;  %v507_v23 = vld [vmem:[%s9778_s29 + $0x970] sm:$0xff] }
 0x265   : > { %v1645_v14 = vpop.xlane.xlu1 %1644  ;;  %v5599_v16 = vsel %vm4567_vm13, %v5598_v6, %v5594_v12  ;;  %v1642_v17 = vpop.xlane.xlu0 %1641  ;;  %v1880_v12 = vsel %vm973_vm0, %v507_v23, 0.0 }
 0x266   : > { %v5608_v21 = vrot.slane %v1645_v14, %v10040_v15  ;;  %v5603_v46 = vrot.slane %v1642_v17, %v10043_v60  ;;  %v510_v17 = vld [vmem:[%s9778_s29 + $0x988] sm:$0xff] }
 0x267   : > { %v1889_v24 = vsel %vm973_vm0, %v510_v17, 0.0 }
 0x268   : > { %v5604_v25 = vsel %vm4574_vm14, %v5603_v46, %v5599_v16  ;;  %1860 = vadd.xlane.f32.xlu1 %v1859_v19  ;;  %1857 = vadd.xlane.f32.xlu0 %v1856_v20  ;;  %v509_v19 = vld [vmem:[%s9778_s29 + $0x980] sm:$0xff] }
 0x269   : > { %v5609_v26 = vsel %vm4581_vm15, %v5608_v21, %v5604_v25  ;;  %v1651_v27 = vpop.xlane.xlu1 %1650  ;;  %v1648_v28 = vpop.xlane.xlu0 %1647  ;;  %v1886_v25 = vsel %vm973_vm0, %v509_v19, 0.0 }
 0x26a   : > { %v5617_v59 = vrot.slane %v1651_v27, %v9946_v33  ;;  %v5613_v62 = vrot.slane %v1648_v28, %v9940_v31  ;;  %v10930_v45 = vsel %vm14694_vm8, %v5609_v26, %v10725_v11  ;;  %v512_v28 = vld [vmem:[%s9778_s29 + $0x998] sm:$0xff] }
 0x26b   : > { %v1895_v42 = vsel %vm973_vm0, %v512_v28, 0.0 }
 0x26c   : > { %v5618_v47 = vsel %vm4483_vm1, %v5617_v59, %v5613_v62  ;;  %1866 = vadd.xlane.f32.xlu1 %v1865_v34  ;;  %1863 = vadd.xlane.f32.xlu0 %v1862_v36  ;;  %v511_v34 = vld [vmem:[%s9778_s29 + $0x990] sm:$0xff] }
 0x26d   : > { %v1657_v48 = vpop.xlane.xlu1 %1656  ;;  %v1654_v49 = vpop.xlane.xlu0 %1653 }
 0x26e   : > { %v5627_v10 = vrot.slane %v1657_v48, %v9943_v32  ;;  %v5622_v52 = vrot.slane %v1654_v49, %v9950_v35 }
 0x270   : > { %v5623_v11 = vsel %vm14697_vm2, %v5622_v52, %v5618_v47  ;;  %1872 = vadd.xlane.f32.xlu1 %v1871_v50  ;;  %1869 = vadd.xlane.f32.xlu0 %v1868_v13  ;;  %v1892_v47 = vsel %vm973_vm0, %v511_v34, 0.0  ;;  %v514_v50 = vld [vmem:[%s9778_s29 + $0x9a8] sm:$0xff]  ;;  %v513_v13 = vld [vmem:[%s9778_s29 + $0x9a0] sm:$0xff] }
 0x271   : > { %v1663_v57 = vpop.xlane.xlu1 %1662  ;;  %v5628_v58 = vsel %vm4497_vm3, %v5627_v10, %v5623_v11  ;;  %v1660_v61 = vpop.xlane.xlu0 %1659  ;;  %v1901_v11 = vsel %vm973_vm0, %v514_v50, 0.0 }
 0x272   : > { %v5637_v2 = vrot.slane %v1663_v57, %v9955_v40  ;;  %v5632_v3 = vrot.slane %v1660_v61, %v9958_v41  ;;  %v1898_v57 = vsel %vm973_vm0, %v513_v13, 0.0 }
 0x274   : > { %v5633_v5 = vsel %vm4504_vm4, %v5632_v3, %v5628_v58  ;;  %1878 = vadd.xlane.f32.xlu1 %v1877_v22  ;;  %1875 = vadd.xlane.f32.xlu0 %v1874_v1  ;;  %v516_v22 = vld [vmem:[%s9778_s29 + $0x9b8] sm:$0xff]  ;;  %v515_v1 = vld [vmem:[%s9778_s29 + $0x9b0] sm:$0xff] }
 0x275   : > { %v1669_v6 = vpop.xlane.xlu1 %1668  ;;  %v5638_v9 = vsel %vm4511_vm5, %v5637_v2, %v5633_v5  ;;  %v1666_v37 = vpop.xlane.xlu0 %1665  ;;  %v1907_v5 = vsel %vm973_vm0, %v516_v22, 0.0 }
 0x276   : > { %v5647_v14 = vrot.slane %v1669_v6, %v9973_v56  ;;  %v5642_v16 = vrot.slane %v1666_v37, %v9983_v0  ;;  %v1904_v6 = vsel %vm973_vm0, %v515_v1, 0.0 }
 0x278   : > { %v5643_v20 = vsel %vm4518_vm6, %v5642_v16, %v5638_v9  ;;  %1884 = vadd.xlane.f32.xlu1 %v1883_v38  ;;  %1881 = vadd.xlane.f32.xlu0 %v1880_v12  ;;  %v518_v38 = vld [vmem:[%s9778_s29 + $0x9c8] sm:$0xff]  ;;  %v517_v12 = vld [vmem:[%s9778_s29 + $0x9c0] sm:$0xff] }
 0x279   : > { %v1675_v21 = vpop.xlane.xlu1 %1674  ;;  %v5648_v46 = vsel %vm4525_vm7, %v5647_v14, %v5643_v20  ;;  %v1672_v51 = vpop.xlane.xlu0 %1671  ;;  %v1913_v20 = vsel %vm973_vm0, %v518_v38, 0.0 }
 0x27a   : > { %v5657_v26 = vrot.slane %v1675_v21, %v9990_v7  ;;  %v5652_v27 = vrot.slane %v1672_v51, %v9993_v8  ;;  %v1910_v21 = vsel %vm973_vm0, %v517_v12, 0.0 }
 0x27c   : > { %v5653_v36 = vsel %vm14719_vm11, %v5652_v27, %v5648_v46  ;;  %1890 = vadd.xlane.f32.xlu1 %v1889_v24  ;;  %1887 = vadd.xlane.f32.xlu0 %v1886_v25  ;;  %vm14720_vm11 = vcmask 786112   ;;  %v520_v25 = vld [vmem:[%s9778_s29 + $0x9d8] sm:$0xff] }
 0x27d   : > { %v1681_v59 = vpop.xlane.xlu1 %1680  ;;  %v5658_v62 = vsel %vm4539_vm9, %v5657_v26, %v5653_v36  ;;  %v1678_v39 = vpop.xlane.xlu0 %1677  ;;  %v519_v26 = vld [vmem:[%s9778_s29 + $0x9d0] sm:$0xff]  ;;  %v1919_v36 = vsel %vm973_vm0, %v520_v25, 0.0 }
 0x27e   : > { %v5667_v48 = vrot.slane %v1681_v59, %v10012_v29  ;;  %v5662_v49 = vrot.slane %v1678_v39, %v10015_v30  ;;  %v1916_v59 = vsel %vm973_vm0, %v519_v26, 0.0  ;;  %v522_v39 = vld [vmem:[%s9778_s29 + $0x9e8] sm:$0xff] }
 0x27f   : > { %v1925_v13 = vsel %vm973_vm0, %v522_v39, 0.0 }
 0x280   : > { %v5663_v10 = vsel %vm4546_vm10, %v5662_v49, %v5658_v62  ;;  %1896 = vadd.xlane.f32.xlu1 %v1895_v42  ;;  %1893 = vadd.xlane.f32.xlu0 %v1892_v47  ;;  %v521_v42 = vld [vmem:[%s9778_s29 + $0x9e0] sm:$0xff] }
 0x281   : > { %v1687_v52 = vpop.xlane.xlu1 %1686  ;;  %v5668_v53 = vsel %vm14720_vm11, %v5667_v48, %v5663_v10  ;;  %v1684_v55 = vpop.xlane.xlu0 %1683  ;;  %v1922_v10 = vsel %vm973_vm0, %v521_v42, 0.0  ;;  %vm14721_vm11 = vcmask 589312  }
 0x282   : > { %v5677_v58 = vrot.slane %v1687_v52, %v10022_v43  ;;  %v5672_v61 = vrot.slane %v1684_v55, %v10025_v44  ;;  %v524_v55 = vld [vmem:[%s9778_s29 + $0x9f8] sm:$0xff] }
 0x283   : > { %v1931_v1 = vsel %vm973_vm0, %v524_v55, 0.0 }
 0x284   : > { %v5673_v2 = vsel %vm4560_vm12, %v5672_v61, %v5668_v53  ;;  %1902 = vadd.xlane.f32.xlu1 %v1901_v11  ;;  %1899 = vadd.xlane.f32.xlu0 %v1898_v57  ;;  %v523_v11 = vld [vmem:[%s9778_s29 + $0x9f0] sm:$0xff] }
 0x285   : > { %v1693_v3 = vpop.xlane.xlu1 %1692  ;;  %v5678_v4 = vsel %vm4567_vm13, %v5677_v58, %v5673_v2  ;;  %v1690_v23 = vpop.xlane.xlu0 %1689  ;;  %v1928_v2 = vsel %vm973_vm0, %v523_v11, 0.0 }
 0x286   : > { %v5687_v9 = vrot.slane %v1693_v3, %v10040_v15  ;;  %v5682_v37 = vrot.slane %v1690_v23, %v10043_v60  ;;  %v526_v23 = vld [vmem:[%s9778_s29 + $0xa08] sm:$0xff] }
 0x287   : > { %v1937_v12 = vsel %vm973_vm0, %v526_v23, 0.0 }
 0x288   : > { %v5683_v14 = vsel %vm4574_vm14, %v5682_v37, %v5678_v4  ;;  %1908 = vadd.xlane.f32.xlu1 %v1907_v5  ;;  %1905 = vadd.xlane.f32.xlu0 %v1904_v6  ;;  %v525_v5 = vld [vmem:[%s9778_s29 + $0xa00] sm:$0xff] }
 0x289   : > { %v5688_v16 = vsel %vm4581_vm15, %v5687_v9, %v5683_v14  ;;  %v1699_v17 = vpop.xlane.xlu1 %1698  ;;  %v1696_v19 = vpop.xlane.xlu0 %1695  ;;  %v1934_v14 = vsel %vm973_vm0, %v525_v5, 0.0 }
 0x28a   : > { %v10993_v46 = vsel %vm14694_vm8, %v5688_v16, %v10792_v63  ;;  %v5696_v51 = vrot.slane %v1699_v17, %v9946_v33  ;;  %v5692_v24 = vrot.slane %v1696_v19, %v9940_v31  ;;  %v528_v19 = vld [vmem:[%s9778_s29 + $0xa18] sm:$0xff]  ;;  %vm14723_vm8 = vcmask 589312  }
 0x28b   : > { %v1943_v26 = vsel %vm973_vm0, %v528_v19, 0.0 }
 0x28c   : > { %v5697_v27 = vsel %vm4483_vm1, %v5696_v51, %v5692_v24  ;;  %1914 = vadd.xlane.f32.xlu1 %v1913_v20  ;;  %1911 = vadd.xlane.f32.xlu0 %v1910_v21  ;;  %v527_v20 = vld [vmem:[%s9778_s29 + $0xa10] sm:$0xff] }
 0x28d   : > { %v1705_v28 = vpop.xlane.xlu1 %1704  ;;  %v1702_v34 = vpop.xlane.xlu0 %1701 }
 0x28e   : > { %v5706_v63 = vrot.slane %v1705_v28, %v9943_v32  ;;  %v5701_v62 = vrot.slane %v1702_v34, %v9950_v35 }
 0x290   : > { %v5702_v47 = vsel %vm14697_vm2, %v5701_v62, %v5697_v27  ;;  %1920 = vadd.xlane.f32.xlu1 %v1919_v36  ;;  %1917 = vadd.xlane.f32.xlu0 %v1916_v59  ;;  %v1940_v27 = vsel %vm973_vm0, %v527_v20, 0.0  ;;  %v530_v36 = vld [vmem:[%s9778_s29 + $0xa28] sm:$0xff]  ;;  %v529_v59 = vld [vmem:[%s9778_s29 + $0xa20] sm:$0xff] }
 0x291   : > { %v1711_v48 = vpop.xlane.xlu1 %1710  ;;  %v5707_v49 = vsel %vm4497_vm3, %v5706_v63, %v5702_v47  ;;  %v1708_v50 = vpop.xlane.xlu0 %1707  ;;  %v1949_v47 = vsel %vm973_vm0, %v530_v36, 0.0 }
 0x292   : > { %v5716_v52 = vrot.slane %v1711_v48, %v9955_v40  ;;  %v5711_v53 = vrot.slane %v1708_v50, %v9958_v41  ;;  %v1946_v48 = vsel %vm973_vm0, %v529_v59, 0.0 }
 0x294   : > { %v5712_v57 = vsel %vm4504_vm4, %v5711_v53, %v5707_v49  ;;  %1926 = vadd.xlane.f32.xlu1 %v1925_v13  ;;  %1923 = vadd.xlane.f32.xlu0 %v1922_v10  ;;  %v532_v13 = vld [vmem:[%s9778_s29 + $0xa38] sm:$0xff]  ;;  %v531_v10 = vld [vmem:[%s9778_s29 + $0xa30] sm:$0xff] }
 0x295   : > { %v1717_v58 = vpop.xlane.xlu1 %1716  ;;  %v5717_v61 = vsel %vm4511_vm5, %v5716_v52, %v5712_v57  ;;  %v1714_v22 = vpop.xlane.xlu0 %1713  ;;  %v1955_v57 = vsel %vm973_vm0, %v532_v13, 0.0 }
 0x296   : > { %v5726_v3 = vrot.slane %v1717_v58, %v9973_v56  ;;  %v5721_v4 = vrot.slane %v1714_v22, %v9983_v0  ;;  %v1952_v58 = vsel %vm973_vm0, %v531_v10, 0.0 }
 0x298   : > { %v5722_v6 = vsel %vm4518_vm6, %v5721_v4, %v5717_v61  ;;  %1932 = vadd.xlane.f32.xlu1 %v1931_v1  ;;  %1929 = vadd.xlane.f32.xlu0 %v1928_v2  ;;  %v534_v1 = vld [vmem:[%s9778_s29 + $0xa48] sm:$0xff]  ;;  %v533_v2 = vld [vmem:[%s9778_s29 + $0xa40] sm:$0xff] }
 0x299   : > { %v1723_v9 = vpop.xlane.xlu1 %1722  ;;  %v5727_v37 = vsel %vm4525_vm7, %v5726_v3, %v5722_v6  ;;  %v1720_v38 = vpop.xlane.xlu0 %1719  ;;  %v1961_v6 = vsel %vm973_vm0, %v534_v1, 0.0 }
 0x29a   : > { %v5736_v16 = vrot.slane %v1723_v9, %v9990_v7  ;;  %v5731_v17 = vrot.slane %v1720_v38, %v9993_v8  ;;  %v1958_v9 = vsel %vm973_vm0, %v533_v2, 0.0 }
 0x29c   : > { %v5732_v21 = vsel %vm14721_vm11, %v5731_v17, %v5727_v37  ;;  %1938 = vadd.xlane.f32.xlu1 %v1937_v12  ;;  %1935 = vadd.xlane.f32.xlu0 %v1934_v14  ;;  %vm14722_vm11 = vcmask 786112   ;;  %v536_v12 = vld [vmem:[%s9778_s29 + $0xa58] sm:$0xff]  ;;  %v535_v14 = vld [vmem:[%s9778_s29 + $0xa50] sm:$0xff] }
 0x29d   : > { %v1729_v51 = vpop.xlane.xlu1 %1728  ;;  %v5737_v24 = vsel %vm4539_vm9, %v5736_v16, %v5732_v21  ;;  %v1726_v25 = vpop.xlane.xlu0 %1725  ;;  %v1967_v21 = vsel %vm973_vm0, %v536_v12, 0.0 }
 0x29e   : > { %v5746_v28 = vrot.slane %v1729_v51, %v10012_v29  ;;  %v5741_v34 = vrot.slane %v1726_v25, %v10015_v30  ;;  %v1964_v51 = vsel %vm973_vm0, %v535_v14, 0.0 }
 0x2a0   : > { %v5742_v63 = vsel %vm4546_vm10, %v5741_v34, %v5737_v24  ;;  %1944 = vadd.xlane.f32.xlu1 %v1943_v26  ;;  %1941 = vadd.xlane.f32.xlu0 %v1940_v27  ;;  %v538_v26 = vld [vmem:[%s9778_s29 + $0xa68] sm:$0xff]  ;;  %v537_v27 = vld [vmem:[%s9778_s29 + $0xa60] sm:$0xff] }
 0x2a1   : > { %v1735_v62 = vpop.xlane.xlu1 %1734  ;;  %v5747_v39 = vsel %vm14722_vm11, %v5746_v28, %v5742_v63  ;;  %v1732_v42 = vpop.xlane.xlu0 %1731  ;;  %vm14695_vm11 = vcmask 1045509   ;;  %v1973_v59 = vsel %vm973_vm0, %v538_v26, 0.0  ;;  %v1970_v63 = vsel %vm973_vm0, %v537_v27, 0.0 }
 0x2a2   : > { %v5756_v49 = vrot.slane %v1735_v62, %v10022_v43  ;;  %v5751_v50 = vrot.slane %v1732_v42, %v10025_v44  ;;  %v540_v42 = vld [vmem:[%s9778_s29 + $0xa78] sm:$0xff] }
 0x2a3   : > { %v1979_v10 = vsel %vm973_vm0, %v540_v42, 0.0 }
 0x2a4   : > { %v5752_v52 = vsel %vm4560_vm12, %v5751_v50, %v5747_v39  ;;  %1950 = vadd.xlane.f32.xlu1 %v1949_v47  ;;  %1947 = vadd.xlane.f32.xlu0 %v1946_v48  ;;  %v539_v47 = vld [vmem:[%s9778_s29 + $0xa70] sm:$0xff] }
 0x2a5   : > { %v1741_v53 = vpop.xlane.xlu1 %1740  ;;  %v5757_v55 = vsel %vm4567_vm13, %v5756_v49, %v5752_v52  ;;  %v1738_v11 = vpop.xlane.xlu0 %1737  ;;  %v1976_v52 = vsel %vm973_vm0, %v539_v47, 0.0 }
 0x2a6   : > { %v5766_v61 = vrot.slane %v1741_v53, %v10040_v15  ;;  %v5761_v22 = vrot.slane %v1738_v11, %v10043_v60  ;;  %v542_v11 = vld [vmem:[%s9778_s29 + $0xa88] sm:$0xff] }
 0x2a7   : > { %v1985_v2 = vsel %vm973_vm0, %v542_v11, 0.0 }
 0x2a8   : > { %v5762_v3 = vsel %vm4574_vm14, %v5761_v22, %v5757_v55  ;;  %1956 = vadd.xlane.f32.xlu1 %v1955_v57  ;;  %1953 = vadd.xlane.f32.xlu0 %v1952_v58  ;;  %v541_v57 = vld [vmem:[%s9778_s29 + $0xa80] sm:$0xff] }
 0x2a9   : > { %v5767_v4 = vsel %vm4581_vm15, %v5766_v61, %v5762_v3  ;;  %v1747_v23 = vpop.xlane.xlu1 %1746  ;;  %v1744_v5 = vpop.xlane.xlu0 %1743  ;;  %v1982_v3 = vsel %vm973_vm0, %v541_v57, 0.0 }
 0x2aa   : > { %v5775_v37 = vrot.slane %v1747_v23, %v9946_v33  ;;  %v5771_v38 = vrot.slane %v1744_v5, %v9940_v31  ;;  %v11064_v16 = vsel %vm14695_vm11, %v5767_v4, %v10863_v54  ;;  %v544_v5 = vld [vmem:[%s9778_s29 + $0xa98] sm:$0xff] }
 0x2ab   : > { %v1991_v14 = vsel %vm973_vm0, %v544_v5, 0.0  ;;  %v551_v5 = vld [vmem:[%s9778_s29 + $0xad0] sm:$0xff] }
 0x2ac   : > { %v5776_v17 = vsel %vm4483_vm1, %v5775_v37, %v5771_v38  ;;  %1962 = vadd.xlane.f32.xlu1 %v1961_v6  ;;  %1959 = vadd.xlane.f32.xlu0 %v1958_v9  ;;  %v543_v6 = vld [vmem:[%s9778_s29 + $0xa90] sm:$0xff] }
 0x2ad   : > { %v1753_v19 = vpop.xlane.xlu1 %1752  ;;  %v1750_v20 = vpop.xlane.xlu0 %1749 }
 0x2ae   : > { %v5785_v24 = vrot.slane %v1753_v19, %v9943_v32  ;;  %v5780_v25 = vrot.slane %v1750_v20, %v9950_v35 }
 0x2b0   : > { %v5781_v54 = vsel %vm14697_vm2, %v5780_v25, %v5776_v17  ;;  %1968 = vadd.xlane.f32.xlu1 %v1967_v21  ;;  %1965 = vadd.xlane.f32.xlu0 %v1964_v51  ;;  %v1988_v17 = vsel %vm973_vm0, %v543_v6, 0.0  ;;  %v546_v21 = vld [vmem:[%s9778_s29 + $0xaa8] sm:$0xff]  ;;  %v545_v51 = vld [vmem:[%s9778_s29 + $0xaa0] sm:$0xff] }
 0x2b1   : > { %v1759_v28 = vpop.xlane.xlu1 %1758  ;;  %v5786_v34 = vsel %vm4497_vm3, %v5785_v24, %v5781_v54  ;;  %v1756_v36 = vpop.xlane.xlu0 %1755  ;;  %v1997_v54 = vsel %vm973_vm0, %v546_v21, 0.0 }
 0x2b2   : > { %v5795_v62 = vrot.slane %v1759_v28, %v9955_v40  ;;  %v5790_v39 = vrot.slane %v1756_v36, %v9958_v41  ;;  %v1994_v28 = vsel %vm973_vm0, %v545_v51, 0.0 }
 0x2b4   : > { %v5791_v48 = vsel %vm4504_vm4, %v5790_v39, %v5786_v34  ;;  %1974 = vadd.xlane.f32.xlu1 %v1973_v59  ;;  %1971 = vadd.xlane.f32.xlu0 %v1970_v63  ;;  %v548_v59 = vld [vmem:[%s9778_s29 + $0xab8] sm:$0xff]  ;;  %v547_v63 = vld [vmem:[%s9778_s29 + $0xab0] sm:$0xff] }
 0x2b5   : > { %v1765_v49 = vpop.xlane.xlu1 %1764  ;;  %v5796_v50 = vsel %vm4511_vm5, %v5795_v62, %v5791_v48  ;;  %v1762_v13 = vpop.xlane.xlu0 %1761  ;;  %v2003_v48 = vsel %vm973_vm0, %v548_v59, 0.0  ;;  %v554_v59 = vld [vmem:[%s9778_s29 + $0xae8] sm:$0xff] }
 0x2b6   : > { %v5805_v53 = vrot.slane %v1765_v49, %v9973_v56  ;;  %v5800_v55 = vrot.slane %v1762_v13, %v9983_v0  ;;  %v2000_v49 = vsel %vm973_vm0, %v547_v63, 0.0  ;;  %v553_v63 = vld [vmem:[%s9778_s29 + $0xae0] sm:$0xff] }
 0x2b8   : > { %v5801_v58 = vsel %vm4518_vm6, %v5800_v55, %v5796_v50  ;;  %1980 = vadd.xlane.f32.xlu1 %v1979_v10  ;;  %1977 = vadd.xlane.f32.xlu0 %v1976_v52  ;;  %v550_v10 = vld [vmem:[%s9778_s29 + $0xac8] sm:$0xff]  ;;  %v549_v52 = vld [vmem:[%s9778_s29 + $0xac0] sm:$0xff] }
 0x2b9   : > { %v1771_v61 = vpop.xlane.xlu1 %1770  ;;  %v5806_v22 = vsel %vm4525_vm7, %v5805_v53, %v5801_v58  ;;  %v1768_v1 = vpop.xlane.xlu0 %1767  ;;  %v2009_v58 = vsel %vm973_vm0, %v550_v10, 0.0  ;;  %v3304_v10 = vld [vmem:[%s14686_s1 + $0xd0] sm:$0xff] }
 0x2ba   : > { %v5815_v4 = vrot.slane %v1771_v61, %v9990_v7  ;;  %v5810_v23 = vrot.slane %v1768_v1, %v9993_v8  ;;  %v2006_v61 = vsel %vm973_vm0, %v549_v52, 0.0  ;;  %v3287_v1 = vld [vmem:[%s14686_s1 + $0x48] sm:$0xff] }
 0x2bc   : > { %v5811_v9 = vsel %vm14723_vm8, %v5810_v23, %v5806_v22  ;;  %1986 = vadd.xlane.f32.xlu1 %v1985_v2  ;;  %1983 = vadd.xlane.f32.xlu0 %v1982_v3  ;;  %vm14724_vm8 = vcmask 786112   ;;  %v3279_v22 = vld [vmem:[%s14686_s1 + $0x8] sm:$0xff]  ;;  %v3281_v2 = vld [vmem:[%s14686_s1 + $0x18] sm:$0xff] }
 0x2bd   : > { %v1777_v37 = vpop.xlane.xlu1 %1776  ;;  %v5816_v38 = vsel %vm4539_vm9, %v5815_v4, %v5811_v9  ;;  %v1774_v12 = vpop.xlane.xlu0 %1773  ;;  %v552_v23 = vld [vmem:[%s9778_s29 + $0xad8] sm:$0xff]  ;;  %v9172_v6 = vpack.c.bf16 %v3287_v1, %v3279_v22  ;;  %v3319_v22 = vld [vmem:[%s14686_s1 + $0x148] sm:$0xff] }
 0x2be   : > { %v5825_v19 = vrot.slane %v1777_v37, %v10012_v29  ;;  %v5820_v20 = vrot.slane %v1774_v12, %v10015_v30  ;;  %v3289_v9 = vld [vmem:[%s14686_s1 + $0x58] sm:$0xff]  ;;  %v3278_v12 = vld [vmem:[%s14686_s1] sm:$0xff] }
 0x2bf   : > { %9173 = vmatprep.subr.bf16.mxu0 %v9172_v6  ;;  %v3313_v1 = vld [vmem:[%s14686_s1 + $0x118] sm:$0xff] }
 0x2c0   : > { %v5821_v24 = vsel %vm4546_vm10, %v5820_v20, %v5816_v38  ;;  %1992 = vadd.xlane.f32.xlu1 %v1991_v14  ;;  %1989 = vadd.xlane.f32.xlu0 %v1988_v17  ;;  %v9268_v38 = vpack.c.bf16 %v3289_v9, %v3281_v2  ;;  %v3286_v14 = vld [vmem:[%s14686_s1 + $0x40] sm:$0xff]  ;;  %v3280_v17 = vld [vmem:[%s14686_s1 + $0x10] sm:$0xff]  ;;  %v3321_v6 = vld [vmem:[%s14686_s1 + $0x158] sm:$0xff] }
 0x2c1   : > { %v1783_v25 = vpop.xlane.xlu1 %1782  ;;  %v5826_v26 = vsel %vm14724_vm8, %v5825_v19, %v5821_v24  ;;  %v1780_v27 = vpop.xlane.xlu0 %1779  ;;  %v3288_v20 = vld [vmem:[%s14686_s1 + $0x50] sm:$0xff]  ;;  %v2015_v24 = vsel %vm973_vm0, %v552_v23, 0.0  ;;  %v9276_v9 = vpack.c.bf16 %v3321_v6, %v3313_v1  ;;  %v3345_v1 = vld [vmem:[%s14686_s1 + $0x218] sm:$0xff]  ;;  %vm14725_vm8 = vcmask 589312  }
 0x2c2   : > { %v5835_v34 = vrot.slane %v1783_v25, %v10022_v43  ;;  %v5830_v36 = vrot.slane %v1780_v27, %v10025_v44  ;;  %v2012_v25 = vsel %vm973_vm0, %v551_v5, 0.0  ;;  %9269 = vmatprep.subr.bf16.mxu1 %v9268_v38  ;;  %v3295_v27 = vld [vmem:[%s14686_s1 + $0x88] sm:$0xff]  ;;  %v555_v23 = vld [vmem:[%s9778_s29 + $0xaf0] sm:$0xff]  ;;  %v3310_v38 = vld [vmem:[%s14686_s1 + $0x100] sm:$0xff] }
 0x2c3   : > { %v3353_v6 = vld [vmem:[%s14686_s1 + $0x258] sm:$0xff] }
 0x2c4   : > { %v5831_v62 = vsel %vm4560_vm12, %v5830_v36, %v5826_v26  ;;  %1998 = vadd.xlane.f32.xlu1 %v1997_v54  ;;  %1995 = vadd.xlane.f32.xlu0 %v1994_v28  ;;  %v9270_v26 = vpack.c.bf16 %v3288_v20, %v3280_v17  ;;  %v3303_v54 = vld [vmem:[%s14686_s1 + $0xc8] sm:$0xff]  ;;  %v3297_v28 = vld [vmem:[%s14686_s1 + $0x98] sm:$0xff] }
 0x2c5   : > { %v1789_v39 = vpop.xlane.xlu1 %1788  ;;  %v5836_v42 = vsel %vm4567_vm13, %v5835_v34, %v5831_v62  ;;  %v1786_v47 = vpop.xlane.xlu0 %1785  ;;  %v9176_v62 = vpack.c.bf16 %v3303_v54, %v3295_v27  ;;  %v3327_v27 = vld [vmem:[%s14686_s1 + $0x188] sm:$0xff] }
 0x2c6   : > { %v5845_v50 = vrot.slane %v1789_v39, %v10040_v15  ;;  %v5840_v13 = vrot.slane %v1786_v47, %v10043_v60  ;;  %v3305_v39 = vld [vmem:[%s14686_s1 + $0xd8] sm:$0xff]  ;;  %9271 = vmatpush1.bf16.msra.mxu1 %v9270_v26  ;;  %v3294_v47 = vld [vmem:[%s14686_s1 + $0x80] sm:$0xff]  ;;  %v3335_v54 = vld [vmem:[%s14686_s1 + $0x1c8] sm:$0xff] }
 0x2c8   : > { %v5841_v53 = vsel %vm4574_vm14, %v5840_v13, %v5836_v42  ;;  %2004 = vadd.xlane.f32.xlu1 %v2003_v48  ;;  %2001 = vadd.xlane.f32.xlu0 %v2000_v49  ;;  %v9272_v42 = vpack.c.bf16 %v3305_v39, %v3297_v28  ;;  %v3302_v48 = vld [vmem:[%s14686_s1 + $0xc0] sm:$0xff]  ;;  %v3296_v49 = vld [vmem:[%s14686_s1 + $0x90] sm:$0xff]  ;;  %v3329_v28 = vld [vmem:[%s14686_s1 + $0x198] sm:$0xff] }
 0x2c9   : > { %v5846_v55 = vsel %vm4581_vm15, %v5845_v50, %v5841_v53  ;;  %v1795_v11 = vpop.xlane.xlu1 %1794  ;;  %v1792_v57 = vpop.xlane.xlu0 %1791  ;;  %v9178_v13 = vpack.c.bf16 %v3302_v48, %v3294_v47  ;;  %v3337_v39 = vld [vmem:[%s14686_s1 + $0x1d8] sm:$0xff]  ;;  %v3326_v47 = vld [vmem:[%s14686_s1 + $0x180] sm:$0xff] }
 0x2ca   : > { %v5854_v3 = vrot.slane %v1795_v11, %v9946_v33  ;;  %v5850_v4 = vrot.slane %v1792_v57, %v9940_v31  ;;  %v11143_v37 = vsel %vm14695_vm11, %v5846_v55, %v10930_v45  ;;  %v9174_v45 = vpack.c.bf16 %v3286_v14, %v3278_v12  ;;  %9273 = vmatprep.subr.bf16.mxu1 %v9272_v42  ;;  %v3318_v12 = vld [vmem:[%s14686_s1 + $0x140] sm:$0xff]  ;;  %v3312_v14 = vld [vmem:[%s14686_s1 + $0x110] sm:$0xff] }
 0x2cb   : > { %v2021_v11 = vsel %vm973_vm0, %v554_v59, 0.0  ;;  %v2018_v57 = vsel %vm973_vm0, %v553_v63, 0.0  ;;  %v558_v59 = vld [vmem:[%s9778_s29 + $0xb08] sm:$0xff]  ;;  %v557_v63 = vld [vmem:[%s9778_s29 + $0xb00] sm:$0xff]  ;;  %v9280_v42 = vpack.c.bf16 %v3337_v39, %v3329_v28  ;;  %v3361_v28 = vld [vmem:[%s14686_s1 + $0x298] sm:$0xff] }
 0x2cc   : > { %v5855_v19 = vsel %vm4483_vm1, %v5854_v3, %v5850_v4  ;;  %2010 = vadd.xlane.f32.xlu1 %v2009_v58  ;;  %2007 = vadd.xlane.f32.xlu0 %v2006_v61  ;;  %v9274_v58 = vpack.c.bf16 %v3304_v10, %v3296_v49  ;;  %v3311_v61 = vld [vmem:[%s14686_s1 + $0x108] sm:$0xff]  ;;  %v556_v4 = vld [vmem:[%s9778_s29 + $0xaf8] sm:$0xff]  ;;  %v3334_v48 = vld [vmem:[%s14686_s1 + $0x1c0] sm:$0xff] }
 0x2cd   : > { %v1801_v21 = vpop.xlane.xlu1 %1800  ;;  %v1798_v51 = vpop.xlane.xlu0 %1797  ;;  %9175 = vmatpush1.bf16.msra.mxu0 %v9174_v45  ;;  %v9180_v5 = vpack.c.bf16 %v3319_v22, %v3311_v61  ;;  %v3320_v45 = vld [vmem:[%s14686_s1 + $0x150] sm:$0xff]  ;;  %v3343_v61 = vld [vmem:[%s14686_s1 + $0x208] sm:$0xff]  ;;  %v3369_v39 = vld [vmem:[%s14686_s1 + $0x2d8] sm:$0xff] }
 0x2ce   : > { %v5864_v34 = vrot.slane %v1801_v21, %v9943_v32  ;;  %v5859_v36 = vrot.slane %v1798_v51, %v9950_v35  ;;  %9177 = vmatprep.subr.bf16.mxu0 %v9176_v62  ;;  %9275 = vmatpush1.bf16.msra.mxu1 %v9274_v58  ;;  %v9278_v26 = vpack.c.bf16 %v3320_v45, %v3312_v14  ;;  %v3328_v49 = vld [vmem:[%s14686_s1 + $0x190] sm:$0xff]  ;;  %v3351_v22 = vld [vmem:[%s14686_s1 + $0x248] sm:$0xff] }
 0x2cf   : > { %9277 = vmatprep.subr.bf16.mxu1 %v9276_v9  ;;  %v9184_v62 = vpack.c.bf16 %v3335_v54, %v3327_v27  ;;  %v3336_v10 = vld [vmem:[%s14686_s1 + $0x1d0] sm:$0xff]  ;;  %v9284_v9 = vpack.c.bf16 %v3353_v6, %v3345_v1  ;;  %v3359_v27 = vld [vmem:[%s14686_s1 + $0x288] sm:$0xff]  ;;  %v3377_v1 = vld [vmem:[%s14686_s1 + $0x318] sm:$0xff] }
 0x2d0   : > { %v5860_v50 = vsel %vm14697_vm2, %v5859_v36, %v5855_v19  ;;  %2016 = vadd.xlane.f32.xlu1 %v2015_v24  ;;  %2013 = vadd.xlane.f32.xlu0 %v2012_v25  ;;  %v9182_v19 = vpack.c.bf16 %v3318_v12, %v3310_v38  ;;  %v2027_v24 = vsel %vm973_vm0, %v556_v4, 0.0  ;;  %v2024_v25 = vsel %vm973_vm0, %v555_v23, 0.0  ;;  %v560_v4 = vld [vmem:[%s9778_s29 + $0xb18] sm:$0xff]  ;;  %v559_v23 = vld [vmem:[%s9778_s29 + $0xb10] sm:$0xff]  ;;  %v3342_v38 = vld [vmem:[%s14686_s1 + $0x200] sm:$0xff] }
 0x2d1   : > { %v1807_v52 = vpop.xlane.xlu1 %1806  ;;  %v5865_v53 = vsel %vm4497_vm3, %v5864_v34, %v5860_v50  ;;  %v1804_v55 = vpop.xlane.xlu0 %1803  ;;  %9179 = vmatpush1.bf16.msra.mxu0 %v9178_v13  ;;  %v9186_v13 = vpack.c.bf16 %v3334_v48, %v3326_v47  ;;  %v9282_v58 = vpack.c.bf16 %v3336_v10, %v3328_v49  ;;  %v3350_v12 = vld [vmem:[%s14686_s1 + $0x240] sm:$0xff]  ;;  %v3344_v14 = vld [vmem:[%s14686_s1 + $0x210] sm:$0xff]  ;;  %v3367_v54 = vld [vmem:[%s14686_s1 + $0x2c8] sm:$0xff] }
 0x2d2   : > { %v5874_v2 = vrot.slane %v1807_v52, %v9955_v40  ;;  %v5869_v3 = vrot.slane %v1804_v55, %v9958_v41  ;;  %9181 = vmatprep.subr.bf16.mxu0 %v9180_v5  ;;  %9279 = vmatpush1.bf16.msra.mxu1 %v9278_v26  ;;  %v9188_v5 = vpack.c.bf16 %v3351_v22, %v3343_v61  ;;  %v3352_v45 = vld [vmem:[%s14686_s1 + $0x250] sm:$0xff]  ;;  %v3358_v47 = vld [vmem:[%s14686_s1 + $0x280] sm:$0xff]  ;;  %v3375_v61 = vld [vmem:[%s14686_s1 + $0x308] sm:$0xff] }
 0x2d3   : > { %9281 = vmatprep.subr.bf16.mxu1 %v9280_v42  ;;  %v9286_v26 = vpack.c.bf16 %v3352_v45, %v3344_v14  ;;  %v9288_v42 = vpack.c.bf16 %v3369_v39, %v3361_v28  ;;  %v3366_v48 = vld [vmem:[%s14686_s1 + $0x2c0] sm:$0xff]  ;;  %v3360_v49 = vld [vmem:[%s14686_s1 + $0x290] sm:$0xff]  ;;  %v3383_v22 = vld [vmem:[%s14686_s1 + $0x348] sm:$0xff] }
 0x2d4   : > { %v5870_v17 = vsel %vm4504_vm4, %v5869_v3, %v5865_v53  ;;  %2022 = vadd.xlane.f32.xlu1 %v2021_v11  ;;  %2019 = vadd.xlane.f32.xlu0 %v2018_v57  ;;  %v2033_v11 = vsel %vm973_vm0, %v558_v59, 0.0  ;;  %v2030_v57 = vsel %vm973_vm0, %v557_v63, 0.0  ;;  %v562_v59 = vld [vmem:[%s9778_s29 + $0xb28] sm:$0xff]  ;;  %v561_v63 = vld [vmem:[%s9778_s29 + $0xb20] sm:$0xff]  ;;  %v3368_v10 = vld [vmem:[%s14686_s1 + $0x2d0] sm:$0xff] }
 0x2d5   : > { %v1813_v20 = vpop.xlane.xlu1 %1812  ;;  %v5875_v21 = vsel %vm4511_vm5, %v5874_v2, %v5870_v17  ;;  %v1810_v51 = vpop.xlane.xlu0 %1809  ;;  %9183 = vmatpush1.bf16.msra.mxu0 %v9182_v19  ;;  %v9190_v19 = vpack.c.bf16 %v3350_v12, %v3342_v38  ;;  %v3385_v6 = vld [vmem:[%s14686_s1 + $0x358] sm:$0xff]  ;;  %v3374_v38 = vld [vmem:[%s14686_s1 + $0x300] sm:$0xff]  ;;  %v3376_v14 = vld [vmem:[%s14686_s1 + $0x310] sm:$0xff] }
 0x2d6   : > { %v5884_v34 = vrot.slane %v1813_v20, %v9973_v56  ;;  %v5879_v36 = vrot.slane %v1810_v51, %v9983_v0  ;;  %9185 = vmatprep.subr.bf16.mxu0 %v9184_v62  ;;  %9283 = vmatpush1.bf16.msra.mxu1 %v9282_v58  ;;  %v9192_v62 = vpack.c.bf16 %v3367_v54, %v3359_v27  ;;  %v3382_v12 = vld [vmem:[%s14686_s1 + $0x340] sm:$0xff]  ;;  %v3384_v45 = vld [vmem:[%s14686_s1 + $0x350] sm:$0xff]  ;;  %v3391_v27 = vld [vmem:[%s14686_s1 + $0x388] sm:$0xff] }
 0x2d7   : > { %9285 = vmatprep.subr.bf16.mxu1 %v9284_v9  ;;  %v9290_v58 = vpack.c.bf16 %v3368_v10, %v3360_v49  ;;  %v9292_v9 = vpack.c.bf16 %v3385_v6, %v3377_v1  ;;  %v3399_v54 = vld [vmem:[%s14686_s1 + $0x3c8] sm:$0xff]  ;;  %v3393_v28 = vld [vmem:[%s14686_s1 + $0x398] sm:$0xff]  ;;  %v3392_v49 = vld [vmem:[%s14686_s1 + $0x390] sm:$0xff] }
 0x2d8   : > { %v5880_v50 = vsel %vm4518_vm6, %v5879_v36, %v5875_v21  ;;  %2028 = vadd.xlane.f32.xlu1 %v2027_v24  ;;  %2025 = vadd.xlane.f32.xlu0 %v2024_v25  ;;  %v2039_v24 = vsel %vm973_vm0, %v560_v4, 0.0  ;;  %v2036_v25 = vsel %vm973_vm0, %v559_v23, 0.0  ;;  %v564_v4 = vld [vmem:[%s9778_s29 + $0xb38] sm:$0xff]  ;;  %v563_v23 = vld [vmem:[%s9778_s29 + $0xb30] sm:$0xff] }
 0x2d9   : > { %v1819_v52 = vpop.xlane.xlu1 %1818  ;;  %v5885_v53 = vsel %vm4525_vm7, %v5884_v34, %v5880_v50  ;;  %v1816_v55 = vpop.xlane.xlu0 %1815  ;;  %9187 = vmatpush1.bf16.msra.mxu0 %v9186_v13  ;;  %v9194_v13 = vpack.c.bf16 %v3366_v48, %v3358_v47  ;;  %v3401_v39 = vld [vmem:[%s14686_s1 + $0x3d8] sm:$0xff]  ;;  %v3390_v47 = vld [vmem:[%s14686_s1 + $0x380] sm:$0xff]  ;;  %v3400_v10 = vld [vmem:[%s14686_s1 + $0x3d0] sm:$0xff] }
 0x2da   : > { %v5894_v2 = vrot.slane %v1819_v52, %v9990_v7  ;;  %v5889_v3 = vrot.slane %v1816_v55, %v9993_v8  ;;  %9189 = vmatprep.subr.bf16.mxu0 %v9188_v5  ;;  %9287 = vmatpush1.bf16.msra.mxu1 %v9286_v26  ;;  %v9196_v5 = vpack.c.bf16 %v3383_v22, %v3375_v61  ;;  %v3398_v48 = vld [vmem:[%s14686_s1 + $0x3c0] sm:$0xff]  ;;  %v3407_v61 = vld [vmem:[%s14686_s1 + $0x408] sm:$0xff]  ;;  %v3409_v1 = vld [vmem:[%s14686_s1 + $0x418] sm:$0xff] }
 0x2db   : > { %9289 = vmatprep.subr.bf16.mxu1 %v9288_v42  ;;  %v9294_v26 = vpack.c.bf16 %v3384_v45, %v3376_v14  ;;  %v9296_v42 = vpack.c.bf16 %v3401_v39, %v3393_v28  ;;  %v3415_v22 = vld [vmem:[%s14686_s1 + $0x448] sm:$0xff]  ;;  %v3417_v6 = vld [vmem:[%s14686_s1 + $0x458] sm:$0xff]  ;;  %v3414_v14 = vld [vmem:[%s14686_s1 + $0x440] sm:$0xff] }
 0x2dc   : > { %v5890_v17 = vsel %vm14725_vm8, %v5889_v3, %v5885_v53  ;;  %2034 = vadd.xlane.f32.xlu1 %v2033_v11  ;;  %2031 = vadd.xlane.f32.xlu0 %v2030_v57  ;;  %vm14726_vm8 = vcmask 786112   ;;  %v2045_v11 = vsel %vm973_vm0, %v562_v59, 0.0  ;;  %v2042_v57 = vsel %vm973_vm0, %v561_v63, 0.0  ;;  %v566_v59 = vld [vmem:[%s9778_s29 + $0xb48] sm:$0xff]  ;;  %v565_v63 = vld [vmem:[%s9778_s29 + $0xb40] sm:$0xff]  ;;  %v3416_v45 = vld [vmem:[%s14686_s1 + $0x450] sm:$0xff] }
 0x2dd   : > { %v1825_v20 = vpop.xlane.xlu1 %1824  ;;  %v5895_v21 = vsel %vm4539_vm9, %v5894_v2, %v5890_v17  ;;  %v1822_v51 = vpop.xlane.xlu0 %1821  ;;  %9191 = vmatpush1.bf16.msra.mxu0 %v9190_v19  ;;  %v9198_v19 = vpack.c.bf16 %v3382_v12, %v3374_v38  ;;  %v9300_v38 = vpack.c.bf16 %v3417_v6, %v3409_v1  ;;  %v3406_v12 = vld [vmem:[%s14686_s1 + $0x400] sm:$0xff] }
 0x2de   : > { %v5904_v34 = vrot.slane %v1825_v20, %v10012_v29  ;;  %v5899_v36 = vrot.slane %v1822_v51, %v10015_v30  ;;  %9193 = vmatprep.subr.bf16.mxu0 %v9192_v62  ;;  %9291 = vmatpush1.bf16.msra.mxu1 %v9290_v58  ;;  %v9200_v62 = vpack.c.bf16 %v3399_v54, %v3391_v27  ;;  %v3431_v27 = vld [vmem:[%s14686_s1 + $0x4c8] sm:$0xff]  ;;  %v3425_v54 = vld [vmem:[%s14686_s1 + $0x498] sm:$0xff] }
 0x2df   : > { %9293 = vmatprep.subr.bf16.mxu1 %v9292_v9  ;;  %v9298_v58 = vpack.c.bf16 %v3400_v10, %v3392_v49 }
 0x2e0   : > { %v5900_v50 = vsel %vm4546_vm10, %v5899_v36, %v5895_v21  ;;  %2040 = vadd.xlane.f32.xlu1 %v2039_v24  ;;  %2037 = vadd.xlane.f32.xlu0 %v2036_v25  ;;  %v2051_v24 = vsel %vm973_vm0, %v564_v4, 0.0  ;;  %v2048_v25 = vsel %vm973_vm0, %v563_v23, 0.0  ;;  %v568_v4 = vld [vmem:[%s9778_s29 + $0xb58] sm:$0xff]  ;;  %v567_v23 = vld [vmem:[%s9778_s29 + $0xb50] sm:$0xff] }
 0x2e1   : > { %v1831_v52 = vpop.xlane.xlu1 %1830  ;;  %v5905_v53 = vsel %vm14726_vm8, %v5904_v34, %v5900_v50  ;;  %v1828_v55 = vpop.xlane.xlu0 %1827  ;;  %9195 = vmatpush1.bf16.msra.mxu0 %v9194_v13  ;;  %v9202_v13 = vpack.c.bf16 %v3398_v48, %v3390_v47  ;;  %v3430_v47 = vld [vmem:[%s14686_s1 + $0x4c0] sm:$0xff]  ;;  %v3424_v48 = vld [vmem:[%s14686_s1 + $0x490] sm:$0xff]  ;;  %vm14727_vm8 = vcmask 589312  }
 0x2e2   : > { %v5914_v2 = vrot.slane %v1831_v52, %v10022_v43  ;;  %v5909_v3 = vrot.slane %v1828_v55, %v10025_v44  ;;  %9197 = vmatprep.subr.bf16.mxu0 %v9196_v5  ;;  %9295 = vmatpush1.bf16.msra.mxu1 %v9294_v26  ;;  %v9204_v5 = vpack.c.bf16 %v3415_v22, %v3407_v61  ;;  %v3423_v26 = vld [vmem:[%s14686_s1 + $0x488] sm:$0xff]  ;;  %v3441_v22 = vld [vmem:[%s14686_s1 + $0x518] sm:$0xff] }
 0x2e3   : > { %9297 = vmatprep.subr.bf16.mxu1 %v9296_v42  ;;  %v3422_v42 = vld [vmem:[%s14686_s1 + $0x480] sm:$0xff]  ;;  %v3447_v61 = vld [vmem:[%s14686_s1 + $0x548] sm:$0xff] }
 0x2e4   : > { %v5910_v17 = vsel %vm4560_vm12, %v5909_v3, %v5905_v53  ;;  %2046 = vadd.xlane.f32.xlu1 %v2045_v11  ;;  %2043 = vadd.xlane.f32.xlu0 %v2042_v57  ;;  %v2057_v11 = vsel %vm973_vm0, %v566_v59, 0.0  ;;  %v2054_v57 = vsel %vm973_vm0, %v565_v63, 0.0  ;;  %v569_v59 = vld [vmem:[%s9778_s29 + $0xb60] sm:$0xff]  ;;  %v9208_v63 = vpack.c.bf16 %v3431_v27, %v3423_v26  ;;  %v3455_v26 = vld [vmem:[%s14686_s1 + $0x588] sm:$0xff] }
 0x2e5   : > { %v1837_v20 = vpop.xlane.xlu1 %1836  ;;  %v5915_v21 = vsel %vm4567_vm13, %v5914_v2, %v5910_v17  ;;  %v1834_v51 = vpop.xlane.xlu0 %1833  ;;  %9199 = vmatpush1.bf16.msra.mxu0 %v9198_v19  ;;  %v3408_v17 = vld [vmem:[%s14686_s1 + $0x410] sm:$0xff]  ;;  %v3463_v27 = vld [vmem:[%s14686_s1 + $0x5c8] sm:$0xff] }
 0x2e6   : > { %v5924_v34 = vrot.slane %v1837_v20, %v10040_v15  ;;  %v5919_v36 = vrot.slane %v1834_v51, %v10043_v60  ;;  %9201 = vmatprep.subr.bf16.mxu0 %v9200_v62  ;;  %9299 = vmatpush1.bf16.msra.mxu1 %v9298_v58  ;;  %v2063_v51 = vsel %vm973_vm0, %v568_v4, 0.0  ;;  %v3433_v62 = vld [vmem:[%s14686_s1 + $0x4d8] sm:$0xff]  ;;  %v3439_v58 = vld [vmem:[%s14686_s1 + $0x508] sm:$0xff]  ;;  %v571_v4 = vld [vmem:[%s9778_s29 + $0xb70] sm:$0xff] }
 0x2e7   : > { %9301 = vmatprep.subr.bf16.mxu1 %v9300_v38  ;;  %v9304_v39 = vpack.c.bf16 %v3433_v62, %v3425_v54  ;;  %v3438_v38 = vld [vmem:[%s14686_s1 + $0x500] sm:$0xff]  ;;  %v3457_v54 = vld [vmem:[%s14686_s1 + $0x598] sm:$0xff] }
 0x2e8   : > { %v5920_v50 = vsel %vm4574_vm14, %v5919_v36, %v5915_v21  ;;  %2052 = vadd.xlane.f32.xlu1 %v2051_v24  ;;  %2049 = vadd.xlane.f32.xlu0 %v2048_v25  ;;  %v2060_v24 = vsel %vm973_vm0, %v567_v23, 0.0  ;;  %v9302_v25 = vpack.c.bf16 %v3416_v45, %v3408_v17  ;;  %v570_v36 = vld [vmem:[%s9778_s29 + $0xb68] sm:$0xff]  ;;  %v9212_v23 = vpack.c.bf16 %v3447_v61, %v3439_v58  ;;  %v3465_v62 = vld [vmem:[%s14686_s1 + $0x5d8] sm:$0xff] }
 0x2e9   : > { %v5925_v52 = vsel %vm4581_vm15, %v5924_v34, %v5920_v50  ;;  %v1843_v53 = vpop.xlane.xlu1 %1842  ;;  %v1840_v55 = vpop.xlane.xlu0 %1839  ;;  %9203 = vmatpush1.bf16.msra.mxu0 %v9202_v13  ;;  %v9210_v50 = vpack.c.bf16 %v3430_v47, %v3422_v42  ;;  %v3432_v13 = vld [vmem:[%s14686_s1 + $0x4d0] sm:$0xff]  ;;  %v3454_v42 = vld [vmem:[%s14686_s1 + $0x580] sm:$0xff]  ;;  %v3471_v58 = vld [vmem:[%s14686_s1 + $0x608] sm:$0xff] }
 0x2ea   : > { %v5933_v2 = vrot.slane %v1843_v53, %v9946_v33  ;;  %v5929_v3 = vrot.slane %v1840_v55, %v9940_v31  ;;  %v11402_v9 = vsel %vm14695_vm11, %v5925_v52, %v10993_v46  ;;  %v9206_v46 = vpack.c.bf16 %v3414_v14, %v3406_v12  ;;  %9205 = vmatprep.subr.bf16.mxu0 %v9204_v5  ;;  %v3449_v5 = vld [vmem:[%s14686_s1 + $0x558] sm:$0xff]  ;;  %v3446_v12 = vld [vmem:[%s14686_s1 + $0x540] sm:$0xff]  ;;  %v3440_v14 = vld [vmem:[%s14686_s1 + $0x510] sm:$0xff] }
 0x2eb   : > { %9303 = vmatpush1.bf16.msra.mxu1 %v9302_v25  ;;  %v2069_v55 = vsel %vm973_vm0, %v570_v36, 0.0  ;;  %v9308_v6 = vpack.c.bf16 %v3449_v5, %v3441_v22  ;;  %v574_v36 = vld [vmem:[%s9778_s29 + $0xb88] sm:$0xff]  ;;  %v3462_v47 = vld [vmem:[%s14686_s1 + $0x5c0] sm:$0xff]  ;;  %v3473_v22 = vld [vmem:[%s14686_s1 + $0x618] sm:$0xff]  ;;  %vm14729_vm11 = vcmask 589312  }
 0x2ec   : > { %v5934_v19 = vsel %vm4483_vm1, %v5933_v2, %v5929_v3  ;;  %2058 = vadd.xlane.f32.xlu1 %v2057_v11  ;;  %2055 = vadd.xlane.f32.xlu0 %v2054_v57  ;;  %v2066_v11 = vsel %vm973_vm0, %v569_v59, 0.0  ;;  %v9306_v57 = vpack.c.bf16 %v3432_v13, %v3424_v48  ;;  %v572_v3 = vld [vmem:[%s9778_s29 + $0xb78] sm:$0xff]  ;;  %v573_v59 = vld [vmem:[%s9778_s29 + $0xb80] sm:$0xff]  ;;  %v3456_v48 = vld [vmem:[%s14686_s1 + $0x590] sm:$0xff] }
 0x2ed   : > { %v1849_v20 = vpop.xlane.xlu1 %1848  ;;  %v1846_v21 = vpop.xlane.xlu0 %1845  ;;  %9207 = vmatpush1.bf16.msra.mxu0 %v9206_v46  ;;  %9305 = vmatprep.subr.bf16.mxu1 %v9304_v39  ;;  %v3448_v46 = vld [vmem:[%s14686_s1 + $0x550] sm:$0xff]  ;;  %v9312_v39 = vpack.c.bf16 %v3465_v62, %v3457_v54  ;;  %v3479_v61 = vld [vmem:[%s14686_s1 + $0x648] sm:$0xff]  ;;  %v3481_v5 = vld [vmem:[%s14686_s1 + $0x658] sm:$0xff] }
 0x2ee   : > { %v5943_v28 = vrot.slane %v1849_v20, %v9943_v32  ;;  %v5938_v34 = vrot.slane %v1846_v21, %v9950_v35  ;;  %9209 = vmatprep.subr.bf16.mxu0 %v9208_v63  ;;  %v9310_v25 = vpack.c.bf16 %v3448_v46, %v3440_v14  ;;  %v9216_v63 = vpack.c.bf16 %v3463_v27, %v3455_v26  ;;  %v3464_v13 = vld [vmem:[%s14686_s1 + $0x5d0] sm:$0xff]  ;;  %v3487_v26 = vld [vmem:[%s14686_s1 + $0x688] sm:$0xff]  ;;  %v3489_v54 = vld [vmem:[%s14686_s1 + $0x698] sm:$0xff] }
 0x2ef   : > { %9307 = vmatpush1.bf16.msra.mxu1 %v9306_v57  ;;  %v9314_v57 = vpack.c.bf16 %v3464_v13, %v3456_v48  ;;  %v3472_v14 = vld [vmem:[%s14686_s1 + $0x610] sm:$0xff]  ;;  %v3495_v27 = vld [vmem:[%s14686_s1 + $0x6c8] sm:$0xff]  ;;  %v3497_v62 = vld [vmem:[%s14686_s1 + $0x6d8] sm:$0xff] }
 0x2f0   : > { %v5939_v49 = vsel %vm14697_vm2, %v5938_v34, %v5934_v19  ;;  %2064 = vadd.xlane.f32.xlu1 %v2063_v51  ;;  %2061 = vadd.xlane.f32.xlu0 %v2060_v24  ;;  %v9214_v19 = vpack.c.bf16 %v3446_v12, %v3438_v38  ;;  %v2075_v51 = vsel %vm973_vm0, %v572_v3, 0.0  ;;  %v2072_v24 = vsel %vm973_vm0, %v571_v4, 0.0  ;;  %v576_v3 = vld [vmem:[%s9778_s29 + $0xb98] sm:$0xff]  ;;  %v575_v4 = vld [vmem:[%s9778_s29 + $0xb90] sm:$0xff]  ;;  %v3470_v38 = vld [vmem:[%s14686_s1 + $0x600] sm:$0xff] }
 0x2f1   : > { %v1855_v10 = vpop.xlane.xlu1 %1854  ;;  %v5944_v52 = vsel %vm4497_vm3, %v5943_v28, %v5939_v49  ;;  %v1852_v53 = vpop.xlane.xlu0 %1851  ;;  %9211 = vmatpush1.bf16.msra.mxu0 %v9210_v50  ;;  %9309 = vmatprep.subr.bf16.mxu1 %v9308_v6  ;;  %v9218_v50 = vpack.c.bf16 %v3462_v47, %v3454_v42  ;;  %v9316_v6 = vpack.c.bf16 %v3481_v5, %v3473_v22  ;;  %v3478_v12 = vld [vmem:[%s14686_s1 + $0x640] sm:$0xff]  ;;  %v3480_v46 = vld [vmem:[%s14686_s1 + $0x650] sm:$0xff]  ;;  %v3505_v22 = vld [vmem:[%s14686_s1 + $0x718] sm:$0xff] }
 0x2f2   : > { %v5953_v1 = vrot.slane %v1855_v10, %v9955_v40  ;;  %v5948_v2 = vrot.slane %v1852_v53, %v9958_v41  ;;  %9213 = vmatprep.subr.bf16.mxu0 %v9212_v23  ;;  %v9220_v23 = vpack.c.bf16 %v3479_v61, %v3471_v58  ;;  %v3486_v42 = vld [vmem:[%s14686_s1 + $0x680] sm:$0xff]  ;;  %v3488_v48 = vld [vmem:[%s14686_s1 + $0x690] sm:$0xff]  ;;  %v3503_v58 = vld [vmem:[%s14686_s1 + $0x708] sm:$0xff] }
 0x2f3   : > { %9311 = vmatpush1.bf16.msra.mxu1 %v9310_v25  ;;  %v9318_v25 = vpack.c.bf16 %v3480_v46, %v3472_v14  ;;  %v3494_v47 = vld [vmem:[%s14686_s1 + $0x6c0] sm:$0xff]  ;;  %v3496_v13 = vld [vmem:[%s14686_s1 + $0x6d0] sm:$0xff]  ;;  %v3511_v61 = vld [vmem:[%s14686_s1 + $0x748] sm:$0xff] }
 0x2f4   : > { %v5949_v17 = vsel %vm4504_vm4, %v5948_v2, %v5944_v52  ;;  %2070 = vadd.xlane.f32.xlu1 %v2069_v55  ;;  %2067 = vadd.xlane.f32.xlu0 %v2066_v11  ;;  %v2081_v55 = vsel %vm973_vm0, %v574_v36, 0.0  ;;  %v2078_v11 = vsel %vm973_vm0, %v573_v59, 0.0  ;;  %v578_v36 = vld [vmem:[%s9778_s29 + $0xba8] sm:$0xff]  ;;  %v577_v59 = vld [vmem:[%s9778_s29 + $0xba0] sm:$0xff]  ;;  %v3513_v5 = vld [vmem:[%s14686_s1 + $0x758] sm:$0xff] }
 0x2f5   : > { %v1861_v45 = vpop.xlane.xlu1 %1860  ;;  %v5954_v20 = vsel %vm4511_vm5, %v5953_v1, %v5949_v17  ;;  %v1858_v21 = vpop.xlane.xlu0 %1857  ;;  %9215 = vmatpush1.bf16.msra.mxu0 %v9214_v19  ;;  %9313 = vmatprep.subr.bf16.mxu1 %v9312_v39  ;;  %v9222_v19 = vpack.c.bf16 %v3478_v12, %v3470_v38  ;;  %v9320_v39 = vpack.c.bf16 %v3497_v62, %v3489_v54  ;;  %v3502_v38 = vld [vmem:[%s14686_s1 + $0x700] sm:$0xff]  ;;  %v3504_v14 = vld [vmem:[%s14686_s1 + $0x710] sm:$0xff]  ;;  %v3521_v54 = vld [vmem:[%s14686_s1 + $0x798] sm:$0xff] }
 0x2f6   : > { %v5963_v28 = vrot.slane %v1861_v45, %v9973_v56  ;;  %v5958_v34 = vrot.slane %v1858_v21, %v9983_v0  ;;  %9217 = vmatprep.subr.bf16.mxu0 %v9216_v63  ;;  %v9224_v63 = vpack.c.bf16 %v3495_v27, %v3487_v26  ;;  %v3510_v12 = vld [vmem:[%s14686_s1 + $0x740] sm:$0xff]  ;;  %v3512_v46 = vld [vmem:[%s14686_s1 + $0x750] sm:$0xff]  ;;  %v3519_v26 = vld [vmem:[%s14686_s1 + $0x788] sm:$0xff] }
 0x2f7   : > { %9315 = vmatpush1.bf16.msra.mxu1 %v9314_v57  ;;  %v9322_v57 = vpack.c.bf16 %v3496_v13, %v3488_v48  ;;  %v3527_v27 = vld [vmem:[%s14686_s1 + $0x7c8] sm:$0xff]  ;;  %v3529_v62 = vld [vmem:[%s14686_s1 + $0x7d8] sm:$0xff]  ;;  %v3520_v48 = vld [vmem:[%s14686_s1 + $0x790] sm:$0xff] }
 0x2f8   : > { %v5959_v49 = vsel %vm4518_vm6, %v5958_v34, %v5954_v20  ;;  %2076 = vadd.xlane.f32.xlu1 %v2075_v51  ;;  %2073 = vadd.xlane.f32.xlu0 %v2072_v24  ;;  %v2087_v51 = vsel %vm973_vm0, %v576_v3, 0.0  ;;  %v2084_v24 = vsel %vm973_vm0, %v575_v4, 0.0  ;;  %v580_v3 = vld [vmem:[%s9778_s29 + $0xbb8] sm:$0xff]  ;;  %v579_v4 = vld [vmem:[%s9778_s29 + $0xbb0] sm:$0xff] }
 0x2f9   : > { %v1867_v10 = vpop.xlane.xlu1 %1866  ;;  %v5964_v52 = vsel %vm4525_vm7, %v5963_v28, %v5959_v49  ;;  %v1864_v53 = vpop.xlane.xlu0 %1863  ;;  %9219 = vmatpush1.bf16.msra.mxu0 %v9218_v50  ;;  %9317 = vmatprep.subr.bf16.mxu1 %v9316_v6  ;;  %v9226_v50 = vpack.c.bf16 %v3494_v47, %v3486_v42  ;;  %v9324_v6 = vpack.c.bf16 %v3513_v5, %v3505_v22  ;;  %v3518_v42 = vld [vmem:[%s14686_s1 + $0x780] sm:$0xff]  ;;  %v3528_v13 = vld [vmem:[%s14686_s1 + $0x7d0] sm:$0xff]  ;;  %v584_v22 = vld [vmem:[%s9778_s29 + $0xbd8] sm:$0xff] }
 0x2fa   : > { %v5973_v1 = vrot.slane %v1867_v10, %v9990_v7  ;;  %v5968_v2 = vrot.slane %v1864_v53, %v9993_v8  ;;  %9221 = vmatprep.subr.bf16.mxu0 %v9220_v23  ;;  %v9228_v23 = vpack.c.bf16 %v3511_v61, %v3503_v58  ;;  %v3526_v47 = vld [vmem:[%s14686_s1 + $0x7c0] sm:$0xff]  ;;  %v2111_v5 = vsel %vm973_vm0, %v584_v22, 0.0 }
 0x2fb   : > { %9319 = vmatpush1.bf16.msra.mxu1 %v9318_v25  ;;  %v9326_v25 = vpack.c.bf16 %v3512_v46, %v3504_v14  ;;  %v586_v14 = vld [vmem:[%s9778_s29 + $0xbe8] sm:$0xff] }
 0x2fc   : > { %v5969_v17 = vsel %vm14727_vm8, %v5968_v2, %v5964_v52  ;;  %2082 = vadd.xlane.f32.xlu1 %v2081_v55  ;;  %2079 = vadd.xlane.f32.xlu0 %v2078_v11  ;;  %vm14728_vm8 = vcmask 786112   ;;  %v2093_v55 = vsel %vm973_vm0, %v578_v36, 0.0  ;;  %v2090_v11 = vsel %vm973_vm0, %v577_v59, 0.0  ;;  %v582_v36 = vld [vmem:[%s9778_s29 + $0xbc8] sm:$0xff]  ;;  %v581_v59 = vld [vmem:[%s9778_s29 + $0xbc0] sm:$0xff] }
 0x2fd   : > { %v1873_v45 = vpop.xlane.xlu1 %1872  ;;  %v5974_v20 = vsel %vm4539_vm9, %v5973_v1, %v5969_v17  ;;  %v1870_v21 = vpop.xlane.xlu0 %1869  ;;  %9223 = vmatpush1.bf16.msra.mxu0 %v9222_v19  ;;  %9321 = vmatprep.subr.bf16.mxu1 %v9320_v39  ;;  %v9230_v19 = vpack.c.bf16 %v3510_v12, %v3502_v38  ;;  %v9328_v39 = vpack.c.bf16 %v3529_v62, %v3521_v54 }
 0x2fe   : > { %v5983_v28 = vrot.slane %v1873_v45, %v10012_v29  ;;  %v5978_v34 = vrot.slane %v1870_v21, %v10015_v30  ;;  %9225 = vmatprep.subr.bf16.mxu0 %v9224_v63  ;;  %v9232_v63 = vpack.c.bf16 %v3527_v27, %v3519_v26  ;;  %v587_v26 = vld [vmem:[%s9778_s29 + $0xbf0] sm:$0xff] }
 0x2ff   : > { %9323 = vmatpush1.bf16.msra.mxu1 %v9322_v57 }
 0x300   : > { %v5979_v49 = vsel %vm4546_vm10, %v5978_v34, %v5974_v20  ;;  %2088 = vadd.xlane.f32.xlu1 %v2087_v51  ;;  %2085 = vadd.xlane.f32.xlu0 %v2084_v24  ;;  %v2099_v51 = vsel %vm973_vm0, %v580_v3, 0.0  ;;  %v2096_v24 = vsel %vm973_vm0, %v579_v4, 0.0 }
 0x301   : > { %v1879_v10 = vpop.xlane.xlu1 %1878  ;;  %v5984_v52 = vsel %vm14728_vm8, %v5983_v28, %v5979_v49  ;;  %v1876_v53 = vpop.xlane.xlu0 %1875  ;;  %9227 = vmatpush1.bf16.msra.mxu0 %v9226_v50  ;;  %9325 = vmatprep.subr.bf16.mxu1 %v9324_v6  ;;  %vm14696_vm8 = vcmask 1046534   ;;  %v9234_v50 = vpack.c.bf16 %v3526_v47, %v3518_v42  ;;  %v589_v42 = vld [vmem:[%s9778_s29 + $0xc00] sm:$0xff] }
 0x302   : > { %v5993_v1 = vrot.slane %v1879_v10, %v10022_v43  ;;  %v5988_v2 = vrot.slane %v1876_v53, %v10025_v44  ;;  %9229 = vmatprep.subr.bf16.mxu0 %v9228_v23  ;;  %v2105_v53 = vsel %vm973_vm0, %v582_v36, 0.0 }
 0x303   : > { %9327 = vmatpush1.bf16.msra.mxu1 %v9326_v25  ;;  %v588_v25 = vld [vmem:[%s9778_s29 + $0xbf8] sm:$0xff] }
 0x304   : > { %v5989_v17 = vsel %vm4560_vm12, %v5988_v2, %v5984_v52  ;;  %2094 = vadd.xlane.f32.xlu1 %v2093_v55  ;;  %2091 = vadd.xlane.f32.xlu0 %v2090_v11  ;;  %v2102_v55 = vsel %vm973_vm0, %v581_v59, 0.0  ;;  %v9330_v11 = vpack.c.bf16 %v3528_v13, %v3520_v48  ;;  %v2123_v36 = vsel %vm973_vm0, %v588_v25, 0.0 }
 0x305   : > { %v1885_v45 = vpop.xlane.xlu1 %1884  ;;  %v5994_v20 = vsel %vm4567_vm13, %v5993_v1, %v5989_v17  ;;  %v1882_v21 = vpop.xlane.xlu0 %1881  ;;  %9231 = vmatpush1.bf16.msra.mxu0 %v9230_v19  ;;  %9329 = vmatprep.subr.bf16.mxu1 %v9328_v39  ;;  %v583_v1 = vld [vmem:[%s9778_s29 + $0xbd0] sm:$0xff]  ;;  %v2120_v59 = vsel %vm973_vm0, %v587_v26, 0.0  ;;  %v590_v39 = vld [vmem:[%s9778_s29 + $0xc08] sm:$0xff] }
 0x306   : > { %v6003_v28 = vrot.slane %v1885_v45, %v10040_v15  ;;  %v5998_v34 = vrot.slane %v1882_v21, %v10043_v60  ;;  %9233 = vmatprep.subr.bf16.mxu0 %v9232_v63  ;;  %v2108_v6 = vsel %vm973_vm0, %v583_v1, 0.0  ;;  %v2129_v13 = vsel %vm973_vm0, %v590_v39, 0.0 }
 0x307   : > { %9331 = vmatpush1.bf16.msra.mxu1 %v9330_v11  ;;  %v591_v11 = vld [vmem:[%s9778_s29 + $0xc10] sm:$0xff] }
 0x308   : > { %v5999_v49 = vsel %vm4574_vm14, %v5998_v34, %v5994_v20  ;;  %2100 = vadd.xlane.f32.xlu1 %v2099_v51  ;;  %2097 = vadd.xlane.f32.xlu0 %v2096_v24  ;;  %v2117_v20 = vsel %vm973_vm0, %v586_v14, 0.0 }
 0x309   : > { %v1891_v10 = vpop.xlane.xlu1 %1890  ;;  %v1888_v52 = vpop.xlane.xlu0 %1887  ;;  %v6004_v57 = vsel %vm4581_vm15, %v6003_v28, %v5999_v49  ;;  %9235 = vmatpush1.bf16.msra.mxu0 %v9234_v50 }
 0x30a   : > { %v6012_v58 = vrot.slane %v1891_v10, %v9946_v33  ;;  %v6008_v61 = vrot.slane %v1888_v52, %v9940_v31  ;;  %v11649_v2 = vsel %vm14696_vm8, %v6004_v57, %v11064_v16  ;;  %v585_v16 = vld [vmem:[%s9778_s29 + $0xbe0] sm:$0xff]  ;;  %v2126_v10 = vsel %vm973_vm0, %v589_v42, 0.0 }
 0x30b   : > { %v2114_v21 = vsel %vm973_vm0, %v585_v16, 0.0 }
 0x30c   : > { %v6013_v3 = vsel %vm4483_vm1, %v6012_v58, %v6008_v61  ;;  %2106 = vadd.xlane.f32.xlu1 %v2105_v53  ;;  %2103 = vadd.xlane.f32.xlu0 %v2102_v55  ;;  %v592_v55 = vld [vmem:[%s9778_s29 + $0xc18] sm:$0xff] }
 0x30d   : > { %v1897_v4 = vpop.xlane.xlu1 %1896  ;;  %v1894_v23 = vpop.xlane.xlu0 %1893  ;;  %v2135_v1 = vsel %vm973_vm0, %v592_v55, 0.0 }
 0x30e   : > { %v6022_v38 = vrot.slane %v1897_v4, %v9943_v32  ;;  %v6017_v12 = vrot.slane %v1894_v23, %v9950_v35 }
 0x310   : > { %v6018_v17 = vsel %vm14697_vm2, %v6017_v12, %v6013_v3  ;;  %2112 = vadd.xlane.f32.xlu1 %v2111_v5  ;;  %2109 = vadd.xlane.f32.xlu0 %v2108_v6  ;;  %v2132_v3 = vsel %vm973_vm0, %v591_v11, 0.0  ;;  %v594_v5 = vld [vmem:[%s9778_s29 + $0xc28] sm:$0xff]  ;;  %v593_v6 = vld [vmem:[%s9778_s29 + $0xc20] sm:$0xff] }
 0x311   : > { %v1903_v19 = vpop.xlane.xlu1 %1902  ;;  %v6023_v46 = vsel %vm4497_vm3, %v6022_v38, %v6018_v17  ;;  %v1900_v45 = vpop.xlane.xlu0 %1899  ;;  %v2141_v17 = vsel %vm973_vm0, %v594_v5, 0.0 }
 0x312   : > { %v6032_v51 = vrot.slane %v1903_v19, %v9955_v40  ;;  %v6027_v24 = vrot.slane %v1900_v45, %v9958_v41  ;;  %v2138_v19 = vsel %vm973_vm0, %v593_v6, 0.0 }
 0x314   : > { %v6028_v27 = vsel %vm4504_vm4, %v6027_v24, %v6023_v46  ;;  %2118 = vadd.xlane.f32.xlu1 %v2117_v20  ;;  %2115 = vadd.xlane.f32.xlu0 %v2114_v21  ;;  %v596_v20 = vld [vmem:[%s9778_s29 + $0xc38] sm:$0xff]  ;;  %v595_v21 = vld [vmem:[%s9778_s29 + $0xc30] sm:$0xff] }
 0x315   : > { %v1909_v54 = vpop.xlane.xlu1 %1908  ;;  %v6033_v28 = vsel %vm4511_vm5, %v6032_v51, %v6028_v27  ;;  %v1906_v34 = vpop.xlane.xlu0 %1905  ;;  %v2147_v27 = vsel %vm973_vm0, %v596_v20, 0.0 }
 0x316   : > { %v6042_v63 = vrot.slane %v1909_v54, %v9973_v56  ;;  %v6037_v62 = vrot.slane %v1906_v34, %v9983_v0  ;;  %v2144_v54 = vsel %vm973_vm0, %v595_v21, 0.0 }
 0x318   : > { %v6038_v47 = vsel %vm4518_vm6, %v6037_v62, %v6033_v28  ;;  %2124 = vadd.xlane.f32.xlu1 %v2123_v36  ;;  %2121 = vadd.xlane.f32.xlu0 %v2120_v59  ;;  %v598_v36 = vld [vmem:[%s9778_s29 + $0xc48] sm:$0xff]  ;;  %v597_v59 = vld [vmem:[%s9778_s29 + $0xc40] sm:$0xff] }
 0x319   : > { %v1915_v48 = vpop.xlane.xlu1 %1914  ;;  %v6043_v49 = vsel %vm4525_vm7, %v6042_v63, %v6038_v47  ;;  %v1912_v50 = vpop.xlane.xlu0 %1911  ;;  %v2153_v42 = vsel %vm973_vm0, %v598_v36, 0.0  ;;  %v2150_v47 = vsel %vm973_vm0, %v597_v59, 0.0 }
 0x31a   : > { %v6052_v52 = vrot.slane %v1915_v48, %v9990_v7  ;;  %v6047_v53 = vrot.slane %v1912_v50, %v9993_v8 }
 0x31c   : > { %v6048_v57 = vsel %vm14729_vm11, %v6047_v53, %v6043_v49  ;;  %2130 = vadd.xlane.f32.xlu1 %v2129_v13  ;;  %2127 = vadd.xlane.f32.xlu0 %v2126_v10  ;;  %vm14730_vm11 = vcmask 786112   ;;  %v600_v13 = vld [vmem:[%s9778_s29 + $0xc58] sm:$0xff]  ;;  %v599_v10 = vld [vmem:[%s9778_s29 + $0xc50] sm:$0xff] }
 0x31d   : > { %v1921_v58 = vpop.xlane.xlu1 %1920  ;;  %v6053_v61 = vsel %vm4539_vm9, %v6052_v52, %v6048_v57  ;;  %v1918_v22 = vpop.xlane.xlu0 %1917  ;;  %v2159_v57 = vsel %vm973_vm0, %v600_v13, 0.0 }
 0x31e   : > { %v6062_v4 = vrot.slane %v1921_v58, %v10012_v29  ;;  %v6057_v23 = vrot.slane %v1918_v22, %v10015_v30  ;;  %v2156_v58 = vsel %vm973_vm0, %v599_v10, 0.0 }
 0x320   : > { %v6058_v38 = vsel %vm4546_vm10, %v6057_v23, %v6053_v61  ;;  %2136 = vadd.xlane.f32.xlu1 %v2135_v1  ;;  %2133 = vadd.xlane.f32.xlu0 %v2132_v3  ;;  %v602_v1 = vld [vmem:[%s9778_s29 + $0xc68] sm:$0xff]  ;;  %v601_v3 = vld [vmem:[%s9778_s29 + $0xc60] sm:$0xff] }
 0x321   : > { %v1927_v12 = vpop.xlane.xlu1 %1926  ;;  %v6063_v14 = vsel %vm14730_vm11, %v6062_v4, %v6058_v38  ;;  %v1924_v16 = vpop.xlane.xlu0 %1923  ;;  %v2165_v6 = vsel %vm973_vm0, %v602_v1, 0.0  ;;  %v2162_v38 = vsel %vm973_vm0, %v601_v3, 0.0  ;;  %vm14731_vm11 = vcmask 589312  }
 0x322   : > { %v6072_v46 = vrot.slane %v1927_v12, %v10022_v43  ;;  %v6067_v45 = vrot.slane %v1924_v16, %v10025_v44  ;;  %v604_v16 = vld [vmem:[%s9778_s29 + $0xc78] sm:$0xff] }
 0x323   : > { %v2171_v21 = vsel %vm973_vm0, %v604_v16, 0.0 }
 0x324   : > { %v6068_v51 = vsel %vm4560_vm12, %v6067_v45, %v6063_v14  ;;  %2142 = vadd.xlane.f32.xlu1 %v2141_v17  ;;  %2139 = vadd.xlane.f32.xlu0 %v2138_v19  ;;  %v603_v17 = vld [vmem:[%s9778_s29 + $0xc70] sm:$0xff] }
 0x325   : > { %v1933_v24 = vpop.xlane.xlu1 %1932  ;;  %v6073_v25 = vsel %vm4567_vm13, %v6072_v46, %v6068_v51  ;;  %v1930_v26 = vpop.xlane.xlu0 %1929  ;;  %v2168_v51 = vsel %vm973_vm0, %v603_v17, 0.0 }
 0x326   : > { %v6082_v28 = vrot.slane %v1933_v24, %v10040_v15  ;;  %v6077_v34 = vrot.slane %v1930_v26, %v10043_v60  ;;  %v606_v26 = vld [vmem:[%s9778_s29 + $0xc88] sm:$0xff] }
 0x327   : > { %v2177_v59 = vsel %vm973_vm0, %v606_v26, 0.0 }
 0x328   : > { %v6078_v63 = vsel %vm4574_vm14, %v6077_v34, %v6073_v25  ;;  %2148 = vadd.xlane.f32.xlu1 %v2147_v27  ;;  %2145 = vadd.xlane.f32.xlu0 %v2144_v54  ;;  %v605_v27 = vld [vmem:[%s9778_s29 + $0xc80] sm:$0xff] }
 0x329   : > { %v1939_v62 = vpop.xlane.xlu1 %1938  ;;  %v1936_v39 = vpop.xlane.xlu0 %1935  ;;  %v6083_v48 = vsel %vm4581_vm15, %v6082_v28, %v6078_v63  ;;  %v2174_v63 = vsel %vm973_vm0, %v605_v27, 0.0 }
 0x32a   : > { %v6091_v49 = vrot.slane %v1939_v62, %v9946_v33  ;;  %v6087_v50 = vrot.slane %v1936_v39, %v9940_v31  ;;  %v11716_v52 = vsel %vm14696_vm8, %v6083_v48, %v11143_v37 }
 0x32c   : > { %v6092_v53 = vsel %vm4483_vm1, %v6091_v49, %v6087_v50  ;;  %2154 = vadd.xlane.f32.xlu1 %v2153_v42  ;;  %2151 = vadd.xlane.f32.xlu0 %v2150_v47  ;;  %v608_v42 = vld [vmem:[%s9778_s29 + $0xc98] sm:$0xff]  ;;  %v607_v47 = vld [vmem:[%s9778_s29 + $0xc90] sm:$0xff] }
 0x32d   : > { %v1945_v55 = vpop.xlane.xlu1 %1944  ;;  %v1942_v11 = vpop.xlane.xlu0 %1941  ;;  %v2183_v10 = vsel %vm973_vm0, %v608_v42, 0.0 }
 0x32e   : > { %v6101_v61 = vrot.slane %v1945_v55, %v9943_v32  ;;  %v6096_v22 = vrot.slane %v1942_v11, %v9950_v35 }
 0x330   : > { %v6097_v37 = vsel %vm14697_vm2, %v6096_v22, %v6092_v53  ;;  %2160 = vadd.xlane.f32.xlu1 %v2159_v57  ;;  %2157 = vadd.xlane.f32.xlu0 %v2156_v58  ;;  %v2180_v53 = vsel %vm973_vm0, %v607_v47, 0.0  ;;  %v610_v57 = vld [vmem:[%s9778_s29 + $0xca8] sm:$0xff]  ;;  %v609_v58 = vld [vmem:[%s9778_s29 + $0xca0] sm:$0xff] }
 0x331   : > { %v1951_v4 = vpop.xlane.xlu1 %1950  ;;  %v6102_v23 = vsel %vm4497_vm3, %v6101_v61, %v6097_v37  ;;  %v1948_v5 = vpop.xlane.xlu0 %1947  ;;  %v2189_v37 = vsel %vm973_vm0, %v610_v57, 0.0  ;;  %v618_v47 = vld [vmem:[%s9778_s29 + $0xce8] sm:$0xff] }
 0x332   : > { %v6111_v12 = vrot.slane %v1951_v4, %v9955_v40  ;;  %v6106_v14 = vrot.slane %v1948_v5, %v9958_v41  ;;  %v2186_v4 = vsel %vm973_vm0, %v609_v58, 0.0 }
 0x334   : > { %v6107_v19 = vsel %vm4504_vm4, %v6106_v14, %v6102_v23  ;;  %2166 = vadd.xlane.f32.xlu1 %v2165_v6  ;;  %2163 = vadd.xlane.f32.xlu0 %v2162_v38  ;;  %v612_v6 = vld [vmem:[%s9778_s29 + $0xcb8] sm:$0xff]  ;;  %v611_v38 = vld [vmem:[%s9778_s29 + $0xcb0] sm:$0xff] }
 0x335   : > { %v1957_v46 = vpop.xlane.xlu1 %1956  ;;  %v6112_v45 = vsel %vm4511_vm5, %v6111_v12, %v6107_v19  ;;  %v1954_v20 = vpop.xlane.xlu0 %1953  ;;  %v2195_v19 = vsel %vm973_vm0, %v612_v6, 0.0 }
 0x336   : > { %v6121_v24 = vrot.slane %v1957_v46, %v9973_v56  ;;  %v6116_v25 = vrot.slane %v1954_v20, %v9983_v0  ;;  %v2192_v46 = vsel %vm973_vm0, %v611_v38, 0.0 }
 0x338   : > { %v6117_v54 = vsel %vm4518_vm6, %v6116_v25, %v6112_v45  ;;  %2172 = vadd.xlane.f32.xlu1 %v2171_v21  ;;  %2169 = vadd.xlane.f32.xlu0 %v2168_v51  ;;  %v614_v21 = vld [vmem:[%s9778_s29 + $0xcc8] sm:$0xff]  ;;  %v613_v51 = vld [vmem:[%s9778_s29 + $0xcc0] sm:$0xff] }
 0x339   : > { %v1963_v28 = vpop.xlane.xlu1 %1962  ;;  %v6122_v34 = vsel %vm4525_vm7, %v6121_v24, %v6117_v54  ;;  %v1960_v36 = vpop.xlane.xlu0 %1959  ;;  %v2201_v54 = vsel %vm973_vm0, %v614_v21, 0.0  ;;  %v628_v21 = vld [vmem:[%s9778_s29 + $0xd38] sm:$0xff] }
 0x33a   : > { %v6131_v62 = vrot.slane %v1963_v28, %v9990_v7  ;;  %v6126_v39 = vrot.slane %v1960_v36, %v9993_v8  ;;  %v2198_v28 = vsel %vm973_vm0, %v613_v51, 0.0  ;;  %v615_v36 = vld [vmem:[%s9778_s29 + $0xcd0] sm:$0xff] }
 0x33b   : > { %v2204_v42 = vsel %vm973_vm0, %v615_v36, 0.0  ;;  %v627_v51 = vld [vmem:[%s9778_s29 + $0xd30] sm:$0xff]  ;;  %v629_v36 = vld [vmem:[%s9778_s29 + $0xd40] sm:$0xff] }
 0x33c   : > { %v6127_v48 = vsel %vm14731_vm11, %v6126_v39, %v6122_v34  ;;  %2178 = vadd.xlane.f32.xlu1 %v2177_v59  ;;  %2175 = vadd.xlane.f32.xlu0 %v2174_v63  ;;  %vm14732_vm11 = vcmask 786112   ;;  %v616_v34 = vld [vmem:[%s9778_s29 + $0xcd8] sm:$0xff] }
 0x33d   : > { %v1969_v49 = vpop.xlane.xlu1 %1968  ;;  %v6132_v50 = vsel %vm4539_vm9, %v6131_v62, %v6127_v48  ;;  %v1966_v13 = vpop.xlane.xlu0 %1965  ;;  %v2207_v39 = vsel %vm973_vm0, %v616_v34, 0.0  ;;  %v617_v48 = vld [vmem:[%s9778_s29 + $0xce0] sm:$0xff]  ;;  %v630_v34 = vld [vmem:[%s9778_s29 + $0xd48] sm:$0xff] }
 0x33e   : > { %v6141_v55 = vrot.slane %v1969_v49, %v10012_v29  ;;  %v6136_v11 = vrot.slane %v1966_v13, %v10015_v30  ;;  %v2210_v13 = vsel %vm973_vm0, %v617_v48, 0.0 }
 0x340   : > { %v6137_v61 = vsel %vm4546_vm10, %v6136_v11, %v6132_v50  ;;  %2184 = vadd.xlane.f32.xlu1 %v2183_v10  ;;  %2181 = vadd.xlane.f32.xlu0 %v2180_v53  ;;  %v2213_v50 = vsel %vm973_vm0, %v618_v47, 0.0  ;;  %v620_v10 = vld [vmem:[%s9778_s29 + $0xcf8] sm:$0xff]  ;;  %v619_v53 = vld [vmem:[%s9778_s29 + $0xcf0] sm:$0xff] }
 0x341   : > { %v1975_v22 = vpop.xlane.xlu1 %1974  ;;  %v6142_v1 = vsel %vm14732_vm11, %v6141_v55, %v6137_v61  ;;  %v1972_v3 = vpop.xlane.xlu0 %1971  ;;  %v2219_v57 = vsel %vm973_vm0, %v620_v10, 0.0  ;;  %v2216_v58 = vsel %vm973_vm0, %v619_v53, 0.0  ;;  %v622_v61 = vld [vmem:[%s9778_s29 + $0xd08] sm:$0xff]  ;;  %v632_v53 = vld [vmem:[%s9778_s29 + $0xd58] sm:$0xff]  ;;  %vm14733_vm11 = vcmask 589312  }
 0x342   : > { %v6151_v23 = vrot.slane %v1975_v22, %v10022_v43  ;;  %v6146_v5 = vrot.slane %v1972_v3, %v10025_v44  ;;  %v621_v22 = vld [vmem:[%s9778_s29 + $0xd00] sm:$0xff] }
 0x344   : > { %v6147_v12 = vsel %vm4560_vm12, %v6146_v5, %v6142_v1  ;;  %2190 = vadd.xlane.f32.xlu1 %v2189_v37  ;;  %2187 = vadd.xlane.f32.xlu0 %v2186_v4  ;;  %v2225_v37 = vsel %vm973_vm0, %v622_v61, 0.0  ;;  %v2222_v4 = vsel %vm973_vm0, %v621_v22, 0.0  ;;  %v623_v5 = vld [vmem:[%s9778_s29 + $0xd10] sm:$0xff] }
 0x345   : > { %v1981_v14 = vpop.xlane.xlu1 %1980  ;;  %v6152_v16 = vsel %vm4567_vm13, %v6151_v23, %v6147_v12  ;;  %v1978_v17 = vpop.xlane.xlu0 %1977  ;;  %v624_v23 = vld [vmem:[%s9778_s29 + $0xd18] sm:$0xff] }
 0x346   : > { %v6161_v45 = vrot.slane %v1981_v14, %v10040_v15  ;;  %v6156_v20 = vrot.slane %v1978_v17, %v10043_v60  ;;  %v2231_v12 = vsel %vm973_vm0, %v624_v23, 0.0  ;;  %v2228_v14 = vsel %vm973_vm0, %v623_v5, 0.0  ;;  %v625_v17 = vld [vmem:[%s9778_s29 + $0xd20] sm:$0xff] }
 0x348   : > { %v6157_v24 = vsel %vm4574_vm14, %v6156_v20, %v6152_v16  ;;  %2196 = vadd.xlane.f32.xlu1 %v2195_v19  ;;  %2193 = vadd.xlane.f32.xlu0 %v2192_v46  ;;  %v626_v16 = vld [vmem:[%s9778_s29 + $0xd28] sm:$0xff]  ;;  %v2234_v20 = vsel %vm973_vm0, %v625_v17, 0.0 }
 0x349   : > { %v6162_v25 = vsel %vm4581_vm15, %v6161_v45, %v6157_v24  ;;  %v11775_v26 = vpop.xlane.xlu1 %1986  ;;  %v11777_v27 = vpop.xlane.xlu0 %1983  ;;  %v2237_v45 = vsel %vm973_vm0, %v626_v16, 0.0  ;;  %v633_v16 = vld [vmem:[%s9778_s29 + $0xd60] sm:$0xff] }
 0x34a   : > { %v11785_v59 = vsel %vm14696_vm8, %v6162_v25, %v11402_v9  ;;  %vm14734_vm8 = vmmov %vm14733_vm11 }
 0x34c   : > { %2202 = vadd.xlane.f32.xlu1 %v2201_v54  ;;  %2199 = vadd.xlane.f32.xlu0 %v2198_v28  ;;  %v2243_v54 = vsel %vm973_vm0, %v628_v21, 0.0  ;;  %v2240_v28 = vsel %vm973_vm0, %v627_v51, 0.0 }
 0x34d   : > { %v11787_v63 = vpop.xlane.xlu1 %1992  ;;  %v11789_v62 = vpop.xlane.xlu0 %1989 }
 0x34e   : > { %v6175_v10 = vrot.slane %v11789_v62, %v9950_v35  ;;  %v6180_v61 = vrot.slane %v11787_v63, %v9943_v32 }
 0x350   : > { %2208 = vadd.xlane.f32.xlu1 %v2207_v39  ;;  %2205 = vadd.xlane.f32.xlu0 %v2204_v42  ;;  %v6170_v39 = vrot.slane %v11775_v26, %v9946_v33  ;;  %v6166_v42 = vrot.slane %v11777_v27, %v9940_v31 }
 0x351   : > { %v11795_v49 = vpop.xlane.xlu1 %1998  ;;  %v11797_v9 = vpop.xlane.xlu0 %1995 }
 0x352   : > { %v6171_v27 = vsel %vm4483_vm1, %v6170_v39, %v6166_v42  ;;  %v6185_v5 = vrot.slane %v11797_v9, %v9958_v41  ;;  %v636_v42 = vld [vmem:[%s9778_s29 + $0xd78] sm:$0xff] }
 0x353   : > { %v6176_v23 = vsel %vm14697_vm2, %v6175_v10, %v6171_v27 }
 0x354   : > { %2214 = vadd.xlane.f32.xlu1 %v2213_v50  ;;  %2211 = vadd.xlane.f32.xlu0 %v2210_v13  ;;  %v2249_v50 = vsel %vm973_vm0, %v630_v34, 0.0  ;;  %v2246_v13 = vsel %vm973_vm0, %v629_v36, 0.0  ;;  %v6181_v21 = vsel %vm4497_vm3, %v6180_v61, %v6176_v23 }
 0x355   : > { %v11803_v55 = vpop.xlane.xlu1 %2004  ;;  %v11805_v11 = vpop.xlane.xlu0 %2001  ;;  %v6186_v34 = vsel %vm4504_vm4, %v6185_v5, %v6181_v21  ;;  %v639_v21 = vld [vmem:[%s9778_s29 + $0xd90] sm:$0xff] }
 0x356   : > { %v6195_v36 = vrot.slane %v11805_v11, %v9983_v0 }
 0x358   : > { %2220 = vadd.xlane.f32.xlu1 %v2219_v57  ;;  %2217 = vadd.xlane.f32.xlu0 %v2216_v58  ;;  %v631_v57 = vld [vmem:[%s9778_s29 + $0xd50] sm:$0xff] }
 0x359   : > { %v11811_v1 = vpop.xlane.xlu1 %2010  ;;  %v11813_v3 = vpop.xlane.xlu0 %2007  ;;  %v2252_v62 = vsel %vm973_vm0, %v631_v57, 0.0  ;;  %v2267_v57 = vsel %vm973_vm0, %v636_v42, 0.0 }
 0x35a   : > { %v6205_v27 = vrot.slane %v11813_v3, %v9993_v8  ;;  %v6210_v23 = vrot.slane %v11811_v1, %v9990_v7 }
 0x35c   : > { %2226 = vadd.xlane.f32.xlu1 %v2225_v37  ;;  %2223 = vadd.xlane.f32.xlu0 %v2222_v4  ;;  %v2255_v4 = vsel %vm973_vm0, %v632_v53, 0.0 }
 0x35d   : > { %v11819_v6 = vpop.xlane.xlu1 %2016  ;;  %v11821_v38 = vpop.xlane.xlu0 %2013 }
 0x360   : > { %2232 = vadd.xlane.f32.xlu1 %v2231_v12  ;;  %2229 = vadd.xlane.f32.xlu0 %v2228_v14  ;;  %v634_v14 = vld [vmem:[%s9778_s29 + $0xd68] sm:$0xff] }
 0x361   : > { %v11827_v19 = vpop.xlane.xlu1 %2022  ;;  %v11829_v46 = vpop.xlane.xlu0 %2019 }
 0x364   : > { %2238 = vadd.xlane.f32.xlu1 %v2237_v45  ;;  %2235 = vadd.xlane.f32.xlu0 %v2234_v20  ;;  %v6190_v20 = vrot.slane %v11795_v49, %v9955_v40 }
 0x365   : > { %v11835_v24 = vpop.xlane.xlu1 %2028  ;;  %v11837_v25 = vpop.xlane.xlu0 %2025 }
 0x366   : > { %v6191_v10 = vsel %vm4511_vm5, %v6190_v20, %v6186_v34  ;;  %v640_v20 = vld [vmem:[%s9778_s29 + $0xd98] sm:$0xff] }
 0x368   : > { %2244 = vadd.xlane.f32.xlu1 %v2243_v54  ;;  %2241 = vadd.xlane.f32.xlu0 %v2240_v28  ;;  %v2261_v54 = vsel %vm973_vm0, %v634_v14, 0.0  ;;  %v2258_v28 = vsel %vm973_vm0, %v633_v16, 0.0 }
 0x369   : > { %v2035_v47 = vpop.xlane.xlu1 %2034  ;;  %v2032_v48 = vpop.xlane.xlu0 %2031 }
 0x36a   : > { %v6249_v58 = vrot.slane %v2035_v47, %v9946_v33  ;;  %v6245_v26 = vrot.slane %v2032_v48, %v9940_v31  ;;  %v635_v47 = vld [vmem:[%s9778_s29 + $0xd70] sm:$0xff] }
 0x36c   : > { %2250 = vadd.xlane.f32.xlu1 %v2249_v50  ;;  %2247 = vadd.xlane.f32.xlu0 %v2246_v13  ;;  %v6250_v17 = vsel %vm4483_vm1, %v6249_v58, %v6245_v26  ;;  %v6200_v13 = vrot.slane %v11803_v55, %v9973_v56  ;;  %v2264_v58 = vsel %vm973_vm0, %v635_v47, 0.0  ;;  %v6196_v26 = vsel %vm4518_vm6, %v6195_v36, %v6191_v10 }
 0x36d   : > { %v2041_v22 = vpop.xlane.xlu1 %2040  ;;  %v2038_v37 = vpop.xlane.xlu0 %2037  ;;  %v2279_v36 = vsel %vm973_vm0, %v640_v20, 0.0  ;;  %v6225_v47 = vrot.slane %v11829_v46, %v10025_v44  ;;  %v645_v20 = vld [vmem:[%s9778_s29 + $0xdc0] sm:$0xff] }
 0x36e   : > { %v6254_v12 = vrot.slane %v2038_v37, %v9950_v35  ;;  %v6259_v63 = vrot.slane %v2041_v22, %v9943_v32  ;;  %v638_v22 = vld [vmem:[%s9778_s29 + $0xd88] sm:$0xff]  ;;  %v637_v37 = vld [vmem:[%s9778_s29 + $0xd80] sm:$0xff]  ;;  %v6201_v5 = vsel %vm4525_vm7, %v6200_v13, %v6196_v26 }
 0x36f   : > { %v2273_v14 = vsel %vm973_vm0, %v638_v22, 0.0  ;;  %v2270_v16 = vsel %vm973_vm0, %v637_v37, 0.0  ;;  %v644_v37 = vld [vmem:[%s9778_s29 + $0xdb8] sm:$0xff] }
 0x370   : > { %v6255_v45 = vsel %vm14697_vm2, %v6254_v12, %v6250_v17  ;;  %2256 = vadd.xlane.f32.xlu1 %v2255_v4  ;;  %2253 = vadd.xlane.f32.xlu0 %v2252_v62  ;;  %v6206_v17 = vsel %vm14733_vm11, %v6205_v27, %v6201_v5 }
 0x371   : > { %v2047_v9 = vpop.xlane.xlu1 %2046  ;;  %v2044_v51 = vpop.xlane.xlu0 %2043  ;;  %v6260_v48 = vsel %vm4497_vm3, %v6259_v63, %v6255_v45  ;;  %v6215_v63 = vrot.slane %v11821_v38, %v10015_v30 }
 0x372   : > { %v6264_v39 = vrot.slane %v2044_v51, %v9958_v41  ;;  %v6269_v49 = vrot.slane %v2047_v9, %v9955_v40 }
 0x374   : > { %v6265_v50 = vsel %vm4504_vm4, %v6264_v39, %v6260_v48  ;;  %2262 = vadd.xlane.f32.xlu1 %v2261_v54  ;;  %2259 = vadd.xlane.f32.xlu0 %v2258_v28  ;;  %v6220_v54 = vrot.slane %v11819_v6, %v10012_v29  ;;  %v6211_v28 = vsel %vm4539_vm9, %v6210_v23, %v6206_v17  ;;  %v2276_v39 = vsel %vm973_vm0, %v639_v21, 0.0  ;;  %v642_v48 = vld [vmem:[%s9778_s29 + $0xda8] sm:$0xff] }
 0x375   : > { %v2053_v11 = vpop.xlane.xlu1 %2052  ;;  %v2050_v53 = vpop.xlane.xlu0 %2049  ;;  %v6270_v4 = vsel %vm4511_vm5, %v6269_v49, %v6265_v50  ;;  %v6216_v42 = vsel %vm4546_vm10, %v6215_v63, %v6211_v28  ;;  %v641_v50 = vld [vmem:[%s9778_s29 + $0xda0] sm:$0xff]  ;;  %v6240_v23 = vrot.slane %v11835_v24, %v10040_v15  ;;  %v2294_v28 = vsel %vm973_vm0, %v645_v20, 0.0 }
 0x376   : > { %v6274_v61 = vrot.slane %v2050_v53, %v9983_v0  ;;  %v6279_v55 = vrot.slane %v2053_v11, %v9973_v56  ;;  %v6230_v11 = vrot.slane %v11827_v19, %v10022_v43  ;;  %v2282_v26 = vsel %vm973_vm0, %v641_v50, 0.0 }
 0x378   : > { %v6275_v62 = vsel %vm4518_vm6, %v6274_v61, %v6270_v4  ;;  %2268 = vadd.xlane.f32.xlu1 %v2267_v57  ;;  %2265 = vadd.xlane.f32.xlu0 %v2264_v58  ;;  %v2285_v58 = vsel %vm973_vm0, %v642_v48, 0.0  ;;  %v6235_v61 = vrot.slane %v11837_v25, %v10043_v60 }
 0x379   : > { %v2059_v3 = vpop.xlane.xlu1 %2058  ;;  %v2056_v12 = vpop.xlane.xlu0 %2055  ;;  %v6280_v9 = vsel %vm4525_vm7, %v6279_v55, %v6275_v62  ;;  %v643_v55 = vld [vmem:[%s9778_s29 + $0xdb0] sm:$0xff] }
 0x37a   : > { %v6284_v45 = vrot.slane %v2056_v12, %v9993_v8  ;;  %v6289_v1 = vrot.slane %v2059_v3, %v9990_v7  ;;  %v2291_v12 = vsel %vm973_vm0, %v644_v37, 0.0 }
 0x37c   : > { %v6285_v51 = vsel %vm14734_vm8, %v6284_v45, %v6280_v9  ;;  %2274 = vadd.xlane.f32.xlu1 %v2273_v14  ;;  %2271 = vadd.xlane.f32.xlu0 %v2270_v16  ;;  %vm14735_vm8 = vcmask 786112   ;;  %v2288_v14 = vsel %vm973_vm0, %v643_v55, 0.0  ;;  %v646_v45 = vld [vmem:[%s9778_s29 + $0xdc8] sm:$0xff]  ;;  %v652_v55 = vld [vmem:[%s9778_s29 + $0xdf8] sm:$0xff] }
 0x37d   : > { %v2065_v38 = vpop.xlane.xlu1 %2064  ;;  %v2062_v34 = vpop.xlane.xlu0 %2061  ;;  %v6290_v13 = vsel %vm4539_vm9, %v6289_v1, %v6285_v51  ;;  %v6221_v53 = vsel %vm14735_vm8, %v6220_v54, %v6216_v42  ;;  %vm14736_vm11 = vmmov %vm14735_vm8  ;;  %vm8308_vm8 = vcmask 1047559   ;;  %v2297_v54 = vsel %vm973_vm0, %v646_v45, 0.0  ;;  %v648_v42 = vld [vmem:[%s9778_s29 + $0xdd8] sm:$0xff] }
 0x37e   : > { %v6294_v49 = vrot.slane %v2062_v34, %v10015_v30  ;;  %v6299_v6 = vrot.slane %v2065_v38, %v10012_v29  ;;  %v6226_v27 = vsel %vm4560_vm12, %v6225_v47, %v6221_v53  ;;  %v647_v47 = vld [vmem:[%s9778_s29 + $0xdd0] sm:$0xff]  ;;  %v650_v53 = vld [vmem:[%s9778_s29 + $0xde8] sm:$0xff] }
 0x37f   : > { %v6231_v5 = vsel %vm4567_vm13, %v6230_v11, %v6226_v27  ;;  %v2309_v27 = vsel %vm973_vm0, %v650_v53, 0.0 }
 0x380   : > { %v6295_v10 = vsel %vm4546_vm10, %v6294_v49, %v6290_v13  ;;  %2280 = vadd.xlane.f32.xlu1 %v2279_v36  ;;  %2277 = vadd.xlane.f32.xlu0 %v2276_v39  ;;  %v6236_v16 = vsel %vm4574_vm14, %v6235_v61, %v6231_v5  ;;  %v2300_v13 = vsel %vm973_vm0, %v647_v47, 0.0 }
 0x381   : > { %v2071_v46 = vpop.xlane.xlu1 %2070  ;;  %v2068_v57 = vpop.xlane.xlu0 %2067  ;;  %v6300_v4 = vsel %vm14736_vm11, %v6299_v6, %v6295_v10  ;;  %v6241_v38 = vsel %vm4581_vm15, %v6240_v23, %v6236_v16  ;;  %v2303_v6 = vsel %vm973_vm0, %v648_v42, 0.0  ;;  %v654_v16 = vld [vmem:[%s9778_s29 + $0xe08] sm:$0xff]  ;;  %vm14737_vm11 = vcmask 589312  }
 0x382   : > { %v6304_v22 = vrot.slane %v2068_v57, %v10025_v44  ;;  %v6309_v19 = vrot.slane %v2071_v46, %v10022_v43  ;;  %v11968_v48 = vsel %vm8308_vm8, %v6241_v38, %v11649_v2  ;;  %v649_v46 = vld [vmem:[%s9778_s29 + $0xde0] sm:$0xff] }
 0x383   : > { %v2306_v61 = vsel %vm973_vm0, %v649_v46, 0.0 }
 0x384   : > { %v6305_v62 = vsel %vm4560_vm12, %v6304_v22, %v6300_v4  ;;  %2286 = vadd.xlane.f32.xlu1 %v2285_v58  ;;  %2283 = vadd.xlane.f32.xlu0 %v2282_v26 }
 0x385   : > { %v2077_v25 = vpop.xlane.xlu1 %2076  ;;  %v2074_v3 = vpop.xlane.xlu0 %2073  ;;  %v6310_v24 = vsel %vm4567_vm13, %v6309_v19, %v6305_v62  ;;  %v651_v19 = vld [vmem:[%s9778_s29 + $0xdf0] sm:$0xff] }
 0x386   : > { %v6319_v17 = vrot.slane %v2077_v25, %v10040_v15  ;;  %v6314_v63 = vrot.slane %v2074_v3, %v10043_v60  ;;  %v2315_v25 = vsel %vm973_vm0, %v652_v55, 0.0  ;;  %v2312_v3 = vsel %vm973_vm0, %v651_v19, 0.0 }
 0x388   : > { %v6315_v21 = vsel %vm4574_vm14, %v6314_v63, %v6310_v24  ;;  %2292 = vadd.xlane.f32.xlu1 %v2291_v12  ;;  %2289 = vadd.xlane.f32.xlu0 %v2288_v14 }
 0x389   : > { %v2083_v1 = vpop.xlane.xlu1 %2082  ;;  %v2080_v9 = vpop.xlane.xlu0 %2079  ;;  %v6320_v51 = vsel %vm4581_vm15, %v6319_v17, %v6315_v21  ;;  %v653_v17 = vld [vmem:[%s9778_s29 + $0xe00] sm:$0xff]  ;;  %v2321_v21 = vsel %vm973_vm0, %v654_v16, 0.0 }
 0x38a   : > { %v6328_v34 = vrot.slane %v2083_v1, %v9946_v33  ;;  %v6324_v36 = vrot.slane %v2080_v9, %v9940_v31  ;;  %v11959_v39 = vsel %vm8308_vm8, %v6320_v51, %v11716_v52  ;;  %v2318_v1 = vsel %vm973_vm0, %v653_v17, 0.0 }
 0x38b   : > { %8415 = vmatprep.mubr.f32.mxu0 %v11959_v39  ;;  %8569 = vmatprep.mubr.f32.mxu1 %v11959_v39 }
 0x38c   : > { %v6329_v49 = vsel %vm4483_vm1, %v6328_v34, %v6324_v36  ;;  %2298 = vadd.xlane.f32.xlu1 %v2297_v54  ;;  %2295 = vadd.xlane.f32.xlu0 %v2294_v28  ;;  %v656_v54 = vld [vmem:[%s9778_s29 + $0xe18] sm:$0xff]  ;;  %v655_v28 = vld [vmem:[%s9778_s29 + $0xe10] sm:$0xff] }
 0x38d   : > { %8416 = vmatmul.mubr.f32.vlgmr.msra.gmra.mrb[0].mxu0 %v11968_v48  ;;  %8570 = vmatmul.mubr.f32.vlgmr.msra.gmra.mrb[0].mxu1 %v11968_v48  ;;  %v2089_v52 = vpop.xlane.xlu1 %2088  ;;  %v2086_v50 = vpop.xlane.xlu0 %2085  ;;  %v2327_v47 = vsel %vm973_vm0, %v656_v54, 0.0 }
 0x38e   : > { %v6338_v10 = vrot.slane %v2089_v52, %v9943_v32  ;;  %v6333_v11 = vrot.slane %v2086_v50, %v9950_v35 }
 0x390   : > { %v6334_v2 = vsel %vm14697_vm2, %v6333_v11, %v6329_v49  ;;  %2304 = vadd.xlane.f32.xlu1 %v2303_v6  ;;  %2301 = vadd.xlane.f32.xlu0 %v2300_v13  ;;  %v2324_v49 = vsel %vm973_vm0, %v655_v28, 0.0  ;;  %v658_v6 = vld [vmem:[%s9778_s29 + $0xe28] sm:$0xff]  ;;  %v657_v13 = vld [vmem:[%s9778_s29 + $0xe20] sm:$0xff] }
 0x391   : > { %v2095_v57 = vpop.xlane.xlu1 %2094  ;;  %v6339_v58 = vsel %vm4497_vm3, %v6338_v10, %v6334_v2  ;;  %v2092_v26 = vpop.xlane.xlu0 %2091  ;;  %v2333_v2 = vsel %vm973_vm0, %v658_v6, 0.0 }
 0x392   : > { %v6348_v22 = vrot.slane %v2095_v57, %v9955_v40  ;;  %v6343_v37 = vrot.slane %v2092_v26, %v9958_v41  ;;  %v2330_v57 = vsel %vm973_vm0, %v657_v13, 0.0 }
 0x394   : > { %v6344_v4 = vsel %vm4504_vm4, %v6343_v37, %v6339_v58  ;;  %2310 = vadd.xlane.f32.xlu1 %v2309_v27  ;;  %2307 = vadd.xlane.f32.xlu0 %v2306_v61  ;;  %v660_v27 = vld [vmem:[%s9778_s29 + $0xe38] sm:$0xff]  ;;  %v659_v61 = vld [vmem:[%s9778_s29 + $0xe30] sm:$0xff] }
 0x395   : > { %v2101_v62 = vpop.xlane.xlu1 %2100  ;;  %v6349_v23 = vsel %vm4511_vm5, %v6348_v22, %v6344_v4  ;;  %v2098_v5 = vpop.xlane.xlu0 %2097  ;;  %v2339_v4 = vsel %vm973_vm0, %v660_v27, 0.0 }
 0x396   : > { %v6358_v12 = vrot.slane %v2101_v62, %v9973_v56  ;;  %v6353_v14 = vrot.slane %v2098_v5, %v9983_v0  ;;  %v2336_v62 = vsel %vm973_vm0, %v659_v61, 0.0 }
 0x398   : > { %v6354_v63 = vsel %vm4518_vm6, %v6353_v14, %v6349_v23  ;;  %2316 = vadd.xlane.f32.xlu1 %v2315_v25  ;;  %2313 = vadd.xlane.f32.xlu0 %v2312_v3  ;;  %v662_v25 = vld [vmem:[%s9778_s29 + $0xe48] sm:$0xff]  ;;  %v661_v3 = vld [vmem:[%s9778_s29 + $0xe40] sm:$0xff] }
 0x399   : > { %v2107_v45 = vpop.xlane.xlu1 %2106  ;;  %v6359_v20 = vsel %vm4525_vm7, %v6358_v12, %v6354_v63  ;;  %v2104_v24 = vpop.xlane.xlu0 %2103  ;;  %v2345_v17 = vsel %vm973_vm0, %v662_v25, 0.0  ;;  %v2342_v63 = vsel %vm973_vm0, %v661_v3, 0.0 }
 0x39a   : > { %v6368_v9 = vrot.slane %v2107_v45, %v9990_v7  ;;  %v6363_v51 = vrot.slane %v2104_v24, %v9993_v8 }
 0x39c   : > { %v6364_v38 = vsel %vm14737_vm11, %v6363_v51, %v6359_v20  ;;  %2322 = vadd.xlane.f32.xlu1 %v2321_v21  ;;  %2319 = vadd.xlane.f32.xlu0 %v2318_v1  ;;  %vm14738_vm11 = vcmask 786112   ;;  %v664_v21 = vld [vmem:[%s9778_s29 + $0xe58] sm:$0xff]  ;;  %v663_v1 = vld [vmem:[%s9778_s29 + $0xe50] sm:$0xff] }
 0x39d   : > { %v2113_v34 = vpop.xlane.xlu1 %2112  ;;  %v6369_v36 = vsel %vm4539_vm9, %v6368_v9, %v6364_v38  ;;  %v2110_v42 = vpop.xlane.xlu0 %2109  ;;  %v2351_v38 = vsel %vm973_vm0, %v664_v21, 0.0 }
 0x39e   : > { %v6378_v52 = vrot.slane %v2113_v34, %v10012_v29  ;;  %v6373_v50 = vrot.slane %v2110_v42, %v10015_v30  ;;  %v2348_v34 = vsel %vm973_vm0, %v663_v1, 0.0 }
 0x3a0   : > { %v6374_v10 = vsel %vm4546_vm10, %v6373_v50, %v6369_v36  ;;  %2328 = vadd.xlane.f32.xlu1 %v2327_v47  ;;  %2325 = vadd.xlane.f32.xlu0 %v2324_v49  ;;  %v666_v47 = vld [vmem:[%s9778_s29 + $0xe68] sm:$0xff]  ;;  %v665_v49 = vld [vmem:[%s9778_s29 + $0xe60] sm:$0xff] }
 0x3a1   : > { %v2119_v11 = vpop.xlane.xlu1 %2118  ;;  %v6379_v53 = vsel %vm14738_vm11, %v6378_v52, %v6374_v10  ;;  %v2116_v46 = vpop.xlane.xlu0 %2115  ;;  %v2357_v13 = vsel %vm973_vm0, %v666_v47, 0.0  ;;  %v2354_v10 = vsel %vm973_vm0, %v665_v49, 0.0  ;;  %vm14739_vm11 = vcmask 589312  }
 0x3a2   : > { %v6388_v58 = vrot.slane %v2119_v11, %v10022_v43  ;;  %v6383_v26 = vrot.slane %v2116_v46, %v10025_v44  ;;  %v668_v46 = vld [vmem:[%s9778_s29 + $0xe78] sm:$0xff] }
 0x3a3   : > { %v2363_v61 = vsel %vm973_vm0, %v668_v46, 0.0 }
 0x3a4   : > { %v6384_v22 = vsel %vm4560_vm12, %v6383_v26, %v6379_v53  ;;  %2334 = vadd.xlane.f32.xlu1 %v2333_v2  ;;  %2331 = vadd.xlane.f32.xlu0 %v2330_v57  ;;  %v667_v2 = vld [vmem:[%s9778_s29 + $0xe70] sm:$0xff] }
 0x3a5   : > { %v2125_v37 = vpop.xlane.xlu1 %2124  ;;  %v6389_v55 = vsel %vm4567_vm13, %v6388_v58, %v6384_v22  ;;  %v2122_v19 = vpop.xlane.xlu0 %2121  ;;  %v2360_v22 = vsel %vm973_vm0, %v667_v2, 0.0 }
 0x3a6   : > { %v6398_v23 = vrot.slane %v2125_v37, %v10040_v15  ;;  %v6393_v5 = vrot.slane %v2122_v19, %v10043_v60  ;;  %v670_v19 = vld [vmem:[%s9778_s29 + $0xe88] sm:$0xff] }
 0x3a7   : > { %v2369_v3 = vsel %vm973_vm0, %v670_v19, 0.0 }
 0x3a8   : > { %v6394_v12 = vsel %vm4574_vm14, %v6393_v5, %v6389_v55  ;;  %2340 = vadd.xlane.f32.xlu1 %v2339_v4  ;;  %2337 = vadd.xlane.f32.xlu0 %v2336_v62  ;;  %v669_v4 = vld [vmem:[%s9778_s29 + $0xe80] sm:$0xff] }
 0x3a9   : > { %v2131_v14 = vpop.xlane.xlu1 %2130  ;;  %v2128_v16 = vpop.xlane.xlu0 %2127  ;;  %v6399_v45 = vsel %vm4581_vm15, %v6398_v23, %v6394_v12  ;;  %v2366_v12 = vsel %vm973_vm0, %v669_v4, 0.0 }
 0x3aa   : > { %v6407_v20 = vrot.slane %v2131_v14, %v9946_v33  ;;  %v6403_v24 = vrot.slane %v2128_v16, %v9940_v31  ;;  %v12036_v9 = vsel %vm8308_vm8, %v6399_v45, %v11785_v59 }
 0x3ac   : > { %v6408_v51 = vsel %vm4483_vm1, %v6407_v20, %v6403_v24  ;;  %2346 = vadd.xlane.f32.xlu1 %v2345_v17  ;;  %2343 = vadd.xlane.f32.xlu0 %v2342_v63  ;;  %v672_v17 = vld [vmem:[%s9778_s29 + $0xe98] sm:$0xff]  ;;  %v671_v63 = vld [vmem:[%s9778_s29 + $0xe90] sm:$0xff] }
 0x3ad   : > { %v2137_v54 = vpop.xlane.xlu1 %2136  ;;  %v2134_v28 = vpop.xlane.xlu0 %2133  ;;  %v2375_v1 = vsel %vm973_vm0, %v672_v17, 0.0 }
 0x3ae   : > { %v6417_v36 = vrot.slane %v2137_v54, %v9943_v32  ;;  %v6412_v42 = vrot.slane %v2134_v28, %v9950_v35 }
 0x3b0   : > { %v6413_v59 = vsel %vm14697_vm2, %v6412_v42, %v6408_v51  ;;  %2352 = vadd.xlane.f32.xlu1 %v2351_v38  ;;  %2349 = vadd.xlane.f32.xlu0 %v2348_v34  ;;  %v2372_v51 = vsel %vm973_vm0, %v671_v63, 0.0  ;;  %v674_v38 = vld [vmem:[%s9778_s29 + $0xea8] sm:$0xff]  ;;  %v673_v34 = vld [vmem:[%s9778_s29 + $0xea0] sm:$0xff] }
 0x3b1   : > { %v2143_v52 = vpop.xlane.xlu1 %2142  ;;  %v6418_v50 = vsel %vm4497_vm3, %v6417_v36, %v6413_v59  ;;  %v2140_v6 = vpop.xlane.xlu0 %2139  ;;  %v2381_v59 = vsel %vm973_vm0, %v674_v38, 0.0 }
 0x3b2   : > { %v6427_v11 = vrot.slane %v2143_v52, %v9955_v40  ;;  %v6422_v53 = vrot.slane %v2140_v6, %v9958_v41  ;;  %v2378_v52 = vsel %vm973_vm0, %v673_v34, 0.0 }
 0x3b4   : > { %v6423_v57 = vsel %vm4504_vm4, %v6422_v53, %v6418_v50  ;;  %2358 = vadd.xlane.f32.xlu1 %v2357_v13  ;;  %2355 = vadd.xlane.f32.xlu0 %v2354_v10  ;;  %v676_v13 = vld [vmem:[%s9778_s29 + $0xeb8] sm:$0xff]  ;;  %v675_v10 = vld [vmem:[%s9778_s29 + $0xeb0] sm:$0xff] }
 0x3b5   : > { %v2149_v58 = vpop.xlane.xlu1 %2148  ;;  %v6428_v26 = vsel %vm4511_vm5, %v6427_v11, %v6423_v57  ;;  %v2146_v27 = vpop.xlane.xlu0 %2145  ;;  %v2387_v57 = vsel %vm973_vm0, %v676_v13, 0.0 }
 0x3b6   : > { %v6437_v37 = vrot.slane %v2149_v58, %v9973_v56  ;;  %v6432_v55 = vrot.slane %v2146_v27, %v9983_v0  ;;  %v2384_v58 = vsel %vm973_vm0, %v675_v10, 0.0 }
 0x3b8   : > { %v6433_v62 = vsel %vm4518_vm6, %v6432_v55, %v6428_v26  ;;  %2364 = vadd.xlane.f32.xlu1 %v2363_v61  ;;  %2361 = vadd.xlane.f32.xlu0 %v2360_v22  ;;  %v678_v61 = vld [vmem:[%s9778_s29 + $0xec8] sm:$0xff]  ;;  %v677_v22 = vld [vmem:[%s9778_s29 + $0xec0] sm:$0xff] }
 0x3b9   : > { %v2155_v23 = vpop.xlane.xlu1 %2154  ;;  %v6438_v5 = vsel %vm4525_vm7, %v6437_v37, %v6433_v62  ;;  %v2152_v25 = vpop.xlane.xlu0 %2151  ;;  %v2393_v62 = vsel %vm973_vm0, %v678_v61, 0.0 }
 0x3ba   : > { %v6447_v14 = vrot.slane %v2155_v23, %v9990_v7  ;;  %v6442_v16 = vrot.slane %v2152_v25, %v9993_v8  ;;  %v2390_v23 = vsel %vm973_vm0, %v677_v22, 0.0 }
 0x3bc   : > { %v6443_v45 = vsel %vm14739_vm11, %v6442_v16, %v6438_v5  ;;  %2370 = vadd.xlane.f32.xlu1 %v2369_v3  ;;  %2367 = vadd.xlane.f32.xlu0 %v2366_v12  ;;  %vm14740_vm11 = vcmask 786112   ;;  %v680_v3 = vld [vmem:[%s9778_s29 + $0xed8] sm:$0xff]  ;;  %v679_v12 = vld [vmem:[%s9778_s29 + $0xed0] sm:$0xff] }
 0x3bd   : > { %v2161_v20 = vpop.xlane.xlu1 %2160  ;;  %v6448_v24 = vsel %vm4539_vm9, %v6447_v14, %v6443_v45  ;;  %v2158_v21 = vpop.xlane.xlu0 %2157  ;;  %v2399_v63 = vsel %vm973_vm0, %v680_v3, 0.0  ;;  %v2396_v45 = vsel %vm973_vm0, %v679_v12, 0.0 }
 0x3be   : > { %v6457_v54 = vrot.slane %v2161_v20, %v10012_v29  ;;  %v6452_v28 = vrot.slane %v2158_v21, %v10015_v30  ;;  %v682_v21 = vld [vmem:[%s9778_s29 + $0xee8] sm:$0xff] }
 0x3bf   : > { %v2405_v34 = vsel %vm973_vm0, %v682_v21, 0.0 }
 0x3c0   : > { %v6453_v36 = vsel %vm4546_vm10, %v6452_v28, %v6448_v24  ;;  %2376 = vadd.xlane.f32.xlu1 %v2375_v1  ;;  %2373 = vadd.xlane.f32.xlu0 %v2372_v51  ;;  %v681_v1 = vld [vmem:[%s9778_s29 + $0xee0] sm:$0xff] }
 0x3c1   : > { %v2167_v42 = vpop.xlane.xlu1 %2166  ;;  %v6458_v47 = vsel %vm14740_vm11, %v6457_v54, %v6453_v36  ;;  %v2164_v49 = vpop.xlane.xlu0 %2163  ;;  %v2402_v36 = vsel %vm973_vm0, %v681_v1, 0.0  ;;  %vm14741_vm11 = vcmask 589312  }
 0x3c2   : > { %v6467_v50 = vrot.slane %v2167_v42, %v10022_v43  ;;  %v6462_v6 = vrot.slane %v2164_v49, %v10025_v44  ;;  %v684_v49 = vld [vmem:[%s9778_s29 + $0xef8] sm:$0xff] }
 0x3c3   : > { %v2411_v10 = vsel %vm973_vm0, %v684_v49, 0.0 }
 0x3c4   : > { %v6463_v11 = vsel %vm4560_vm12, %v6462_v6, %v6458_v47  ;;  %2382 = vadd.xlane.f32.xlu1 %v2381_v59  ;;  %2379 = vadd.xlane.f32.xlu0 %v2378_v52  ;;  %v683_v59 = vld [vmem:[%s9778_s29 + $0xef0] sm:$0xff] }
 0x3c5   : > { %v2173_v53 = vpop.xlane.xlu1 %2172  ;;  %v6468_v46 = vsel %vm4567_vm13, %v6467_v50, %v6463_v11  ;;  %v2170_v2 = vpop.xlane.xlu0 %2169  ;;  %v2408_v11 = vsel %vm973_vm0, %v683_v59, 0.0 }
 0x3c6   : > { %v6477_v26 = vrot.slane %v2173_v53, %v10040_v15  ;;  %v6472_v27 = vrot.slane %v2170_v2, %v10043_v60  ;;  %v686_v2 = vld [vmem:[%s9778_s29 + $0xf08] sm:$0xff] }
 0x3c7   : > { %v2417_v22 = vsel %vm973_vm0, %v686_v2, 0.0 }
 0x3c8   : > { %v6473_v37 = vsel %vm4574_vm14, %v6472_v27, %v6468_v46  ;;  %2388 = vadd.xlane.f32.xlu1 %v2387_v57  ;;  %2385 = vadd.xlane.f32.xlu0 %v2384_v58  ;;  %v685_v57 = vld [vmem:[%s9778_s29 + $0xf00] sm:$0xff] }
 0x3c9   : > { %v12095_v55 = vsel %vm4581_vm15, %v6477_v26, %v6473_v37  ;;  %v2179_v19 = vpop.xlane.xlu1 %2178  ;;  %v2176_v4 = vpop.xlane.xlu0 %2175  ;;  %v2414_v37 = vsel %vm973_vm0, %v685_v57, 0.0 }
 0x3ca   : > { %v6486_v5 = vrot.slane %v2179_v19, %v9946_v33  ;;  %v6482_v25 = vrot.slane %v2176_v4, %v9940_v31 }
 0x3cc   : > { %v6487_v14 = vsel %vm4483_vm1, %v6486_v5, %v6482_v25  ;;  %2394 = vadd.xlane.f32.xlu1 %v2393_v62  ;;  %2391 = vadd.xlane.f32.xlu0 %v2390_v23  ;;  %v688_v62 = vld [vmem:[%s9778_s29 + $0xf18] sm:$0xff]  ;;  %v687_v23 = vld [vmem:[%s9778_s29 + $0xf10] sm:$0xff] }
 0x3cd   : > { %v2185_v16 = vpop.xlane.xlu1 %2184  ;;  %v2182_v17 = vpop.xlane.xlu0 %2181 }
 0x3ce   : > { %v6496_v20 = vrot.slane %v2185_v16, %v9943_v32  ;;  %v6491_v24 = vrot.slane %v2182_v17, %v9950_v35  ;;  %v2420_v16 = vsel %vm973_vm0, %v687_v23, 0.0 }
 0x3d0   : > { %v6492_v51 = vsel %vm14697_vm2, %v6491_v24, %v6487_v14  ;;  %2400 = vadd.xlane.f32.xlu1 %v2399_v63  ;;  %2397 = vadd.xlane.f32.xlu0 %v2396_v45  ;;  %v2423_v14 = vsel %vm973_vm0, %v688_v62, 0.0  ;;  %v690_v45 = vld [vmem:[%s9778_s29 + $0xf28] sm:$0xff] }
 0x3d1   : > { %v2191_v54 = vpop.xlane.xlu1 %2190  ;;  %v6497_v28 = vsel %vm4497_vm3, %v6496_v20, %v6492_v51  ;;  %v2188_v38 = vpop.xlane.xlu0 %2187  ;;  %v689_v20 = vld [vmem:[%s9778_s29 + $0xf20] sm:$0xff] }
 0x3d2   : > { %v6506_v42 = vrot.slane %v2191_v54, %v9955_v40  ;;  %v6501_v47 = vrot.slane %v2188_v38, %v9958_v41  ;;  %v2429_v54 = vsel %vm973_vm0, %v690_v45, 0.0 }
 0x3d4   : > { %v6502_v52 = vsel %vm4504_vm4, %v6501_v47, %v6497_v28  ;;  %2406 = vadd.xlane.f32.xlu1 %v2405_v34  ;;  %2403 = vadd.xlane.f32.xlu0 %v2402_v36  ;;  %v2426_v28 = vsel %vm973_vm0, %v689_v20, 0.0  ;;  %v692_v36 = vld [vmem:[%s9778_s29 + $0xf38] sm:$0xff] }
 0x3d5   : > { %v2197_v50 = vpop.xlane.xlu1 %2196  ;;  %v6507_v6 = vsel %vm4511_vm5, %v6506_v42, %v6502_v52  ;;  %v2194_v13 = vpop.xlane.xlu0 %2193  ;;  %v691_v42 = vld [vmem:[%s9778_s29 + $0xf30] sm:$0xff] }
 0x3d6   : > { %v6516_v53 = vrot.slane %v2197_v50, %v9973_v56  ;;  %v6511_v46 = vrot.slane %v2194_v13, %v9983_v0  ;;  %v2435_v50 = vsel %vm973_vm0, %v692_v36, 0.0 }
 0x3d8   : > { %v6512_v58 = vsel %vm4518_vm6, %v6511_v46, %v6507_v6  ;;  %2412 = vadd.xlane.f32.xlu1 %v2411_v10  ;;  %2409 = vadd.xlane.f32.xlu0 %v2408_v11  ;;  %v2432_v6 = vsel %vm973_vm0, %v691_v42, 0.0  ;;  %v694_v11 = vld [vmem:[%s9778_s29 + $0xf48] sm:$0xff] }
 0x3d9   : > { %v2203_v26 = vpop.xlane.xlu1 %2202  ;;  %v6517_v27 = vsel %vm4525_vm7, %v6516_v53, %v6512_v58  ;;  %v2200_v61 = vpop.xlane.xlu0 %2199  ;;  %v693_v53 = vld [vmem:[%s9778_s29 + $0xf40] sm:$0xff] }
 0x3da   : > { %v6526_v19 = vrot.slane %v2203_v26, %v9990_v7  ;;  %v6521_v4 = vrot.slane %v2200_v61, %v9993_v8  ;;  %v2441_v26 = vsel %vm973_vm0, %v694_v11, 0.0 }
 0x3dc   : > { %v6522_v5 = vsel %vm14741_vm11, %v6521_v4, %v6517_v27  ;;  %2418 = vadd.xlane.f32.xlu1 %v2417_v22  ;;  %2415 = vadd.xlane.f32.xlu0 %v2414_v37  ;;  %vm14742_vm11 = vcmask 786112   ;;  %v2438_v27 = vsel %vm973_vm0, %v693_v53, 0.0  ;;  %v696_v37 = vld [vmem:[%s9778_s29 + $0xf58] sm:$0xff] }
 0x3dd   : > { %v2209_v25 = vpop.xlane.xlu1 %2208  ;;  %v6527_v3 = vsel %vm4539_vm9, %v6526_v19, %v6522_v5  ;;  %v2206_v12 = vpop.xlane.xlu0 %2205  ;;  %v695_v19 = vld [vmem:[%s9778_s29 + $0xf50] sm:$0xff]  ;;  %v2447_v5 = vsel %vm973_vm0, %v696_v37, 0.0 }
 0x3de   : > { %v6536_v17 = vrot.slane %v2209_v25, %v10012_v29  ;;  %v6531_v63 = vrot.slane %v2206_v12, %v10015_v30  ;;  %v2444_v25 = vsel %vm973_vm0, %v695_v19, 0.0 }
 0x3e0   : > { %v6532_v24 = vsel %vm4546_vm10, %v6531_v63, %v6527_v3  ;;  %2424 = vadd.xlane.f32.xlu1 %v2423_v14  ;;  %2421 = vadd.xlane.f32.xlu0 %v2420_v16  ;;  %v698_v14 = vld [vmem:[%s9778_s29 + $0xf68] sm:$0xff]  ;;  %v697_v16 = vld [vmem:[%s9778_s29 + $0xf60] sm:$0xff] }
 0x3e1   : > { %v2215_v21 = vpop.xlane.xlu1 %2214  ;;  %v6537_v1 = vsel %vm14742_vm11, %v6536_v17, %v6532_v24  ;;  %v2212_v51 = vpop.xlane.xlu0 %2211  ;;  %v2453_v24 = vsel %vm973_vm0, %v698_v14, 0.0  ;;  %vm14743_vm11 = vcmask 589312  }
 0x3e2   : > { %v6546_v38 = vrot.slane %v2215_v21, %v10022_v43  ;;  %v6541_v34 = vrot.slane %v2212_v51, %v10025_v44  ;;  %v2450_v21 = vsel %vm973_vm0, %v697_v16, 0.0 }
 0x3e4   : > { %v6542_v47 = vsel %vm4560_vm12, %v6541_v34, %v6537_v1  ;;  %2430 = vadd.xlane.f32.xlu1 %v2429_v54  ;;  %2427 = vadd.xlane.f32.xlu0 %v2426_v28  ;;  %v700_v54 = vld [vmem:[%s9778_s29 + $0xf78] sm:$0xff]  ;;  %v699_v28 = vld [vmem:[%s9778_s29 + $0xf70] sm:$0xff] }
 0x3e5   : > { %v2221_v49 = vpop.xlane.xlu1 %2220  ;;  %v6547_v59 = vsel %vm4567_vm13, %v6546_v38, %v6542_v47  ;;  %v2218_v52 = vpop.xlane.xlu0 %2217  ;;  %v2459_v47 = vsel %vm973_vm0, %v700_v54, 0.0 }
 0x3e6   : > { %v6556_v13 = vrot.slane %v2221_v49, %v10040_v15  ;;  %v6551_v10 = vrot.slane %v2218_v52, %v10043_v60  ;;  %v2456_v49 = vsel %vm973_vm0, %v699_v28, 0.0 }
 0x3e8   : > { %v6552_v46 = vsel %vm4574_vm14, %v6551_v10, %v6547_v59  ;;  %2436 = vadd.xlane.f32.xlu1 %v2435_v50  ;;  %2433 = vadd.xlane.f32.xlu0 %v2432_v6  ;;  %v702_v50 = vld [vmem:[%s9778_s29 + $0xf88] sm:$0xff]  ;;  %v701_v6 = vld [vmem:[%s9778_s29 + $0xf80] sm:$0xff] }
 0x3e9   : > { %v12160_v2 = vsel %vm4581_vm15, %v6556_v13, %v6552_v46  ;;  %v2227_v57 = vpop.xlane.xlu1 %2226  ;;  %v2224_v58 = vpop.xlane.xlu0 %2223  ;;  %v2465_v46 = vsel %vm973_vm0, %v702_v50, 0.0 }
 0x3ea   : > { %v6565_v61 = vrot.slane %v2227_v57, %v9946_v33  ;;  %v6561_v22 = vrot.slane %v2224_v58, %v9940_v31  ;;  %v2462_v57 = vsel %vm973_vm0, %v701_v6, 0.0 }
 0x3ec   : > { %v6566_v4 = vsel %vm4483_vm1, %v6565_v61, %v6561_v22  ;;  %2442 = vadd.xlane.f32.xlu1 %v2441_v26  ;;  %2439 = vadd.xlane.f32.xlu0 %v2438_v27  ;;  %v704_v27 = vld [vmem:[%s9778_s29 + $0xf98] sm:$0xff]  ;;  %v703_v61 = vld [vmem:[%s9778_s29 + $0xf90] sm:$0xff] }
 0x3ed   : > { %v2233_v62 = vpop.xlane.xlu1 %2232  ;;  %v2230_v23 = vpop.xlane.xlu0 %2229 }
 0x3ee   : > { %v6575_v3 = vrot.slane %v2233_v62, %v9943_v32  ;;  %v6570_v12 = vrot.slane %v2230_v23, %v9950_v35  ;;  %v2471_v62 = vsel %vm973_vm0, %v704_v27, 0.0  ;;  %v2468_v23 = vsel %vm973_vm0, %v703_v61, 0.0 }
 0x3f0   : > { %v6571_v17 = vsel %vm14697_vm2, %v6570_v12, %v6566_v4  ;;  %2448 = vadd.xlane.f32.xlu1 %v2447_v5  ;;  %2445 = vadd.xlane.f32.xlu0 %v2444_v25  ;;  %v705_v12 = vld [vmem:[%s9778_s29 + $0xfa0] sm:$0xff] }
 0x3f1   : > { %v2239_v63 = vpop.xlane.xlu1 %2238  ;;  %v6576_v45 = vsel %vm4497_vm3, %v6575_v3, %v6571_v17  ;;  %v2236_v20 = vpop.xlane.xlu0 %2235  ;;  %v706_v3 = vld [vmem:[%s9778_s29 + $0xfa8] sm:$0xff] }
 0x3f2   : > { %v6585_v1 = vrot.slane %v2239_v63, %v9955_v40  ;;  %v6580_v51 = vrot.slane %v2236_v20, %v9958_v41  ;;  %v2474_v20 = vsel %vm973_vm0, %v705_v12, 0.0 }
 0x3f4   : > { %v6581_v38 = vsel %vm4504_vm4, %v6580_v51, %v6576_v45  ;;  %2454 = vadd.xlane.f32.xlu1 %v2453_v24  ;;  %2451 = vadd.xlane.f32.xlu0 %v2450_v21  ;;  %v2477_v45 = vsel %vm973_vm0, %v706_v3, 0.0  ;;  %v707_v51 = vld [vmem:[%s9778_s29 + $0xfb0] sm:$0xff] }
 0x3f5   : > { %v2245_v34 = vpop.xlane.xlu1 %2244  ;;  %v6586_v36 = vsel %vm4511_vm5, %v6585_v1, %v6581_v38  ;;  %v2242_v42 = vpop.xlane.xlu0 %2241  ;;  %v708_v1 = vld [vmem:[%s9778_s29 + $0xfb8] sm:$0xff] }
 0x3f6   : > { %v6595_v59 = vrot.slane %v2245_v34, %v9973_v56  ;;  %v6590_v52 = vrot.slane %v2242_v42, %v9983_v0  ;;  %v2480_v42 = vsel %vm973_vm0, %v707_v51, 0.0 }
 0x3f8   : > { %v6591_v13 = vsel %vm4518_vm6, %v6590_v52, %v6586_v36  ;;  %2460 = vadd.xlane.f32.xlu1 %v2459_v47  ;;  %2457 = vadd.xlane.f32.xlu0 %v2456_v49  ;;  %v2483_v36 = vsel %vm973_vm0, %v708_v1, 0.0  ;;  %v709_v52 = vld [vmem:[%s9778_s29 + $0xfc0] sm:$0xff] }
 0x3f9   : > { %v2251_v10 = vpop.xlane.xlu1 %2250  ;;  %v6596_v11 = vsel %vm4525_vm7, %v6595_v59, %v6591_v13  ;;  %v2248_v53 = vpop.xlane.xlu0 %2247  ;;  %v710_v59 = vld [vmem:[%s9778_s29 + $0xfc8] sm:$0xff] }
 0x3fa   : > { %v6605_v58 = vrot.slane %v2251_v10, %v9990_v7  ;;  %v6600_v26 = vrot.slane %v2248_v53, %v9993_v8  ;;  %v2486_v53 = vsel %vm973_vm0, %v709_v52, 0.0 }
 0x3fc   : > { %v6601_v22 = vsel %vm14743_vm11, %v6600_v26, %v6596_v11  ;;  %2466 = vadd.xlane.f32.xlu1 %v2465_v46  ;;  %2463 = vadd.xlane.f32.xlu0 %v2462_v57  ;;  %vm14744_vm11 = vcmask 786112   ;;  %v2489_v11 = vsel %vm973_vm0, %v710_v59, 0.0  ;;  %v711_v26 = vld [vmem:[%s9778_s29 + $0xfd0] sm:$0xff] }
 0x3fd   : > { %v2257_v37 = vpop.xlane.xlu1 %2256  ;;  %v6606_v19 = vsel %vm4539_vm9, %v6605_v58, %v6601_v22  ;;  %v2254_v4 = vpop.xlane.xlu0 %2253  ;;  %v712_v58 = vld [vmem:[%s9778_s29 + $0xfd8] sm:$0xff] }
 0x3fe   : > { %v6615_v5 = vrot.slane %v2257_v37, %v10012_v29  ;;  %v6610_v25 = vrot.slane %v2254_v4, %v10015_v30  ;;  %v2495_v37 = vsel %vm973_vm0, %v712_v58, 0.0 }
 0x400   : > { %v6611_v14 = vsel %vm4546_vm10, %v6610_v25, %v6606_v19  ;;  %2472 = vadd.xlane.f32.xlu1 %v2471_v62  ;;  %2469 = vadd.xlane.f32.xlu0 %v2468_v23  ;;  %v2492_v19 = vsel %vm973_vm0, %v711_v26, 0.0  ;;  %v714_v23 = vld [vmem:[%s9778_s29 + $0xfe8] sm:$0xff] }
 0x401   : > { %v2263_v16 = vpop.xlane.xlu1 %2262  ;;  %v6616_v17 = vsel %vm14744_vm11, %v6615_v5, %v6611_v14  ;;  %v2260_v63 = vpop.xlane.xlu0 %2259  ;;  %v713_v5 = vld [vmem:[%s9778_s29 + $0xfe0] sm:$0xff]  ;;  %vm14745_vm11 = vcmask 589312  }
 0x402   : > { %v6625_v24 = vrot.slane %v2263_v16, %v10022_v43  ;;  %v6620_v21 = vrot.slane %v2260_v63, %v10025_v44  ;;  %v2501_v16 = vsel %vm973_vm0, %v714_v23, 0.0  ;;  %v750_v23 = vld [vmem:[%s9778_s29 + $0x1108] sm:$0xff] }
 0x404   : > { %v6621_v54 = vsel %vm4560_vm12, %v6620_v21, %v6616_v17  ;;  %2478 = vadd.xlane.f32.xlu1 %v2477_v45  ;;  %2475 = vadd.xlane.f32.xlu0 %v2474_v20  ;;  %v2498_v17 = vsel %vm973_vm0, %v713_v5, 0.0  ;;  %v716_v20 = vld [vmem:[%s9778_s29 + $0xff8] sm:$0xff] }
 0x405   : > { %v2269_v28 = vpop.xlane.xlu1 %2268  ;;  %v6626_v38 = vsel %vm4567_vm13, %v6625_v24, %v6621_v54  ;;  %v2266_v34 = vpop.xlane.xlu0 %2265  ;;  %v715_v24 = vld [vmem:[%s9778_s29 + $0xff0] sm:$0xff] }
 0x406   : > { %v6635_v47 = vrot.slane %v2269_v28, %v10040_v15  ;;  %v6630_v49 = vrot.slane %v2266_v34, %v10043_v60  ;;  %v2507_v28 = vsel %vm973_vm0, %v716_v20, 0.0  ;;  %v734_v20 = vld [vmem:[%s9778_s29 + $0x1088] sm:$0xff] }
 0x408   : > { %v6631_v50 = vsel %vm4574_vm14, %v6630_v49, %v6626_v38  ;;  %2484 = vadd.xlane.f32.xlu1 %v2483_v36  ;;  %2481 = vadd.xlane.f32.xlu0 %v2480_v42  ;;  %v2504_v38 = vsel %vm973_vm0, %v715_v24, 0.0  ;;  %v718_v42 = vld [vmem:[%s9778_s29 + $0x1008] sm:$0xff] }
 0x409   : > { %v12225_v6 = vsel %vm4581_vm15, %v6635_v47, %v6631_v50  ;;  %v2275_v13 = vpop.xlane.xlu1 %2274  ;;  %v2272_v10 = vpop.xlane.xlu0 %2271  ;;  %v717_v47 = vld [vmem:[%s9778_s29 + $0x1000] sm:$0xff] }
 0x40a   : > { %v6644_v46 = vrot.slane %v2275_v13, %v9946_v33  ;;  %v6640_v57 = vrot.slane %v2272_v10, %v9940_v31  ;;  %v2513_v13 = vsel %vm973_vm0, %v718_v42, 0.0  ;;  %v2510_v10 = vsel %vm973_vm0, %v717_v47, 0.0  ;;  %v797_v42 = vld [vmem:[%s9778_s29 + $0x1280] sm:$0xff] }
 0x40c   : > { %v6645_v27 = vsel %vm4483_vm1, %v6644_v46, %v6640_v57  ;;  %2490 = vadd.xlane.f32.xlu1 %v2489_v11  ;;  %2487 = vadd.xlane.f32.xlu0 %v2486_v53  ;;  %v749_v46 = vld [vmem:[%s9778_s29 + $0x1100] sm:$0xff]  ;;  %v719_v57 = vld [vmem:[%s9778_s29 + $0x1010] sm:$0xff] }
 0x40d   : > { %v2281_v61 = vpop.xlane.xlu1 %2280  ;;  %v2278_v22 = vpop.xlane.xlu0 %2277 }
 0x40e   : > { %v6654_v4 = vrot.slane %v2281_v61, %v9943_v32  ;;  %v6649_v62 = vrot.slane %v2278_v22, %v9950_v35  ;;  %v2606_v22 = vsel %vm973_vm0, %v749_v46, 0.0  ;;  %v752_v46 = vld [vmem:[%s9778_s29 + $0x1118] sm:$0xff] }
 0x410   : > { %v6650_v25 = vsel %vm14697_vm2, %v6649_v62, %v6645_v27  ;;  %2496 = vadd.xlane.f32.xlu1 %v2495_v37  ;;  %2493 = vadd.xlane.f32.xlu0 %v2492_v19  ;;  %v2516_v37 = vsel %vm973_vm0, %v719_v57, 0.0  ;;  %v733_v62 = vld [vmem:[%s9778_s29 + $0x1080] sm:$0xff]  ;;  %v735_v57 = vld [vmem:[%s9778_s29 + $0x1090] sm:$0xff] }
 0x411   : > { %v2287_v3 = vpop.xlane.xlu1 %2286  ;;  %v6655_v12 = vsel %vm4497_vm3, %v6654_v4, %v6650_v25  ;;  %v2284_v14 = vpop.xlane.xlu0 %2283 }
 0x412   : > { %v6664_v63 = vrot.slane %v2287_v3, %v9955_v40  ;;  %v6659_v45 = vrot.slane %v2284_v14, %v9958_v41  ;;  %v2558_v14 = vsel %vm973_vm0, %v733_v62, 0.0 }
 0x414   : > { %v6660_v21 = vsel %vm4504_vm4, %v6659_v45, %v6655_v12  ;;  %2502 = vadd.xlane.f32.xlu1 %v2501_v16  ;;  %2499 = vadd.xlane.f32.xlu0 %v2498_v17  ;;  %v2609_v16 = vsel %vm973_vm0, %v750_v23, 0.0  ;;  %v751_v45 = vld [vmem:[%s9778_s29 + $0x1110] sm:$0xff] }
 0x415   : > { %v2293_v1 = vpop.xlane.xlu1 %2292  ;;  %v6665_v51 = vsel %vm4511_vm5, %v6664_v63, %v6660_v21  ;;  %v2290_v54 = vpop.xlane.xlu0 %2289 }
 0x416   : > { %v6674_v34 = vrot.slane %v2293_v1, %v9973_v56  ;;  %v6669_v36 = vrot.slane %v2290_v54, %v9983_v0  ;;  %v2612_v54 = vsel %vm973_vm0, %v751_v45, 0.0 }
 0x418   : > { %v6670_v49 = vsel %vm4518_vm6, %v6669_v36, %v6665_v51  ;;  %2508 = vadd.xlane.f32.xlu1 %v2507_v28  ;;  %2505 = vadd.xlane.f32.xlu0 %v2504_v38  ;;  %v2561_v28 = vsel %vm973_vm0, %v734_v20, 0.0  ;;  %v798_v36 = vld [vmem:[%s9778_s29 + $0x1288] sm:$0xff] }
 0x419   : > { %v2299_v59 = vpop.xlane.xlu1 %2298  ;;  %v6675_v52 = vsel %vm4525_vm7, %v6674_v34, %v6670_v49  ;;  %v2296_v50 = vpop.xlane.xlu0 %2295 }
 0x41a   : > { %v6684_v11 = vrot.slane %v2299_v59, %v9990_v7  ;;  %v6679_v53 = vrot.slane %v2296_v50, %v9993_v8  ;;  %v2753_v50 = vsel %vm973_vm0, %v798_v36, 0.0 }
 0x41c   : > { %v6680_v58 = vsel %vm14745_vm11, %v6679_v53, %v6675_v52  ;;  %2514 = vadd.xlane.f32.xlu1 %v2513_v13  ;;  %2511 = vadd.xlane.f32.xlu0 %v2510_v10  ;;  %vm14746_vm11 = vcmask 786112   ;;  %v2750_v13 = vsel %vm973_vm0, %v797_v42, 0.0 }
 0x41d   : > { %v2305_v26 = vpop.xlane.xlu1 %2304  ;;  %v6685_v27 = vsel %vm4539_vm9, %v6684_v11, %v6680_v58  ;;  %v2302_v61 = vpop.xlane.xlu0 %2301 }
 0x41e   : > { %v6694_v19 = vrot.slane %v2305_v26, %v10012_v29  ;;  %v6689_v4 = vrot.slane %v2302_v61, %v10015_v30  ;;  %v2615_v61 = vsel %vm973_vm0, %v752_v46, 0.0 }
 0x420   : > { %v6690_v5 = vsel %vm4546_vm10, %v6689_v4, %v6685_v27  ;;  %2607 = vadd.xlane.f32.xlu1 %v2606_v22  ;;  %2517 = vadd.xlane.f32.xlu0 %v2516_v37  ;;  %v2564_v22 = vsel %vm973_vm0, %v735_v57, 0.0  ;;  %v781_v4 = vld [vmem:[%s9778_s29 + $0x1200] sm:$0xff] }
 0x421   : > { %v2311_v25 = vpop.xlane.xlu1 %2310  ;;  %v6695_v3 = vsel %vm14746_vm11, %v6694_v19, %v6690_v5  ;;  %v2308_v12 = vpop.xlane.xlu0 %2307  ;;  %vm14747_vm11 = vcmask 1041409   ;;  %v782_v19 = vld [vmem:[%s9778_s29 + $0x1208] sm:$0xff] }
 0x422   : > { %v6704_v17 = vrot.slane %v2311_v25, %v10022_v43  ;;  %v6699_v63 = vrot.slane %v2308_v12, %v10025_v44  ;;  %v2702_v12 = vsel %vm973_vm0, %v781_v4, 0.0 }
 0x424   : > { %v6700_v24 = vsel %vm4560_vm12, %v6699_v63, %v6695_v3  ;;  %2559 = vadd.xlane.f32.xlu1 %v2558_v14  ;;  %2610 = vadd.xlane.f32.xlu0 %v2609_v16  ;;  %v2705_v3 = vsel %vm973_vm0, %v782_v19, 0.0  ;;  %v799_v63 = vld [vmem:[%s9778_s29 + $0x1290] sm:$0xff]  ;;  %v800_v19 = vld [vmem:[%s9778_s29 + $0x1298] sm:$0xff] }
 0x425   : > { %v2317_v21 = vpop.xlane.xlu1 %2316  ;;  %v6705_v1 = vsel %vm4567_vm13, %v6704_v17, %v6700_v24  ;;  %v2314_v51 = vpop.xlane.xlu0 %2313  ;;  %v845_v17 = vld [vmem:[%s9778_s29 + $0x1400] sm:$0xff] }
 0x426   : > { %v6714_v38 = vrot.slane %v2317_v21, %v10040_v15  ;;  %v6709_v34 = vrot.slane %v2314_v51, %v10043_v60  ;;  %v2756_v51 = vsel %vm973_vm0, %v799_v63, 0.0 }
 0x428   : > { %v6710_v47 = vsel %vm4574_vm14, %v6709_v34, %v6705_v1  ;;  %2613 = vadd.xlane.f32.xlu1 %v2612_v54  ;;  %2562 = vadd.xlane.f32.xlu0 %v2561_v28  ;;  %v2894_v1 = vsel %vm973_vm0, %v845_v17, 0.0  ;;  %v846_v34 = vld [vmem:[%s9778_s29 + $0x1408] sm:$0xff] }
 0x429   : > { %v6715_v49 = vsel %vm4581_vm15, %v6714_v38, %v6710_v47  ;;  %v2323_v59 = vpop.xlane.xlu1 %2322  ;;  %v2320_v52 = vpop.xlane.xlu0 %2319  ;;  %v736_v38 = vld [vmem:[%s9778_s29 + $0x1098] sm:$0xff]  ;;  %v830_v17 = vld [vmem:[%s9778_s29 + $0x1388] sm:$0xff] }
 0x42a   : > { %v12294_v10 = vsel %vm14747_vm11, %v6715_v49, %v12095_v55  ;;  %v6723_v11 = vrot.slane %v2323_v59, %v9946_v33  ;;  %v6719_v53 = vrot.slane %v2320_v52, %v9940_v31  ;;  %v2567_v59 = vsel %vm973_vm0, %v736_v38, 0.0  ;;  %v893_v38 = vld [vmem:[%s9778_s29 + $0x1580] sm:$0xff] }
 0x42b   : > { %v2897_v52 = vsel %vm973_vm0, %v846_v34, 0.0  ;;  %vm14748_vm11 = vcmask 589312  }
 0x42c   : > { %v6724_v58 = vsel %vm4483_vm1, %v6723_v11, %v6719_v53  ;;  %2754 = vadd.xlane.f32.xlu1 %v2753_v50  ;;  %2751 = vadd.xlane.f32.xlu0 %v2750_v13  ;;  %v783_v11 = vld [vmem:[%s9778_s29 + $0x1210] sm:$0xff]  ;;  %v753_v53 = vld [vmem:[%s9778_s29 + $0x1120] sm:$0xff] }
 0x42d   : > { %v2329_v26 = vpop.xlane.xlu1 %2328  ;;  %v2326_v27 = vpop.xlane.xlu0 %2325 }
 0x42e   : > { %v6733_v55 = vrot.slane %v2329_v26, %v9943_v32  ;;  %v6728_v37 = vrot.slane %v2326_v27, %v9950_v35  ;;  %v2708_v27 = vsel %vm973_vm0, %v783_v11, 0.0  ;;  %v754_v11 = vld [vmem:[%s9778_s29 + $0x1128] sm:$0xff] }
 0x430   : > { %v6729_v62 = vsel %vm14697_vm2, %v6728_v37, %v6724_v58  ;;  %2616 = vadd.xlane.f32.xlu1 %v2615_v61  ;;  %2565 = vadd.xlane.f32.xlu0 %v2564_v22  ;;  %v2618_v61 = vsel %vm973_vm0, %v753_v53, 0.0  ;;  %v829_v37 = vld [vmem:[%s9778_s29 + $0x1380] sm:$0xff] }
 0x431   : > { %v2335_v23 = vpop.xlane.xlu1 %2334  ;;  %v6734_v5 = vsel %vm4497_vm3, %v6733_v55, %v6729_v62  ;;  %v2332_v25 = vpop.xlane.xlu0 %2331  ;;  %v737_v53 = vld [vmem:[%s9778_s29 + $0x10a0] sm:$0xff] }
 0x432   : > { %v6743_v14 = vrot.slane %v2335_v23, %v9955_v40  ;;  %v6738_v16 = vrot.slane %v2332_v25, %v9958_v41  ;;  %v2846_v25 = vsel %vm973_vm0, %v829_v37, 0.0 }
 0x434   : > { %v6739_v45 = vsel %vm4504_vm4, %v6738_v16, %v6734_v5  ;;  %2706 = vadd.xlane.f32.xlu1 %v2705_v3  ;;  %2703 = vadd.xlane.f32.xlu0 %v2702_v12  ;;  %v2759_v3 = vsel %vm973_vm0, %v800_v19, 0.0  ;;  %v847_v16 = vld [vmem:[%s9778_s29 + $0x1410] sm:$0xff] }
 0x435   : > { %v2341_v20 = vpop.xlane.xlu1 %2340  ;;  %v6744_v24 = vsel %vm4511_vm5, %v6743_v14, %v6739_v45  ;;  %v2338_v21 = vpop.xlane.xlu0 %2337 }
 0x436   : > { %v6753_v54 = vrot.slane %v2341_v20, %v9973_v56  ;;  %v6748_v28 = vrot.slane %v2338_v21, %v9983_v0  ;;  %v2900_v21 = vsel %vm973_vm0, %v847_v16, 0.0 }
 0x438   : > { %v6749_v36 = vsel %vm4518_vm6, %v6748_v28, %v6744_v24  ;;  %2895 = vadd.xlane.f32.xlu1 %v2894_v1  ;;  %2757 = vadd.xlane.f32.xlu0 %v2756_v51  ;;  %v2849_v1 = vsel %vm973_vm0, %v830_v17, 0.0  ;;  %v894_v28 = vld [vmem:[%s9778_s29 + $0x1588] sm:$0xff] }
 0x439   : > { %v2347_v42 = vpop.xlane.xlu1 %2346  ;;  %v6754_v47 = vsel %vm4525_vm7, %v6753_v54, %v6749_v36  ;;  %v2344_v49 = vpop.xlane.xlu0 %2343 }
 0x43a   : > { %v6763_v50 = vrot.slane %v2347_v42, %v9990_v7  ;;  %v6758_v13 = vrot.slane %v2344_v49, %v9993_v8  ;;  %v3041_v49 = vsel %vm973_vm0, %v894_v28, 0.0 }
 0x43c   : > { %v6759_v46 = vsel %vm14748_vm11, %v6758_v13, %v6754_v47  ;;  %2568 = vadd.xlane.f32.xlu1 %v2567_v59  ;;  %2898 = vadd.xlane.f32.xlu0 %v2897_v52  ;;  %vm14749_vm11 = vcmask 786112   ;;  %v3038_v59 = vsel %vm973_vm0, %v893_v38, 0.0 }
 0x43d   : > { %v2353_v57 = vpop.xlane.xlu1 %2352  ;;  %v6764_v58 = vsel %vm4539_vm9, %v6763_v50, %v6759_v46  ;;  %v2350_v26 = vpop.xlane.xlu0 %2349 }
 0x43e   : > { %v6773_v22 = vrot.slane %v2353_v57, %v10012_v29  ;;  %v6768_v55 = vrot.slane %v2350_v26, %v10015_v30  ;;  %v2621_v26 = vsel %vm973_vm0, %v754_v11, 0.0 }
 0x440   : > { %v6769_v4 = vsel %vm4546_vm10, %v6768_v55, %v6764_v58  ;;  %2709 = vadd.xlane.f32.xlu1 %v2708_v27  ;;  %2619 = vadd.xlane.f32.xlu0 %v2618_v61  ;;  %v2570_v27 = vsel %vm973_vm0, %v737_v53, 0.0  ;;  %v784_v55 = vld [vmem:[%s9778_s29 + $0x1218] sm:$0xff] }
 0x441   : > { %v2359_v62 = vpop.xlane.xlu1 %2358  ;;  %v6774_v23 = vsel %vm14749_vm11, %v6773_v22, %v6769_v4  ;;  %v2356_v5 = vpop.xlane.xlu0 %2355  ;;  %vm14750_vm11 = vcmask 1041409   ;;  %v801_v22 = vld [vmem:[%s9778_s29 + $0x12a0] sm:$0xff] }
 0x442   : > { %v6783_v12 = vrot.slane %v2359_v62, %v10022_v43  ;;  %v6778_v14 = vrot.slane %v2356_v5, %v10025_v44  ;;  %v2711_v5 = vsel %vm973_vm0, %v784_v55, 0.0 }
 0x444   : > { %v6779_v63 = vsel %vm4560_vm12, %v6778_v14, %v6774_v23  ;;  %2847 = vadd.xlane.f32.xlu1 %v2846_v25  ;;  %2760 = vadd.xlane.f32.xlu0 %v2759_v3  ;;  %v2762_v23 = vsel %vm973_vm0, %v801_v22, 0.0  ;;  %v831_v14 = vld [vmem:[%s9778_s29 + $0x1390] sm:$0xff]  ;;  %v942_v22 = vld [vmem:[%s9778_s29 + $0x1708] sm:$0xff] }
 0x445   : > { %v2365_v45 = vpop.xlane.xlu1 %2364  ;;  %v6784_v20 = vsel %vm4567_vm13, %v6783_v12, %v6779_v63  ;;  %v2362_v24 = vpop.xlane.xlu0 %2361  ;;  %v848_v12 = vld [vmem:[%s9778_s29 + $0x1418] sm:$0xff] }
 0x446   : > { %v6793_v51 = vrot.slane %v2365_v45, %v10040_v15  ;;  %v6788_v54 = vrot.slane %v2362_v24, %v10043_v60  ;;  %v2852_v24 = vsel %vm973_vm0, %v831_v14, 0.0 }
 0x448   : > { %v6789_v34 = vsel %vm4574_vm14, %v6788_v54, %v6784_v20  ;;  %2901 = vadd.xlane.f32.xlu1 %v2900_v21  ;;  %2850 = vadd.xlane.f32.xlu0 %v2849_v1  ;;  %v2903_v20 = vsel %vm973_vm0, %v848_v12, 0.0  ;;  %v877_v54 = vld [vmem:[%s9778_s29 + $0x1500] sm:$0xff]  ;;  %v755_v12 = vld [vmem:[%s9778_s29 + $0x1130] sm:$0xff] }
 0x449   : > { %v6794_v36 = vsel %vm4581_vm15, %v6793_v51, %v6789_v34  ;;  %v2371_v42 = vpop.xlane.xlu1 %2370  ;;  %v2368_v47 = vpop.xlane.xlu0 %2367  ;;  %v878_v51 = vld [vmem:[%s9778_s29 + $0x1508] sm:$0xff] }
 0x44a   : > { %v12361_v52 = vsel %vm14750_vm11, %v6794_v36, %v12160_v2  ;;  %v6802_v50 = vrot.slane %v2371_v42, %v9946_v33  ;;  %v6798_v13 = vrot.slane %v2368_v47, %v9940_v31  ;;  %v2993_v42 = vsel %vm973_vm0, %v878_v51, 0.0  ;;  %v802_v51 = vld [vmem:[%s9778_s29 + $0x12a8] sm:$0xff] }
 0x44b   : > { %v2990_v47 = vsel %vm973_vm0, %v877_v54, 0.0  ;;  %vm14751_vm11 = vcmask 589312  }
 0x44c   : > { %v6803_v46 = vsel %vm4483_vm1, %v6802_v50, %v6798_v13  ;;  %3042 = vadd.xlane.f32.xlu1 %v3041_v49  ;;  %3039 = vadd.xlane.f32.xlu0 %v3038_v59  ;;  %v941_v50 = vld [vmem:[%s9778_s29 + $0x1700] sm:$0xff]  ;;  %v895_v13 = vld [vmem:[%s9778_s29 + $0x1590] sm:$0xff] }
 0x44d   : > { %v2377_v57 = vpop.xlane.xlu1 %2376  ;;  %v2374_v58 = vpop.xlane.xlu0 %2373 }
 0x44e   : > { %v6812_v2 = vrot.slane %v2377_v57, %v9943_v32  ;;  %v6807_v61 = vrot.slane %v2374_v58, %v9950_v35  ;;  %v3182_v58 = vsel %vm973_vm0, %v941_v50, 0.0  ;;  %v849_v50 = vld [vmem:[%s9778_s29 + $0x1420] sm:$0xff] }
 0x450   : > { %v6808_v37 = vsel %vm14697_vm2, %v6807_v61, %v6803_v46  ;;  %2622 = vadd.xlane.f32.xlu1 %v2621_v26  ;;  %2571 = vadd.xlane.f32.xlu0 %v2570_v27  ;;  %v3044_v26 = vsel %vm973_vm0, %v895_v13, 0.0  ;;  %v738_v61 = vld [vmem:[%s9778_s29 + $0x10a8] sm:$0xff] }
 0x451   : > { %v2383_v19 = vpop.xlane.xlu1 %2382  ;;  %v6813_v4 = vsel %vm4497_vm3, %v6812_v2, %v6808_v37  ;;  %v2380_v62 = vpop.xlane.xlu0 %2379 }
 0x452   : > { %v6822_v25 = vrot.slane %v2383_v19, %v9955_v40  ;;  %v6817_v3 = vrot.slane %v2380_v62, %v9958_v41  ;;  %v2573_v62 = vsel %vm973_vm0, %v738_v61, 0.0  ;;  %v896_v61 = vld [vmem:[%s9778_s29 + $0x1598] sm:$0xff] }
 0x454   : > { %v6818_v16 = vsel %vm4504_vm4, %v6817_v3, %v6813_v4  ;;  %2763 = vadd.xlane.f32.xlu1 %v2762_v23  ;;  %2712 = vadd.xlane.f32.xlu0 %v2711_v5  ;;  %v3185_v23 = vsel %vm973_vm0, %v942_v22, 0.0  ;;  %v785_v3 = vld [vmem:[%s9778_s29 + $0x1220] sm:$0xff] }
 0x455   : > { %v2389_v17 = vpop.xlane.xlu1 %2388  ;;  %v6823_v63 = vsel %vm4511_vm5, %v6822_v25, %v6818_v16  ;;  %v2386_v45 = vpop.xlane.xlu0 %2385 }
 0x456   : > { %v6832_v21 = vrot.slane %v2389_v17, %v9973_v56  ;;  %v6827_v1 = vrot.slane %v2386_v45, %v9983_v0  ;;  %v2714_v45 = vsel %vm973_vm0, %v785_v3, 0.0 }
 0x458   : > { %v6828_v28 = vsel %vm4518_vm6, %v6827_v1, %v6823_v63  ;;  %2904 = vadd.xlane.f32.xlu1 %v2903_v20  ;;  %2853 = vadd.xlane.f32.xlu0 %v2852_v24  ;;  %v2624_v20 = vsel %vm973_vm0, %v755_v12, 0.0  ;;  %v832_v1 = vld [vmem:[%s9778_s29 + $0x1398] sm:$0xff] }
 0x459   : > { %v2395_v38 = vpop.xlane.xlu1 %2394  ;;  %v6833_v34 = vsel %vm4525_vm7, %v6832_v21, %v6828_v28  ;;  %v2392_v36 = vpop.xlane.xlu0 %2391 }
 0x45a   : > { %v6842_v49 = vrot.slane %v2395_v38, %v9990_v7  ;;  %v6837_v59 = vrot.slane %v2392_v36, %v9993_v8  ;;  %v2855_v36 = vsel %vm973_vm0, %v832_v1, 0.0 }
 0x45c   : > { %v6838_v11 = vsel %vm14751_vm11, %v6837_v59, %v6833_v34  ;;  %2994 = vadd.xlane.f32.xlu1 %v2993_v42  ;;  %2991 = vadd.xlane.f32.xlu0 %v2990_v47  ;;  %vm14752_vm11 = vcmask 786112   ;;  %v2765_v42 = vsel %vm973_vm0, %v802_v51, 0.0  ;;  %v879_v59 = vld [vmem:[%s9778_s29 + $0x1510] sm:$0xff] }
 0x45d   : > { %v2401_v53 = vpop.xlane.xlu1 %2400  ;;  %v6843_v46 = vsel %vm4539_vm9, %v6842_v49, %v6838_v11  ;;  %v2398_v57 = vpop.xlane.xlu0 %2397 }
 0x45e   : > { %v6852_v27 = vrot.slane %v2401_v53, %v10012_v29  ;;  %v6847_v2 = vrot.slane %v2398_v57, %v10015_v30  ;;  %v2996_v57 = vsel %vm973_vm0, %v879_v59, 0.0 }
 0x460   : > { %v6848_v55 = vsel %vm4546_vm10, %v6847_v2, %v6843_v46  ;;  %3183 = vadd.xlane.f32.xlu1 %v3182_v58  ;;  %3045 = vadd.xlane.f32.xlu0 %v3044_v26  ;;  %v2906_v58 = vsel %vm973_vm0, %v849_v50, 0.0  ;;  %v925_v2 = vld [vmem:[%s9778_s29 + $0x1680] sm:$0xff] }
 0x461   : > { %v2407_v37 = vpop.xlane.xlu1 %2406  ;;  %v6853_v19 = vsel %vm14752_vm11, %v6852_v27, %v6848_v55  ;;  %v2404_v4 = vpop.xlane.xlu0 %2403  ;;  %vm14753_vm11 = vcmask 1041409  }
 0x462   : > { %v6862_v5 = vrot.slane %v2407_v37, %v10022_v43  ;;  %v6857_v25 = vrot.slane %v2404_v4, %v10025_v44  ;;  %v3047_v4 = vsel %vm973_vm0, %v896_v61, 0.0 }
 0x464   : > { %v6858_v14 = vsel %vm4560_vm12, %v6857_v25, %v6853_v19  ;;  %2574 = vadd.xlane.f32.xlu1 %v2573_v62  ;;  %3186 = vadd.xlane.f32.xlu0 %v3185_v23  ;;  %v3134_v19 = vsel %vm973_vm0, %v925_v2, 0.0  ;;  %v926_v25 = vld [vmem:[%s9778_s29 + $0x1688] sm:$0xff]  ;;  %v833_v2 = vld [vmem:[%s9778_s29 + $0x13a0] sm:$0xff] }
 0x465   : > { %v2413_v16 = vpop.xlane.xlu1 %2412  ;;  %v6863_v17 = vsel %vm4567_vm13, %v6862_v5, %v6858_v14  ;;  %v2410_v63 = vpop.xlane.xlu0 %2409  ;;  %v943_v5 = vld [vmem:[%s9778_s29 + $0x1710] sm:$0xff] }
 0x466   : > { %v6872_v24 = vrot.slane %v2413_v16, %v10040_v15  ;;  %v6867_v21 = vrot.slane %v2410_v63, %v10043_v60  ;;  %v3137_v63 = vsel %vm973_vm0, %v926_v25, 0.0 }
 0x468   : > { %v6868_v54 = vsel %vm4574_vm14, %v6867_v21, %v6863_v17  ;;  %2715 = vadd.xlane.f32.xlu1 %v2714_v45  ;;  %2625 = vadd.xlane.f32.xlu0 %v2624_v20  ;;  %v3188_v17 = vsel %vm973_vm0, %v943_v5, 0.0  ;;  %v739_v21 = vld [vmem:[%s9778_s29 + $0x10b0] sm:$0xff]  ;;  %v880_v5 = vld [vmem:[%s9778_s29 + $0x1518] sm:$0xff] }
 0x469   : > { %v6873_v28 = vsel %vm4581_vm15, %v6872_v24, %v6868_v54  ;;  %v2419_v38 = vpop.xlane.xlu1 %2418  ;;  %v2416_v34 = vpop.xlane.xlu0 %2415  ;;  %v756_v24 = vld [vmem:[%s9778_s29 + $0x1138] sm:$0xff] }
 0x46a   : > { %v6881_v47 = vrot.slane %v2419_v38, %v9946_v33  ;;  %v6877_v49 = vrot.slane %v2416_v34, %v9940_v31  ;;  %v12432_v13 = vsel %vm14753_vm11, %v6873_v28, %v12225_v6  ;;  %v2627_v38 = vsel %vm973_vm0, %v756_v24, 0.0  ;;  %v927_v24 = vld [vmem:[%s9778_s29 + $0x1690] sm:$0xff] }
 0x46b   : > { %v2576_v34 = vsel %vm973_vm0, %v739_v21, 0.0  ;;  %vm14754_vm11 = vcmask 589312  }
 0x46c   : > { %v6882_v11 = vsel %vm4483_vm1, %v6881_v47, %v6877_v49  ;;  %2856 = vadd.xlane.f32.xlu1 %v2855_v36  ;;  %2766 = vadd.xlane.f32.xlu0 %v2765_v42  ;;  %v803_v47 = vld [vmem:[%s9778_s29 + $0x12b0] sm:$0xff]  ;;  %v786_v49 = vld [vmem:[%s9778_s29 + $0x1228] sm:$0xff] }
 0x46d   : > { %v2425_v53 = vpop.xlane.xlu1 %2424  ;;  %v2422_v46 = vpop.xlane.xlu0 %2421 }
 0x46e   : > { %v6891_v26 = vrot.slane %v2425_v53, %v9943_v32  ;;  %v6886_v27 = vrot.slane %v2422_v46, %v9950_v35  ;;  %v2768_v46 = vsel %vm973_vm0, %v803_v47, 0.0  ;;  %v740_v47 = vld [vmem:[%s9778_s29 + $0x10b8] sm:$0xff] }
 0x470   : > { %v6887_v6 = vsel %vm14697_vm2, %v6886_v27, %v6882_v11  ;;  %2997 = vadd.xlane.f32.xlu1 %v2996_v57  ;;  %2907 = vadd.xlane.f32.xlu0 %v2906_v58  ;;  %v2717_v57 = vsel %vm973_vm0, %v786_v49, 0.0  ;;  %v850_v27 = vld [vmem:[%s9778_s29 + $0x1428] sm:$0xff] }
 0x471   : > { %v2431_v22 = vpop.xlane.xlu1 %2430  ;;  %v6892_v55 = vsel %vm4497_vm3, %v6891_v26, %v6887_v6  ;;  %v2428_v37 = vpop.xlane.xlu0 %2427 }
 0x472   : > { %v6901_v62 = vrot.slane %v2431_v22, %v9955_v40  ;;  %v6896_v23 = vrot.slane %v2428_v37, %v9958_v41  ;;  %v2909_v37 = vsel %vm973_vm0, %v850_v27, 0.0  ;;  %v787_v27 = vld [vmem:[%s9778_s29 + $0x1230] sm:$0xff] }
 0x474   : > { %v6897_v3 = vsel %vm4504_vm4, %v6896_v23, %v6892_v55  ;;  %3135 = vadd.xlane.f32.xlu1 %v3134_v19  ;;  %3048 = vadd.xlane.f32.xlu0 %v3047_v4  ;;  %v2858_v19 = vsel %vm973_vm0, %v833_v2, 0.0  ;;  %v897_v23 = vld [vmem:[%s9778_s29 + $0x15a0] sm:$0xff] }
 0x475   : > { %v2437_v12 = vpop.xlane.xlu1 %2436  ;;  %v6902_v14 = vsel %vm4511_vm5, %v6901_v62, %v6897_v3  ;;  %v2434_v16 = vpop.xlane.xlu0 %2433 }
 0x476   : > { %v6911_v45 = vrot.slane %v2437_v12, %v9973_v56  ;;  %v6906_v20 = vrot.slane %v2434_v16, %v9983_v0  ;;  %v3050_v16 = vsel %vm973_vm0, %v897_v23, 0.0 }
 0x478   : > { %v6907_v1 = vsel %vm4518_vm6, %v6906_v20, %v6902_v14  ;;  %3189 = vadd.xlane.f32.xlu1 %v3188_v17  ;;  %3138 = vadd.xlane.f32.xlu0 %v3137_v63  ;;  %v2999_v17 = vsel %vm973_vm0, %v880_v5, 0.0  ;;  %v944_v20 = vld [vmem:[%s9778_s29 + $0x1718] sm:$0xff] }
 0x479   : > { %v2443_v51 = vpop.xlane.xlu1 %2442  ;;  %v6912_v54 = vsel %vm4525_vm7, %v6911_v45, %v6907_v1  ;;  %v2440_v28 = vpop.xlane.xlu0 %2439 }
 0x47a   : > { %v6921_v36 = vrot.slane %v2443_v51, %v9990_v7  ;;  %v6916_v42 = vrot.slane %v2440_v28, %v9993_v8  ;;  %v3191_v28 = vsel %vm973_vm0, %v944_v20, 0.0 }
 0x47c   : > { %v6917_v59 = vsel %vm14754_vm11, %v6916_v42, %v6912_v54  ;;  %2628 = vadd.xlane.f32.xlu1 %v2627_v38  ;;  %2577 = vadd.xlane.f32.xlu0 %v2576_v34  ;;  %vm14755_vm11 = vcmask 786112   ;;  %v3140_v38 = vsel %vm973_vm0, %v927_v24, 0.0  ;;  %v757_v42 = vld [vmem:[%s9778_s29 + $0x1140] sm:$0xff] }
 0x47d   : > { %v2449_v50 = vpop.xlane.xlu1 %2448  ;;  %v6922_v11 = vsel %vm4539_vm9, %v6921_v36, %v6917_v59  ;;  %v2446_v53 = vpop.xlane.xlu0 %2445 }
 0x47e   : > { %v6931_v58 = vrot.slane %v2449_v50, %v10012_v29  ;;  %v6926_v26 = vrot.slane %v2446_v53, %v10015_v30  ;;  %v2630_v53 = vsel %vm973_vm0, %v757_v42, 0.0 }
 0x480   : > { %v6927_v61 = vsel %vm4546_vm10, %v6926_v26, %v6922_v11  ;;  %2769 = vadd.xlane.f32.xlu1 %v2768_v46  ;;  %2718 = vadd.xlane.f32.xlu0 %v2717_v57  ;;  %v2579_v46 = vsel %vm973_vm0, %v740_v47, 0.0  ;;  %v804_v26 = vld [vmem:[%s9778_s29 + $0x12b8] sm:$0xff] }
 0x481   : > { %v2455_v6 = vpop.xlane.xlu1 %2454  ;;  %v6932_v22 = vsel %vm14755_vm11, %v6931_v58, %v6927_v61  ;;  %v2452_v55 = vpop.xlane.xlu0 %2451  ;;  %vm14756_vm11 = vcmask 1042434  }
 0x482   : > { %v6941_v4 = vrot.slane %v2455_v6, %v10022_v43  ;;  %v6936_v62 = vrot.slane %v2452_v55, %v10025_v44  ;;  %v2720_v55 = vsel %vm973_vm0, %v787_v27, 0.0 }
 0x484   : > { %v6937_v25 = vsel %vm4560_vm12, %v6936_v62, %v6932_v22  ;;  %2910 = vadd.xlane.f32.xlu1 %v2909_v37  ;;  %2859 = vadd.xlane.f32.xlu0 %v2858_v19  ;;  %v2771_v22 = vsel %vm973_vm0, %v804_v26, 0.0  ;;  %v834_v62 = vld [vmem:[%s9778_s29 + $0x13a8] sm:$0xff]  ;;  %v741_v26 = vld [vmem:[%s9778_s29 + $0x10c0] sm:$0xff] }
 0x485   : > { %v2461_v3 = vpop.xlane.xlu1 %2460  ;;  %v6942_v12 = vsel %vm4567_vm13, %v6941_v4, %v6937_v25  ;;  %v2458_v14 = vpop.xlane.xlu0 %2457  ;;  %v851_v4 = vld [vmem:[%s9778_s29 + $0x1430] sm:$0xff] }
 0x486   : > { %v6951_v63 = vrot.slane %v2461_v3, %v10040_v15  ;;  %v6946_v45 = vrot.slane %v2458_v14, %v10043_v60  ;;  %v2861_v14 = vsel %vm973_vm0, %v834_v62, 0.0 }
 0x488   : > { %v6947_v21 = vsel %vm4574_vm14, %v6946_v45, %v6942_v12  ;;  %3051 = vadd.xlane.f32.xlu1 %v3050_v16  ;;  %3000 = vadd.xlane.f32.xlu0 %v2999_v17  ;;  %v2912_v12 = vsel %vm973_vm0, %v851_v4, 0.0  ;;  %v881_v45 = vld [vmem:[%s9778_s29 + $0x1520] sm:$0xff]  ;;  %v788_v4 = vld [vmem:[%s9778_s29 + $0x1238] sm:$0xff] }
 0x489   : > { %v6952_v1 = vsel %vm4581_vm15, %v6951_v63, %v6947_v21  ;;  %v2467_v51 = vpop.xlane.xlu1 %2466  ;;  %v2464_v54 = vpop.xlane.xlu0 %2463  ;;  %v898_v63 = vld [vmem:[%s9778_s29 + $0x15a8] sm:$0xff] }
 0x48a   : > { %v6960_v34 = vrot.slane %v2467_v51, %v9946_v33  ;;  %v6956_v36 = vrot.slane %v2464_v54, %v9940_v31  ;;  %v12499_v49 = vsel %vm14756_vm11, %v6952_v1, %v12294_v10  ;;  %v3053_v51 = vsel %vm973_vm0, %v898_v63, 0.0  ;;  %v835_v63 = vld [vmem:[%s9778_s29 + $0x13b0] sm:$0xff] }
 0x48b   : > { %v3002_v54 = vsel %vm973_vm0, %v881_v45, 0.0  ;;  %vm14757_vm11 = vcmask 589312  }
 0x48c   : > { %v6961_v59 = vsel %vm4483_vm1, %v6960_v34, %v6956_v36  ;;  %3192 = vadd.xlane.f32.xlu1 %v3191_v28  ;;  %3141 = vadd.xlane.f32.xlu0 %v3140_v38  ;;  %v945_v34 = vld [vmem:[%s9778_s29 + $0x1720] sm:$0xff]  ;;  %v928_v36 = vld [vmem:[%s9778_s29 + $0x1698] sm:$0xff] }
 0x48d   : > { %v2473_v50 = vpop.xlane.xlu1 %2472  ;;  %v2470_v11 = vpop.xlane.xlu0 %2469 }
 0x48e   : > { %v6970_v57 = vrot.slane %v2473_v50, %v9943_v32  ;;  %v6965_v58 = vrot.slane %v2470_v11, %v9950_v35  ;;  %v3194_v11 = vsel %vm973_vm0, %v945_v34, 0.0  ;;  %v882_v34 = vld [vmem:[%s9778_s29 + $0x1528] sm:$0xff] }
 0x490   : > { %v6966_v10 = vsel %vm14697_vm2, %v6965_v58, %v6961_v59  ;;  %2631 = vadd.xlane.f32.xlu1 %v2630_v53  ;;  %2580 = vadd.xlane.f32.xlu0 %v2579_v46  ;;  %v3143_v53 = vsel %vm973_vm0, %v928_v36, 0.0  ;;  %v758_v58 = vld [vmem:[%s9778_s29 + $0x1148] sm:$0xff] }
 0x491   : > { %v2479_v2 = vpop.xlane.xlu1 %2478  ;;  %v6971_v61 = vsel %vm4497_vm3, %v6970_v57, %v6966_v10  ;;  %v2476_v6 = vpop.xlane.xlu0 %2475 }
 0x492   : > { %v6980_v37 = vrot.slane %v2479_v2, %v9955_v40  ;;  %v6975_v19 = vrot.slane %v2476_v6, %v9958_v41  ;;  %v2633_v6 = vsel %vm973_vm0, %v758_v58, 0.0 }
 0x494   : > { %v6976_v23 = vsel %vm4504_vm4, %v6975_v19, %v6971_v61  ;;  %2772 = vadd.xlane.f32.xlu1 %v2771_v22  ;;  %2721 = vadd.xlane.f32.xlu0 %v2720_v55  ;;  %v2582_v22 = vsel %vm973_vm0, %v741_v26, 0.0  ;;  %v805_v19 = vld [vmem:[%s9778_s29 + $0x12c0] sm:$0xff] }
 0x495   : > { %v2485_v5 = vpop.xlane.xlu1 %2484  ;;  %v6981_v25 = vsel %vm4511_vm5, %v6980_v37, %v6976_v23  ;;  %v2482_v3 = vpop.xlane.xlu0 %2481 }
 0x496   : > { %v6990_v16 = vrot.slane %v2485_v5, %v9973_v56  ;;  %v6985_v17 = vrot.slane %v2482_v3, %v9983_v0  ;;  %v2774_v3 = vsel %vm973_vm0, %v805_v19, 0.0 }
 0x498   : > { %v6986_v20 = vsel %vm4518_vm6, %v6985_v17, %v6981_v25  ;;  %2913 = vadd.xlane.f32.xlu1 %v2912_v12  ;;  %2862 = vadd.xlane.f32.xlu0 %v2861_v14  ;;  %v2723_v12 = vsel %vm973_vm0, %v788_v4, 0.0  ;;  %v852_v17 = vld [vmem:[%s9778_s29 + $0x1438] sm:$0xff] }
 0x499   : > { %v2491_v24 = vpop.xlane.xlu1 %2490  ;;  %v6991_v21 = vsel %vm4525_vm7, %v6990_v16, %v6986_v20  ;;  %v2488_v1 = vpop.xlane.xlu0 %2487 }
 0x49a   : > { %v7000_v28 = vrot.slane %v2491_v24, %v9990_v7  ;;  %v6995_v38 = vrot.slane %v2488_v1, %v9993_v8  ;;  %v2915_v1 = vsel %vm973_vm0, %v852_v17, 0.0 }
 0x49c   : > { %v6996_v42 = vsel %vm14757_vm11, %v6995_v38, %v6991_v21  ;;  %3054 = vadd.xlane.f32.xlu1 %v3053_v51  ;;  %3003 = vadd.xlane.f32.xlu0 %v3002_v54  ;;  %vm14758_vm11 = vcmask 786112   ;;  %v2864_v51 = vsel %vm973_vm0, %v835_v63, 0.0  ;;  %v899_v38 = vld [vmem:[%s9778_s29 + $0x15b0] sm:$0xff] }
 0x49d   : > { %v2497_v47 = vpop.xlane.xlu1 %2496  ;;  %v7001_v59 = vsel %vm4539_vm9, %v7000_v28, %v6996_v42  ;;  %v2494_v50 = vpop.xlane.xlu0 %2493 }
 0x49e   : > { %v7010_v46 = vrot.slane %v2497_v47, %v10012_v29  ;;  %v7005_v57 = vrot.slane %v2494_v50, %v10015_v30  ;;  %v3056_v50 = vsel %vm973_vm0, %v899_v38, 0.0 }
 0x4a0   : > { %v7006_v27 = vsel %vm4546_vm10, %v7005_v57, %v7001_v59  ;;  %3195 = vadd.xlane.f32.xlu1 %v3194_v11  ;;  %3144 = vadd.xlane.f32.xlu0 %v3143_v53  ;;  %v3005_v11 = vsel %vm973_vm0, %v882_v34, 0.0  ;;  %v929_v57 = vld [vmem:[%s9778_s29 + $0x16a0] sm:$0xff] }
 0x4a1   : > { %v2503_v10 = vpop.xlane.xlu1 %2502  ;;  %v7011_v2 = vsel %vm14758_vm11, %v7010_v46, %v7006_v27  ;;  %v2500_v61 = vpop.xlane.xlu0 %2499  ;;  %vm14759_vm11 = vcmask 1042434   ;;  %v946_v46 = vld [vmem:[%s9778_s29 + $0x1728] sm:$0xff] }
 0x4a2   : > { %v7020_v55 = vrot.slane %v2503_v10, %v10022_v43  ;;  %v7015_v37 = vrot.slane %v2500_v61, %v10025_v44  ;;  %v3197_v27 = vsel %vm973_vm0, %v946_v46, 0.0  ;;  %v3146_v10 = vsel %vm973_vm0, %v929_v57, 0.0 }
 0x4a4   : > { %v7016_v62 = vsel %vm4560_vm12, %v7015_v37, %v7011_v2  ;;  %2634 = vadd.xlane.f32.xlu1 %v2633_v6  ;;  %2583 = vadd.xlane.f32.xlu0 %v2582_v22  ;;  %v759_v6 = vld [vmem:[%s9778_s29 + $0x1150] sm:$0xff]  ;;  %v742_v22 = vld [vmem:[%s9778_s29 + $0x10c8] sm:$0xff] }
 0x4a5   : > { %v2509_v23 = vpop.xlane.xlu1 %2508  ;;  %v7021_v5 = vsel %vm4567_vm13, %v7020_v55, %v7016_v62  ;;  %v2506_v25 = vpop.xlane.xlu0 %2505  ;;  %v2636_v4 = vsel %vm973_vm0, %v759_v6, 0.0  ;;  %v2585_v62 = vsel %vm973_vm0, %v742_v22, 0.0  ;;  %v930_v6 = vld [vmem:[%s9778_s29 + $0x16a8] sm:$0xff] }
 0x4a6   : > { %v7030_v14 = vrot.slane %v2509_v23, %v10040_v15  ;;  %v7025_v16 = vrot.slane %v2506_v25, %v10043_v60 }
 0x4a8   : > { %v7026_v45 = vsel %vm4574_vm14, %v7025_v16, %v7021_v5  ;;  %2775 = vadd.xlane.f32.xlu1 %v2774_v3  ;;  %2724 = vadd.xlane.f32.xlu0 %v2723_v12  ;;  %v806_v3 = vld [vmem:[%s9778_s29 + $0x12c8] sm:$0xff]  ;;  %v789_v12 = vld [vmem:[%s9778_s29 + $0x1240] sm:$0xff] }
 0x4a9   : > { %v7031_v20 = vsel %vm4581_vm15, %v7030_v14, %v7026_v45  ;;  %v2515_v24 = vpop.xlane.xlu1 %2514  ;;  %v2512_v21 = vpop.xlane.xlu0 %2511  ;;  %v2777_v45 = vsel %vm973_vm0, %v806_v3, 0.0 }
 0x4aa   : > { %v7039_v54 = vrot.slane %v2515_v24, %v9946_v33  ;;  %v7035_v28 = vrot.slane %v2512_v21, %v9940_v31  ;;  %v12566_v36 = vsel %vm14759_vm11, %v7031_v20, %v12361_v52  ;;  %v2726_v20 = vsel %vm973_vm0, %v789_v12, 0.0 }
 0x4ab   : > { %vm14760_vm11 = vcmask 589312  }
 0x4ac   : > { %v7040_v42 = vsel %vm4483_vm1, %v7039_v54, %v7035_v28  ;;  %2916 = vadd.xlane.f32.xlu1 %v2915_v1  ;;  %2865 = vadd.xlane.f32.xlu0 %v2864_v51  ;;  %v853_v1 = vld [vmem:[%s9778_s29 + $0x1440] sm:$0xff]  ;;  %v836_v51 = vld [vmem:[%s9778_s29 + $0x13b8] sm:$0xff] }
 0x4ad   : > { %v2608_v47 = vpop.xlane.xlu1 %2607  ;;  %v2518_v59 = vpop.xlane.xlu0 %2517  ;;  %v2918_v34 = vsel %vm973_vm0, %v853_v1, 0.0 }
 0x4ae   : > { %v7044_v53 = vrot.slane %v2518_v59, %v9950_v35  ;;  %v7193_v2 = vrot.slane %v2608_v47, %v9940_v31 }
 0x4b0   : > { %v12575_v58 = vsel %vm14697_vm2, %v7044_v53, %v7040_v42  ;;  %3057 = vadd.xlane.f32.xlu1 %v3056_v50  ;;  %3006 = vadd.xlane.f32.xlu0 %v3005_v11  ;;  %v2867_v42 = vsel %vm973_vm0, %v836_v51, 0.0  ;;  %v900_v50 = vld [vmem:[%s9778_s29 + $0x15b8] sm:$0xff]  ;;  %v883_v11 = vld [vmem:[%s9778_s29 + $0x1530] sm:$0xff] }
 0x4b1   : > { %v2560_v52 = vpop.xlane.xlu1 %2559  ;;  %v2611_v26 = vpop.xlane.xlu0 %2610 }
 0x4b2   : > { %v7197_v61 = vrot.slane %v2611_v26, %v9946_v33  ;;  %v7114_v23 = vrot.slane %v2560_v52, %v9940_v31  ;;  %v3059_v26 = vsel %vm973_vm0, %v900_v50, 0.0 }
 0x4b4   : > { %v7198_v55 = vsel %vm4483_vm1, %v7197_v61, %v7193_v2  ;;  %3198 = vadd.xlane.f32.xlu1 %v3197_v27  ;;  %3147 = vadd.xlane.f32.xlu0 %v3146_v10  ;;  %v3008_v27 = vsel %vm973_vm0, %v883_v11, 0.0  ;;  %v947_v61 = vld [vmem:[%s9778_s29 + $0x1730] sm:$0xff] }
 0x4b5   : > { %v2614_v37 = vpop.xlane.xlu1 %2613  ;;  %v2563_v19 = vpop.xlane.xlu0 %2562 }
 0x4b6   : > { %v7202_v5 = vrot.slane %v2614_v37, %v9950_v35  ;;  %v7118_v25 = vrot.slane %v2563_v19, %v9946_v33  ;;  %v3200_v19 = vsel %vm973_vm0, %v947_v61, 0.0 }
 0x4b8   : > { %v7203_v14 = vsel %vm14697_vm2, %v7202_v5, %v7198_v55  ;;  %v7119_v16 = vsel %vm4483_vm1, %v7118_v25, %v7114_v23  ;;  %2637 = vadd.xlane.f32.xlu1 %v2636_v4  ;;  %2586 = vadd.xlane.f32.xlu0 %v2585_v62  ;;  %v3149_v4 = vsel %vm973_vm0, %v930_v6, 0.0  ;;  %v760_v23 = vld [vmem:[%s9778_s29 + $0x1158] sm:$0xff]  ;;  %v743_v5 = vld [vmem:[%s9778_s29 + $0x10d0] sm:$0xff] }
 0x4b9   : > { %v2755_v17 = vpop.xlane.xlu1 %2754  ;;  %v2752_v63 = vpop.xlane.xlu0 %2751 }
 0x4ba   : > { %v7434_v24 = vrot.slane %v2755_v17, %v9946_v33  ;;  %v7430_v21 = vrot.slane %v2752_v63, %v9940_v31 }
 0x4bc   : > { %v7435_v54 = vsel %vm4483_vm1, %v7434_v24, %v7430_v21  ;;  %2778 = vadd.xlane.f32.xlu1 %v2777_v45  ;;  %2727 = vadd.xlane.f32.xlu0 %v2726_v20  ;;  %v807_v20 = vld [vmem:[%s9778_s29 + $0x12d0] sm:$0xff]  ;;  %v790_v24 = vld [vmem:[%s9778_s29 + $0x1248] sm:$0xff] }
 0x4bd   : > { %v2617_v28 = vpop.xlane.xlu1 %2616  ;;  %v2566_v38 = vpop.xlane.xlu0 %2565 }
 0x4be   : > { %v7207_v47 = vrot.slane %v2617_v28, %v9943_v32  ;;  %v7123_v59 = vrot.slane %v2566_v38, %v9950_v35  ;;  %v2780_v28 = vsel %vm973_vm0, %v807_v20, 0.0  ;;  %v2729_v38 = vsel %vm973_vm0, %v790_v24, 0.0  ;;  %v744_v20 = vld [vmem:[%s9778_s29 + $0x10d8] sm:$0xff] }
 0x4c0   : > { %v7208_v53 = vsel %vm4497_vm3, %v7207_v47, %v7203_v14  ;;  %v7124_v46 = vsel %vm14697_vm2, %v7123_v59, %v7119_v16  ;;  %2919 = vadd.xlane.f32.xlu1 %v2918_v34  ;;  %2868 = vadd.xlane.f32.xlu0 %v2867_v42  ;;  %v2639_v14 = vsel %vm973_vm0, %v760_v23, 0.0  ;;  %v2588_v16 = vsel %vm973_vm0, %v743_v5, 0.0  ;;  %v854_v47 = vld [vmem:[%s9778_s29 + $0x1448] sm:$0xff]  ;;  %v837_v59 = vld [vmem:[%s9778_s29 + $0x13c0] sm:$0xff]  ;;  %v931_v23 = vld [vmem:[%s9778_s29 + $0x16b0] sm:$0xff] }
 0x4c1   : > { %v2707_v57 = vpop.xlane.xlu1 %2706  ;;  %v2704_v52 = vpop.xlane.xlu0 %2703 }
 0x4c2   : > { %v7355_v10 = vrot.slane %v2707_v57, %v9946_v33  ;;  %v7351_v2 = vrot.slane %v2704_v52, %v9940_v31  ;;  %v2921_v52 = vsel %vm973_vm0, %v854_v47, 0.0  ;;  %v791_v47 = vld [vmem:[%s9778_s29 + $0x1250] sm:$0xff] }
 0x4c4   : > { %v7356_v22 = vsel %vm4483_vm1, %v7355_v10, %v7351_v2  ;;  %3060 = vadd.xlane.f32.xlu1 %v3059_v26  ;;  %3009 = vadd.xlane.f32.xlu0 %v3008_v27  ;;  %v2870_v26 = vsel %vm973_vm0, %v837_v59, 0.0  ;;  %v901_v10 = vld [vmem:[%s9778_s29 + $0x15c0] sm:$0xff]  ;;  %v884_v2 = vld [vmem:[%s9778_s29 + $0x1538] sm:$0xff] }
 0x4c5   : > { %v2896_v55 = vpop.xlane.xlu1 %2895  ;;  %v2758_v37 = vpop.xlane.xlu0 %2757 }
 0x4c6   : > { %v7439_v62 = vrot.slane %v2758_v37, %v9950_v35  ;;  %v7667_v17 = vrot.slane %v2896_v55, %v9940_v31  ;;  %v3011_v55 = vsel %vm973_vm0, %v884_v2, 0.0 }
 0x4c8   : > { %v7440_v25 = vsel %vm14697_vm2, %v7439_v62, %v7435_v54  ;;  %3201 = vadd.xlane.f32.xlu1 %v3200_v19  ;;  %3150 = vadd.xlane.f32.xlu0 %v3149_v4  ;;  %v948_v62 = vld [vmem:[%s9778_s29 + $0x1738] sm:$0xff] }
 0x4c9   : > { %v2569_v3 = vpop.xlane.xlu1 %2568  ;;  %v2899_v12 = vpop.xlane.xlu0 %2898 }
 0x4ca   : > { %v7128_v63 = vrot.slane %v2569_v3, %v9943_v32  ;;  %v7671_v45 = vrot.slane %v2899_v12, %v9946_v33 }
 0x4cc   : > { %v7129_v21 = vsel %vm4497_vm3, %v7128_v63, %v7124_v46  ;;  %v7672_v1 = vsel %vm4483_vm1, %v7671_v45, %v7667_v17  ;;  %2640 = vadd.xlane.f32.xlu1 %v2639_v14  ;;  %2589 = vadd.xlane.f32.xlu0 %v2588_v16  ;;  %v3203_v14 = vsel %vm973_vm0, %v948_v62, 0.0  ;;  %v3152_v16 = vsel %vm973_vm0, %v931_v23, 0.0  ;;  %v761_v45 = vld [vmem:[%s9778_s29 + $0x1160] sm:$0xff]  ;;  %v902_v23 = vld [vmem:[%s9778_s29 + $0x15c8] sm:$0xff] }
 0x4cd   : > { %v2710_v51 = vpop.xlane.xlu1 %2709  ;;  %v2620_v54 = vpop.xlane.xlu0 %2619 }
 0x4ce   : > { %v7360_v34 = vrot.slane %v2710_v51, %v9950_v35  ;;  %v7212_v42 = vrot.slane %v2620_v54, %v9958_v41  ;;  %v2642_v54 = vsel %vm973_vm0, %v761_v45, 0.0 }
 0x4d0   : > { %v7361_v50 = vsel %vm14697_vm2, %v7360_v34, %v7356_v22  ;;  %v7213_v11 = vsel %vm4504_vm4, %v7212_v42, %v7208_v53  ;;  %2781 = vadd.xlane.f32.xlu1 %v2780_v28  ;;  %2730 = vadd.xlane.f32.xlu0 %v2729_v38  ;;  %v3062_v22 = vsel %vm973_vm0, %v901_v10, 0.0  ;;  %v2591_v28 = vsel %vm973_vm0, %v744_v20, 0.0  ;;  %v808_v42 = vld [vmem:[%s9778_s29 + $0x12d8] sm:$0xff]  ;;  %v949_v20 = vld [vmem:[%s9778_s29 + $0x1740] sm:$0xff] }
 0x4d1   : > { %v2848_v46 = vpop.xlane.xlu1 %2847  ;;  %v2761_v57 = vpop.xlane.xlu0 %2760 }
 0x4d2   : > { %v7444_v27 = vrot.slane %v2761_v57, %v9943_v32  ;;  %v7588_v37 = vrot.slane %v2848_v46, %v9940_v31 }
 0x4d4   : > { %v7445_v61 = vsel %vm4497_vm3, %v7444_v27, %v7440_v25  ;;  %2922 = vadd.xlane.f32.xlu1 %v2921_v52  ;;  %2871 = vadd.xlane.f32.xlu0 %v2870_v26  ;;  %v2783_v26 = vsel %vm973_vm0, %v808_v42, 0.0  ;;  %v2732_v27 = vsel %vm973_vm0, %v791_v47, 0.0  ;;  %v745_v42 = vld [vmem:[%s9778_s29 + $0x10e0] sm:$0xff] }
 0x4d5   : > { %v2902_v6 = vpop.xlane.xlu1 %2901  ;;  %v2851_v53 = vpop.xlane.xlu0 %2850 }
 0x4d6   : > { %v7676_v19 = vrot.slane %v2902_v6, %v9950_v35  ;;  %v7592_v4 = vrot.slane %v2851_v53, %v9946_v33  ;;  %v855_v6 = vld [vmem:[%s9778_s29 + $0x1450] sm:$0xff]  ;;  %v838_v53 = vld [vmem:[%s9778_s29 + $0x13c8] sm:$0xff] }
 0x4d8   : > { %v7677_v5 = vsel %vm14697_vm2, %v7676_v19, %v7672_v1  ;;  %v7593_v25 = vsel %vm4483_vm1, %v7592_v4, %v7588_v37  ;;  %3063 = vadd.xlane.f32.xlu1 %v3062_v22  ;;  %3012 = vadd.xlane.f32.xlu0 %v3011_v55  ;;  %v2924_v37 = vsel %vm973_vm0, %v855_v6, 0.0  ;;  %v2873_v19 = vsel %vm973_vm0, %v838_v53, 0.0  ;;  %v809_v53 = vld [vmem:[%s9778_s29 + $0x12e0] sm:$0xff] }
 0x4d9   : > { %v3043_v3 = vpop.xlane.xlu1 %3042  ;;  %v3040_v12 = vpop.xlane.xlu0 %3039 }
 0x4da   : > { %v7908_v17 = vrot.slane %v3043_v3, %v9946_v33  ;;  %v7904_v63 = vrot.slane %v3040_v12, %v9940_v31  ;;  %v885_v3 = vld [vmem:[%s9778_s29 + $0x1540] sm:$0xff] }
 0x4dc   : > { %v7909_v24 = vsel %vm4483_vm1, %v7908_v17, %v7904_v63  ;;  %3204 = vadd.xlane.f32.xlu1 %v3203_v14  ;;  %3153 = vadd.xlane.f32.xlu0 %v3152_v16  ;;  %v3065_v16 = vsel %vm973_vm0, %v902_v23, 0.0  ;;  %v3014_v17 = vsel %vm973_vm0, %v885_v3, 0.0 }
 0x4dd   : > { %v2623_v1 = vpop.xlane.xlu1 %2622  ;;  %v2572_v51 = vpop.xlane.xlu0 %2571 }
 0x4de   : > { %v7217_v38 = vrot.slane %v2623_v1, %v9955_v40  ;;  %v7133_v34 = vrot.slane %v2572_v51, %v9958_v41  ;;  %v932_v1 = vld [vmem:[%s9778_s29 + $0x16b8] sm:$0xff] }
 0x4e0   : > { %v12667_v59 = vsel %vm4511_vm5, %v7217_v38, %v7213_v11  ;;  %v7134_v46 = vsel %vm4504_vm4, %v7133_v34, %v7129_v21  ;;  %2643 = vadd.xlane.f32.xlu1 %v2642_v54  ;;  %2592 = vadd.xlane.f32.xlu0 %v2591_v28  ;;  %v3206_v54 = vsel %vm973_vm0, %v949_v20, 0.0  ;;  %v3155_v28 = vsel %vm973_vm0, %v932_v1, 0.0  ;;  %v762_v34 = vld [vmem:[%s9778_s29 + $0x1168] sm:$0xff] }
 0x4e1   : > { %v2764_v57 = vpop.xlane.xlu1 %2763  ;;  %v2713_v52 = vpop.xlane.xlu0 %2712 }
 0x4e2   : > { %v7449_v10 = vrot.slane %v2764_v57, %v9958_v41  ;;  %v7365_v2 = vrot.slane %v2713_v52, %v9943_v32 }
 0x4e4   : > { %v12677_v11 = vsel %vm4504_vm4, %v7449_v10, %v7445_v61  ;;  %v7366_v21 = vsel %vm4497_vm3, %v7365_v2, %v7361_v50  ;;  %2784 = vadd.xlane.f32.xlu1 %v2783_v26  ;;  %2733 = vadd.xlane.f32.xlu0 %v2732_v27  ;;  %v2645_v26 = vsel %vm973_vm0, %v762_v34, 0.0  ;;  %v2594_v27 = vsel %vm973_vm0, %v745_v42, 0.0 }
 0x4e5   : > { %v2905_v22 = vpop.xlane.xlu1 %2904  ;;  %v2854_v55 = vpop.xlane.xlu0 %2853 }
 0x4e6   : > { %v7681_v4 = vrot.slane %v2905_v22, %v9943_v32  ;;  %v7597_v62 = vrot.slane %v2854_v55, %v9950_v35  ;;  %v792_v22 = vld [vmem:[%s9778_s29 + $0x1258] sm:$0xff] }
 0x4e8   : > { %v12687_v61 = vsel %vm4497_vm3, %v7681_v4, %v7677_v5  ;;  %v7598_v50 = vsel %vm14697_vm2, %v7597_v62, %v7593_v25  ;;  %2925 = vadd.xlane.f32.xlu1 %v2924_v37  ;;  %2874 = vadd.xlane.f32.xlu0 %v2873_v19  ;;  %v2786_v4 = vsel %vm973_vm0, %v809_v53, 0.0  ;;  %v2735_v62 = vsel %vm973_vm0, %v792_v22, 0.0 }
 0x4e9   : > { %v2995_v12 = vpop.xlane.xlu1 %2994  ;;  %v2992_v14 = vpop.xlane.xlu0 %2991 }
 0x4ea   : > { %v7829_v63 = vrot.slane %v2995_v12, %v9946_v33  ;;  %v7825_v45 = vrot.slane %v2992_v14, %v9940_v31  ;;  %v856_v12 = vld [vmem:[%s9778_s29 + $0x1458] sm:$0xff]  ;;  %v839_v14 = vld [vmem:[%s9778_s29 + $0x13d0] sm:$0xff] }
 0x4eb   : > { %v2876_v20 = vsel %vm973_vm0, %v839_v14, 0.0 }
 0x4ec   : > { %v7830_v5 = vsel %vm4483_vm1, %v7829_v63, %v7825_v45  ;;  %3066 = vadd.xlane.f32.xlu1 %v3065_v16  ;;  %3015 = vadd.xlane.f32.xlu0 %v3014_v17  ;;  %v2927_v45 = vsel %vm973_vm0, %v856_v12, 0.0 }
 0x4ed   : > { %v3184_v25 = vpop.xlane.xlu1 %3183  ;;  %v3046_v51 = vpop.xlane.xlu0 %3045 }
 0x4ee   : > { %v7913_v38 = vrot.slane %v3046_v51, %v9950_v35  ;;  %v8141_v10 = vrot.slane %v3184_v25, %v9940_v31  ;;  %v903_v51 = vld [vmem:[%s9778_s29 + $0x15d0] sm:$0xff] }
 0x4ef   : > { %v3068_v34 = vsel %vm973_vm0, %v903_v51, 0.0 }
 0x4f0   : > { %v7914_v47 = vsel %vm14697_vm2, %v7913_v38, %v7909_v24  ;;  %3207 = vadd.xlane.f32.xlu1 %v3206_v54  ;;  %3156 = vadd.xlane.f32.xlu0 %v3155_v28 }
 0x4f1   : > { %v2575_v57 = vpop.xlane.xlu1 %2574  ;;  %v3187_v52 = vpop.xlane.xlu0 %3186 }
 0x4f2   : > { %v7138_v2 = vrot.slane %v2575_v57, %v9955_v40  ;;  %v8145_v6 = vrot.slane %v3187_v52, %v9946_v33 }
 0x4f4   : > { %v12711_v24 = vsel %vm4511_vm5, %v7138_v2, %v7134_v46  ;;  %v8146_v55 = vsel %vm4483_vm1, %v8145_v6, %v8141_v10  ;;  %2646 = vadd.xlane.f32.xlu1 %v2645_v26  ;;  %2595 = vadd.xlane.f32.xlu0 %v2594_v27  ;;  %v950_v26 = vld [vmem:[%s9778_s29 + $0x1748] sm:$0xff] }
 0x4f5   : > { %v2716_v37 = vpop.xlane.xlu1 %2715  ;;  %v2626_v19 = vpop.xlane.xlu0 %2625  ;;  %v3209_v6 = vsel %vm973_vm0, %v950_v26, 0.0 }
 0x4f6   : > { %v7370_v23 = vrot.slane %v2716_v37, %v9958_v41  ;;  %v7222_v3 = vrot.slane %v2626_v19, %v9983_v0  ;;  %v763_v37 = vld [vmem:[%s9778_s29 + $0x1170] sm:$0xff]  ;;  %v746_v19 = vld [vmem:[%s9778_s29 + $0x10e8] sm:$0xff] }
 0x4f8   : > { %v12721_v46 = vsel %vm4504_vm4, %v7370_v23, %v7366_v21  ;;  %v7223_v16 = vsel %vm4518_vm6, %v7222_v3, %v12667_v59  ;;  %2787 = vadd.xlane.f32.xlu1 %v2786_v4  ;;  %2736 = vadd.xlane.f32.xlu0 %v2735_v62  ;;  %v886_v21 = vld [vmem:[%s9778_s29 + $0x1548] sm:$0xff]  ;;  %v2648_v62 = vsel %vm973_vm0, %v763_v37, 0.0  ;;  %v2597_v23 = vsel %vm973_vm0, %v746_v19, 0.0 }
 0x4f9   : > { %v2857_v17 = vpop.xlane.xlu1 %2856  ;;  %v2767_v63 = vpop.xlane.xlu0 %2766  ;;  %v3017_v42 = vsel %vm973_vm0, %v886_v21, 0.0 }
 0x4fa   : > { %v7602_v1 = vrot.slane %v2857_v17, %v9943_v32  ;;  %v7454_v25 = vrot.slane %v2767_v63, %v9955_v40  ;;  %v810_v17 = vld [vmem:[%s9778_s29 + $0x12e8] sm:$0xff]  ;;  %v793_v63 = vld [vmem:[%s9778_s29 + $0x1260] sm:$0xff] }
 0x4fb   : > { %v2738_v51 = vsel %vm973_vm0, %v793_v63, 0.0 }
 0x4fc   : > { %v12732_v54 = vsel %vm4497_vm3, %v7602_v1, %v7598_v50  ;;  %v7455_v59 = vsel %vm4511_vm5, %v7454_v25, %v12677_v11  ;;  %2928 = vadd.xlane.f32.xlu1 %v2927_v45  ;;  %2877 = vadd.xlane.f32.xlu0 %v2876_v20  ;;  %v933_v50 = vld [vmem:[%s9778_s29 + $0x16c0] sm:$0xff]  ;;  %v2789_v25 = vsel %vm973_vm0, %v810_v17, 0.0 }
 0x4fd   : > { %v2998_v28 = vpop.xlane.xlu1 %2997  ;;  %v2908_v38 = vpop.xlane.xlu0 %2907  ;;  %v3158_v53 = vsel %vm973_vm0, %v933_v50, 0.0 }
 0x4fe   : > { %v7834_v57 = vrot.slane %v2998_v28, %v9950_v35  ;;  %v7686_v52 = vrot.slane %v2908_v38, %v9958_v41  ;;  %v857_v38 = vld [vmem:[%s9778_s29 + $0x1460] sm:$0xff] }
 0x4ff   : > { %v2930_v26 = vsel %vm973_vm0, %v857_v38, 0.0 }
 0x500   : > { %v12743_v27 = vsel %vm14697_vm2, %v7834_v57, %v7830_v5  ;;  %v7687_v11 = vsel %vm4504_vm4, %v7686_v52, %v12687_v61  ;;  %3069 = vadd.xlane.f32.xlu1 %v3068_v34  ;;  %3018 = vadd.xlane.f32.xlu0 %v3017_v42  ;;  %v840_v34 = vld [vmem:[%s9778_s29 + $0x13d8] sm:$0xff] }
 0x501   : > { %v3136_v10 = vpop.xlane.xlu1 %3135  ;;  %v3049_v2 = vpop.xlane.xlu0 %3048  ;;  %v2879_v50 = vsel %vm973_vm0, %v840_v34, 0.0 }
 0x502   : > { %v7918_v22 = vrot.slane %v3049_v2, %v9943_v32  ;;  %v8062_v3 = vrot.slane %v3136_v10, %v9940_v31 }
 0x504   : > { %v7919_v5 = vsel %vm4497_vm3, %v7918_v22, %v7914_v47  ;;  %3210 = vadd.xlane.f32.xlu1 %v3209_v6  ;;  %3159 = vadd.xlane.f32.xlu0 %v3158_v53  ;;  %v904_v6 = vld [vmem:[%s9778_s29 + $0x15d8] sm:$0xff]  ;;  %v887_v53 = vld [vmem:[%s9778_s29 + $0x1550] sm:$0xff] }
 0x505   : > { %v3190_v4 = vpop.xlane.xlu1 %3189  ;;  %v3139_v61 = vpop.xlane.xlu0 %3138  ;;  %v3071_v19 = vsel %vm973_vm0, %v904_v6, 0.0 }
 0x506   : > { %v8150_v12 = vrot.slane %v3190_v4, %v9950_v35  ;;  %v8066_v14 = vrot.slane %v3139_v61, %v9946_v33  ;;  %v3020_v4 = vsel %vm973_vm0, %v887_v53, 0.0 }
 0x508   : > { %v8151_v47 = vsel %vm14697_vm2, %v8150_v12, %v8146_v55  ;;  %v8067_v45 = vsel %vm4483_vm1, %v8066_v14, %v8062_v3  ;;  %2649 = vadd.xlane.f32.xlu1 %v2648_v62  ;;  %2598 = vadd.xlane.f32.xlu0 %v2597_v23  ;;  %v951_v23 = vld [vmem:[%s9778_s29 + $0x1750] sm:$0xff]  ;;  %v934_v3 = vld [vmem:[%s9778_s29 + $0x16c8] sm:$0xff] }
 0x509   : > { %v2629_v20 = vpop.xlane.xlu1 %2628  ;;  %v2578_v1 = vpop.xlane.xlu0 %2577  ;;  %v3212_v17 = vsel %vm973_vm0, %v951_v23, 0.0  ;;  %v3161_v63 = vsel %vm973_vm0, %v934_v3, 0.0 }
 0x50a   : > { %v7227_v21 = vrot.slane %v2629_v20, %v9973_v56  ;;  %v7143_v28 = vrot.slane %v2578_v1, %v9983_v0 }
 0x50c   : > { %v7228_v55 = vsel %vm4525_vm7, %v7227_v21, %v7223_v16  ;;  %v7144_v42 = vsel %vm4518_vm6, %v7143_v28, %v12711_v24  ;;  %2790 = vadd.xlane.f32.xlu1 %v2789_v25  ;;  %2739 = vadd.xlane.f32.xlu0 %v2738_v51  ;;  %v764_v25 = vld [vmem:[%s9778_s29 + $0x1178] sm:$0xff]  ;;  %v747_v51 = vld [vmem:[%s9778_s29 + $0x10f0] sm:$0xff] }
 0x50d   : > { %v2770_v57 = vpop.xlane.xlu1 %2769  ;;  %v2719_v52 = vpop.xlane.xlu0 %2718  ;;  %v2651_v38 = vsel %vm973_vm0, %v764_v25, 0.0  ;;  %v2600_v34 = vsel %vm973_vm0, %v747_v51, 0.0 }
 0x50e   : > { %v7459_v10 = vrot.slane %v2770_v57, %v9983_v0  ;;  %v7375_v2 = vrot.slane %v2719_v52, %v9955_v40 }
 0x510   : > { %v7460_v16 = vsel %vm4518_vm6, %v7459_v10, %v7455_v59  ;;  %v7376_v24 = vsel %vm4511_vm5, %v7375_v2, %v12721_v46  ;;  %2931 = vadd.xlane.f32.xlu1 %v2930_v26  ;;  %2880 = vadd.xlane.f32.xlu0 %v2879_v50  ;;  %v811_v26 = vld [vmem:[%s9778_s29 + $0x12f0] sm:$0xff]  ;;  %v794_v50 = vld [vmem:[%s9778_s29 + $0x1268] sm:$0xff] }
 0x511   : > { %v2911_v22 = vpop.xlane.xlu1 %2910  ;;  %v2860_v37 = vpop.xlane.xlu0 %2859  ;;  %v2792_v6 = vsel %vm973_vm0, %v811_v26, 0.0  ;;  %v2741_v53 = vsel %vm973_vm0, %v794_v50, 0.0 }
 0x512   : > { %v7691_v61 = vrot.slane %v2911_v22, %v9955_v40  ;;  %v7607_v62 = vrot.slane %v2860_v37, %v9958_v41 }
 0x514   : > { %v7692_v59 = vsel %vm4511_vm5, %v7691_v61, %v7687_v11  ;;  %v7608_v46 = vsel %vm4504_vm4, %v7607_v62, %v12732_v54  ;;  %3072 = vadd.xlane.f32.xlu1 %v3071_v19  ;;  %3021 = vadd.xlane.f32.xlu0 %v3020_v4  ;;  %v858_v19 = vld [vmem:[%s9778_s29 + $0x1468] sm:$0xff]  ;;  %v841_v4 = vld [vmem:[%s9778_s29 + $0x13e0] sm:$0xff] }
 0x515   : > { %v3052_v12 = vpop.xlane.xlu1 %3051  ;;  %v3001_v14 = vpop.xlane.xlu0 %3000  ;;  %v2933_v23 = vsel %vm973_vm0, %v858_v19, 0.0  ;;  %v2882_v3 = vsel %vm973_vm0, %v841_v4, 0.0 }
 0x516   : > { %v7923_v20 = vrot.slane %v3052_v12, %v9958_v41  ;;  %v7839_v1 = vrot.slane %v3001_v14, %v9943_v32 }
 0x518   : > { %v7924_v11 = vsel %vm4504_vm4, %v7923_v20, %v7919_v5  ;;  %v7840_v54 = vsel %vm4497_vm3, %v7839_v1, %v12743_v27  ;;  %3213 = vadd.xlane.f32.xlu1 %v3212_v17  ;;  %3162 = vadd.xlane.f32.xlu0 %v3161_v63  ;;  %v905_v17 = vld [vmem:[%s9778_s29 + $0x15e0] sm:$0xff]  ;;  %v888_v63 = vld [vmem:[%s9778_s29 + $0x1558] sm:$0xff] }
 0x519   : > { %v3193_v21 = vpop.xlane.xlu1 %3192  ;;  %v3142_v28 = vpop.xlane.xlu0 %3141  ;;  %v3074_v25 = vsel %vm973_vm0, %v905_v17, 0.0  ;;  %v3023_v51 = vsel %vm973_vm0, %v888_v63, 0.0 }
 0x51a   : > { %v8155_v57 = vrot.slane %v3193_v21, %v9943_v32  ;;  %v8071_v52 = vrot.slane %v3142_v28, %v9950_v35 }
 0x51c   : > { %v8156_v5 = vsel %vm4497_vm3, %v8155_v57, %v8151_v47  ;;  %v8072_v27 = vsel %vm14697_vm2, %v8071_v52, %v8067_v45  ;;  %2652 = vadd.xlane.f32.xlu1 %v2651_v38  ;;  %2601 = vadd.xlane.f32.xlu0 %v2600_v34  ;;  %v952_v38 = vld [vmem:[%s9778_s29 + $0x1758] sm:$0xff]  ;;  %v935_v34 = vld [vmem:[%s9778_s29 + $0x16d0] sm:$0xff]  ;;  %vm14761_vm2 = vmmov %vm14760_vm11 }
 0x51d   : > { %v2632_v10 = vpop.xlane.xlu1 %2631  ;;  %v2581_v2 = vpop.xlane.xlu0 %2580  ;;  %v3215_v26 = vsel %vm973_vm0, %v952_v38, 0.0  ;;  %v3164_v50 = vsel %vm973_vm0, %v935_v34, 0.0 }
 0x51e   : > { %v7232_v22 = vrot.slane %v2632_v10, %v9993_v8  ;;  %v7148_v37 = vrot.slane %v2581_v2, %v9973_v56 }
 0x520   : > { %v7233_v47 = vsel %vm14760_vm11, %v7232_v22, %v7228_v55  ;;  %v7149_v45 = vsel %vm4525_vm7, %v7148_v37, %v7144_v42  ;;  %2793 = vadd.xlane.f32.xlu1 %v2792_v6  ;;  %2742 = vadd.xlane.f32.xlu0 %v2741_v53  ;;  %v795_v6 = vld [vmem:[%s9778_s29 + $0x1270] sm:$0xff]  ;;  %v748_v53 = vld [vmem:[%s9778_s29 + $0x10f8] sm:$0xff] }
 0x521   : > { %v2773_v61 = vpop.xlane.xlu1 %2772  ;;  %v2722_v62 = vpop.xlane.xlu0 %2721  ;;  %v2744_v19 = vsel %vm973_vm0, %v795_v6, 0.0  ;;  %v2603_v4 = vsel %vm973_vm0, %v748_v53, 0.0 }
 0x522   : > { %v7464_v12 = vrot.slane %v2773_v61, %v9973_v56  ;;  %v7380_v14 = vrot.slane %v2722_v62, %v9983_v0 }
 0x524   : > { %v7465_v55 = vsel %vm4525_vm7, %v7464_v12, %v7460_v16  ;;  %v7381_v42 = vsel %vm4518_vm6, %v7380_v14, %v7376_v24  ;;  %2934 = vadd.xlane.f32.xlu1 %v2933_v23  ;;  %2883 = vadd.xlane.f32.xlu0 %v2882_v3  ;;  %v842_v23 = vld [vmem:[%s9778_s29 + $0x13e8] sm:$0xff]  ;;  %v812_v3 = vld [vmem:[%s9778_s29 + $0x12f8] sm:$0xff] }
 0x525   : > { %v2914_v20 = vpop.xlane.xlu1 %2913  ;;  %v2863_v1 = vpop.xlane.xlu0 %2862  ;;  %v2885_v17 = vsel %vm973_vm0, %v842_v23, 0.0  ;;  %v2795_v63 = vsel %vm973_vm0, %v812_v3, 0.0 }
 0x526   : > { %v7696_v21 = vrot.slane %v2914_v20, %v9983_v0  ;;  %v7612_v28 = vrot.slane %v2863_v1, %v9955_v40 }
 0x528   : > { %v7697_v16 = vsel %vm4518_vm6, %v7696_v21, %v7692_v59  ;;  %v7613_v24 = vsel %vm4511_vm5, %v7612_v28, %v7608_v46  ;;  %3075 = vadd.xlane.f32.xlu1 %v3074_v25  ;;  %3024 = vadd.xlane.f32.xlu0 %v3023_v51  ;;  %v889_v25 = vld [vmem:[%s9778_s29 + $0x1560] sm:$0xff]  ;;  %v859_v51 = vld [vmem:[%s9778_s29 + $0x1470] sm:$0xff] }
 0x529   : > { %v3055_v57 = vpop.xlane.xlu1 %3054  ;;  %v3004_v52 = vpop.xlane.xlu0 %3003  ;;  %v3026_v38 = vsel %vm973_vm0, %v889_v25, 0.0  ;;  %v2936_v34 = vsel %vm973_vm0, %v859_v51, 0.0 }
 0x52a   : > { %v7928_v10 = vrot.slane %v3055_v57, %v9955_v40  ;;  %v7844_v2 = vrot.slane %v3004_v52, %v9958_v41 }
 0x52c   : > { %v7929_v59 = vsel %vm4511_vm5, %v7928_v10, %v7924_v11  ;;  %v7845_v46 = vsel %vm4504_vm4, %v7844_v2, %v7840_v54  ;;  %3216 = vadd.xlane.f32.xlu1 %v3215_v26  ;;  %3165 = vadd.xlane.f32.xlu0 %v3164_v50  ;;  %v936_v26 = vld [vmem:[%s9778_s29 + $0x16d8] sm:$0xff]  ;;  %v906_v50 = vld [vmem:[%s9778_s29 + $0x15e8] sm:$0xff] }
 0x52d   : > { %v3196_v22 = vpop.xlane.xlu1 %3195  ;;  %v3145_v37 = vpop.xlane.xlu0 %3144  ;;  %v3167_v6 = vsel %vm973_vm0, %v936_v26, 0.0  ;;  %v3077_v53 = vsel %vm973_vm0, %v906_v50, 0.0 }
 0x52e   : > { %v8160_v61 = vrot.slane %v3196_v22, %v9958_v41  ;;  %v8076_v62 = vrot.slane %v3145_v37, %v9943_v32 }
 0x530   : > { %v8161_v11 = vsel %vm4504_vm4, %v8160_v61, %v8156_v5  ;;  %v8077_v54 = vsel %vm4497_vm3, %v8076_v62, %v8072_v27  ;;  %2745 = vadd.xlane.f32.xlu1 %v2744_v19  ;;  %2604 = vadd.xlane.f32.xlu0 %v2603_v4  ;;  %v796_v19 = vld [vmem:[%s9778_s29 + $0x1278] sm:$0xff]  ;;  %v953_v4 = vld [vmem:[%s9778_s29 + $0x1760] sm:$0xff] }
 0x531   : > { %v2635_v12 = vpop.xlane.xlu1 %2634  ;;  %v2584_v14 = vpop.xlane.xlu0 %2583  ;;  %v2747_v23 = vsel %vm973_vm0, %v796_v19, 0.0  ;;  %v3218_v3 = vsel %vm973_vm0, %v953_v4, 0.0 }
 0x532   : > { %v7237_v20 = vrot.slane %v2635_v12, %v9990_v7  ;;  %v7153_v1 = vrot.slane %v2584_v14, %v9993_v8 }
 0x534   : > { %v7238_v5 = vsel %vm4539_vm9, %v7237_v20, %v7233_v47  ;;  %v7154_v27 = vsel %vm14760_vm11, %v7153_v1, %v7149_v45  ;;  %2886 = vadd.xlane.f32.xlu1 %v2885_v17  ;;  %2796 = vadd.xlane.f32.xlu0 %v2795_v63  ;;  %v860_v17 = vld [vmem:[%s9778_s29 + $0x1478] sm:$0xff]  ;;  %v843_v63 = vld [vmem:[%s9778_s29 + $0x13f0] sm:$0xff]  ;;  %vm14762_vm11 = vmmov %vm14761_vm2 }
 0x535   : > { %v2776_v21 = vpop.xlane.xlu1 %2775  ;;  %v2725_v28 = vpop.xlane.xlu0 %2724  ;;  %v2939_v25 = vsel %vm973_vm0, %v860_v17, 0.0  ;;  %v2888_v51 = vsel %vm973_vm0, %v843_v63, 0.0 }
 0x536   : > { %v7469_v57 = vrot.slane %v2776_v21, %v9993_v8  ;;  %v7385_v52 = vrot.slane %v2725_v28, %v9973_v56 }
 0x538   : > { %v7470_v47 = vsel %vm14761_vm2, %v7469_v57, %v7465_v55  ;;  %v7386_v45 = vsel %vm4525_vm7, %v7385_v52, %v7381_v42  ;;  %3027 = vadd.xlane.f32.xlu1 %v3026_v38  ;;  %2937 = vadd.xlane.f32.xlu0 %v2936_v34  ;;  %v907_v38 = vld [vmem:[%s9778_s29 + $0x15f0] sm:$0xff]  ;;  %v890_v34 = vld [vmem:[%s9778_s29 + $0x1568] sm:$0xff] }
 0x539   : > { %v2917_v10 = vpop.xlane.xlu1 %2916  ;;  %v2866_v2 = vpop.xlane.xlu0 %2865  ;;  %v3080_v26 = vsel %vm973_vm0, %v907_v38, 0.0  ;;  %v3029_v50 = vsel %vm973_vm0, %v890_v34, 0.0 }
 0x53a   : > { %v7701_v22 = vrot.slane %v2917_v10, %v9973_v56  ;;  %v7617_v37 = vrot.slane %v2866_v2, %v9983_v0 }
 0x53c   : > { %v7702_v55 = vsel %vm4525_vm7, %v7701_v22, %v7697_v16  ;;  %v7618_v42 = vsel %vm4518_vm6, %v7617_v37, %v7613_v24  ;;  %3168 = vadd.xlane.f32.xlu1 %v3167_v6  ;;  %3078 = vadd.xlane.f32.xlu0 %v3077_v53  ;;  %v954_v6 = vld [vmem:[%s9778_s29 + $0x1768] sm:$0xff] }
 0x53d   : > { %v3058_v61 = vpop.xlane.xlu1 %3057  ;;  %v3007_v62 = vpop.xlane.xlu0 %3006  ;;  %v3221_v19 = vsel %vm973_vm0, %v954_v6, 0.0  ;;  %v3543_v6 = vld [vmem:[%s14686_s1 + $0x848] sm:$0xff] }
 0x53e   : > { %v7933_v12 = vrot.slane %v3058_v61, %v9983_v0  ;;  %v7849_v14 = vrot.slane %v3007_v62, %v9955_v40 }
 0x540   : > { %v7934_v16 = vsel %vm4518_vm6, %v7933_v12, %v7929_v59  ;;  %v7850_v24 = vsel %vm4511_vm5, %v7849_v14, %v7845_v46  ;;  %2748 = vadd.xlane.f32.xlu1 %v2747_v23  ;;  %3219 = vadd.xlane.f32.xlu0 %v3218_v3  ;;  %v891_v23 = vld [vmem:[%s9778_s29 + $0x1570] sm:$0xff] }
 0x541   : > { %v3199_v20 = vpop.xlane.xlu1 %3198  ;;  %v3148_v1 = vpop.xlane.xlu0 %3147  ;;  %v3032_v17 = vsel %vm973_vm0, %v891_v23, 0.0 }
 0x542   : > { %v8165_v21 = vrot.slane %v3199_v20, %v9955_v40  ;;  %v8081_v28 = vrot.slane %v3148_v1, %v9958_v41 }
 0x544   : > { %v12885_v59 = vsel %vm4511_vm5, %v8165_v21, %v8161_v11  ;;  %v12888_v46 = vsel %vm4504_vm4, %v8081_v28, %v8077_v54  ;;  %2940 = vadd.xlane.f32.xlu1 %v2939_v25  ;;  %2889 = vadd.xlane.f32.xlu0 %v2888_v51  ;;  %v937_v11 = vld [vmem:[%s9778_s29 + $0x16e0] sm:$0xff]  ;;  %v938_v25 = vld [vmem:[%s9778_s29 + $0x16e8] sm:$0xff] }
 0x545   : > { %v2638_v57 = vpop.xlane.xlu1 %2637  ;;  %v2587_v52 = vpop.xlane.xlu0 %2586  ;;  %v3170_v4 = vsel %vm973_vm0, %v937_v11, 0.0  ;;  %v3173_v38 = vsel %vm973_vm0, %v938_v25, 0.0 }
 0x546   : > { %v7242_v10 = vrot.slane %v2638_v57, %v10015_v30  ;;  %v7158_v2 = vrot.slane %v2587_v52, %v9990_v7 }
 0x548   : > { %v12897_v53 = vsel %vm4546_vm10, %v7242_v10, %v7238_v5  ;;  %v12900_v54 = vsel %vm4539_vm9, %v7158_v2, %v7154_v27  ;;  %3081 = vadd.xlane.f32.xlu1 %v3080_v26  ;;  %3030 = vadd.xlane.f32.xlu0 %v3029_v50  ;;  %v844_v5 = vld [vmem:[%s9778_s29 + $0x13f8] sm:$0xff]  ;;  %v955_v50 = vld [vmem:[%s9778_s29 + $0x1770] sm:$0xff]  ;;  %v3535_v2 = vld [vmem:[%s14686_s1 + $0x808] sm:$0xff] }
 0x549   : > { %v2779_v22 = vpop.xlane.xlu1 %2778  ;;  %v2728_v37 = vpop.xlane.xlu0 %2727  ;;  %v2891_v63 = vsel %vm973_vm0, %v844_v5, 0.0  ;;  %v892_v26 = vld [vmem:[%s9778_s29 + $0x1578] sm:$0xff] }
 0x54a   : > { %v7474_v61 = vrot.slane %v2779_v22, %v9990_v7  ;;  %v7390_v62 = vrot.slane %v2728_v37, %v9993_v8  ;;  %v956_v10 = vld [vmem:[%s9778_s29 + $0x1778] sm:$0xff]  ;;  %v3224_v37 = vsel %vm973_vm0, %v955_v50, 0.0 }
 0x54b   : > { %v3561_v50 = vld [vmem:[%s14686_s1 + $0x8d8] sm:$0xff] }
 0x54c   : > { %v12909_v3 = vsel %vm4539_vm9, %v7474_v61, %v7470_v47  ;;  %v12912_v27 = vsel %vm14761_vm2, %v7390_v62, %v7386_v45  ;;  %3222 = vadd.xlane.f32.xlu1 %v3221_v19  ;;  %3171 = vadd.xlane.f32.xlu0 %v3170_v4  ;;  %v908_v47 = vld [vmem:[%s9778_s29 + $0x15f8] sm:$0xff]  ;;  %v9236_v19 = vpack.c.bf16 %v3543_v6, %v3535_v2  ;;  %v3534_v61 = vld [vmem:[%s14686_s1 + $0x800] sm:$0xff]  ;;  %vm14763_vm2 = vcmask 786112  }
 0x54d   : > { %v2920_v12 = vpop.xlane.xlu1 %2919  ;;  %v2869_v14 = vpop.xlane.xlu0 %2868  ;;  %v3083_v34 = vsel %vm973_vm0, %v908_v47, 0.0  ;;  %v3545_v4 = vld [vmem:[%s14686_s1 + $0x858] sm:$0xff]  ;;  %v3542_v62 = vld [vmem:[%s14686_s1 + $0x840] sm:$0xff] }
 0x54e   : > { %v7706_v20 = vrot.slane %v2920_v12, %v9993_v8  ;;  %v7622_v1 = vrot.slane %v2869_v14, %v9973_v56  ;;  %v939_v12 = vld [vmem:[%s9778_s29 + $0x16f0] sm:$0xff]  ;;  %9237 = vmatprep.subr.bf16.mxu0 %v9236_v19  ;;  %v3550_v2 = vld [vmem:[%s14686_s1 + $0x880] sm:$0xff] }
 0x54f   : > { %v3558_v6 = vld [vmem:[%s14686_s1 + $0x8c0] sm:$0xff]  ;;  %v3560_v19 = vld [vmem:[%s14686_s1 + $0x8d0] sm:$0xff] }
 0x550   : > { %v12921_v51 = vsel %vm14762_vm11, %v7706_v20, %v7702_v55  ;;  %v12924_v45 = vsel %vm4525_vm7, %v7622_v1, %v7618_v42  ;;  %3033 = vadd.xlane.f32.xlu1 %v3032_v17  ;;  %2892 = vadd.xlane.f32.xlu0 %v2891_v63  ;;  %v9238_v17 = vpack.c.bf16 %v3542_v62, %v3534_v61  ;;  %v3536_v63 = vld [vmem:[%s14686_s1 + $0x810] sm:$0xff] }
 0x551   : > { %v3061_v21 = vpop.xlane.xlu1 %3060  ;;  %v3010_v28 = vpop.xlane.xlu0 %3009  ;;  %v3544_v20 = vld [vmem:[%s14686_s1 + $0x850] sm:$0xff] }
 0x552   : > { %v7938_v57 = vrot.slane %v3061_v21, %v9973_v56  ;;  %v7854_v52 = vrot.slane %v3010_v28, %v9983_v0  ;;  %v9334_v1 = vpack.c.bf16 %v3544_v20, %v3536_v63  ;;  %v765_v21 = vld [vmem:[%s9778_s29 + $0x1180] sm:$0xff]  ;;  %v3551_v28 = vld [vmem:[%s14686_s1 + $0x888] sm:$0xff]  ;;  %9239 = vmatpush1.bf16.msra.mxu0 %v9238_v17 }
 0x554   : > { %v12933_v55 = vsel %vm4525_vm7, %v7938_v57, %v7934_v16  ;;  %v12936_v42 = vsel %vm4518_vm6, %v7854_v52, %v7850_v24  ;;  %3174 = vadd.xlane.f32.xlu1 %v3173_v38  ;;  %3084 = vadd.xlane.f32.xlu0 %v3083_v34  ;;  %v3537_v16 = vld [vmem:[%s14686_s1 + $0x818] sm:$0xff]  ;;  %v3035_v24 = vsel %vm973_vm0, %v892_v26, 0.0  ;;  %v3559_v38 = vld [vmem:[%s14686_s1 + $0x8c8] sm:$0xff]  ;;  %v3176_v52 = vsel %vm973_vm0, %v939_v12, 0.0 }
 0x555   : > { %v3202_v11 = vpop.xlane.xlu1 %3201  ;;  %v3151_v22 = vpop.xlane.xlu0 %3150  ;;  %v9332_v14 = vpack.c.bf16 %v3545_v4, %v3537_v16  ;;  %v9240_v26 = vpack.c.bf16 %v3559_v38, %v3551_v28  ;;  %v3575_v12 = vld [vmem:[%s14686_s1 + $0x948] sm:$0xff]  ;;  %v3566_v28 = vld [vmem:[%s14686_s1 + $0x900] sm:$0xff] }
 0x556   : > { %v8170_v23 = vrot.slane %v3202_v11, %v9983_v0  ;;  %v8086_v5 = vrot.slane %v3151_v22, %v9955_v40  ;;  %v940_v11 = vld [vmem:[%s9778_s29 + $0x16f8] sm:$0xff]  ;;  %v3574_v38 = vld [vmem:[%s14686_s1 + $0x940] sm:$0xff] }
 0x557   : > { %9333 = vmatprep.subr.bf16.mxu1 %v9332_v14  ;;  %9241 = vmatprep.subr.bf16.mxu0 %v9240_v26  ;;  %v3179_v63 = vsel %vm973_vm0, %v940_v11, 0.0  ;;  %v3576_v26 = vld [vmem:[%s14686_s1 + $0x950] sm:$0xff]  ;;  %v3591_v11 = vld [vmem:[%s14686_s1 + $0x9c8] sm:$0xff] }
 0x558   : > { %v12970_v25 = vsel %vm4518_vm6, %v8170_v23, %v12885_v59  ;;  %v12974_v47 = vsel %vm4511_vm5, %v8086_v5, %v12888_v46  ;;  %3036 = vadd.xlane.f32.xlu1 %v3035_v24  ;;  %3225 = vadd.xlane.f32.xlu0 %v3224_v37  ;;  %v3553_v59 = vld [vmem:[%s14686_s1 + $0x898] sm:$0xff]  ;;  %v3227_v46 = vsel %vm973_vm0, %v956_v10, 0.0  ;;  %v9242_v24 = vpack.c.bf16 %v3558_v6, %v3550_v2  ;;  %v3552_v37 = vld [vmem:[%s14686_s1 + $0x890] sm:$0xff]  ;;  %v3567_v5 = vld [vmem:[%s14686_s1 + $0x908] sm:$0xff] }
 0x559   : > { %v2641_v34 = vpop.xlane.xlu1 %2640  ;;  %v2590_v57 = vpop.xlane.xlu0 %2589  ;;  %9335 = vmatpush1.bf16.msra.mxu1 %v9334_v1  ;;  %v9336_v22 = vpack.c.bf16 %v3561_v50, %v3553_v59  ;;  %v9338_v4 = vpack.c.bf16 %v3560_v19, %v3552_v37  ;;  %v720_v23 = vld [vmem:[%s9778_s29 + $0x1018] sm:$0xff]  ;;  %v9244_v20 = vpack.c.bf16 %v3575_v12, %v3567_v5  ;;  %v3582_v5 = vld [vmem:[%s14686_s1 + $0x980] sm:$0xff] }
 0x55a   : > { %v7247_v10 = vrot.slane %v2641_v34, %v10012_v29  ;;  %v7163_v16 = vrot.slane %v2590_v57, %v10015_v30  ;;  %9243 = vmatpush1.bf16.msra.mxu0 %v9242_v24  ;;  %v3577_v1 = vld [vmem:[%s14686_s1 + $0x958] sm:$0xff]  ;;  %v766_v34 = vld [vmem:[%s9778_s29 + $0x1188] sm:$0xff]  ;;  %v3590_v12 = vld [vmem:[%s14686_s1 + $0x9c0] sm:$0xff] }
 0x55b   : > { %9337 = vmatprep.subr.bf16.mxu1 %v9336_v22  ;;  %9245 = vmatprep.subr.bf16.mxu0 %v9244_v20  ;;  %v2657_v37 = vsel %vm973_vm0, %v766_v34, 0.0  ;;  %v3592_v20 = vld [vmem:[%s14686_s1 + $0x9d0] sm:$0xff]  ;;  %v3607_v34 = vld [vmem:[%s14686_s1 + $0xa48] sm:$0xff] }
 0x55c   : > { %v13008_v61 = vsel %vm14763_vm2, %v7247_v10, %v12897_v53  ;;  %v13012_v62 = vsel %vm4546_vm10, %v7163_v16, %v12900_v54  ;;  %3228 = vadd.xlane.f32.xlu1 %v3227_v46  ;;  %3177 = vadd.xlane.f32.xlu0 %v3176_v52  ;;  %v3569_v53 = vld [vmem:[%s14686_s1 + $0x918] sm:$0xff]  ;;  %v2654_v54 = vsel %vm973_vm0, %v765_v21, 0.0  ;;  %v9246_v46 = vpack.c.bf16 %v3574_v38, %v3566_v28  ;;  %v3568_v52 = vld [vmem:[%s14686_s1 + $0x910] sm:$0xff]  ;;  %v813_v10 = vld [vmem:[%s9778_s29 + $0x1300] sm:$0xff] }
 0x55d   : > { %v2782_v14 = vpop.xlane.xlu1 %2781  ;;  %v2731_v17 = vpop.xlane.xlu0 %2730  ;;  %9339 = vmatpush1.bf16.msra.mxu1 %v9338_v4  ;;  %v9340_v57 = vpack.c.bf16 %v3577_v1, %v3569_v53  ;;  %v9342_v50 = vpack.c.bf16 %v3576_v26, %v3568_v52  ;;  %v3583_v16 = vld [vmem:[%s14686_s1 + $0x988] sm:$0xff]  ;;  %v3593_v4 = vld [vmem:[%s14686_s1 + $0x9d8] sm:$0xff]  ;;  %vm14764_vm2 = vmmov %vm14762_vm11 }
 0x55e   : > { %v7479_v21 = vrot.slane %v2782_v14, %v10015_v30  ;;  %v7395_v59 = vrot.slane %v2731_v17, %v9990_v7  ;;  %9247 = vmatpush1.bf16.msra.mxu0 %v9246_v46  ;;  %v9248_v19 = vpack.c.bf16 %v3591_v11, %v3583_v16  ;;  %v767_v14 = vld [vmem:[%s9778_s29 + $0x1190] sm:$0xff]  ;;  %v3598_v16 = vld [vmem:[%s14686_s1 + $0xa00] sm:$0xff] }
 0x55f   : > { %9341 = vmatprep.subr.bf16.mxu1 %v9340_v57  ;;  %v2660_v52 = vsel %vm973_vm0, %v767_v14, 0.0  ;;  %v3606_v11 = vld [vmem:[%s14686_s1 + $0xa40] sm:$0xff]  ;;  %v3623_v14 = vld [vmem:[%s14686_s1 + $0xac8] sm:$0xff] }
 0x560   : > { %v13046_v2 = vsel %vm4546_vm10, %v7479_v21, %v12909_v3  ;;  %v13050_v6 = vsel %vm4539_vm9, %v7395_v59, %v12912_v27  ;;  %2655 = vadd.xlane.f32.xlu1 %v2654_v54  ;;  %3180 = vadd.xlane.f32.xlu0 %v3179_v63  ;;  %v3585_v3 = vld [vmem:[%s14686_s1 + $0x998] sm:$0xff]  ;;  %v2519_v27 = vsel %vm973_vm0, %v720_v23, 0.0  ;;  %v9250_v54 = vpack.c.bf16 %v3590_v12, %v3582_v5  ;;  %v3584_v63 = vld [vmem:[%s14686_s1 + $0x990] sm:$0xff]  ;;  %v721_v21 = vld [vmem:[%s9778_s29 + $0x1020] sm:$0xff] }
 0x561   : > { %v2923_v22 = vpop.xlane.xlu1 %2922  ;;  %v2872_v24 = vpop.xlane.xlu0 %2871  ;;  %9343 = vmatpush1.bf16.msra.mxu1 %v9342_v50  ;;  %v9344_v17 = vpack.c.bf16 %v3593_v4, %v3585_v3  ;;  %9249 = vmatprep.subr.bf16.mxu0 %v9248_v19  ;;  %v9346_v1 = vpack.c.bf16 %v3592_v20, %v3584_v63  ;;  %v3599_v59 = vld [vmem:[%s14686_s1 + $0xa08] sm:$0xff]  ;;  %v3609_v50 = vld [vmem:[%s14686_s1 + $0xa58] sm:$0xff]  ;;  %v3608_v19 = vld [vmem:[%s14686_s1 + $0xa50] sm:$0xff] }
 0x562   : > { %v7711_v23 = vrot.slane %v2923_v22, %v9990_v7  ;;  %v7627_v53 = vrot.slane %v2872_v24, %v9993_v8  ;;  %9251 = vmatpush1.bf16.msra.mxu0 %v9250_v54  ;;  %v9252_v26 = vpack.c.bf16 %v3607_v34, %v3599_v59  ;;  %v814_v22 = vld [vmem:[%s9778_s29 + $0x1308] sm:$0xff]  ;;  %v3614_v59 = vld [vmem:[%s14686_s1 + $0xa80] sm:$0xff] }
 0x563   : > { %9345 = vmatprep.subr.bf16.mxu1 %v9344_v17  ;;  %v2801_v63 = vsel %vm973_vm0, %v814_v22, 0.0  ;;  %v3622_v34 = vld [vmem:[%s14686_s1 + $0xac0] sm:$0xff]  ;;  %v3639_v22 = vld [vmem:[%s14686_s1 + $0xb48] sm:$0xff] }
 0x564   : > { %v13084_v28 = vsel %vm4539_vm9, %v7711_v23, %v12921_v51  ;;  %v13088_v38 = vsel %vm14762_vm11, %v7627_v53, %v12924_v45  ;;  %2520 = vadd.xlane.f32.xlu1 %v2519_v27  ;;  %2658 = vadd.xlane.f32.xlu0 %v2657_v37  ;;  %v3601_v51 = vld [vmem:[%s14686_s1 + $0xa18] sm:$0xff]  ;;  %v2798_v45 = vsel %vm973_vm0, %v813_v10, 0.0  ;;  %v9254_v27 = vpack.c.bf16 %v3606_v11, %v3598_v16  ;;  %v3600_v37 = vld [vmem:[%s14686_s1 + $0xa10] sm:$0xff]  ;;  %v3615_v53 = vld [vmem:[%s14686_s1 + $0xa88] sm:$0xff] }
 0x565   : > { %v3064_v57 = vpop.xlane.xlu1 %3063  ;;  %v3013_v46 = vpop.xlane.xlu0 %3012  ;;  %9347 = vmatpush1.bf16.msra.mxu1 %v9346_v1  ;;  %v9348_v24 = vpack.c.bf16 %v3609_v50, %v3601_v51  ;;  %9253 = vmatprep.subr.bf16.mxu0 %v9252_v26  ;;  %v9350_v4 = vpack.c.bf16 %v3608_v19, %v3600_v37  ;;  %v815_v23 = vld [vmem:[%s9778_s29 + $0x1310] sm:$0xff]  ;;  %v9256_v20 = vpack.c.bf16 %v3623_v14, %v3615_v53  ;;  %v3625_v1 = vld [vmem:[%s14686_s1 + $0xad8] sm:$0xff]  ;;  %v3630_v53 = vld [vmem:[%s14686_s1 + $0xb00] sm:$0xff]  ;;  %vm14765_vm11 = vcmask 786112  }
 0x566   : > { %v7943_v10 = vrot.slane %v3064_v57, %v9993_v8  ;;  %v7859_v3 = vrot.slane %v3013_v46, %v9973_v56  ;;  %9255 = vmatpush1.bf16.msra.mxu0 %v9254_v27  ;;  %v768_v57 = vld [vmem:[%s9778_s29 + $0x1198] sm:$0xff]  ;;  %v3624_v26 = vld [vmem:[%s14686_s1 + $0xad0] sm:$0xff]  ;;  %v3638_v14 = vld [vmem:[%s14686_s1 + $0xb40] sm:$0xff] }
 0x567   : > { %9349 = vmatprep.subr.bf16.mxu1 %v9348_v24  ;;  %9257 = vmatprep.subr.bf16.mxu0 %v9256_v20  ;;  %v2663_v37 = vsel %vm973_vm0, %v768_v57, 0.0  ;;  %v3640_v20 = vld [vmem:[%s14686_s1 + $0xb50] sm:$0xff]  ;;  %v3655_v57 = vld [vmem:[%s14686_s1 + $0xbc8] sm:$0xff] }
 0x568   : > { %v13122_v5 = vsel %vm14764_vm2, %v7943_v10, %v12933_v55  ;;  %v13126_v12 = vsel %vm4525_vm7, %v7859_v3, %v12936_v42  ;;  %2799 = vadd.xlane.f32.xlu1 %v2798_v45  ;;  %2661 = vadd.xlane.f32.xlu0 %v2660_v52  ;;  %v3617_v55 = vld [vmem:[%s14686_s1 + $0xa98] sm:$0xff]  ;;  %v2522_v42 = vsel %vm973_vm0, %v721_v21, 0.0  ;;  %v9258_v45 = vpack.c.bf16 %v3622_v34, %v3614_v59  ;;  %v3616_v52 = vld [vmem:[%s14686_s1 + $0xa90] sm:$0xff]  ;;  %v862_v10 = vld [vmem:[%s9778_s29 + $0x1488] sm:$0xff] }
 0x569   : > { %v3205_v17 = vpop.xlane.xlu1 %3204  ;;  %v3154_v54 = vpop.xlane.xlu0 %3153  ;;  %9351 = vmatpush1.bf16.msra.mxu1 %v9350_v4  ;;  %v9352_v46 = vpack.c.bf16 %v3625_v1, %v3617_v55  ;;  %v9354_v50 = vpack.c.bf16 %v3624_v26, %v3616_v52  ;;  %v3631_v3 = vld [vmem:[%s14686_s1 + $0xb08] sm:$0xff]  ;;  %v3641_v4 = vld [vmem:[%s14686_s1 + $0xb58] sm:$0xff]  ;;  %vm14766_vm2 = vmmov %vm14765_vm11 }
 0x56a   : > { %v8175_v21 = vrot.slane %v3205_v17, %v9973_v56  ;;  %v8091_v51 = vrot.slane %v3154_v54, %v9983_v0  ;;  %9259 = vmatpush1.bf16.msra.mxu0 %v9258_v45  ;;  %v9260_v19 = vpack.c.bf16 %v3639_v22, %v3631_v3  ;;  %v861_v17 = vld [vmem:[%s9778_s29 + $0x1480] sm:$0xff] }
 0x56b   : > { %9353 = vmatprep.subr.bf16.mxu1 %v9352_v46  ;;  %v2942_v52 = vsel %vm973_vm0, %v861_v17, 0.0  ;;  %v3646_v3 = vld [vmem:[%s14686_s1 + $0xb80] sm:$0xff] }
 0x56c   : > { %v13160_v16 = vsel %vm4525_vm7, %v8175_v21, %v12970_v25  ;;  %v13164_v11 = vsel %vm4518_vm6, %v8091_v51, %v12974_v47  ;;  %2523 = vadd.xlane.f32.xlu1 %v2522_v42  ;;  %2802 = vadd.xlane.f32.xlu0 %v2801_v63  ;;  %v3633_v25 = vld [vmem:[%s14686_s1 + $0xb18] sm:$0xff]  ;;  %v2804_v47 = vsel %vm973_vm0, %v815_v23, 0.0  ;;  %v9262_v42 = vpack.c.bf16 %v3638_v14, %v3630_v53  ;;  %v3632_v63 = vld [vmem:[%s14686_s1 + $0xb10] sm:$0xff]  ;;  %v769_v21 = vld [vmem:[%s9778_s29 + $0x11a0] sm:$0xff] }
 0x56d   : > { %v2644_v24 = vpop.xlane.xlu1 %2643  ;;  %v2593_v27 = vpop.xlane.xlu0 %2592  ;;  %9355 = vmatpush1.bf16.msra.mxu1 %v9354_v50  ;;  %v9356_v54 = vpack.c.bf16 %v3641_v4, %v3633_v25  ;;  %9261 = vmatprep.subr.bf16.mxu0 %v9260_v19  ;;  %v9358_v1 = vpack.c.bf16 %v3640_v20, %v3632_v63  ;;  %v3647_v51 = vld [vmem:[%s14686_s1 + $0xb88] sm:$0xff]  ;;  %v3657_v50 = vld [vmem:[%s14686_s1 + $0xbd8] sm:$0xff]  ;;  %v3654_v22 = vld [vmem:[%s14686_s1 + $0xbc0] sm:$0xff]  ;;  %v2666_v17 = vsel %vm973_vm0, %v769_v21, 0.0 }
 0x56e   : > { %v7252_v23 = vrot.slane %v2644_v24, %v10025_v44  ;;  %v7168_v55 = vrot.slane %v2593_v27, %v10012_v29  ;;  %9263 = vmatpush1.bf16.msra.mxu0 %v9262_v42  ;;  %v9264_v26 = vpack.c.bf16 %v3655_v57, %v3647_v51  ;;  %v722_v24 = vld [vmem:[%s9778_s29 + $0x1028] sm:$0xff]  ;;  %v3656_v19 = vld [vmem:[%s14686_s1 + $0xbd0] sm:$0xff]  ;;  %v816_v20 = vld [vmem:[%s9778_s29 + $0x1318] sm:$0xff] }
 0x56f   : > { %9357 = vmatprep.subr.bf16.mxu1 %v9356_v54  ;;  %v2525_v54 = vsel %vm973_vm0, %v722_v24, 0.0  ;;  %v863_v63 = vld [vmem:[%s9778_s29 + $0x1490] sm:$0xff]  ;;  %v770_v24 = vld [vmem:[%s9778_s29 + $0x11a8] sm:$0xff] }
 0x570   : > { %v13198_v59 = vsel %vm4560_vm12, %v7252_v23, %v13008_v61  ;;  %v13202_v34 = vsel %vm14765_vm11, %v7168_v55, %v13012_v62  ;;  %2805 = vadd.xlane.f32.xlu1 %v2804_v47  ;;  %2664 = vadd.xlane.f32.xlu0 %v2663_v37  ;;  %v3649_v61 = vld [vmem:[%s14686_s1 + $0xb98] sm:$0xff]  ;;  %v2945_v62 = vsel %vm973_vm0, %v862_v10, 0.0  ;;  %v9266_v47 = vpack.c.bf16 %v3654_v22, %v3646_v3  ;;  %v3648_v37 = vld [vmem:[%s14686_s1 + $0xb90] sm:$0xff] }
 0x571   : > { %v2785_v46 = vpop.xlane.xlu1 %2784  ;;  %v2734_v45 = vpop.xlane.xlu0 %2733  ;;  %9359 = vmatpush1.bf16.msra.mxu1 %v9358_v1  ;;  %v9360_v27 = vpack.c.bf16 %v3657_v50, %v3649_v61  ;;  %9265 = vmatprep.subr.bf16.mxu0 %v9264_v26  ;;  %v9362_v4 = vpack.c.bf16 %v3656_v19, %v3648_v37  ;;  %v2948_v57 = vsel %vm973_vm0, %v863_v63, 0.0  ;;  %v2807_v61 = vsel %vm973_vm0, %v816_v20, 0.0 }
 0x572   : > { %v7484_v25 = vrot.slane %v2785_v46, %v10012_v29  ;;  %v7400_v10 = vrot.slane %v2734_v45, %v10015_v30  ;;  %9267 = vmatpush1.bf16.msra.mxu0 %v9266_v47  ;;  %vm14767_vm11 = vcmask 589312   ;;  %v2669_v19 = vsel %vm973_vm0, %v770_v24, 0.0 }
 0x573   : > { %9361 = vmatprep.subr.bf16.mxu1 %v9360_v27  ;;  %v723_v27 = vld [vmem:[%s9778_s29 + $0x1030] sm:$0xff] }
 0x574   : > { %v13236_v53 = vsel %vm14766_vm2, %v7484_v25, %v13046_v2  ;;  %v13240_v14 = vsel %vm4546_vm10, %v7400_v10, %v13050_v6  ;;  %2946 = vadd.xlane.f32.xlu1 %v2945_v62  ;;  %2943 = vadd.xlane.f32.xlu0 %v2942_v52  ;;  %v910_v62 = vld [vmem:[%s9778_s29 + $0x1608] sm:$0xff]  ;;  %v909_v52 = vld [vmem:[%s9778_s29 + $0x1600] sm:$0xff]  ;;  %vm14768_vm2 = vmmov %vm14767_vm11 }
 0x575   : > { %v2926_v23 = vpop.xlane.xlu1 %2925  ;;  %v2875_v55 = vpop.xlane.xlu0 %2874  ;;  %9363 = vmatpush1.bf16.msra.mxu1 %v9362_v4  ;;  %v3089_v3 = vsel %vm973_vm0, %v910_v62, 0.0  ;;  %v3086_v22 = vsel %vm973_vm0, %v909_v52, 0.0  ;;  %v2528_v4 = vsel %vm973_vm0, %v723_v27, 0.0 }
 0x576   : > { %v7716_v42 = vrot.slane %v2926_v23, %v10015_v30  ;;  %v7632_v2 = vrot.slane %v2875_v55, %v9990_v7 }
 0x578   : > { %v7717_v6 = vsel %vm4546_vm10, %v7716_v42, %v13084_v28  ;;  %v7633_v1 = vsel %vm4539_vm9, %v7632_v2, %v13088_v38  ;;  %2667 = vadd.xlane.f32.xlu1 %v2666_v17  ;;  %2526 = vadd.xlane.f32.xlu0 %v2525_v54  ;;  %v864_v17 = vld [vmem:[%s9778_s29 + $0x1498] sm:$0xff]  ;;  %v817_v54 = vld [vmem:[%s9778_s29 + $0x1320] sm:$0xff] }
 0x579   : > { %v3067_v21 = vpop.xlane.xlu1 %3066  ;;  %v3016_v51 = vpop.xlane.xlu0 %3015  ;;  %v2951_v63 = vsel %vm973_vm0, %v864_v17, 0.0  ;;  %v2810_v20 = vsel %vm973_vm0, %v817_v54, 0.0 }
 0x57a   : > { %v7948_v46 = vrot.slane %v3067_v21, %v9990_v7  ;;  %v7864_v45 = vrot.slane %v3016_v51, %v9993_v8 }
 0x57c   : > { %v7949_v28 = vsel %vm4539_vm9, %v7948_v46, %v13122_v5  ;;  %v7865_v38 = vsel %vm14767_vm11, %v7864_v45, %v13126_v12  ;;  %2949 = vadd.xlane.f32.xlu1 %v2948_v57  ;;  %2808 = vadd.xlane.f32.xlu0 %v2807_v61  ;;  %v957_v57 = vld [vmem:[%s9778_s29 + $0x1780] sm:$0xff]  ;;  %v911_v61 = vld [vmem:[%s9778_s29 + $0x1610] sm:$0xff]  ;;  %vm14769_vm11 = vcmask 786112  }
 0x57d   : > { %v3208_v26 = vpop.xlane.xlu1 %3207  ;;  %v3157_v50 = vpop.xlane.xlu0 %3156  ;;  %v3230_v62 = vsel %vm973_vm0, %v957_v57, 0.0  ;;  %v3092_v52 = vsel %vm973_vm0, %v911_v61, 0.0 }
 0x57e   : > { %v8180_v25 = vrot.slane %v3208_v26, %v9993_v8  ;;  %v8096_v10 = vrot.slane %v3157_v50, %v9973_v56 }
 0x580   : > { %v8181_v5 = vsel %vm14768_vm2, %v8180_v25, %v13160_v16  ;;  %v8097_v12 = vsel %vm4525_vm7, %v8096_v10, %v13164_v11  ;;  %3090 = vadd.xlane.f32.xlu1 %v3089_v3  ;;  %3087 = vadd.xlane.f32.xlu0 %v3086_v22  ;;  %v724_v3 = vld [vmem:[%s9778_s29 + $0x1038] sm:$0xff]  ;;  %v958_v22 = vld [vmem:[%s9778_s29 + $0x1788] sm:$0xff]  ;;  %vm14770_vm2 = vmmov %vm14769_vm11 }
 0x581   : > { %v2647_v47 = vpop.xlane.xlu1 %2646  ;;  %v2596_v37 = vpop.xlane.xlu0 %2595  ;;  %v2531_v24 = vsel %vm973_vm0, %v724_v3, 0.0  ;;  %v3233_v27 = vsel %vm973_vm0, %v958_v22, 0.0 }
 0x582   : > { %v7257_v23 = vrot.slane %v2647_v47, %v10022_v43  ;;  %v7173_v55 = vrot.slane %v2596_v37, %v10025_v44 }
 0x584   : > { %v7258_v16 = vsel %vm4567_vm13, %v7257_v23, %v13198_v59  ;;  %v7174_v11 = vsel %vm4560_vm12, %v7173_v55, %v13202_v34  ;;  %2670 = vadd.xlane.f32.xlu1 %v2669_v19  ;;  %2529 = vadd.xlane.f32.xlu0 %v2528_v4  ;;  %v818_v19 = vld [vmem:[%s9778_s29 + $0x1328] sm:$0xff]  ;;  %v771_v4 = vld [vmem:[%s9778_s29 + $0x11b0] sm:$0xff] }
 0x585   : > { %v2788_v42 = vpop.xlane.xlu1 %2787  ;;  %v2737_v2 = vpop.xlane.xlu0 %2736  ;;  %v2813_v17 = vsel %vm973_vm0, %v818_v19, 0.0  ;;  %v2672_v54 = vsel %vm973_vm0, %v771_v4, 0.0 }
 0x586   : > { %v7489_v21 = vrot.slane %v2788_v42, %v10025_v44  ;;  %v7405_v51 = vrot.slane %v2737_v2, %v10012_v29 }
 0x588   : > { %v7490_v59 = vsel %vm4560_vm12, %v7489_v21, %v13236_v53  ;;  %v7406_v34 = vsel %vm14769_vm11, %v7405_v51, %v13240_v14  ;;  %2952 = vadd.xlane.f32.xlu1 %v2951_v63  ;;  %2811 = vadd.xlane.f32.xlu0 %v2810_v20  ;;  %v912_v63 = vld [vmem:[%s9778_s29 + $0x1618] sm:$0xff]  ;;  %v865_v20 = vld [vmem:[%s9778_s29 + $0x14a0] sm:$0xff]  ;;  %vm14771_vm11 = vcmask 589312  }
 0x589   : > { %v2929_v46 = vpop.xlane.xlu1 %2928  ;;  %v2878_v45 = vpop.xlane.xlu0 %2877  ;;  %v3095_v57 = vsel %vm973_vm0, %v912_v63, 0.0  ;;  %v2954_v61 = vsel %vm973_vm0, %v865_v20, 0.0 }
 0x58a   : > { %v7721_v26 = vrot.slane %v2929_v46, %v10012_v29  ;;  %v7637_v50 = vrot.slane %v2878_v45, %v10015_v30 }
 0x58c   : > { %v7722_v53 = vsel %vm14770_vm2, %v7721_v26, %v7717_v6  ;;  %v7638_v14 = vsel %vm4546_vm10, %v7637_v50, %v7633_v1  ;;  %3231 = vadd.xlane.f32.xlu1 %v3230_v62  ;;  %3093 = vadd.xlane.f32.xlu0 %v3092_v52  ;;  %v725_v62 = vld [vmem:[%s9778_s29 + $0x1040] sm:$0xff]  ;;  %v959_v52 = vld [vmem:[%s9778_s29 + $0x1790] sm:$0xff] }
 0x58d   : > { %v3070_v25 = vpop.xlane.xlu1 %3069  ;;  %v3019_v10 = vpop.xlane.xlu0 %3018  ;;  %v2534_v3 = vsel %vm973_vm0, %v725_v62, 0.0  ;;  %v3236_v22 = vsel %vm973_vm0, %v959_v52, 0.0 }
 0x58e   : > { %v7953_v47 = vrot.slane %v3070_v25, %v10015_v30  ;;  %v7869_v37 = vrot.slane %v3019_v10, %v9990_v7 }
 0x590   : > { %v7954_v6 = vsel %vm4546_vm10, %v7953_v47, %v7949_v28  ;;  %v7870_v1 = vsel %vm4539_vm9, %v7869_v37, %v7865_v38  ;;  %2532 = vadd.xlane.f32.xlu1 %v2531_v24  ;;  %3234 = vadd.xlane.f32.xlu0 %v3233_v27  ;;  %v819_v24 = vld [vmem:[%s9778_s29 + $0x1330] sm:$0xff]  ;;  %v772_v27 = vld [vmem:[%s9778_s29 + $0x11b8] sm:$0xff] }
 0x591   : > { %v3211_v23 = vpop.xlane.xlu1 %3210  ;;  %v3160_v55 = vpop.xlane.xlu0 %3159  ;;  %v2816_v19 = vsel %vm973_vm0, %v819_v24, 0.0  ;;  %v2675_v4 = vsel %vm973_vm0, %v772_v27, 0.0  ;;  %v914_v27 = vld [vmem:[%s9778_s29 + $0x1628] sm:$0xff] }
 0x592   : > { %v8185_v42 = vrot.slane %v3211_v23, %v9990_v7  ;;  %v8101_v2 = vrot.slane %v3160_v55, %v9993_v8 }
 0x594   : > { %v13315_v28 = vsel %vm4539_vm9, %v8185_v42, %v8181_v5  ;;  %v8102_v38 = vsel %vm14771_vm11, %v8101_v2, %v8097_v12  ;;  %2814 = vadd.xlane.f32.xlu1 %v2813_v17  ;;  %2673 = vadd.xlane.f32.xlu0 %v2672_v54  ;;  %v913_v17 = vld [vmem:[%s9778_s29 + $0x1620] sm:$0xff]  ;;  %vm14772_vm11 = vmmov %vm14770_vm2 }
 0x595   : > { %v2650_v21 = vpop.xlane.xlu1 %2649  ;;  %v2599_v51 = vpop.xlane.xlu0 %2598  ;;  %v3098_v63 = vsel %vm973_vm0, %v913_v17, 0.0  ;;  %v727_v17 = vld [vmem:[%s9778_s29 + $0x1050] sm:$0xff] }
 0x596   : > { %v7262_v46 = vrot.slane %v2650_v21, %v10043_v60  ;;  %v7178_v45 = vrot.slane %v2599_v51, %v10022_v43 }
 0x598   : > { %v7263_v5 = vsel %vm4574_vm14, %v7262_v46, %v7258_v16  ;;  %v13326_v12 = vsel %vm4567_vm13, %v7178_v45, %v7174_v11  ;;  %3096 = vadd.xlane.f32.xlu1 %v3095_v57  ;;  %2955 = vadd.xlane.f32.xlu0 %v2954_v61  ;;  %v726_v57 = vld [vmem:[%s9778_s29 + $0x1048] sm:$0xff] }
 0x599   : > { %v2791_v26 = vpop.xlane.xlu1 %2790  ;;  %v2740_v50 = vpop.xlane.xlu0 %2739  ;;  %v2537_v62 = vsel %vm973_vm0, %v726_v57, 0.0 }
 0x59a   : > { %v7494_v25 = vrot.slane %v2791_v26, %v10022_v43  ;;  %v7410_v10 = vrot.slane %v2740_v50, %v10025_v44  ;;  %v820_v50 = vld [vmem:[%s9778_s29 + $0x1338] sm:$0xff] }
 0x59c   : > { %v13335_v16 = vsel %vm4567_vm13, %v7494_v25, %v7490_v59  ;;  %v13338_v11 = vsel %vm4560_vm12, %v7410_v10, %v7406_v34  ;;  %2535 = vadd.xlane.f32.xlu1 %v2534_v3  ;;  %3237 = vadd.xlane.f32.xlu0 %v3236_v22  ;;  %v866_v59 = vld [vmem:[%s9778_s29 + $0x14a8] sm:$0xff]  ;;  %v773_v3 = vld [vmem:[%s9778_s29 + $0x11c0] sm:$0xff]  ;;  %v2819_v25 = vsel %vm973_vm0, %v820_v50, 0.0 }
 0x59d   : > { %v2932_v47 = vpop.xlane.xlu1 %2931  ;;  %v2881_v37 = vpop.xlane.xlu0 %2880  ;;  %v2957_v20 = vsel %vm973_vm0, %v866_v59, 0.0  ;;  %v2678_v10 = vsel %vm973_vm0, %v773_v3, 0.0  ;;  %v961_v59 = vld [vmem:[%s9778_s29 + $0x17a0] sm:$0xff] }
 0x59e   : > { %v7726_v23 = vrot.slane %v2932_v47, %v10025_v44  ;;  %v7642_v55 = vrot.slane %v2881_v37, %v10012_v29  ;;  %v867_v47 = vld [vmem:[%s9778_s29 + $0x14b0] sm:$0xff] }
 0x5a0   : > { %v13347_v54 = vsel %vm4560_vm12, %v7726_v23, %v7722_v53  ;;  %v13350_v34 = vsel %vm14770_vm2, %v7642_v55, %v7638_v14  ;;  %2817 = vadd.xlane.f32.xlu1 %v2816_v19  ;;  %2676 = vadd.xlane.f32.xlu0 %v2675_v4  ;;  %v960_v53 = vld [vmem:[%s9778_s29 + $0x1798] sm:$0xff]  ;;  %vm14773_vm2 = vcmask 1043459   ;;  %v3101_v23 = vsel %vm973_vm0, %v914_v27, 0.0 }
 0x5a1   : > { %v3073_v42 = vpop.xlane.xlu1 %3072  ;;  %v3022_v2 = vpop.xlane.xlu0 %3021  ;;  %v3239_v52 = vsel %vm973_vm0, %v960_v53, 0.0  ;;  %v2960_v55 = vsel %vm973_vm0, %v867_v47, 0.0 }
 0x5a2   : > { %v7958_v21 = vrot.slane %v3073_v42, %v10012_v29  ;;  %v7874_v51 = vrot.slane %v3022_v2, %v10015_v30  ;;  %v2540_v2 = vsel %vm973_vm0, %v727_v17, 0.0  ;;  %v775_v17 = vld [vmem:[%s9778_s29 + $0x11d0] sm:$0xff] }
 0x5a4   : > { %v13359_v61 = vsel %vm14772_vm11, %v7958_v21, %v7954_v6  ;;  %v13362_v14 = vsel %vm4546_vm10, %v7874_v51, %v7870_v1  ;;  %3099 = vadd.xlane.f32.xlu1 %v3098_v63  ;;  %2958 = vadd.xlane.f32.xlu0 %v2957_v20  ;;  %v821_v63 = vld [vmem:[%s9778_s29 + $0x1340] sm:$0xff]  ;;  %v774_v20 = vld [vmem:[%s9778_s29 + $0x11c8] sm:$0xff]  ;;  %vm14774_vm11 = vmmov %vm14773_vm2 }
 0x5a5   : > { %v13364_v46 = vpop.xlane.xlu1 %3213  ;;  %v3163_v45 = vpop.xlane.xlu0 %3162  ;;  %v2822_v57 = vsel %vm973_vm0, %v821_v63, 0.0  ;;  %v2681_v53 = vsel %vm973_vm0, %v774_v20, 0.0 }
 0x5a6   : > { %v8106_v26 = vrot.slane %v3163_v45, %v9990_v7  ;;  %v915_v45 = vld [vmem:[%s9778_s29 + $0x1630] sm:$0xff] }
 0x5a7   : > { %v3104_v50 = vsel %vm973_vm0, %v915_v45, 0.0  ;;  %v916_v45 = vld [vmem:[%s9778_s29 + $0x1638] sm:$0xff] }
 0x5a8   : > { %v13372_v6 = vsel %vm4539_vm9, %v8106_v26, %v8102_v38  ;;  %2538 = vadd.xlane.f32.xlu1 %v2537_v62  ;;  %3240 = vadd.xlane.f32.xlu0 %v3239_v52  ;;  %v868_v62 = vld [vmem:[%s9778_s29 + $0x14b8] sm:$0xff] }
 0x5a9   : > { %v2653_v1 = vpop.xlane.xlu1 %2652  ;;  %v2602_v22 = vpop.xlane.xlu0 %2601  ;;  %v2963_v3 = vsel %vm973_vm0, %v868_v62, 0.0 }
 0x5aa   : > { %v7267_v24 = vrot.slane %v2653_v1, %v10040_v15  ;;  %v728_v1 = vld [vmem:[%s9778_s29 + $0x1058] sm:$0xff] }
 0x5ab   : > { %v2543_v47 = vsel %vm973_vm0, %v728_v1, 0.0 }
 0x5ac   : > { %v7268_v37 = vsel %vm4581_vm15, %v7267_v24, %v7263_v5  ;;  %2820 = vadd.xlane.f32.xlu1 %v2819_v25  ;;  %2679 = vadd.xlane.f32.xlu0 %v2678_v10  ;;  %v962_v25 = vld [vmem:[%s9778_s29 + $0x17a8] sm:$0xff]  ;;  %v7183_v10 = vrot.slane %v2602_v22, %v10043_v60 }
 0x5ad   : > { %v8333_v38 = vsel %vm14773_vm2, %v7268_v37, %v12566_v36  ;;  %v2794_v19 = vpop.xlane.xlu1 %2793  ;;  %v13382_v4 = vpop.xlane.xlu0 %2742  ;;  %v3242_v36 = vsel %vm973_vm0, %v961_v59, 0.0  ;;  %v3245_v37 = vsel %vm973_vm0, %v962_v25, 0.0  ;;  %vm14775_vm2 = vcmask 1044484  }
 0x5ae   : > { %v7184_v59 = vsel %vm4574_vm14, %v7183_v10, %v13326_v12  ;;  %v3107_v25 = vsel %vm973_vm0, %v916_v45, 0.0 }
 0x5b0   : > { %3102 = vadd.xlane.f32.xlu1 %v3101_v23  ;;  %2961 = vadd.xlane.f32.xlu0 %v2960_v55  ;;  %v822_v55 = vld [vmem:[%s9778_s29 + $0x1348] sm:$0xff] }
 0x5b1   : > { %v13388_v5 = vpop.xlane.xlu1 %2934  ;;  %v13390_v42 = vpop.xlane.xlu0 %2883 }
 0x5b2   : > { %v7731_v45 = vrot.slane %v13388_v5, %v10022_v43 }
 0x5b4   : > { %2541 = vadd.xlane.f32.xlu1 %v2540_v2  ;;  %3243 = vadd.xlane.f32.xlu0 %v3242_v36  ;;  %v7499_v2 = vrot.slane %v2794_v19, %v10043_v60  ;;  %v869_v19 = vld [vmem:[%s9778_s29 + $0x14c0] sm:$0xff] }
 0x5b5   : > { %v13396_v21 = vpop.xlane.xlu1 %3075  ;;  %v13398_v51 = vpop.xlane.xlu0 %3024  ;;  %v2966_v10 = vsel %vm973_vm0, %v869_v19, 0.0  ;;  %v870_v19 = vld [vmem:[%s9778_s29 + $0x14c8] sm:$0xff] }
 0x5b6   : > { %v7500_v62 = vsel %vm4574_vm14, %v7499_v2, %v13335_v16 }
 0x5b8   : > { %2823 = vadd.xlane.f32.xlu1 %v2822_v57  ;;  %2682 = vadd.xlane.f32.xlu0 %v2681_v53  ;;  %v2825_v57 = vsel %vm973_vm0, %v822_v55, 0.0  ;;  %v2684_v53 = vsel %vm973_vm0, %v775_v17, 0.0  ;;  %v7415_v55 = vrot.slane %v13382_v4, %v10022_v43  ;;  %v823_v17 = vld [vmem:[%s9778_s29 + $0x1350] sm:$0xff] }
 0x5b9   : > { %v13404_v52 = vpop.xlane.xlu1 %3216  ;;  %v13406_v26 = vpop.xlane.xlu0 %3165 }
 0x5bc   : > { %3105 = vadd.xlane.f32.xlu1 %v3104_v50  ;;  %2964 = vadd.xlane.f32.xlu0 %v2963_v3 }
 0x5bd   : > { %v2746_v24 = vpop.xlane.xlu1 %2745  ;;  %v2605_v27 = vpop.xlane.xlu0 %2604 }
 0x5be   : > { %v7188_v23 = vrot.slane %v2605_v27, %v10040_v15  ;;  %v729_v27 = vld [vmem:[%s9778_s29 + $0x1060] sm:$0xff]  ;;  %v7420_v2 = vrot.slane %v2746_v24, %v10043_v60 }
 0x5bf   : > { %v917_v24 = vld [vmem:[%s9778_s29 + $0x1640] sm:$0xff] }
 0x5c0   : > { %v7189_v22 = vsel %vm4581_vm15, %v7188_v23, %v7184_v59  ;;  %2544 = vadd.xlane.f32.xlu1 %v2543_v47  ;;  %3246 = vadd.xlane.f32.xlu0 %v3245_v37  ;;  %v963_v47 = vld [vmem:[%s9778_s29 + $0x17b0] sm:$0xff]  ;;  %v2546_v23 = vsel %vm973_vm0, %v729_v27, 0.0  ;;  %v776_v59 = vld [vmem:[%s9778_s29 + $0x11d8] sm:$0xff]  ;;  %v3110_v5 = vsel %vm973_vm0, %v917_v24, 0.0 }
 0x5c1   : > { %v8326_v36 = vsel %vm14774_vm11, %v7189_v22, %v12499_v49  ;;  %v13424_v63 = vpop.xlane.xlu1 %2886  ;;  %v2797_v20 = vpop.xlane.xlu0 %2796  ;;  %vm14776_vm11 = vmmov %vm14775_vm2 }
 0x5c2   : > { %v7504_v12 = vrot.slane %v2797_v20, %v10040_v15 }
 0x5c4   : > { %v7505_v50 = vsel %vm4581_vm15, %v7504_v12, %v7500_v62  ;;  %2826 = vadd.xlane.f32.xlu1 %v2825_v57  ;;  %2685 = vadd.xlane.f32.xlu0 %v2684_v53  ;;  %v2828_v57 = vsel %vm973_vm0, %v823_v17, 0.0  ;;  %v2687_v53 = vsel %vm973_vm0, %v776_v59, 0.0  ;;  %v7416_v12 = vsel %vm4567_vm13, %v7415_v55, %v13338_v11  ;;  %v964_v55 = vld [vmem:[%s9778_s29 + $0x17b8] sm:$0xff] }
 0x5c5   : > { %v8334_v49 = vsel %vm14775_vm2, %v7505_v50, %v8333_v38  ;;  %v13435_v3 = vpop.xlane.xlu1 %3027  ;;  %v2938_v1 = vpop.xlane.xlu0 %2937  ;;  %v3248_v38 = vsel %vm973_vm0, %v963_v47, 0.0  ;;  %v7421_v62 = vsel %vm4574_vm14, %v7420_v2, %v7416_v12  ;;  %v2969_v47 = vsel %vm973_vm0, %v870_v19, 0.0  ;;  %v777_v12 = vld [vmem:[%s9778_s29 + $0x11e0] sm:$0xff] }
 0x5c6   : > { %v7736_v50 = vrot.slane %v2938_v1, %v10043_v60  ;;  %v730_v1 = vld [vmem:[%s9778_s29 + $0x1068] sm:$0xff]  ;;  %vm14777_vm2 = vcmask 1045509  }
 0x5c8   : > { %3108 = vadd.xlane.f32.xlu1 %v3107_v25  ;;  %2967 = vadd.xlane.f32.xlu0 %v2966_v10 }
 0x5c9   : > { %v13441_v16 = vpop.xlane.xlu1 %3168  ;;  %v13443_v37 = vpop.xlane.xlu0 %3078 }
 0x5cc   : > { %2547 = vadd.xlane.f32.xlu1 %v2546_v23  ;;  %3249 = vadd.xlane.f32.xlu0 %v3248_v38  ;;  %v7732_v23 = vsel %vm4567_vm13, %v7731_v45, %v13347_v54  ;;  %v7647_v45 = vrot.slane %v13390_v42, %v10025_v44 }
 0x5cd   : > { %v2749_v22 = vpop.xlane.xlu1 %2748  ;;  %v13452_v20 = vpop.xlane.xlu0 %3219  ;;  %v7737_v17 = vsel %vm4574_vm14, %v7736_v50, %v7732_v23  ;;  %v7652_v50 = vrot.slane %v13424_v63, %v10022_v43  ;;  %v731_v63 = vld [vmem:[%s9778_s29 + $0x1070] sm:$0xff] }
 0x5ce   : > { %v7425_v4 = vrot.slane %v2749_v22, %v10040_v15  ;;  %v2549_v22 = vsel %vm973_vm0, %v730_v1, 0.0  ;;  %v7648_v42 = vsel %vm4560_vm12, %v7647_v45, %v13350_v34 }
 0x5d0   : > { %v7426_v25 = vsel %vm4581_vm15, %v7425_v4, %v7421_v62  ;;  %2829 = vadd.xlane.f32.xlu1 %v2828_v57  ;;  %2688 = vadd.xlane.f32.xlu0 %v2687_v53  ;;  %v3251_v57 = vsel %vm973_vm0, %v964_v55, 0.0  ;;  %v824_v53 = vld [vmem:[%s9778_s29 + $0x1358] sm:$0xff]  ;;  %v2690_v62 = vsel %vm973_vm0, %v777_v12, 0.0  ;;  %v7653_v55 = vsel %vm4567_vm13, %v7652_v50, %v7648_v42 }
 0x5d1   : > { %v8327_v10 = vsel %vm14776_vm11, %v7426_v25, %v8326_v36  ;;  %v2941_v11 = vpop.xlane.xlu1 %2940  ;;  %v2890_v27 = vpop.xlane.xlu0 %2889  ;;  %v2831_v19 = vsel %vm973_vm0, %v824_v53, 0.0  ;;  %v871_v25 = vld [vmem:[%s9778_s29 + $0x14d0] sm:$0xff]  ;;  %v2552_v53 = vsel %vm973_vm0, %v731_v63, 0.0  ;;  %v7884_v12 = vrot.slane %v13435_v3, %v10025_v44  ;;  %vm14778_vm11 = vmmov %vm14777_vm2 }
 0x5d2   : > { %v7741_v38 = vrot.slane %v2941_v11, %v10040_v15  ;;  %v7657_v11 = vrot.slane %v2890_v27, %v10043_v60  ;;  %v2972_v1 = vsel %vm973_vm0, %v871_v25, 0.0  ;;  %v7968_v27 = vrot.slane %v13443_v37, %v10022_v43 }
 0x5d3   : > { %v8190_v3 = vrot.slane %v13364_v46, %v10015_v30  ;;  %v8200_v46 = vrot.slane %v13452_v20, %v10025_v44  ;;  %v8111_v20 = vrot.slane %v13406_v26, %v10015_v30 }
 0x5d4   : > { %v7742_v59 = vsel %vm4581_vm15, %v7741_v38, %v7737_v17  ;;  %3111 = vadd.xlane.f32.xlu1 %v3110_v5  ;;  %2970 = vadd.xlane.f32.xlu0 %v2969_v47  ;;  %v7963_v5 = vrot.slane %v13396_v21, %v10025_v44  ;;  %v7658_v34 = vsel %vm4574_vm14, %v7657_v11, %v7653_v55 }
 0x5d5   : > { %v3082_v36 = vpop.xlane.xlu1 %3081  ;;  %v13476_v2 = vpop.xlane.xlu0 %3030  ;;  %v8335_v54 = vsel %vm14777_vm2, %v7742_v59, %v8334_v49  ;;  %v918_v49 = vld [vmem:[%s9778_s29 + $0x1648] sm:$0xff]  ;;  %v965_v59 = vld [vmem:[%s9778_s29 + $0x17c0] sm:$0xff]  ;;  %vm14779_vm2 = vcmask 786112  }
 0x5d6   : > { %v3113_v38 = vsel %vm973_vm0, %v918_v49, 0.0  ;;  %v7973_v21 = vrot.slane %v3082_v36, %v10043_v60  ;;  %v7964_v37 = vsel %vm4560_vm12, %v7963_v5, %v13359_v61  ;;  %v3254_v36 = vsel %vm973_vm0, %v965_v59, 0.0  ;;  %v778_v61 = vld [vmem:[%s9778_s29 + $0x11e8] sm:$0xff]  ;;  %v872_v59 = vld [vmem:[%s9778_s29 + $0x14d8] sm:$0xff] }
 0x5d7   : > { %v7969_v50 = vsel %vm4567_vm13, %v7968_v27, %v7964_v37  ;;  %v7889_v49 = vrot.slane %v13476_v2, %v10022_v43  ;;  %v2693_v63 = vsel %vm973_vm0, %v778_v61, 0.0  ;;  %v8112_v61 = vsel %vm4546_vm10, %v8111_v20, %v13372_v6  ;;  %v3291_v6 = vld [vmem:[%s14686_s1 + $0x68] sm:$0xff]  ;;  %v3290_v20 = vld [vmem:[%s14686_s1 + $0x60] sm:$0xff] }
 0x5d8   : > { %2550 = vadd.xlane.f32.xlu1 %v2549_v22  ;;  %3252 = vadd.xlane.f32.xlu0 %v3251_v57  ;;  %v7879_v22 = vrot.slane %v13398_v51, %v10012_v29  ;;  %v7974_v11 = vsel %vm4574_vm14, %v7973_v21, %v7969_v50 }
 0x5d9   : > { %v13485_v4 = vpop.xlane.xlu1 %3222  ;;  %v13487_v24 = vpop.xlane.xlu0 %3171 }
 0x5da   : > { %v7880_v5 = vsel %vm14779_vm2, %v7879_v22, %v13362_v14  ;;  %v919_v14 = vld [vmem:[%s9778_s29 + $0x1650] sm:$0xff]  ;;  %v8205_v27 = vrot.slane %v13485_v4, %v10022_v43  ;;  %v8116_v4 = vrot.slane %v13441_v16, %v10012_v29  ;;  %v8121_v26 = vrot.slane %v13487_v24, %v10025_v44 }
 0x5dc   : > { %2832 = vadd.xlane.f32.xlu1 %v2831_v19  ;;  %2691 = vadd.xlane.f32.xlu0 %v2690_v62  ;;  %v825_v62 = vld [vmem:[%s9778_s29 + $0x1360] sm:$0xff] }
 0x5dd   : > { %v3034_v47 = vpop.xlane.xlu1 %3033  ;;  %v2893_v23 = vpop.xlane.xlu0 %2892 }
 0x5de   : > { %v7662_v17 = vrot.slane %v2893_v23, %v10040_v15  ;;  %v7894_v42 = vrot.slane %v3034_v47, %v10043_v60  ;;  %v2834_v23 = vsel %vm973_vm0, %v825_v62, 0.0 }
 0x5e0   : > { %v7663_v57 = vsel %vm4581_vm15, %v7662_v17, %v7658_v34  ;;  %3114 = vadd.xlane.f32.xlu1 %v3113_v38  ;;  %2973 = vadd.xlane.f32.xlu0 %v2972_v1  ;;  %v7885_v38 = vsel %vm4560_vm12, %v7884_v12, %v7880_v5  ;;  %v8191_v34 = vsel %vm4546_vm10, %v8190_v3, %v13315_v28  ;;  %v3285_v5 = vld [vmem:[%s14686_s1 + $0x38] sm:$0xff] }
 0x5e1   : > { %v13518_v45 = vpop.xlane.xlu1 %3174  ;;  %v3085_v19 = vpop.xlane.xlu0 %3084  ;;  %v8328_v51 = vsel %vm14778_vm11, %v7663_v57, %v8327_v10  ;;  %v8195_v10 = vrot.slane %v13404_v52, %v10012_v29  ;;  %vm14780_vm11 = vcmask 1046534   ;;  %v7890_v52 = vsel %vm4567_vm13, %v7889_v49, %v7885_v38 }
 0x5e2   : > { %v7978_v25 = vrot.slane %v3085_v19, %v10040_v15  ;;  %v7895_v21 = vsel %vm4574_vm14, %v7894_v42, %v7890_v52  ;;  %v2975_v19 = vsel %vm973_vm0, %v872_v59, 0.0  ;;  %v8126_v50 = vrot.slane %v13518_v45, %v10022_v43  ;;  %v3283_v45 = vld [vmem:[%s14686_s1 + $0x28] sm:$0xff]  ;;  %v3282_v59 = vld [vmem:[%s14686_s1 + $0x20] sm:$0xff] }
 0x5e3   : > { %v826_v52 = vld [vmem:[%s9778_s29 + $0x1368] sm:$0xff] }
 0x5e4   : > { %v7979_v2 = vsel %vm4581_vm15, %v7978_v25, %v7974_v11  ;;  %2553 = vadd.xlane.f32.xlu1 %v2552_v53  ;;  %3255 = vadd.xlane.f32.xlu0 %v3254_v36  ;;  %v3116_v53 = vsel %vm973_vm0, %v919_v14, 0.0  ;;  %v732_v36 = vld [vmem:[%s9778_s29 + $0x1078] sm:$0xff]  ;;  %v966_v25 = vld [vmem:[%s9778_s29 + $0x17c8] sm:$0xff]  ;;  %v8117_v11 = vsel %vm14779_vm2, %v8116_v4, %v8112_v61  ;;  %v9366_v61 = vpack.c.bf16 %v3290_v20, %v3282_v59 }
 0x5e5   : > { %v3037_v1 = vpop.xlane.xlu1 %3036  ;;  %v3226_v47 = vpop.xlane.xlu0 %3225  ;;  %v8336_v55 = vsel %vm14780_vm11, %v7979_v2, %v8335_v54  ;;  %v8196_v54 = vsel %vm14779_vm2, %v8195_v10, %v8191_v34  ;;  %v8122_v10 = vsel %vm4560_vm12, %v8121_v26, %v8117_v11  ;;  %v920_v26 = vld [vmem:[%s9778_s29 + $0x1658] sm:$0xff] }
 0x5e6   : > { %v7899_v17 = vrot.slane %v3037_v1, %v10040_v15  ;;  %v8210_v22 = vrot.slane %v3226_v47, %v10043_v60  ;;  %v8201_v28 = vsel %vm4560_vm12, %v8200_v46, %v8196_v54  ;;  %v3257_v46 = vsel %vm973_vm0, %v966_v25, 0.0  ;;  %v3293_v47 = vld [vmem:[%s14686_s1 + $0x78] sm:$0xff] }
 0x5e7   : > { %v8206_v16 = vsel %vm4567_vm13, %v8205_v27, %v8201_v28  ;;  %v9364_v1 = vpack.c.bf16 %v3291_v6, %v3283_v45  ;;  %v779_v27 = vld [vmem:[%s9778_s29 + $0x11f0] sm:$0xff]  ;;  %v9698_v25 = vmov 0.0  }
 0x5e8   : > { %v7900_v57 = vsel %vm4581_vm15, %v7899_v17, %v7895_v21  ;;  %2835 = vadd.xlane.f32.xlu1 %v2834_v23  ;;  %2694 = vadd.xlane.f32.xlu0 %v2693_v63  ;;  %v8211_v24 = vsel %vm4574_vm14, %v8210_v22, %v8206_v16  ;;  %v8127_v63 = vsel %vm4567_vm13, %v8126_v50, %v8122_v10  ;;  %v3284_v21 = vld [vmem:[%s14686_s1 + $0x30] sm:$0xff]  ;;  %v2696_v28 = vsel %vm973_vm0, %v779_v27, 0.0  ;;  %v3301_v50 = vld [vmem:[%s14686_s1 + $0xb8] sm:$0xff] }
 0x5e9   : > { %v3229_v37 = vpop.xlane.xlu1 %3228  ;;  %v3178_v12 = vpop.xlane.xlu0 %3177  ;;  %v8329_v62 = vsel %vm14780_vm11, %v7900_v57, %v8328_v51  ;;  %v2555_v51 = vsel %vm973_vm0, %v732_v36, 0.0  ;;  %9365 = vmatprep.subr.bf16.mxu0 %v9364_v1  ;;  %v3292_v22 = vld [vmem:[%s14686_s1 + $0x70] sm:$0xff]  ;;  %v3317_v27 = vld [vmem:[%s14686_s1 + $0x138] sm:$0xff]  ;;  %vm14781_vm11 = vcmask 195712  }
 0x5ea   : > { %v8215_v49 = vrot.slane %v3229_v37, %v10040_v15  ;;  %v8131_v3 = vrot.slane %v3178_v12, %v10043_v60  ;;  %v873_v37 = vld [vmem:[%s9778_s29 + $0x14e0] sm:$0xff]  ;;  %v3299_v12 = vld [vmem:[%s14686_s1 + $0xa8] sm:$0xff]  ;;  %v3300_v45 = vld [vmem:[%s14686_s1 + $0xb0] sm:$0xff] }
 0x5eb   : > { %v3308_v6 = vld [vmem:[%s14686_s1 + $0xf0] sm:$0xff]  ;;  %vm14782_vm2 = vmmov %vm14781_vm11 }
 0x5ec   : > { %v8216_v42 = vsel %vm4581_vm15, %v8215_v49, %v8211_v24  ;;  %3117 = vadd.xlane.f32.xlu1 %v3116_v53  ;;  %2976 = vadd.xlane.f32.xlu0 %v2975_v19  ;;  %v8132_v17 = vsel %vm4574_vm14, %v8131_v3, %v8127_v63  ;;  %v2837_v53 = vsel %vm973_vm0, %v826_v52, 0.0  ;;  %v3309_v49 = vld [vmem:[%s14686_s1 + $0xf8] sm:$0xff]  ;;  %v9462_v24 = vpack.c.bf16 %v3292_v22, %v3284_v21  ;;  %v3298_v3 = vld [vmem:[%s14686_s1 + $0xa0] sm:$0xff]  ;;  %v3315_v63 = vld [vmem:[%s14686_s1 + $0x128] sm:$0xff] }
 0x5ed   : > { %v2656_v2 = vpop.xlane.xlu1 %2655  ;;  %v3181_v23 = vpop.xlane.xlu0 %3180  ;;  %v13589_v38 = vsel %vm8308_vm8, %v8216_v42, %v8336_v55  ;;  %v9460_v55 = vpack.c.bf16 %v3293_v47, %v3285_v5  ;;  %v9464_v47 = vpack.c.bf16 %v3309_v49, %v3301_v50  ;;  %v3323_v52 = vld [vmem:[%s14686_s1 + $0x168] sm:$0xff]  ;;  %v9466_v59 = vpack.c.bf16 %v3308_v6, %v3300_v45  ;;  %v3322_v21 = vld [vmem:[%s14686_s1 + $0x160] sm:$0xff]  ;;  %v3316_v22 = vld [vmem:[%s14686_s1 + $0x130] sm:$0xff] }
 0x5ee   : > { %v8136_v14 = vrot.slane %v3181_v23, %v10040_v15  ;;  %8421 = vmatprep.mubr.f32.mxu0 %v13589_v38  ;;  %8575 = vmatprep.mubr.f32.mxu1 %v13589_v38  ;;  %v7272_v19 = vrot.slane %v2656_v2, %v9940_v31  ;;  %v2978_v2 = vsel %vm973_vm0, %v873_v37, 0.0  ;;  %v780_v23 = vld [vmem:[%s9778_s29 + $0x11f8] sm:$0xff]  ;;  %v874_v37 = vld [vmem:[%s9778_s29 + $0x14e8] sm:$0xff]  ;;  %v3330_v45 = vld [vmem:[%s14686_s1 + $0x1a0] sm:$0xff] }
 0x5ef   : > { %9461 = vmatprep.subr.bf16.mxu1 %v9460_v55  ;;  %v3325_v55 = vld [vmem:[%s14686_s1 + $0x178] sm:$0xff] }
 0x5f0   : > { %v8137_v34 = vsel %vm4581_vm15, %v8136_v14, %v8132_v17  ;;  %2556 = vadd.xlane.f32.xlu1 %v2555_v51  ;;  %3258 = vadd.xlane.f32.xlu0 %v3257_v46  ;;  %v3306_v51 = vld [vmem:[%s14686_s1 + $0xe0] sm:$0xff]  ;;  %v967_v46 = vld [vmem:[%s9778_s29 + $0x17d0] sm:$0xff] }
 0x5f1   : > { %v2521_v54 = vpop.xlane.xlu1 %2520  ;;  %v2659_v4 = vpop.xlane.xlu0 %2658  ;;  %v13616_v57 = vsel %vm8308_vm8, %v8137_v34, %v8329_v62  ;;  %v3307_v62 = vld [vmem:[%s14686_s1 + $0xe8] sm:$0xff]  ;;  %v9370_v17 = vpack.c.bf16 %v3306_v51, %v3298_v3  ;;  %v3314_v34 = vld [vmem:[%s14686_s1 + $0x120] sm:$0xff]  ;;  %v3341_v3 = vld [vmem:[%s14686_s1 + $0x1f8] sm:$0xff] }
 0x5f2   : > { %v7049_v36 = vrot.slane %v2521_v54, %v9943_v32  ;;  %v7276_v16 = vrot.slane %v2659_v4, %v9946_v33  ;;  %8422 = vmatmul.mubr.f32.gmra.mrb[2].mxu0 %v13616_v57  ;;  %8576 = vmatmul.mubr.f32.gmra.mrb[2].mxu1 %v13616_v57  ;;  %v9368_v1 = vpack.c.bf16 %v3307_v62, %v3299_v12  ;;  %v3324_v54 = vld [vmem:[%s14686_s1 + $0x170] sm:$0xff] }
 0x5f3   : > { %8492 = vmatprep.mubr.f32.mxu0 %v9698_v25  ;;  %8646 = vmatprep.mubr.f32.mxu1 %v9698_v25  ;;  %v827_v12 = vld [vmem:[%s9778_s29 + $0x1370] sm:$0xff]  ;;  %v9470_v51 = vpack.c.bf16 %v3324_v54, %v3316_v22 }
 0x5f4   : > { %v7050_v11 = vsel %vm4497_vm3, %v7049_v36, %v12575_v58  ;;  %v7277_v42 = vsel %vm4483_vm1, %v7276_v16, %v7272_v19  ;;  %2838 = vadd.xlane.f32.xlu1 %v2837_v53  ;;  %2697 = vadd.xlane.f32.xlu0 %v2696_v28  ;;  %v3119_v58 = vsel %vm973_vm0, %v920_v26, 0.0  ;;  %v2699_v28 = vsel %vm973_vm0, %v780_v23, 0.0  ;;  %v3331_v16 = vld [vmem:[%s14686_s1 + $0x1a8] sm:$0xff] }
 0x5f5   : > { %v2800_v5 = vpop.xlane.xlu1 %2799  ;;  %v2662_v10 = vpop.xlane.xlu0 %2661  ;;  %v3260_v26 = vsel %vm973_vm0, %v967_v46, 0.0  ;;  %v9372_v19 = vpack.c.bf16 %v3323_v52, %v3315_v63  ;;  %v9468_v36 = vpack.c.bf16 %v3325_v55, %v3317_v27  ;;  %v921_v63 = vld [vmem:[%s9778_s29 + $0x1660] sm:$0xff]  ;;  %v3347_v27 = vld [vmem:[%s14686_s1 + $0x228] sm:$0xff] }
 0x5f6   : > { %v7281_v14 = vrot.slane %v2662_v10, %v9950_v35  ;;  %8493 = vmatmul.mubr.f32.vlgmr.msra.gmra.mrb[0].mxu0 %v12036_v9  ;;  %8647 = vmatmul.mubr.f32.vlgmr.msra.gmra.mrb[0].mxu1 %v12036_v9  ;;  %v7509_v62 = vrot.slane %v2800_v5, %v9940_v31  ;;  %v3338_v10 = vld [vmem:[%s14686_s1 + $0x1e0] sm:$0xff] }
 0x5f7   : > { %9367 = vmatpush1.bf16.msra.mxu0 %v9366_v61  ;;  %9463 = vmatpush1.bf16.msra.mxu1 %v9462_v24  ;;  %v3339_v61 = vld [vmem:[%s14686_s1 + $0x1e8] sm:$0xff]  ;;  %v3333_v24 = vld [vmem:[%s14686_s1 + $0x1b8] sm:$0xff]  ;;  %v9378_v22 = vpack.c.bf16 %v3338_v10, %v3330_v45 }
 0x5f8   : > { %v7282_v20 = vsel %vm14781_vm11, %v7281_v14, %v7277_v42  ;;  %3120 = vadd.xlane.f32.xlu1 %v3119_v58  ;;  %2979 = vadd.xlane.f32.xlu0 %v2978_v2  ;;  %v9374_v42 = vpack.c.bf16 %v3322_v21, %v3314_v34  ;;  %v3332_v58 = vld [vmem:[%s14686_s1 + $0x1b0] sm:$0xff]  ;;  %v9376_v14 = vpack.c.bf16 %v3339_v61, %v3331_v16  ;;  %v3349_v34 = vld [vmem:[%s14686_s1 + $0x238] sm:$0xff]  ;;  %vm14783_vm11 = vmmov %vm14782_vm2 }
 0x5f9   : > { %v2524_v4 = vpop.xlane.xlu1 %2523  ;;  %v2803_v53 = vpop.xlane.xlu0 %2802  ;;  %9369 = vmatprep.subr.bf16.mxu0 %v9368_v1  ;;  %9465 = vmatprep.subr.bf16.mxu1 %v9464_v47  ;;  %v3340_v2 = vld [vmem:[%s14686_s1 + $0x1f0] sm:$0xff]  ;;  %v2840_v1 = vsel %vm973_vm0, %v827_v12, 0.0  ;;  %v968_v47 = vld [vmem:[%s9778_s29 + $0x17d8] sm:$0xff]  ;;  %v9472_v52 = vpack.c.bf16 %v3341_v3, %v3333_v24  ;;  %v3363_v24 = vld [vmem:[%s14686_s1 + $0x2a8] sm:$0xff] }
 0x5fa   : > { %v7054_v50 = vrot.slane %v2524_v4, %v9958_v41  ;;  %v7513_v49 = vrot.slane %v2803_v53, %v9946_v33  ;;  %8498 = vmatprep.mubr.f32.mxu0 %v9698_v25  ;;  %v3357_v21 = vld [vmem:[%s14686_s1 + $0x278] sm:$0xff]  ;;  %8652 = vmatprep.mubr.f32.mxu1 %v9698_v25  ;;  %v9474_v54 = vpack.c.bf16 %v3340_v2, %v3332_v58  ;;  %v3346_v4 = vld [vmem:[%s14686_s1 + $0x220] sm:$0xff]  ;;  %v3356_v12 = vld [vmem:[%s14686_s1 + $0x270] sm:$0xff]  ;;  %v3263_v16 = vsel %vm973_vm0, %v968_v47, 0.0 }
 0x5fb   : > { %9371 = vmatpush1.bf16.msra.mxu0 %v9370_v17  ;;  %9467 = vmatpush1.bf16.msra.mxu1 %v9466_v59  ;;  %v3355_v59 = vld [vmem:[%s14686_s1 + $0x268] sm:$0xff]  ;;  %v9476_v61 = vpack.c.bf16 %v3357_v21, %v3349_v34  ;;  %v3365_v45 = vld [vmem:[%s14686_s1 + $0x2b8] sm:$0xff]  ;;  %v3362_v2 = vld [vmem:[%s14686_s1 + $0x2a0] sm:$0xff] }
 0x5fc   : > { %v13712_v6 = vsel %vm4504_vm4, %v7054_v50, %v7050_v11  ;;  %v7514_v5 = vsel %vm4483_vm1, %v7513_v49, %v7509_v62  ;;  %2700 = vadd.xlane.f32.xlu1 %v2699_v28  ;;  %3261 = vadd.xlane.f32.xlu0 %v3260_v26  ;;  %v2981_v11 = vsel %vm973_vm0, %v874_v37, 0.0  ;;  %v3354_v26 = vld [vmem:[%s14686_s1 + $0x260] sm:$0xff]  ;;  %v3348_v37 = vld [vmem:[%s14686_s1 + $0x230] sm:$0xff]  ;;  %v828_v50 = vld [vmem:[%s9778_s29 + $0x1378] sm:$0xff]  ;;  %v9380_v49 = vpack.c.bf16 %v3355_v59, %v3347_v27 }
 0x5fd   : > { %v2806_v23 = vpop.xlane.xlu1 %2805  ;;  %v2665_v46 = vpop.xlane.xlu0 %2664  ;;  %9373 = vmatprep.subr.bf16.mxu0 %v9372_v19  ;;  %9469 = vmatprep.subr.bf16.mxu1 %v9468_v36  ;;  %v875_v62 = vld [vmem:[%s9778_s29 + $0x14f0] sm:$0xff]  ;;  %v9382_v10 = vpack.c.bf16 %v3354_v26, %v3346_v4  ;;  %v9478_v58 = vpack.c.bf16 %v3356_v12, %v3348_v37  ;;  %v969_v27 = vld [vmem:[%s9778_s29 + $0x17e0] sm:$0xff]  ;;  %v3379_v34 = vld [vmem:[%s14686_s1 + $0x328] sm:$0xff] }
 0x5fe   : > { %v7518_v55 = vrot.slane %v2806_v23, %v9950_v35  ;;  %v7286_v17 = vrot.slane %v2665_v46, %v9943_v32  ;;  %v3370_v46 = vld [vmem:[%s14686_s1 + $0x2e0] sm:$0xff]  ;;  %v3381_v4 = vld [vmem:[%s14686_s1 + $0x338] sm:$0xff] }
 0x5ff   : > { %9375 = vmatpush1.bf16.msra.mxu0 %v9374_v42  ;;  %9471 = vmatpush1.bf16.msra.mxu1 %v9470_v51  ;;  %v3371_v51 = vld [vmem:[%s14686_s1 + $0x2e8] sm:$0xff]  ;;  %v3389_v26 = vld [vmem:[%s14686_s1 + $0x378] sm:$0xff]  ;;  %v9386_v37 = vpack.c.bf16 %v3370_v46, %v3362_v2 }
 0x600   : > { %v13747_v53 = vsel %vm14782_vm2, %v7518_v55, %v7514_v5  ;;  %v7287_v28 = vsel %vm4497_vm3, %v7286_v17, %v7282_v20  ;;  %2982 = vadd.xlane.f32.xlu1 %v2981_v11  ;;  %2841 = vadd.xlane.f32.xlu0 %v2840_v1  ;;  %v3122_v20 = vsel %vm973_vm0, %v921_v63, 0.0  ;;  %v3373_v5 = vld [vmem:[%s14686_s1 + $0x2f8] sm:$0xff]  ;;  %v3364_v11 = vld [vmem:[%s14686_s1 + $0x2b0] sm:$0xff]  ;;  %v922_v55 = vld [vmem:[%s9778_s29 + $0x1668] sm:$0xff]  ;;  %v9384_v17 = vpack.c.bf16 %v3371_v51, %v3363_v24 }
 0x601   : > { %v2947_v19 = vpop.xlane.xlu1 %2946  ;;  %v2944_v36 = vpop.xlane.xlu0 %2943  ;;  %9377 = vmatprep.subr.bf16.mxu0 %v9376_v14  ;;  %9473 = vmatprep.subr.bf16.mxu1 %v9472_v52  ;;  %v3372_v1 = vld [vmem:[%s14686_s1 + $0x2f0] sm:$0xff]  ;;  %v2984_v14 = vsel %vm973_vm0, %v875_v62, 0.0  ;;  %v2843_v52 = vsel %vm973_vm0, %v828_v50, 0.0  ;;  %v9480_v59 = vpack.c.bf16 %v3373_v5, %v3365_v45  ;;  %v9484_v51 = vpack.c.bf16 %v3389_v26, %v3381_v4  ;;  %v3395_v45 = vld [vmem:[%s14686_s1 + $0x3a8] sm:$0xff]  ;;  %v3397_v2 = vld [vmem:[%s14686_s1 + $0x3b8] sm:$0xff] }
 0x602   : > { %v7750_v3 = vrot.slane %v2947_v19, %v9946_v33  ;;  %v7746_v42 = vrot.slane %v2944_v36, %v9940_v31  ;;  %v9482_v12 = vpack.c.bf16 %v3372_v1, %v3364_v11  ;;  %v3378_v19 = vld [vmem:[%s14686_s1 + $0x320] sm:$0xff]  ;;  %v3380_v62 = vld [vmem:[%s14686_s1 + $0x330] sm:$0xff]  ;;  %v3405_v46 = vld [vmem:[%s14686_s1 + $0x3f8] sm:$0xff] }
 0x603   : > { %9379 = vmatpush1.bf16.msra.mxu0 %v9378_v22  ;;  %9475 = vmatpush1.bf16.msra.mxu1 %v9474_v54  ;;  %v3387_v54 = vld [vmem:[%s14686_s1 + $0x368] sm:$0xff]  ;;  %v3388_v50 = vld [vmem:[%s14686_s1 + $0x370] sm:$0xff] }
 0x604   : > { %v7751_v23 = vsel %vm4483_vm1, %v7750_v3, %v7746_v42  ;;  %3264 = vadd.xlane.f32.xlu1 %v3263_v16  ;;  %3123 = vadd.xlane.f32.xlu0 %v3122_v20  ;;  %v3386_v20 = vld [vmem:[%s14686_s1 + $0x360] sm:$0xff]  ;;  %v923_v24 = vld [vmem:[%s9778_s29 + $0x1670] sm:$0xff]  ;;  %v876_v3 = vld [vmem:[%s9778_s29 + $0x14f8] sm:$0xff]  ;;  %v9388_v42 = vpack.c.bf16 %v3387_v54, %v3379_v34  ;;  %v9486_v1 = vpack.c.bf16 %v3388_v50, %v3380_v62 }
 0x605   : > { %v2668_v47 = vpop.xlane.xlu1 %2667  ;;  %v2527_v63 = vpop.xlane.xlu0 %2526  ;;  %9381 = vmatprep.subr.bf16.mxu0 %v9380_v49  ;;  %9477 = vmatprep.subr.bf16.mxu1 %v9476_v61  ;;  %v3266_v61 = vsel %vm973_vm0, %v969_v27, 0.0  ;;  %v9390_v11 = vpack.c.bf16 %v3386_v20, %v3378_v19  ;;  %v3396_v27 = vld [vmem:[%s14686_s1 + $0x3b0] sm:$0xff]  ;;  %v924_v34 = vld [vmem:[%s9778_s29 + $0x1678] sm:$0xff]  ;;  %v9488_v54 = vpack.c.bf16 %v3405_v46, %v3397_v2  ;;  %v3411_v4 = vld [vmem:[%s14686_s1 + $0x428] sm:$0xff] }
 0x606   : > { %v7291_v21 = vrot.slane %v2668_v47, %v9958_v41  ;;  %v7059_v22 = vrot.slane %v2527_v63, %v9955_v40  ;;  %v3394_v47 = vld [vmem:[%s14686_s1 + $0x3a0] sm:$0xff]  ;;  %v3413_v19 = vld [vmem:[%s14686_s1 + $0x438] sm:$0xff]  ;;  %v3427_v46 = vld [vmem:[%s14686_s1 + $0x4a8] sm:$0xff] }
 0x607   : > { %9383 = vmatpush1.bf16.msra.mxu0 %v9382_v10  ;;  %9479 = vmatpush1.bf16.msra.mxu1 %v9478_v58  ;;  %v3403_v58 = vld [vmem:[%s14686_s1 + $0x3e8] sm:$0xff]  ;;  %v3421_v20 = vld [vmem:[%s14686_s1 + $0x478] sm:$0xff] }
 0x608   : > { %v13812_v36 = vsel %vm4504_vm4, %v7291_v21, %v7287_v28  ;;  %v13816_v16 = vsel %vm4511_vm5, %v7059_v22, %v13712_v6  ;;  %2985 = vadd.xlane.f32.xlu1 %v2984_v14  ;;  %2844 = vadd.xlane.f32.xlu0 %v2843_v52  ;;  %v3125_v6 = vsel %vm973_vm0, %v922_v55, 0.0  ;;  %v3402_v52 = vld [vmem:[%s14686_s1 + $0x3e0] sm:$0xff]  ;;  %v3404_v55 = vld [vmem:[%s14686_s1 + $0x3f0] sm:$0xff]  ;;  %v970_v21 = vld [vmem:[%s9778_s29 + $0x17e8] sm:$0xff]  ;;  %v9392_v22 = vpack.c.bf16 %v3403_v58, %v3395_v45 }
 0x609   : > { %v2950_v28 = vpop.xlane.xlu1 %2949  ;;  %v2809_v49 = vpop.xlane.xlu0 %2808  ;;  %9385 = vmatprep.subr.bf16.mxu0 %v9384_v17  ;;  %9481 = vmatprep.subr.bf16.mxu1 %v9480_v59  ;;  %v3128_v59 = vsel %vm973_vm0, %v923_v24, 0.0  ;;  %v9394_v62 = vpack.c.bf16 %v3402_v52, %v3394_v47  ;;  %v9490_v50 = vpack.c.bf16 %v3404_v55, %v3396_v27  ;;  %v3420_v24 = vld [vmem:[%s14686_s1 + $0x470] sm:$0xff]  ;;  %v3269_v45 = vsel %vm973_vm0, %v970_v21, 0.0  ;;  %v3435_v47 = vld [vmem:[%s14686_s1 + $0x4e8] sm:$0xff]  ;;  %v3429_v52 = vld [vmem:[%s14686_s1 + $0x4b8] sm:$0xff] }
 0x60a   : > { %v7755_v5 = vrot.slane %v2950_v28, %v9950_v35  ;;  %v7523_v10 = vrot.slane %v2809_v49, %v9943_v32  ;;  %v3410_v28 = vld [vmem:[%s14686_s1 + $0x420] sm:$0xff]  ;;  %v9492_v2 = vpack.c.bf16 %v3421_v20, %v3413_v19  ;;  %v3437_v27 = vld [vmem:[%s14686_s1 + $0x4f8] sm:$0xff] }
 0x60b   : > { %9387 = vmatpush1.bf16.msra.mxu0 %v9386_v37  ;;  %9483 = vmatpush1.bf16.msra.mxu1 %v9482_v12  ;;  %v3419_v12 = vld [vmem:[%s14686_s1 + $0x468] sm:$0xff]  ;;  %v9496_v19 = vpack.c.bf16 %v3437_v27, %v3429_v52  ;;  %v3445_v20 = vld [vmem:[%s14686_s1 + $0x538] sm:$0xff] }
 0x60c   : > { %v13849_v63 = vsel %vm14783_vm11, %v7755_v5, %v7751_v23  ;;  %v13853_v14 = vsel %vm4497_vm3, %v7523_v10, %v13747_v53  ;;  %3267 = vadd.xlane.f32.xlu1 %v3266_v61  ;;  %3126 = vadd.xlane.f32.xlu0 %v3125_v6  ;;  %v2987_v53 = vsel %vm973_vm0, %v876_v3, 0.0  ;;  %v3418_v61 = vld [vmem:[%s14686_s1 + $0x460] sm:$0xff]  ;;  %v3412_v6 = vld [vmem:[%s14686_s1 + $0x430] sm:$0xff]  ;;  %v972_v10 = vld [vmem:[%s9778_s29 + $0x17f8] sm:$0xff]  ;;  %v9396_v58 = vpack.c.bf16 %v3419_v12, %v3411_v4 }
 0x60d   : > { %v3091_v23 = vpop.xlane.xlu1 %3090  ;;  %v3088_v17 = vpop.xlane.xlu0 %3087  ;;  %9389 = vmatprep.subr.bf16.mxu0 %v9388_v42  ;;  %9485 = vmatprep.subr.bf16.mxu1 %v9484_v51  ;;  %v3131_v51 = vsel %vm973_vm0, %v924_v34, 0.0  ;;  %v971_v5 = vld [vmem:[%s9778_s29 + $0x17f0] sm:$0xff]  ;;  %v9398_v55 = vpack.c.bf16 %v3418_v61, %v3410_v28  ;;  %v3451_v4 = vld [vmem:[%s14686_s1 + $0x568] sm:$0xff]  ;;  %v9400_v12 = vpack.c.bf16 %v3435_v47, %v3427_v46 }
 0x60e   : > { %v7987_v26 = vrot.slane %v3091_v23, %v9946_v33  ;;  %v7983_v37 = vrot.slane %v3088_v17, %v9940_v31  ;;  %v9494_v23 = vpack.c.bf16 %v3420_v24, %v3412_v6  ;;  %v3426_v17 = vld [vmem:[%s14686_s1 + $0x4a0] sm:$0xff] }
 0x60f   : > { %9391 = vmatpush1.bf16.msra.mxu0 %v9390_v11  ;;  %9487 = vmatpush1.bf16.msra.mxu1 %v9486_v1 }
 0x610   : > { %v13886_v49 = vsel %vm4483_vm1, %v7987_v26, %v7983_v37  ;;  %3129 = vadd.xlane.f32.xlu1 %v3128_v59  ;;  %2988 = vadd.xlane.f32.xlu0 %v2987_v53  ;;  %v3434_v59 = vld [vmem:[%s14686_s1 + $0x4e0] sm:$0xff]  ;;  %v3428_v53 = vld [vmem:[%s14686_s1 + $0x4b0] sm:$0xff]  ;;  %v3272_v37 = vsel %vm973_vm0, %v971_v5, 0.0 }
 0x611   : > { %v2671_v3 = vpop.xlane.xlu1 %2670  ;;  %v2530_v42 = vpop.xlane.xlu0 %2529  ;;  %9393 = vmatprep.subr.bf16.mxu0 %v9392_v22  ;;  %9489 = vmatprep.subr.bf16.mxu1 %v9488_v54  ;;  %v3436_v22 = vld [vmem:[%s14686_s1 + $0x4f0] sm:$0xff]  ;;  %v3443_v54 = vld [vmem:[%s14686_s1 + $0x528] sm:$0xff]  ;;  %v9402_v61 = vpack.c.bf16 %v3434_v59, %v3426_v17 }
 0x612   : > { %v7296_v11 = vrot.slane %v2671_v3, %v9955_v40  ;;  %v7064_v1 = vrot.slane %v2530_v42, %v9983_v0  ;;  %v9498_v6 = vpack.c.bf16 %v3436_v22, %v3428_v53  ;;  %v9404_v24 = vpack.c.bf16 %v3451_v4, %v3443_v54  ;;  %v3442_v3 = vld [vmem:[%s14686_s1 + $0x520] sm:$0xff]  ;;  %v3460_v17 = vld [vmem:[%s14686_s1 + $0x5b0] sm:$0xff]  ;;  %v3475_v4 = vld [vmem:[%s14686_s1 + $0x628] sm:$0xff] }
 0x613   : > { %9395 = vmatpush1.bf16.msra.mxu0 %v9394_v62  ;;  %9491 = vmatpush1.bf16.msra.mxu1 %v9490_v50  ;;  %v3453_v62 = vld [vmem:[%s14686_s1 + $0x578] sm:$0xff]  ;;  %v3450_v42 = vld [vmem:[%s14686_s1 + $0x560] sm:$0xff]  ;;  %v3468_v54 = vld [vmem:[%s14686_s1 + $0x5f0] sm:$0xff] }
 0x614   : > { %v13926_v34 = vsel %vm4511_vm5, %v7296_v11, %v13812_v36  ;;  %v13930_v21 = vsel %vm4518_vm6, %v7064_v1, %v13816_v16  ;;  %3132 = vadd.xlane.f32.xlu1 %v3131_v51  ;;  %3270 = vadd.xlane.f32.xlu0 %v3269_v45  ;;  %v3275_v16 = vsel %vm973_vm0, %v972_v10, 0.0  ;;  %v9500_v5 = vpack.c.bf16 %v3453_v62, %v3445_v20  ;;  %v3444_v10 = vld [vmem:[%s14686_s1 + $0x530] sm:$0xff]  ;;  %v3461_v11 = vld [vmem:[%s14686_s1 + $0x5b8] sm:$0xff]  ;;  %vm14784_vm0 = vmmov %vm14782_vm2 }
 0x615   : > { %v2953_v36 = vpop.xlane.xlu1 %2952  ;;  %v2812_v26 = vpop.xlane.xlu0 %2811  ;;  %9397 = vmatprep.subr.bf16.mxu0 %v9396_v58  ;;  %9493 = vmatprep.subr.bf16.mxu1 %v9492_v2  ;;  %v3452_v58 = vld [vmem:[%s14686_s1 + $0x570] sm:$0xff]  ;;  %v3469_v1 = vld [vmem:[%s14686_s1 + $0x5f8] sm:$0xff]  ;;  %v9406_v52 = vpack.c.bf16 %v3450_v42, %v3442_v3  ;;  %vm14786_vm2 = vmmov %vm14784_vm0 }
 0x616   : > { %v7760_v50 = vrot.slane %v2953_v36, %v9943_v32  ;;  %v7528_v28 = vrot.slane %v2812_v26, %v9958_v41  ;;  %v9502_v27 = vpack.c.bf16 %v3452_v58, %v3444_v10  ;;  %v9504_v22 = vpack.c.bf16 %v3469_v1, %v3461_v11  ;;  %v3483_v36 = vld [vmem:[%s14686_s1 + $0x668] sm:$0xff]  ;;  %v3484_v42 = vld [vmem:[%s14686_s1 + $0x670] sm:$0xff] }
 0x617   : > { %9399 = vmatpush1.bf16.msra.mxu0 %v9398_v55  ;;  %9495 = vmatpush1.bf16.msra.mxu1 %v9494_v23  ;;  %v3458_v55 = vld [vmem:[%s14686_s1 + $0x5a0] sm:$0xff]  ;;  %v3499_v10 = vld [vmem:[%s14686_s1 + $0x6e8] sm:$0xff] }
 0x618   : > { %v13959_v51 = vsel %vm4497_vm3, %v7760_v50, %v13849_v63  ;;  %v13963_v45 = vsel %vm4504_vm4, %v7528_v28, %v13853_v14  ;;  %3273 = vadd.xlane.f32.xlu0 %v3272_v37  ;;  %3276 = vadd.xlane.f32.xlu1 %v3275_v16  ;;  %v3459_v63 = vld [vmem:[%s14686_s1 + $0x5a8] sm:$0xff]  ;;  %v3466_v23 = vld [vmem:[%s14686_s1 + $0x5e0] sm:$0xff]  ;;  %v3485_v16 = vld [vmem:[%s14686_s1 + $0x678] sm:$0xff]  ;;  %v9506_v50 = vpack.c.bf16 %v3468_v54, %v3460_v17 }
 0x619   : > { %v3232_v2 = vpop.xlane.xlu1 %3231  ;;  %v3094_v46 = vpop.xlane.xlu0 %3093  ;;  %9401 = vmatprep.subr.bf16.mxu0 %v9400_v12  ;;  %9497 = vmatprep.subr.bf16.mxu1 %v9496_v19  ;;  %v3467_v14 = vld [vmem:[%s14686_s1 + $0x5e8] sm:$0xff]  ;;  %v9410_v62 = vpack.c.bf16 %v3466_v23, %v3458_v55  ;;  %v9412_v28 = vpack.c.bf16 %v3483_v36, %v3475_v4  ;;  %v3492_v55 = vld [vmem:[%s14686_s1 + $0x6b0] sm:$0xff] }
 0x61a   : > { %v7992_v47 = vrot.slane %v3094_v46, %v9950_v35  ;;  %v9408_v53 = vpack.c.bf16 %v3467_v14, %v3459_v63  ;;  %v8220_v12 = vrot.slane %v3232_v2, %v9940_v31  ;;  %v3476_v31 = vld [vmem:[%s14686_s1 + $0x630] sm:$0xff]  ;;  %v3493_v63 = vld [vmem:[%s14686_s1 + $0x6b8] sm:$0xff]  ;;  %v3507_v54 = vld [vmem:[%s14686_s1 + $0x728] sm:$0xff] }
 0x61b   : > { %9403 = vmatpush1.bf16.msra.mxu0 %v9402_v61  ;;  %9499 = vmatpush1.bf16.msra.mxu1 %v9498_v6  ;;  %v3474_v61 = vld [vmem:[%s14686_s1 + $0x620] sm:$0xff]  ;;  %v3501_v2 = vld [vmem:[%s14686_s1 + $0x6f8] sm:$0xff]  ;;  %v9510_v1 = vpack.c.bf16 %v3484_v42, %v3476_v31  ;;  %v3516_v31 = vld [vmem:[%s14686_s1 + $0x770] sm:$0xff] }
 0x61c   : > { %v13995_v59 = vsel %vm14784_vm0, %v7992_v47, %v13886_v49  ;;  %9405 = vmatprep.subr.bf16.mxu0 %v9404_v24  ;;  %9501 = vmatprep.subr.bf16.mxu1 %v9500_v5  ;;  %v3477_v49 = vld [vmem:[%s14686_s1 + $0x638] sm:$0xff]  ;;  %v3482_v6 = vld [vmem:[%s14686_s1 + $0x660] sm:$0xff]  ;;  %v3491_v5 = vld [vmem:[%s14686_s1 + $0x6a8] sm:$0xff] }
 0x61d   : > { %v2533_v26 = vpop.xlane.xlu1 %2532  ;;  %v3235_v37 = vpop.xlane.xlu0 %3234  ;;  %v9508_v3 = vpack.c.bf16 %v3485_v16, %v3477_v49  ;;  %v9414_v11 = vpack.c.bf16 %v3482_v6, %v3474_v61  ;;  %v9416_v47 = vpack.c.bf16 %v3499_v10, %v3491_v5  ;;  %v3531_v42 = vld [vmem:[%s14686_s1 + $0x7e8] sm:$0xff]  ;;  %v3533_v10 = vld [vmem:[%s14686_s1 + $0x7f8] sm:$0xff] }
 0x61e   : > { %v7069_v19 = vrot.slane %v2533_v26, %v9973_v56  ;;  %v8224_v20 = vrot.slane %v3235_v37, %v9946_v33  ;;  %v3517_v26 = vld [vmem:[%s14686_s1 + $0x778] sm:$0xff] }
 0x61f   : > { %9407 = vmatpush1.bf16.msra.mxu0 %v9406_v52  ;;  %9503 = vmatpush1.bf16.msra.mxu1 %v9502_v27  ;;  %v3490_v52 = vld [vmem:[%s14686_s1 + $0x6a0] sm:$0xff] }
 0x620   : > { %v14026_v33 = vsel %vm4525_vm7, %v7069_v19, %v13930_v21  ;;  %v14029_v24 = vsel %vm4483_vm1, %v8224_v20, %v8220_v12  ;;  %9409 = vmatprep.subr.bf16.mxu0 %v9408_v53  ;;  %9505 = vmatprep.subr.bf16.mxu1 %v9504_v22  ;;  %v3498_v27 = vld [vmem:[%s14686_s1 + $0x6e0] sm:$0xff]  ;;  %v9512_v53 = vpack.c.bf16 %v3501_v2, %v3493_v63  ;;  %v3500_v22 = vld [vmem:[%s14686_s1 + $0x6f0] sm:$0xff]  ;;  %vm14785_vm1 = vcmask 589312  }
 0x621   : > { %v2815_v21 = vpop.xlane.xlu1 %2814  ;;  %v2674_v58 = vpop.xlane.xlu0 %2673  ;;  %v9418_v16 = vpack.c.bf16 %v3498_v27, %v3490_v52  ;;  %v9514_v12 = vpack.c.bf16 %v3500_v22, %v3492_v55  ;;  %v3506_v20 = vld [vmem:[%s14686_s1 + $0x720] sm:$0xff]  ;;  %v3532_v27 = vld [vmem:[%s14686_s1 + $0x7f0] sm:$0xff]  ;;  %v3539_v55 = vld [vmem:[%s14686_s1 + $0x828] sm:$0xff] }
 0x622   : > { %v7533_v46 = vrot.slane %v2815_v21, %v9955_v40  ;;  %v7301_v14 = vrot.slane %v2674_v58, %v9983_v0  ;;  %vm14787_vm11 = vmmov %vm14785_vm1 }
 0x623   : > { %9411 = vmatpush1.bf16.msra.mxu0 %v9410_v62  ;;  %9507 = vmatpush1.bf16.msra.mxu1 %v9506_v50  ;;  %v3514_v62 = vld [vmem:[%s14686_s1 + $0x760] sm:$0xff]  ;;  %v3508_v50 = vld [vmem:[%s14686_s1 + $0x730] sm:$0xff] }
 0x624   : > { %v14059_v23 = vsel %vm4511_vm5, %v7533_v46, %v13963_v45  ;;  %v14063_v17 = vsel %vm4518_vm6, %v7301_v14, %v13926_v34  ;;  %9413 = vmatprep.subr.bf16.mxu0 %v9412_v28  ;;  %9509 = vmatprep.subr.bf16.mxu1 %v9508_v3  ;;  %v3515_v45 = vld [vmem:[%s14686_s1 + $0x768] sm:$0xff]  ;;  %v3509_v34 = vld [vmem:[%s14686_s1 + $0x738] sm:$0xff]  ;;  %v9422_v63 = vpack.c.bf16 %v3514_v62, %v3506_v20  ;;  %v3522_v14 = vld [vmem:[%s14686_s1 + $0x7a0] sm:$0xff] }
 0x625   : > { %v3097_v4 = vpop.xlane.xlu1 %3096  ;;  %v2956_v36 = vpop.xlane.xlu0 %2955  ;;  %v9420_v19 = vpack.c.bf16 %v3515_v45, %v3507_v54  ;;  %v9516_v6 = vpack.c.bf16 %v3517_v26, %v3509_v34  ;;  %v3523_v3 = vld [vmem:[%s14686_s1 + $0x7a8] sm:$0xff]  ;;  %v9518_v2 = vpack.c.bf16 %v3516_v31, %v3508_v50  ;;  %v3549_v54 = vld [vmem:[%s14686_s1 + $0x878] sm:$0xff] }
 0x626   : > { %v7997_v37 = vrot.slane %v3097_v4, %v9943_v32  ;;  %v7765_v49 = vrot.slane %v2956_v36, %v9958_v41  ;;  %v9424_v46 = vpack.c.bf16 %v3531_v42, %v3523_v3 }
 0x627   : > { %9415 = vmatpush1.bf16.msra.mxu0 %v9414_v11  ;;  %9511 = vmatpush1.bf16.msra.mxu1 %v9510_v1  ;;  %v3530_v11 = vld [vmem:[%s14686_s1 + $0x7e0] sm:$0xff]  ;;  %v3524_v1 = vld [vmem:[%s14686_s1 + $0x7b0] sm:$0xff] }
 0x628   : > { %v7998_v28 = vsel %vm4497_vm3, %v7997_v37, %v13995_v59  ;;  %v7766_v61 = vsel %vm4504_vm4, %v7765_v49, %v13959_v51  ;;  %9417 = vmatprep.subr.bf16.mxu0 %v9416_v47  ;;  %9513 = vmatprep.subr.bf16.mxu1 %v9512_v53  ;;  %v3525_v51 = vld [vmem:[%s14686_s1 + $0x7b8] sm:$0xff]  ;;  %v3547_v53 = vld [vmem:[%s14686_s1 + $0x868] sm:$0xff]  ;;  %v9426_v36 = vpack.c.bf16 %v3530_v11, %v3522_v14 }
 0x629   : > { %v2536_v5 = vpop.xlane.xlu1 %2535  ;;  %v3238_v59 = vpop.xlane.xlu0 %3237  ;;  %v9520_v52 = vpack.c.bf16 %v3533_v10, %v3525_v51  ;;  %v9522_v34 = vpack.c.bf16 %v3532_v27, %v3524_v1  ;;  %v9428_v26 = vpack.c.bf16 %v3547_v53, %v3539_v55 }
 0x62a   : > { %v7074_v21 = vrot.slane %v2536_v5, %v9993_v8  ;;  %v8229_v58 = vrot.slane %v3238_v59, %v9950_v35 }
 0x62b   : > { %9419 = vmatpush1.bf16.msra.mxu0 %v9418_v16  ;;  %9515 = vmatpush1.bf16.msra.mxu1 %v9514_v12 }
 0x62c   : > { %v7075_v35 = vsel %vm14785_vm1, %v7074_v21, %v14026_v33  ;;  %v8230_v47 = vsel %vm14786_vm2, %v8229_v58, %v14029_v24  ;;  %9421 = vmatprep.subr.bf16.mxu0 %v9420_v19  ;;  %9517 = vmatprep.subr.bf16.mxu1 %v9516_v6  ;;  %v3541_v24 = vld [vmem:[%s14686_s1 + $0x838] sm:$0xff] }
 0x62d   : > { %v2818_v22 = vpop.xlane.xlu1 %2817  ;;  %v2677_v33 = vpop.xlane.xlu0 %2676  ;;  %v9524_v16 = vpack.c.bf16 %v3549_v54, %v3541_v24 }
 0x62e   : > { %v7538_v45 = vrot.slane %v2818_v22, %v9983_v0  ;;  %v7306_v4 = vrot.slane %v2677_v33, %v9973_v56 }
 0x62f   : > { %9423 = vmatpush1.bf16.msra.mxu0 %v9422_v63  ;;  %9519 = vmatpush1.bf16.msra.mxu1 %v9518_v2 }
 0x630   : > { %v7539_v37 = vsel %vm4518_vm6, %v7538_v45, %v14059_v23  ;;  %v7307_v49 = vsel %vm4525_vm7, %v7306_v4, %v14063_v17  ;;  %9425 = vmatprep.subr.bf16.mxu0 %v9424_v46  ;;  %9521 = vmatprep.subr.bf16.mxu1 %v9520_v52 }
 0x631   : > { %v3100_v12 = vpop.xlane.xlu1 %3099  ;;  %v2959_v19 = vpop.xlane.xlu0 %2958 }
 0x632   : > { %v8002_v20 = vrot.slane %v3100_v12, %v9958_v41  ;;  %v7770_v62 = vrot.slane %v2959_v19, %v9955_v40 }
 0x633   : > { %9427 = vmatpush1.bf16.msra.mxu0 %v9426_v36  ;;  %9523 = vmatpush1.bf16.msra.mxu1 %v9522_v34 }
 0x634   : > { %v8003_v50 = vsel %vm4504_vm4, %v8002_v20, %v7998_v28  ;;  %v7771_v6 = vsel %vm4511_vm5, %v7770_v62, %v7766_v61  ;;  %9429 = vmatprep.subr.bf16.mxu0 %v9428_v26  ;;  %9525 = vmatprep.subr.bf16.mxu1 %v9524_v16 }
 0x635   : > { %v2539_v23 = vpop.xlane.xlu1 %2538  ;;  %v3241_v31 = vpop.xlane.xlu0 %3240 }
 0x636   : > { %v7079_v17 = vrot.slane %v2539_v23, %v9990_v7  ;;  %v8234_v3 = vrot.slane %v3241_v31, %v9943_v32 }
 0x638   : > { %v7080_v42 = vsel %vm4539_vm9, %v7079_v17, %v7075_v35  ;;  %v8235_v5 = vsel %vm4497_vm3, %v8234_v3, %v8230_v47  ;;  %vm14788_vm3 = vmmov %vm14785_vm1 }
 0x639   : > { %v2821_v59 = vpop.xlane.xlu1 %2820  ;;  %v2680_v51 = vpop.xlane.xlu0 %2679 }
 0x63a   : > { %v7543_v10 = vrot.slane %v2821_v59, %v9973_v56  ;;  %v7311_v28 = vrot.slane %v2680_v51, %v9993_v8 }
 0x63c   : > { %v7544_v61 = vsel %vm4525_vm7, %v7543_v10, %v7539_v37  ;;  %v7312_v21 = vsel %vm14787_vm11, %v7311_v28, %v7307_v49  ;;  %vm14795_vm11 = vcmask 1044484  }
 0x63d   : > { %v3103_v58 = vpop.xlane.xlu1 %3102  ;;  %v2962_v63 = vpop.xlane.xlu0 %2961 }
 0x63e   : > { %v8007_v2 = vrot.slane %v3103_v58, %v9955_v40  ;;  %v7775_v32 = vrot.slane %v2962_v63, %v9983_v0 }
 0x640   : > { %v8008_v46 = vsel %vm4511_vm5, %v8007_v2, %v8003_v50  ;;  %v7776_v14 = vsel %vm4518_vm6, %v7775_v32, %v7771_v6 }
 0x641   : > { %v2542_v11 = vpop.xlane.xlu1 %2541  ;;  %v3244_v1 = vpop.xlane.xlu0 %3243 }
 0x642   : > { %v7084_v35 = vrot.slane %v2542_v11, %v10015_v30  ;;  %v8239_v47 = vrot.slane %v3244_v1, %v9958_v41 }
 0x644   : > { %v7085_v52 = vsel %vm4546_vm10, %v7084_v35, %v7080_v42  ;;  %v8240_v27 = vsel %vm4504_vm4, %v8239_v47, %v8235_v5  ;;  %vm14789_vm4 = vcmask 786112  }
 0x645   : > { %v2824_v55 = vpop.xlane.xlu1 %2823  ;;  %v2683_v53 = vpop.xlane.xlu0 %2682  ;;  %vm14791_vm0 = vmmov %vm14789_vm4 }
 0x646   : > { %v7548_v22 = vrot.slane %v2824_v55, %v9993_v8  ;;  %v7316_v33 = vrot.slane %v2683_v53, %v9990_v7  ;;  %vm14794_vm2 = vmmov %vm14791_vm0 }
 0x648   : > { %v7549_v24 = vsel %vm14788_vm3, %v7548_v22, %v7544_v61  ;;  %v7317_v54 = vsel %vm4539_vm9, %v7316_v33, %v7312_v21 }
 0x649   : > { %v3106_v45 = vpop.xlane.xlu1 %3105  ;;  %v2965_v4 = vpop.xlane.xlu0 %2964 }
 0x64a   : > { %v8012_v36 = vrot.slane %v3106_v45, %v9983_v0  ;;  %v7780_v41 = vrot.slane %v2965_v4, %v9973_v56 }
 0x64c   : > { %v8013_v34 = vsel %vm4518_vm6, %v8012_v36, %v8008_v46  ;;  %v7781_v26 = vsel %vm4525_vm7, %v7780_v41, %v7776_v14 }
 0x64d   : > { %v2545_v37 = vpop.xlane.xlu1 %2544  ;;  %v3247_v49 = vpop.xlane.xlu0 %3246 }
 0x64e   : > { %v7089_v16 = vrot.slane %v2545_v37, %v10012_v29  ;;  %v8244_v12 = vrot.slane %v3247_v49, %v9955_v40 }
 0x650   : > { %v7090_v19 = vsel %vm14789_vm4, %v7089_v16, %v7085_v52  ;;  %v8245_v20 = vsel %vm4511_vm5, %v8244_v12, %v8240_v27  ;;  %vm14790_vm5 = vmmov %vm14785_vm1  ;;  %vm14793_vm1 = vcmask 1043459  }
 0x651   : > { %v2827_v62 = vpop.xlane.xlu1 %2826  ;;  %v2686_v50 = vpop.xlane.xlu0 %2685  ;;  %vm14796_vm4 = vmmov %vm14791_vm0 }
 0x652   : > { %v7553_v6 = vrot.slane %v2827_v62, %v9990_v7  ;;  %v7321_v23 = vrot.slane %v2686_v50, %v10015_v30 }
 0x654   : > { %v7554_v31 = vsel %vm4539_vm9, %v7553_v6, %v7549_v24  ;;  %v7322_v17 = vsel %vm4546_vm10, %v7321_v23, %v7317_v54 }
 0x655   : > { %v3109_v3 = vpop.xlane.xlu1 %3108  ;;  %v2968_v42 = vpop.xlane.xlu0 %2967 }
 0x656   : > { %v8017_v5 = vrot.slane %v3109_v3, %v9973_v56  ;;  %v7785_v40 = vrot.slane %v2968_v42, %v9993_v8 }
 0x658   : > { %v14185_v59 = vsel %vm4525_vm7, %v8017_v5, %v8013_v34  ;;  %v14188_v51 = vsel %vm14790_vm5, %v7785_v40, %v7781_v26  ;;  %vm14797_vm5 = vmmov %vm14791_vm0 }
 0x659   : > { %v2548_v10 = vpop.xlane.xlu1 %2547  ;;  %v3250_v28 = vpop.xlane.xlu0 %3249 }
 0x65a   : > { %v7094_v61 = vrot.slane %v2548_v10, %v10025_v44  ;;  %v8249_v21 = vrot.slane %v3250_v28, %v9983_v0 }
 0x65c   : > { %v7095_v58 = vsel %vm4560_vm12, %v7094_v61, %v7090_v19  ;;  %v14194_v63 = vsel %vm4518_vm6, %v8249_v21, %v8245_v20  ;;  %vm14792_vm6 = vcmask 1042434  }
 0x65d   : > { %v2830_v2 = vpop.xlane.xlu1 %2829  ;;  %v2689_v32 = vpop.xlane.xlu0 %2688 }
 0x65e   : > { %v7558_v46 = vrot.slane %v2830_v2, %v10015_v30  ;;  %v7326_v14 = vrot.slane %v2689_v32, %v10012_v29 }
 0x660   : > { %v7559_v11 = vsel %vm4546_vm10, %v7558_v46, %v7554_v31  ;;  %v7327_v1 = vsel %vm14791_vm0, %v7326_v14, %v7322_v17  ;;  %vm14798_vm0 = vcmask 1045509  }
 0x661   : > { %v14200_v35 = vpop.xlane.xlu1 %3111  ;;  %v14202_v47 = vpop.xlane.xlu0 %2970 }
 0x665   : > { %v2551_v0 = vpop.xlane.xlu1 %2550  ;;  %v14204_v52 = vpop.xlane.xlu0 %3252 }
 0x666   : > { %v7099_v41 = vrot.slane %v2551_v0, %v10022_v43 }
 0x668   : > { %v7100_v49 = vsel %vm4567_vm13, %v7099_v41, %v7095_v58 }
 0x669   : > { %v2833_v27 = vpop.xlane.xlu1 %2832  ;;  %v2692_v55 = vpop.xlane.xlu0 %2691 }
 0x66a   : > { %v7331_v6 = vrot.slane %v2692_v55, %v10025_v44  ;;  %v7563_v32 = vrot.slane %v2833_v27, %v10012_v29 }
 0x66c   : > { %v7332_v42 = vsel %vm4560_vm12, %v7331_v6, %v7327_v1 }
 0x66d   : > { %v14206_v53 = vpop.xlane.xlu1 %3114  ;;  %v2974_v22 = vpop.xlane.xlu0 %2973 }
 0x671   : > { %v2554_v33 = vpop.xlane.xlu1 %2553  ;;  %v14208_v24 = vpop.xlane.xlu0 %3255 }
 0x672   : > { %v7104_v34 = vrot.slane %v2554_v33, %v10043_v60  ;;  %v7564_v33 = vsel %vm14794_vm2, %v7563_v32, %v7559_v11 }
 0x674   : > { %v7105_v12 = vsel %vm4574_vm14, %v7104_v34, %v7100_v49  ;;  %v7795_v49 = vrot.slane %v2974_v22, %v10015_v30 }
 0x675   : > { %v2836_v54 = vpop.xlane.xlu1 %2835  ;;  %v2695_v45 = vpop.xlane.xlu0 %2694 }
 0x676   : > { %v7336_v17 = vrot.slane %v2695_v45, %v10022_v43  ;;  %v7568_v46 = vrot.slane %v2836_v54, %v10025_v44 }
 0x678   : > { %v7337_v10 = vsel %vm4567_vm13, %v7336_v17, %v7332_v42  ;;  %v7569_v45 = vsel %vm4560_vm12, %v7568_v46, %v7564_v33 }
 0x679   : > { %v14210_v4 = vpop.xlane.xlu1 %3117  ;;  %v2977_v36 = vpop.xlane.xlu0 %2976 }
 0x67a   : > { %v7800_v11 = vrot.slane %v2977_v36, %v10012_v29  ;;  %v8032_v36 = vrot.slane %v14210_v4, %v10015_v30 }
 0x67d   : > { %v2557_v26 = vpop.xlane.xlu1 %2556  ;;  %v14214_v37 = vpop.xlane.xlu0 %3258 }
 0x67e   : > { %v7109_v16 = vrot.slane %v2557_v26, %v10040_v15  ;;  %v7790_v26 = vrot.slane %v14202_v47, %v9990_v7 }
 0x680   : > { %v7110_v19 = vsel %vm4581_vm15, %v7109_v16, %v7105_v12  ;;  %v8022_v12 = vrot.slane %v14200_v35, %v9993_v8  ;;  %v7791_v22 = vsel %vm4539_vm9, %v7790_v26, %v14188_v51 }
 0x681   : > { %v8339_v20 = vsel %vm14792_vm6, %v7110_v19, %v12432_v13  ;;  %v2839_v62 = vpop.xlane.xlu1 %2838  ;;  %v2698_v50 = vpop.xlane.xlu0 %2697  ;;  %v7796_v35 = vsel %vm4546_vm10, %v7795_v49, %v7791_v22  ;;  %vm14799_vm6 = vmmov %vm14788_vm3  ;;  %v3557_v22 = vld [vmem:[%s14686_s1 + $0x8b8] sm:$0xff] }
 0x682   : > { %v7341_v3 = vrot.slane %v2698_v50, %v10043_v60  ;;  %v7573_v0 = vrot.slane %v2839_v62, %v10022_v43 }
 0x684   : > { %v7342_v13 = vsel %vm4574_vm14, %v7341_v3, %v7337_v10  ;;  %v7574_v27 = vsel %vm4567_vm13, %v7573_v0, %v7569_v45 }
 0x685   : > { %v3121_v23 = vpop.xlane.xlu1 %3120  ;;  %v2980_v31 = vpop.xlane.xlu0 %2979 }
 0x686   : > { %v7805_v47 = vrot.slane %v2980_v31, %v10025_v44  ;;  %v7801_v31 = vsel %vm14796_vm4, %v7800_v11, %v7796_v35  ;;  %v8037_v42 = vrot.slane %v3121_v23, %v10012_v29 }
 0x688   : > { %v7806_v10 = vsel %vm4560_vm12, %v7805_v47, %v7801_v31  ;;  %v3546_v47 = vld [vmem:[%s14686_s1 + $0x860] sm:$0xff]  ;;  %v3556_v31 = vld [vmem:[%s14686_s1 + $0x8b0] sm:$0xff] }
 0x689   : > { %v2701_v5 = vpop.xlane.xlu1 %2700  ;;  %v14226_v40 = vpop.xlane.xlu0 %3261 }
 0x68a   : > { %v7346_v28 = vrot.slane %v2701_v5, %v10040_v15  ;;  %v8254_v5 = vrot.slane %v14204_v52, %v9973_v56  ;;  %v8264_v56 = vrot.slane %v14214_v37, %v9990_v7 }
 0x68c   : > { %v7347_v61 = vsel %vm4581_vm15, %v7346_v28, %v7342_v13  ;;  %v8255_v46 = vsel %vm4525_vm7, %v8254_v5, %v14194_v63  ;;  %vm14800_vm7 = vmmov %vm14794_vm2 }
 0x68d   : > { %v8340_v21 = vsel %vm14793_vm1, %v7347_v61, %v8339_v20  ;;  %v2983_v58 = vpop.xlane.xlu1 %2982  ;;  %v2842_v2 = vpop.xlane.xlu0 %2841  ;;  %v8027_v20 = vrot.slane %v14206_v53, %v9990_v7  ;;  %v8023_v53 = vsel %vm14788_vm3, %v8022_v12, %v14185_v59  ;;  %v8259_v61 = vrot.slane %v14208_v24, %v9993_v8 }
 0x68e   : > { %v7578_v55 = vrot.slane %v2842_v2, %v10043_v60  ;;  %v7810_v17 = vrot.slane %v2983_v58, %v10022_v43  ;;  %v8269_v8 = vrot.slane %v14226_v40, %v10015_v30  ;;  %vm14801_vm1 = vcmask 1046534  }
 0x68f   : > { %v8028_v51 = vsel %vm4539_vm9, %v8027_v20, %v8023_v53  ;;  %v8260_v33 = vsel %vm14799_vm6, %v8259_v61, %v8255_v46  ;;  %v3562_v53 = vld [vmem:[%s14686_s1 + $0x8e0] sm:$0xff] }
 0x690   : > { %v7579_v16 = vsel %vm4574_vm14, %v7578_v55, %v7574_v27  ;;  %v7811_v59 = vsel %vm4567_vm13, %v7810_v17, %v7806_v10  ;;  %v8033_v58 = vsel %vm4546_vm10, %v8032_v36, %v8028_v51  ;;  %v3565_v17 = vld [vmem:[%s14686_s1 + $0x8f8] sm:$0xff]  ;;  %v3579_v10 = vld [vmem:[%s14686_s1 + $0x968] sm:$0xff]  ;;  %v3586_v46 = vld [vmem:[%s14686_s1 + $0x9a0] sm:$0xff] }
 0x691   : > { %v14235_v14 = vpop.xlane.xlu1 %3264  ;;  %v3124_v1 = vpop.xlane.xlu0 %3123  ;;  %v8038_v32 = vsel %vm14797_vm5, %v8037_v42, %v8033_v58  ;;  %v3564_v42 = vld [vmem:[%s14686_s1 + $0x8f0] sm:$0xff]  ;;  %v9528_v51 = vpack.c.bf16 %v3565_v17, %v3557_v22  ;;  %v3637_v22 = vld [vmem:[%s14686_s1 + $0xb38] sm:$0xff] }
 0x692   : > { %v8042_v28 = vrot.slane %v3124_v1, %v10025_v44  ;;  %v8274_v1 = vrot.slane %v14235_v14, %v10012_v29  ;;  %v9530_v61 = vpack.c.bf16 %v3564_v42, %v3556_v31  ;;  %v3645_v17 = vld [vmem:[%s14686_s1 + $0xb78] sm:$0xff] }
 0x693   : > { %v9548_v42 = vpack.c.bf16 %v3645_v17, %v3637_v22  ;;  %v3694_v17 = vsub.s32 7, %v9926_v18 }
 0x694   : > { %v8043_v0 = vsel %vm4560_vm12, %v8042_v28, %v8038_v32  ;;  %v3573_v28 = vld [vmem:[%s14686_s1 + $0x938] sm:$0xff] }
 0x695   : > { %v2986_v41 = vpop.xlane.xlu1 %2985  ;;  %v2845_v34 = vpop.xlane.xlu0 %2844  ;;  %v3597_v32 = vld [vmem:[%s14686_s1 + $0x9f8] sm:$0xff] }
 0x696   : > { %v7583_v54 = vrot.slane %v2845_v34, %v10040_v15  ;;  %v7815_v3 = vrot.slane %v2986_v41, %v10043_v60  ;;  %v8265_v41 = vsel %vm4539_vm9, %v8264_v56, %v8260_v33  ;;  %v3580_v56 = vld [vmem:[%s14686_s1 + $0x970] sm:$0xff]  ;;  %v3611_v33 = vld [vmem:[%s14686_s1 + $0xa68] sm:$0xff] }
 0x697   : > { %v8270_v14 = vsel %vm4546_vm10, %v8269_v8, %v8265_v41 }
 0x698   : > { %v7584_v19 = vsel %vm4581_vm15, %v7583_v54, %v7579_v16  ;;  %v7816_v52 = vsel %vm4574_vm14, %v7815_v3, %v7811_v59  ;;  %v8275_v26 = vsel %vm14800_vm7, %v8274_v1, %v8270_v14  ;;  %v3554_v3 = vld [vmem:[%s14686_s1 + $0x8a0] sm:$0xff] }
 0x699   : > { %v8341_v62 = vsel %vm14795_vm11, %v7584_v19, %v8340_v21  ;;  %v3268_v50 = vpop.xlane.xlu1 %3267  ;;  %v3127_v6 = vpop.xlane.xlu0 %3126  ;;  %v3538_v19 = vld [vmem:[%s14686_s1 + $0x820] sm:$0xff] }
 0x69a   : > { %v8047_v21 = vrot.slane %v3127_v6, %v10022_v43  ;;  %v8279_v45 = vrot.slane %v3268_v50, %v10025_v44  ;;  %v3555_v50 = vld [vmem:[%s14686_s1 + $0x8a8] sm:$0xff]  ;;  %v9430_v35 = vpack.c.bf16 %v3546_v47, %v3538_v19  ;;  %v3570_v59 = vld [vmem:[%s14686_s1 + $0x920] sm:$0xff] }
 0x69b   : > { %v3563_v6 = vld [vmem:[%s14686_s1 + $0x8e8] sm:$0xff]  ;;  %v3594_v1 = vld [vmem:[%s14686_s1 + $0x9e0] sm:$0xff] }
 0x69c   : > { %v8048_v30 = vsel %vm4567_vm13, %v8047_v21, %v8043_v0  ;;  %v8280_v49 = vsel %vm4560_vm12, %v8279_v45, %v8275_v26  ;;  %v9432_v5 = vpack.c.bf16 %v3563_v6, %v3555_v50  ;;  %v3578_v21 = vld [vmem:[%s14686_s1 + $0x960] sm:$0xff]  ;;  %v3605_v45 = vld [vmem:[%s14686_s1 + $0xa38] sm:$0xff]  ;;  %v3604_v26 = vld [vmem:[%s14686_s1 + $0xa30] sm:$0xff] }
 0x69d   : > { %v3130_v13 = vpop.xlane.xlu1 %3129  ;;  %v2989_v4 = vpop.xlane.xlu0 %2988  ;;  %v9438_v8 = vpack.c.bf16 %v3578_v21, %v3570_v59  ;;  %v3626_v19 = vld [vmem:[%s14686_s1 + $0xae0] sm:$0xff]  ;;  %v3635_v50 = vld [vmem:[%s14686_s1 + $0xb28] sm:$0xff] }
 0x69e   : > { %v7820_v23 = vrot.slane %v2989_v4, %v10040_v15  ;;  %v8052_v2 = vrot.slane %v3130_v13, %v10043_v60  ;;  %v3581_v13 = vld [vmem:[%s14686_s1 + $0x978] sm:$0xff]  ;;  %v9434_v4 = vpack.c.bf16 %v3562_v53, %v3554_v3  ;;  %v3643_v6 = vld [vmem:[%s14686_s1 + $0xb68] sm:$0xff]  ;;  %v3634_v3 = vld [vmem:[%s14686_s1 + $0xb20] sm:$0xff] }
 0x69f   : > { %v9532_v58 = vpack.c.bf16 %v3581_v13, %v3573_v28  ;;  %v3642_v53 = vld [vmem:[%s14686_s1 + $0xb60] sm:$0xff]  ;;  %v9452_v31 = vpack.c.bf16 %v3643_v6, %v3635_v50  ;;  %v3653_v28 = vld [vmem:[%s14686_s1 + $0xbb8] sm:$0xff] }
 0x6a0   : > { %v7821_v24 = vsel %vm4581_vm15, %v7820_v23, %v7816_v52  ;;  %v8053_v63 = vsel %vm4574_vm14, %v8052_v2, %v8048_v30  ;;  %v3587_v52 = vld [vmem:[%s14686_s1 + $0x9a8] sm:$0xff]  ;;  %v3589_v2 = vld [vmem:[%s14686_s1 + $0x9b8] sm:$0xff]  ;;  %v3650_v59 = vld [vmem:[%s14686_s1 + $0xba0] sm:$0xff] }
 0x6a1   : > { %v8342_v7 = vsel %vm14798_vm0, %v7821_v24, %v8341_v62  ;;  %v3133_v37 = vpop.xlane.xlu1 %3132  ;;  %v3271_v55 = vpop.xlane.xlu0 %3270  ;;  %v3613_v30 = vld [vmem:[%s14686_s1 + $0xa78] sm:$0xff] }
 0x6a2   : > { %v8057_v40 = vrot.slane %v3133_v37, %v10040_v15  ;;  %v8284_v29 = vrot.slane %v3271_v55, %v10022_v43  ;;  %v3596_v37 = vld [vmem:[%s14686_s1 + $0x9f0] sm:$0xff]  ;;  %v3603_v55 = vld [vmem:[%s14686_s1 + $0xa28] sm:$0xff]  ;;  %v3661_v13 = vld [vmem:[%s14686_s1 + $0xbf8] sm:$0xff] }
 0x6a3   : > { %v9444_v14 = vpack.c.bf16 %v3611_v33, %v3603_v55  ;;  %v8971_v55 = vstv %s9771_s24  ;;  %s179_s24 = sand.u32 1, %s9688_s13  }
 0x6a4   : > { %v8058_v34 = vsel %vm4581_vm15, %v8057_v40, %v8053_v63  ;;  %v8285_v11 = vsel %vm4567_vm13, %v8284_v29, %v8280_v49  ;;  %v9442_v40 = vpack.c.bf16 %v3594_v1, %v3586_v46  ;;  %v3602_v63 = vld [vmem:[%s14686_s1 + $0xa20] sm:$0xff]  ;;  %v3621_v49 = vld [vmem:[%s14686_s1 + $0xab8] sm:$0xff]  ;;  %s9154_s7 = sshll.u32 %s179_s24, 7  ;;  %s14624_s29 = scalar_lea.sflag [#allocation3], %s179_s24 }
 0x6a5   : > { %v3274_v27 = vpop.xlane.xlu0 %3273  ;;  %v3277_v54 = vpop.xlane.xlu1 %3276  ;;  %v8343_v44 = vsel %vm14801_vm1, %v8058_v34, %v8342_v7  ;;  %v9536_v7 = vpack.c.bf16 %v3597_v32, %v3589_v2  ;;  %v3610_v29 = vld [vmem:[%s14686_s1 + $0xa60] sm:$0xff]  ;;  %v9540_v34 = vpack.c.bf16 %v3613_v30, %v3605_v45  ;;  %v14517_v30 = vadd.s32 %v8971_v55, %v9926_v18  ;;  %s14600_s8 = scalar_lea.vmem [#allocation2], %s9154_s7 }
 0x6a6   : > { %v8289_v16 = vrot.slane %v3274_v27, %v10043_v60  ;;  %v8294_v12 = vrot.slane %v3277_v54, %v10040_v15  ;;  %v3540_v60 = vld [vmem:[%s14686_s1 + $0x830] sm:$0xff]  ;;  %v3619_v54 = vld [vmem:[%s14686_s1 + $0xaa8] sm:$0xff] }
 0x6a7   : > { %v3548_v15 = vld [vmem:[%s14686_s1 + $0x870] sm:$0xff]  ;;  %vm8974_vm9 = vcmp.lt.s32.totalorder %v14517_v30, 20 }
 0x6a8   : > { %v8290_v43 = vsel %vm4574_vm14, %v8289_v16, %v8285_v11  ;;  %v9526_v36 = vpack.c.bf16 %v3548_v15, %v3540_v60  ;;  %v3612_v27 = vld [vmem:[%s14686_s1 + $0xa70] sm:$0xff]  ;;  %v3629_v16 = vld [vmem:[%s14686_s1 + $0xaf8] sm:$0xff] }
 0x6a9   : > { %v8295_v20 = vsel %vm4581_vm15, %v8294_v12, %v8290_v43  ;;  %v9446_v12 = vpack.c.bf16 %v3610_v29, %v3602_v63  ;;  %v9542_v11 = vpack.c.bf16 %v3612_v27, %v3604_v26  ;;  %v3618_v43 = vld [vmem:[%s14686_s1 + $0xaa0] sm:$0xff]  ;;  %v9544_v47 = vpack.c.bf16 %v3629_v16, %v3621_v49  ;;  %v3620_v60 = vld [vmem:[%s14686_s1 + $0xab0] sm:$0xff] }
 0x6aa   : > { %v14321_v62 = vsel %vm8308_vm8, %v8295_v20, %v8343_v44  ;;  %v3627_v44 = vld [vmem:[%s14686_s1 + $0xae8] sm:$0xff]  ;;  %v3628_v15 = vld [vmem:[%s14686_s1 + $0xaf0] sm:$0xff]  ;;  %v3678_v29 = vsub.s32 3, %v9926_v18 }
 0x6ab   : > { %8499 = vmatmul.mubr.f32.gmra.mrb[2].mxu0 %v14321_v62  ;;  %8653 = vmatmul.mubr.f32.gmra.mrb[2].mxu1 %v14321_v62  ;;  %v9448_v20 = vpack.c.bf16 %v3627_v44, %v3619_v54 }
 0x6ac   : > { %8723 = vmatprep.mubr.f32.mxu0 %v11959_v39  ;;  %8877 = vmatprep.mubr.f32.mxu1 %v11959_v39  ;;  %v3571_v39 = vld [vmem:[%s14686_s1 + $0x928] sm:$0xff] }
 0x6ad   : > { %v9436_v23 = vpack.c.bf16 %v3579_v10, %v3571_v39  ;;  %v3636_v39 = vld [vmem:[%s14686_s1 + $0xb30] sm:$0xff]  ;;  %v3659_v10 = vld [vmem:[%s14686_s1 + $0xbe8] sm:$0xff] }
 0x6af   : > { %8724 = vmatmul.mubr.f32.vlgmr.msra.gmra.mrb[4].mxu0 %v11968_v48  ;;  %8878 = vmatmul.mubr.f32.vlgmr.msra.gmra.mrb[4].mxu1 %v11968_v48  ;;  %v3572_v48 = vld [vmem:[%s14686_s1 + $0x930] sm:$0xff] }
 0x6b0   : > { %9431 = vmatpush1.bf16.msra.mxu0 %v9430_v35  ;;  %9527 = vmatpush1.bf16.msra.mxu1 %v9526_v36  ;;  %v9534_v24 = vpack.c.bf16 %v3580_v56, %v3572_v48  ;;  %v9450_v35 = vpack.c.bf16 %v3626_v19, %v3618_v43  ;;  %v9546_v36 = vpack.c.bf16 %v3628_v15, %v3620_v60  ;;  %v3652_v48 = vld [vmem:[%s14686_s1 + $0xbb0] sm:$0xff]  ;;  %v3682_v19 = vsub.s32 4, %v9926_v18 }
 0x6b1   : > { %8729 = vmatprep.mubr.f32.mxu0 %v13589_v38  ;;  %8883 = vmatprep.mubr.f32.mxu1 %v13589_v38  ;;  %v3595_v38 = vld [vmem:[%s14686_s1 + $0x9e8] sm:$0xff]  ;;  %v3660_v56 = vld [vmem:[%s14686_s1 + $0xbf0] sm:$0xff]  ;;  %v3686_v15 = vsub.s32 5, %v9926_v18 }
 0x6b2   : > { %9433 = vmatprep.subr.bf16.mxu0 %v9432_v5  ;;  %9529 = vmatprep.subr.bf16.mxu1 %v9528_v51  ;;  %v9440_v0 = vpack.c.bf16 %v3595_v38, %v3587_v52  ;;  %v3644_v5 = vld [vmem:[%s14686_s1 + $0xb70] sm:$0xff]  ;;  %v3651_v51 = vld [vmem:[%s14686_s1 + $0xba8] sm:$0xff]  ;;  %v9554_v38 = vpack.c.bf16 %v3660_v56, %v3652_v48 }
 0x6b3   : > { %8730 = vmatmul.mubr.f32.gmra.mrb[6].mxu0 %v13616_v57  ;;  %8884 = vmatmul.mubr.f32.gmra.mrb[6].mxu1 %v13616_v57  ;;  %v3588_v57 = vld [vmem:[%s14686_s1 + $0x9b0] sm:$0xff]  ;;  %v9456_v21 = vpack.c.bf16 %v3659_v10, %v3651_v51 }
 0x6b4   : > { %9435 = vmatpush1.bf16.msra.mxu0 %v9434_v4  ;;  %9531 = vmatpush1.bf16.msra.mxu1 %v9530_v61  ;;  %v9538_v41 = vpack.c.bf16 %v3596_v37, %v3588_v57  ;;  %v9454_v4 = vpack.c.bf16 %v3642_v53, %v3634_v3  ;;  %v9550_v61 = vpack.c.bf16 %v3644_v5, %v3636_v39  ;;  %v3666_v57 = vsub.s32 0, %v9926_v18 }
 0x6b5   : > { %9437 = vmatprep.subr.bf16.mxu0 %v9436_v23  ;;  %9533 = vmatprep.subr.bf16.mxu1 %v9532_v58  ;;  %v9552_v23 = vpack.c.bf16 %v3661_v13, %v3653_v28  ;;  %v3658_v58 = vld [vmem:[%s14686_s1 + $0xbe0] sm:$0xff]  ;;  %v3670_v37 = vsub.s32 1, %v9926_v18 }
 0x6b6   : > { %8800 = vmatprep.mubr.f32.mxu0 %v9698_v25  ;;  %8954 = vmatprep.mubr.f32.mxu1 %v9698_v25  ;;  %v9458_v52 = vpack.c.bf16 %v3658_v58, %v3650_v59 }
 0x6b8   : > { %9439 = vmatpush1.bf16.msra.mxu0 %v9438_v8  ;;  %9535 = vmatpush1.bf16.msra.mxu1 %v9534_v24 }
 0x6b9   : > { %9441 = vmatprep.subr.bf16.mxu0 %v9440_v0  ;;  %9537 = vmatprep.subr.bf16.mxu1 %v9536_v7 }
 0x6bc   : > { %9443 = vmatpush1.bf16.msra.mxu0 %v9442_v40  ;;  %9539 = vmatpush1.bf16.msra.mxu1 %v9538_v41 }
 0x6bd   : > { %9445 = vmatprep.subr.bf16.mxu0 %v9444_v14  ;;  %9541 = vmatprep.subr.bf16.mxu1 %v9540_v34 }
 0x6c0   : > { %9447 = vmatpush1.bf16.msra.mxu0 %v9446_v12  ;;  %9543 = vmatpush1.bf16.msra.mxu1 %v9542_v11 }
 0x6c1   : > { %9449 = vmatprep.subr.bf16.mxu0 %v9448_v20  ;;  %9545 = vmatprep.subr.bf16.mxu1 %v9544_v47  ;;  %v3690_v20 = vsub.s32 6, %v9926_v18 }
 0x6c4   : > { %9451 = vmatpush1.bf16.msra.mxu0 %v9450_v35  ;;  %9547 = vmatpush1.bf16.msra.mxu1 %v9546_v36 }
 0x6c5   : > { %9453 = vmatprep.subr.bf16.mxu0 %v9452_v31  ;;  %9549 = vmatprep.subr.bf16.mxu1 %v9548_v42 }
 0x6c8   : > { %9455 = vmatpush1.bf16.msra.mxu0 %v9454_v4  ;;  %9551 = vmatpush1.bf16.msra.mxu1 %v9550_v61 }
 0x6c9   : > { %v8494_v2 = vpop.f32.mrb[0].mxu0  ;;  %v8648_v32 = vpop.f32.mrb[0].mxu1  ;;  %9457 = vmatprep.subr.bf16.mxu0 %v9456_v21  ;;  %9553 = vmatprep.subr.bf16.mxu1 %v9552_v23 }
 0x6ca   : > { %v8496_v8 = vpop.f32.mrb[1].mxu0  ;;  %v8650_v24 = vpop.f32.mrb[1].mxu1 }
 0x6cc   : > { %9459 = vmatpush1.bf16.msra.mxu0 %v9458_v52  ;;  %9555 = vmatpush1.bf16.msra.mxu1 %v9554_v38 }
 0x6cf   : > { %8801 = vmatmul.mubr.f32.vlgmr.msra.gmra.mrb[4].mxu0 %v12036_v9  ;;  %8955 = vmatmul.mubr.f32.vlgmr.msra.gmra.mrb[4].mxu1 %v12036_v9  ;;  %v3662_v9 = vld [vmem:[%s14687_s2] sm:$0xff] }
 0x6d0   : > { %8806 = vmatprep.mubr.f32.mxu0 %v9698_v25  ;;  %8960 = vmatprep.mubr.f32.mxu1 %v9698_v25  ;;  %v3667_v33 = vrot.slane %v3662_v9, %v3666_v57  ;;  %v3671_v45 = vrot.slane %v3662_v9, %v3670_v37  ;;  %v8969_v25 = vadd.s32 8, %v9926_v18  ;;  %v3679_v44 = vrot.slane %v3662_v9, %v3678_v29 }
 0x6d1   : > { %v3683_v3 = vrot.slane %v3662_v9, %v3682_v19  ;;  %v3691_v53 = vrot.slane %v3662_v9, %v3690_v20  ;;  %v3687_v39 = vrot.slane %v3662_v9, %v3686_v15  ;;  %v3695_v10 = vrot.slane %v3662_v9, %v3694_v17 }
 0x6d2   : > { %v9556_v40 = vadd.f32 %v8494_v2, %v3667_v33  ;;  %v9557_v41 = vadd.f32 %v8496_v8, %v3671_v45  ;;  %v14520_v63 = vadd.s32 %v8971_v55, %v8969_v25  ;;  %v9561_v47 = vadd.f32 %v8650_v24, %v3679_v44 }
 0x6d3   : > { %8807 = vmatmul.mubr.f32.gmra.mrb[6].mxu0 %v14321_v62  ;;  %8961 = vmatmul.mubr.f32.gmra.mrb[6].mxu1 %v14321_v62  ;;  %v3674_v62 = vsub.s32 2, %v9926_v18 }
 0x6d4   : > { %v14526_v27 = vsel %vm8974_vm9, %v9556_v40, 0.0  ;;  %v14530_v54 = vsel %vm8974_vm9, %v9557_v41, 0.0  ;;  %vm8975_vm10 = vcmp.lt.s32.totalorder %v14520_v63, 20  ;;  %v14565_v5 = vsel %vm8974_vm9, %v9561_v47, 0.0 }
 0x6d5   : > { %v3675_v14 = vrot.slane %v3662_v9, %v3674_v62  ;;  %v8996_v16 = vmul.f32 %v14526_v27, %v14526_v27  ;;  %v8997_v12 = vmul.f32 %v14530_v54, %v14530_v54  ;;  %v8999_v48 = vmul.f32 %v14565_v5, %v14565_v5 }
 0x6d7   : > { %v9560_v49 = vadd.f32 %v8648_v32, %v3675_v14  ;;  %v9012_v35 = vadd.f32 %v8997_v12, %v8996_v16 }
 0x6d9   : > { %v14550_v50 = vsel %vm8974_vm9, %v9560_v49, 0.0 }
 0x6da   : > { %v8998_v31 = vmul.f32 %v14550_v50, %v14550_v50 }
 0x6dc   : > { %v9013_v28 = vadd.f32 %v9012_v35, %v8998_v31 }
 0x6de   : > { %v9014_v32 = vadd.f32 %v9013_v28, %v8999_v48 }
 0x77e   : > { %v8500_v46 = vpop.f32.mrb[2].mxu0  ;;  %v8654_v1 = vpop.f32.mrb[2].mxu1 }
 0x77f   : > { %v8502_v0 = vpop.f32.mrb[3].mxu0  ;;  %v8656_v7 = vpop.f32.mrb[3].mxu1  ;;  %v9558_v34 = vadd.f32 %v8500_v46, %v3667_v33  ;;  %v9562_v60 = vadd.f32 %v8654_v1, %v3675_v14 }
 0x780   : > { %v9559_v26 = vadd.f32 %v8502_v0, %v3671_v45  ;;  %v9563_v36 = vadd.f32 %v8656_v7, %v3679_v44 }
 0x781   : > { %v14539_v11 = vsel %vm8975_vm10, %v9558_v34, 0.0  ;;  %v14561_v42 = vsel %vm8975_vm10, %v9562_v60, 0.0 }
 0x782   : > { %v14543_v43 = vsel %vm8975_vm10, %v9559_v26, 0.0  ;;  %v9004_v6 = vmul.f32 %v14539_v11, %v14539_v11  ;;  %v9006_v4 = vmul.f32 %v14561_v42, %v14561_v42  ;;  %v14571_v61 = vsel %vm8975_vm10, %v9563_v36, 0.0 }
 0x783   : > { %v9005_v22 = vmul.f32 %v14543_v43, %v14543_v43  ;;  %v9007_v8 = vmul.f32 %v14571_v61, %v14571_v61 }
 0x785   : > { %v9021_v51 = vadd.f32 %v9005_v22, %v9004_v6 }
 0x787   : > { %v9022_v52 = vadd.f32 %v9021_v51, %v9006_v4 }
 0x789   : > { %v9023_v62 = vadd.f32 %v9022_v52, %v9007_v8 }
 0x7a2   : > { %v8802_v18 = vpop.f32.mrb[4].mxu0  ;;  %v8956_v13 = vpop.f32.mrb[4].mxu1 }
 0x7a3   : > { %v9564_v59 = vadd.f32 %v8802_v18, %v3683_v3  ;;  %v9568_v21 = vadd.f32 %v8956_v13, %v3691_v53  ;;  %v8804_v23 = vpop.f32.mrb[5].mxu0  ;;  %v8958_v58 = vpop.f32.mrb[5].mxu1 }
 0x7a4   : > { %v9565_v56 = vadd.f32 %v8804_v23, %v3687_v39  ;;  %v9569_v2 = vadd.f32 %v8958_v58, %v3695_v10 }
 0x7a5   : > { %v8984_v38 = vsel %vm8974_vm9, %v9564_v59, 0.0  ;;  %v8986_v7 = vsel %vm8974_vm9, %v9568_v21, 0.0 }
 0x7a6   : > { %v9000_v24 = vmul.f32 %v8984_v38, %v8984_v38  ;;  %v8985_v46 = vsel %vm8974_vm9, %v9565_v56, 0.0  ;;  %v8808_v1 = vpop.f32.mrb[6].mxu0  ;;  %v8962_v0 = vpop.f32.mrb[6].mxu1  ;;  %v8987_v40 = vsel %vm8974_vm9, %v9569_v2, 0.0  ;;  %v9002_v14 = vmul.f32 %v8986_v7, %v8986_v7 }
 0x7a7   : > { %v9001_v57 = vmul.f32 %v8985_v46, %v8985_v46  ;;  %v9566_v37 = vadd.f32 %v8808_v1, %v3683_v3  ;;  %v9570_v9 = vadd.f32 %v8962_v0, %v3691_v53  ;;  %v8810_v55 = vpop.f32.mrb[7].mxu0  ;;  %v8964_v33 = vpop.f32.mrb[7].mxu1  ;;  %v9003_v12 = vmul.f32 %v8987_v40, %v8987_v40 }
 0x7a8   : > { %v9015_v45 = vadd.f32 %v9014_v32, %v9000_v24  ;;  %v9567_v25 = vadd.f32 %v8810_v55, %v3687_v39  ;;  %v9571_v29 = vadd.f32 %v8964_v33, %v3695_v10 }
 0x7a9   : > { %v8992_v41 = vsel %vm8975_vm10, %v9566_v37, 0.0  ;;  %v8994_v49 = vsel %vm8975_vm10, %v9570_v9, 0.0 }
 0x7aa   : > { %v9016_v34 = vadd.f32 %v9015_v45, %v9001_v57  ;;  %v9008_v26 = vmul.f32 %v8992_v41, %v8992_v41  ;;  %v8993_v44 = vsel %vm8975_vm10, %v9567_v25, 0.0  ;;  %v8995_v30 = vsel %vm8975_vm10, %v9571_v29, 0.0 }
 0x7ab   : > { %v9009_v16 = vmul.f32 %v8993_v44, %v8993_v44  ;;  %v9010_v47 = vmul.f32 %v8994_v49, %v8994_v49  ;;  %v9011_v6 = vmul.f32 %v8995_v30, %v8995_v30 }
 0x7ac   : > { %v9024_v19 = vadd.f32 %v9023_v62, %v9008_v26  ;;  %v9017_v20 = vadd.f32 %v9016_v34, %v9002_v14 }
 0x7ae   : > { %v9025_v60 = vadd.f32 %v9024_v19, %v9009_v16  ;;  %v9018_v15 = vadd.f32 %v9017_v20, %v9003_v12 }
 0x7b0   : > { %9019 = vadd.xlane.f32.xlu0 %v9018_v15  ;;  %v9026_v22 = vadd.f32 %v9025_v60, %v9010_v47 }
 0x7b2   : > { %v9027_v17 = vadd.f32 %v9026_v22, %v9011_v6 }
 0x7b4   : > { %9028 = vadd.xlane.f32.xlu1 %v9027_v17 }
 0x83d   : > { %v9020_v35 = vpop.xlane.xlu0 %9019 }
 0x83e   : > { %v9030_v36 = vmax.f32 %v9020_v35, 1e-24 }
 0x840   : > { %9630 = vrsqrt.f32 %v9030_v36 }
 0x841   : > { %v9029_v3 = vpop.xlane.xlu1 %9028 }
 0x842   : > { %v9031_v53 = vmax.f32 %v9029_v3, 1e-24 }
 0x844   : > { %9632 = vrsqrt.f32 %v9031_v53 }
 0x84a   : > { %v9631_v63 = vpop.eup %9630 }
 0x84b   : > { %v9034_v31 = vmul.f32 %v9631_v63, %v14526_v27  ;;  %v9035_v39 = vmul.f32 %v9631_v63, %v14530_v54  ;;  %v9036_v51 = vmul.f32 %v9631_v63, %v14550_v50  ;;  %v9037_v10 = vmul.f32 %v9631_v63, %v14565_v5 }
 0x84c   : > { %v9038_v28 = vmul.f32 %v9631_v63, %v8984_v38  ;;  %v9039_v18 = vmul.f32 %v9631_v63, %v8985_v46  ;;  %v9040_v13 = vmul.f32 %v9631_v63, %v8986_v7  ;;  %v9041_v4 = vmul.f32 %v9631_v63, %v8987_v40 }
 0x84d   : > { %9050 = vst [vmem:[%s14600_s8] sm:$0xff] %v9034_v31  ;;  %9051 = vst [vmem:[%s14600_s8 + $0x8] sm:$0xff] %v9035_v39 }
 0x84e   : > { %9052 = vst [vmem:[%s14600_s8 + $0x10] sm:$0xff] %v9036_v51  ;;  %9053 = vst [vmem:[%s14600_s8 + $0x18] sm:$0xff] %v9037_v10  ;;  %v9633_v27 = vpop.eup %9632  ;;  %9073 = sbr.rel (!%p9760_p5) target bundleno = 2161 (0x871), region = 36 }
 0x84f   : > { %9054 = vst [vmem:[%s14600_s8 + $0x20] sm:$0xff] %v9038_v28  ;;  %9055 = vst [vmem:[%s14600_s8 + $0x28] sm:$0xff] %v9039_v18  ;;  %v9042_v54 = vmul.f32 %v9633_v27, %v14539_v11  ;;  %v9043_v50 = vmul.f32 %v9633_v27, %v14543_v43  ;;  %v9044_v5 = vmul.f32 %v9633_v27, %v14561_v42 }
 0x850   : > { %9056 = vst [vmem:[%s14600_s8 + $0x30] sm:$0xff] %v9040_v13  ;;  %9057 = vst [vmem:[%s14600_s8 + $0x38] sm:$0xff] %v9041_v4  ;;  %v9045_v59 = vmul.f32 %v9633_v27, %v14571_v61  ;;  %v9046_v21 = vmul.f32 %v9633_v27, %v8992_v41  ;;  %v9047_v23 = vmul.f32 %v9633_v27, %v8993_v44 }
 0x851   : > { %v9048_v58 = vmul.f32 %v9633_v27, %v8994_v49  ;;  %v9049_v48 = vmul.f32 %v9633_v27, %v8995_v30  ;;  %9058 = vst [vmem:[%s14600_s8 + $0x40] sm:$0xff] %v9042_v54  ;;  %9059 = vst [vmem:[%s14600_s8 + $0x48] sm:$0xff] %v9043_v50 }
 0x852   : > { %9060 = vst [vmem:[%s14600_s8 + $0x50] sm:$0xff] %v9044_v5  ;;  %9061 = vst [vmem:[%s14600_s8 + $0x58] sm:$0xff] %v9045_v59 }
 0x853   : > { %9062 = vst [vmem:[%s14600_s8 + $0x60] sm:$0xff] %v9046_v21  ;;  %9063 = vst [vmem:[%s14600_s8 + $0x68] sm:$0xff] %v9047_v23 }
 0x854   : > { %9064 = vst [vmem:[%s14600_s8 + $0x70] sm:$0xff] %v9048_v58  ;;  %9065 = vst [vmem:[%s14600_s8 + $0x78] sm:$0xff] %v9049_v48 }
 0x855   : > { %s14807_s10 = smov (!%p9076_p11, %s9075_s10), 2 }
 0x856   : > { %s14629_s11 = sshll.u32 %s14807_s10, 10 }
 0x857   : > { %s9081_s17 = ssub.s32 2048, %s14629_s11 }
 0x858   : > { %9082 = vsyncadd %s14624_s29, %s9081_s17  ;;  %p9162_p12 = scmp.ne.s32.totalorder %s14629_s11, 0  ;;  %s9171_s19 = sshll.u32 %s9743_s16, 11 }
 0x859   : > { %s14638_s25 = scalar_lea.hbm %s14688_s3, %s9171_s19  ;;  %s9088_s26 = sshll.u32 %s14600_s8, 4  ;;  %s14641_s26 = int_to_ptr.vmem [resolvable:$true] %s9088_s26 }
 0x85a   : > { %s9634_s27 = scalar_lea.vmem %s14641_s26, %s14629_s11  ;;  %s9699_s28 = smov [#allocation2]  }
 0x85b   : > { %p9635_p13 = scmp.ne.s32.totalorder %s14641_s26, %s9634_s27  ;;  %s9638_s30 = sshll.u32 %s9699_s28, 4  ;;  %s9639_s30 = int_to_ptr.vmem [resolvable:$false] %s9638_s30 }
 0x85c   : > { %s9640_s16 = scalar_lea.vmem %s9639_s30, 4096  ;;  %p9641_p2 = scmp.lt.s32.totalorder %s14641_s26, %s9639_s30 }
 0x85d   : > { %p9636_p0 = pnand %p9635_p13, %p9162_p12  ;;  %p9642_p3 = scmp.lt.s32.totalorder %s9640_s16, %s9634_s27 }
 0x85f   : > { %p9637_p1 = pneg %p9636_p0  ;;  %p9643_p4 = por %p9642_p3, %p9641_p2 }
 0x861   : > { %p9644_p5 = pnand %p9643_p4, %p9637_p1 }
 0x863   : > { %9647 = shalt.err (!%p9644_p5)
}
 0x864   : > { %s9648_s4 = scalar_lea.hbm %s14638_s25, %s14629_s11  ;;  %s9652_s24 = scalar_lea.hbm %s14688_s3, 3072 }
 0x865   : > { %p9649_p7 = scmp.ne.s32.totalorder %s14638_s25, %s9648_s4  ;;  %p9653_p10 = scmp.lt.u32.totalorder %s14638_s25, %s14688_s3 }
 0x866   : > { %p9654_p11 = scmp.lt.u32.totalorder %s9652_s24, %s9648_s4  ;;  %p9656_p0 = scmp.lt.u32.totalorder %s9648_s4, %s14638_s25 }
 0x867   : > { %p9650_p8 = pnand %p9649_p7, %p9162_p12 }
 0x868   : > { %p9655_p13 = por %p9654_p11, %p9653_p10 }
 0x869   : > { %p9651_p9 = pneg %p9650_p8 }
 0x86a   : > { %p9657_p1 = por %p9656_p0, %p9655_p13 }
 0x86c   : > { %p9658_p2 = pnand %p9657_p1, %p9651_p9 }
 0x86e   : > { %9661 = shalt.err (!%p9658_p2)
}
 0x86f   : > { %s9700_s9 = smov 1024   ;;  %s9701_s10 = smov 64  }
 0x870   : > { %9094 = dma.vmem_to_hbm [thread:$0]  (%p9162_p12), %s14641_s26, %s14629_s11, %s14638_s25, %s14624_s29, %s9700_s9, %s9700_s9, %s9701_s10  }
 0x871 PF: > { %p9594_p3 = scmp.ge.s32.totalorder %s9696_s15, 2  ;;  %s9103_s17 = sand.u32 1, %s9684_s12  }
 0x872   : > { %s9104_s19 = scalar_lea.sflag [#allocation3], %s9103_s17 }
 0x873   : > { %p9591_p4 = pnand %p9594_p3, %p9764_p6 }
 0x875   : > { %9679 = dma.done.wait (!%p9591_p4), %s9104_s19, 2048  }
 0x876   : > { %9681 = vsyncadd (!%p9591_p4), %s9104_s19, 4294965248  ;;  %p13_p5 = scmp.ge.s32.totalorder %s9747_s18, 4   ;;  %s14802_s12 = smov %s9688_s13 }
 0x877   : > { %s14803_s13 = smov %s9692_s14  ;;  %s14804_s14 = smov %s9758_s21 }
 0x878   : > { %s14805_s15 = smov %s9747_s18  ;;  %15 = sbr.rel (!%p13_p5) target bundleno = 3 (0x3), region = 67 }
 0x87f   :  { %9109 = vsyncpa [#allocation3], 1 }
 0x880   :  { %9111 = vsyncpa [#allocation3 + $0x1], 1 }

</bundles_post_ra>
